<compile_context>
chip_gen: v6e
topology: v6e:2x2x1
jax: 0.10.0
libtpu: 0.0.40
codegen_flags: <defaults>
</compile_context>

<pallas_src>
import numpy as np

import jax
import jax.numpy as jnp
from jax.experimental import pallas as pl
from jax.experimental.pallas import tpu as pltpu

_BN_EPS = 1e-5
_VMEM_LIMIT = 32 * 1024 * 1024   # safe on v5e/v6e (128 MiB) and v7x (64 MiB)


# ---------------------------------------------------------------------------
# Generic per-layer kernel: matmul -> [+bias] -> [grouped BatchNorm] -> [tanh]
# (bn_groups=4 handles the phase-stacked polyphase ConvTranspose outputs.)
# ---------------------------------------------------------------------------
def _make_matmul_kernel(has_bias, use_bn, bn_groups, post_act):
    def kernel(*refs):
        refs = list(refs)
        w_ref = refs.pop(0)
        p_ref = refs.pop(0)
        b_ref = refs.pop(0) if has_bias else None
        if use_bn:
            g_ref = refs.pop(0)
            bt_ref = refs.pop(0)
        o_ref = refs.pop(0)

        # Lane-dense orientation: (rows, M) with M on the lane axis.
        acc = jnp.dot(w_ref[...], p_ref[...], preferred_element_type=jnp.float32)
        if has_bias:
            acc = acc + b_ref[...]                       # (R, 1) broadcast
        if use_bn:
            R, M = acc.shape
            C = R // bn_groups
            inv_cnt = 1.0 / (bn_groups * M)

            def group_sum(v):                            # (R,1) -> (C,1)
                out = v[0:C]
                for g in range(1, bn_groups):
                    out = out + v[g * C:(g + 1) * C]
                return out

            def per_row(v):                              # (C,1) -> (R,1)
                if bn_groups == 1:
                    return v
                return jnp.concatenate([v] * bn_groups, axis=0)

            # Two-pass (mean then centered sum-of-squares) for numerical safety.
            mean = group_sum(jnp.sum(acc, axis=1, keepdims=True)) * inv_cnt
            xc = acc - per_row(mean)
            var = group_sum(jnp.sum(xc * xc, axis=1, keepdims=True)) * inv_cnt
            inv_std = jax.lax.rsqrt(var + _BN_EPS)
            acc = xc * per_row(inv_std) * g_ref[...] + bt_ref[...]
        if post_act == "tanh":
            acc = jnp.tanh(acc)
        o_ref[...] = acc.astype(o_ref.dtype)
    return kernel


def _pallas_full_call(kernel, args, out_shape, out_dtype, cost):
    """Single-block pallas_call: every operand is one full VMEM block."""
    in_specs = [pl.BlockSpec(a.shape, lambda i, nd=a.ndim: (0,) * nd) for a in args]
    out_specs = pl.BlockSpec(out_shape, lambda i, nd=len(out_shape): (0,) * nd)
    return pl.pallas_call(
        kernel,
        out_shape=jax.ShapeDtypeStruct(out_shape, out_dtype),
        grid=(1,),
        in_specs=in_specs,
        out_specs=out_specs,
        compiler_params=pltpu.CompilerParams(
            dimension_semantics=("arbitrary",),
            vmem_limit_bytes=_VMEM_LIMIT),
        cost_estimate=cost,
    )(*args)


def _matmul_epilogue(wflat, patches, *, bias=None, gamma=None, beta=None,
                     bn_groups=1, post_act=None):
    R, K = wflat.shape
    Kp, M = patches.shape
    assert K == Kp
    has_bias = bias is not None
    use_bn = gamma is not None

    # bf16 MXU inputs; epilogue (bias / BN / tanh) stays f32.
    args = [wflat.astype(jnp.bfloat16), patches.astype(jnp.bfloat16)]
    if has_bias:
        args.append(bias.astype(jnp.float32))
    if use_bn:
        args += [gamma.astype(jnp.float32), beta.astype(jnp.float32)]

    cost = pl.CostEstimate(
        flops=2 * R * K * M,
        transcendentals=(R * M if post_act == "tanh" else 0),
        bytes_accessed=2 * (R * K + K * M) + 4 * 2 * R * M,
    )
    kernel = _make_matmul_kernel(has_bias, use_bn, bn_groups, post_act)
    return _pallas_full_call(kernel, args, (R, M), jnp.float32, cost)


# ---------------------------------------------------------------------------
# XLA glue (channel-first "CNHW" matrix layout everywhere)
# ---------------------------------------------------------------------------
def _im2col(x, k, stride, pad):
    """x: (C, N, H, W) -> (C*k*k, N*Ho*Wo); K order = (c, ki, kj)."""
    C, N, H, W = x.shape
    xp = jnp.pad(x, ((0, 0), (0, 0), (pad, pad), (pad, pad)))
    Ho = (H + 2 * pad - k) // stride + 1
    Wo = (W + 2 * pad - k) // stride + 1
    taps = []
    for i in range(k):
        for j in range(k):
            taps.append(xp[:, :, i:i + stride * Ho:stride, j:j + stride * Wo:stride])
    p = jnp.stack(taps, axis=1)                       # (C, k*k, N, Ho, Wo)
    return p.reshape(C * k * k, N * Ho * Wo), Ho, Wo


def conv_down_layer(x, w, *, bias=None, gamma=None, beta=None, pre_act=None):
    """[LeakyReLU(0.2)] -> Conv2d(k4,s2,p1) -> [bias] -> [BatchNorm]."""
    Cout, Cin, k, _ = w.shape
    _, N, _, _ = x.shape
    if pre_act == "lrelu":
        x = jnp.maximum(x, 0.2 * x)
    patches, Ho, Wo = _im2col(x, k, stride=2, pad=1)
    wflat = w.reshape(Cout, Cin * k * k)
    col = lambda v: None if v is None else v.reshape(Cout, 1)
    out = _matmul_epilogue(wflat, patches, bias=col(bias),
                           gamma=col(gamma), beta=col(beta),
                           bn_groups=1, post_act=None)
    return out.reshape(Cout, N, Ho, Wo)


def _polyphase_weight(w):
    """ConvTranspose2d(k4,s2,p1) weight (Cin,Cout,4,4) -> phase-stacked
    stride-1 3x3 conv weight (4*Cout, Cin*9); phase p = (oh%2)*2 + (ow%2)."""
    Cin, Cout, _, _ = w.shape
    wc = jnp.flip(w, axis=(2, 3)).transpose(1, 0, 2, 3)       # (Cout, Cin, 4, 4)
    blocks = []
    for ph in (0, 1):
        for pw in (0, 1):
            w3 = jnp.zeros((Cout, Cin, 3, 3), w.dtype)
            for dy in (0, 1):
                for dx in (0, 1):
                    w3 = w3.at[:, :, ph + dy, pw + dx].set(
                        wc[:, :, 2 * dy + ph, 2 * dx + pw])
            blocks.append(w3.reshape(Cout, Cin * 9))
    return jnp.concatenate(blocks, axis=0)                    # (4*Cout, Cin*9)


def conv_up_layer(x, w, *, bias=None, gamma=None, beta=None, post_act=None):
    """ReLU -> ConvTranspose2d(k4,s2,p1) via polyphase -> [bias]/[BN] -> [tanh]."""
    Cin, Cout, _, _ = w.shape
    _, N, H, W = x.shape
    x = jnp.maximum(x, 0.0)                                   # ReLU pre-activation
    patches, _, _ = _im2col(x, 3, stride=1, pad=1)            # (Cin*9, N*H*W)
    wstack = _polyphase_weight(w)                             # (4*Cout, Cin*9)
    tile4 = lambda v: None if v is None else jnp.tile(v.reshape(Cout, 1), (4, 1))
    out = _matmul_epilogue(wstack, patches, bias=tile4(bias),
                           gamma=tile4(gamma), beta=tile4(beta),
                           bn_groups=4, post_act=post_act)    # (4*Cout, N*H*W)
    out = out.reshape(2, 2, Cout, N, H, W)
    out = out.transpose(2, 3, 4, 0, 5, 1).reshape(Cout, N, 2 * H, 2 * W)
    return out


# ---------------------------------------------------------------------------
# Fused inner bottleneck (d3 -> d4 -> d5 -> u5 -> u4) in one pallas_call.
# Spatial gathers are encoded as constant 0/1 selection matrices so the kernel
# is only plain 2-D matmuls / adds / BN epilogues / sublane concats.
# ---------------------------------------------------------------------------
def _sel_matrices_down(N, H, W, k=4, stride=2, pad=1):
    Ho = (H + 2 * pad - k) // stride + 1
    Wo = (W + 2 * pad - k) // stride + 1
    sels, taps = [], []
    for ki in range(k):
        for kj in range(k):
            S = np.zeros((N * H * W, N * Ho * Wo), np.float32)
            nz = False
            for ho in range(Ho):
                hi = stride * ho + ki - pad
                if hi < 0 or hi >= H:
                    continue
                for wo in range(Wo):
                    wi = stride * wo + kj - pad
                    if wi < 0 or wi >= W:
                        continue
                    for n in range(N):
                        S[(n * H + hi) * W + wi, (n * Ho + ho) * Wo + wo] = 1.0
                    nz = True
            if nz:
                sels.append(S)
                taps.append((ki, kj))
    return np.stack(sels, axis=0), taps


def _sel_matrices_up(N, H, W, k=4, stride=2, pad=1):
    Ho, Wo = stride * H, stride * W
    sels, taps = [], []
    for ki in range(k):
        for kj in range(k):
            S = np.zeros((N * H * W, N * Ho * Wo), np.float32)
            nz = False
            for ih in range(H):
                oh = stride * ih - pad + ki
                if oh < 0 or oh >= Ho:
                    continue
                for iw in range(W):
                    ow = stride * iw - pad + kj
                    if ow < 0 or ow >= Wo:
                        continue
                    for n in range(N):
                        S[(n * H + ih) * W + iw, (n * Ho + oh) * Wo + ow] = 1.0
                    nz = True
            if nz:
                sels.append(S)
                taps.append((ki, kj))
    return np.stack(sels, axis=0), taps


def _fused_inner_kernel(x2_ref,
                        w3_ref, s3_ref, g3_ref, bt3_ref,
                        w4_ref, s4_ref, g4_ref, bt4_ref,
                        w5_ref, s5_ref, b5_ref,
                        wu5_ref, su5_ref, gu5_ref, btu5_ref,
                        wu4_ref, su4_ref, gu4_ref, btu4_ref,
                        out_ref):
    def conv(a, w_ref, s_ref):
        acc = None
        for t in range(w_ref.shape[0]):        # static unroll over taps
            cols = jnp.dot(a, s_ref[t], preferred_element_type=jnp.float32)
            part = jnp.dot(w_ref[t], cols, preferred_element_type=jnp.float32)
            acc = part if acc is None else acc + part
        return acc

    def bn(a, g_ref, bt_ref):
        m = a.shape[1]
        mean = jnp.sum(a, axis=1, keepdims=True) * (1.0 / m)
        xc = a - mean
        var = jnp.sum(xc * xc, axis=1, keepdims=True) * (1.0 / m)
        return xc * jax.lax.rsqrt(var + _BN_EPS) * g_ref[...] + bt_ref[...]

    lrelu = lambda v: jnp.maximum(v, 0.2 * v)
    relu = lambda v: jnp.maximum(v, 0.0)

    x2 = x2_ref[...]                                                  # (16, N*64)
    d3 = bn(conv(lrelu(x2), w3_ref, s3_ref), g3_ref, bt3_ref)         # (32, N*16)
    d4 = bn(conv(lrelu(d3), w4_ref, s4_ref), g4_ref, bt4_ref)         # (64, N*4)
    d5 = conv(lrelu(d4), w5_ref, s5_ref) + b5_ref[...]                # (64, N)
    u5 = bn(conv(relu(d5), wu5_ref, su5_ref), gu5_ref, btu5_ref)      # (64, N*4)
    u4_in = jnp.concatenate([u5, d4], axis=0)                         # (128, N*4)
    u4 = bn(conv(relu(u4_in), wu4_ref, su4_ref), gu4_ref, btu4_ref)   # (32, N*16)
    out_ref[...] = jnp.concatenate([u4, d3], axis=0)                  # (64, N*16)


def fused_inner_block(d2, params):
    """Returns cat([u4, d3], channel axis) as (64, N, 4, 4)."""
    C2, N, H2, W2 = d2.shape                                  # (16, N, 8, 8)
    x2 = d2.reshape(C2, N * H2 * W2)

    s3, t3 = _sel_matrices_down(N, H2, W2)                    # 8x8 -> 4x4
    s4, t4 = _sel_matrices_down(N, H2 // 2, W2 // 2)          # 4x4 -> 2x2
    s5, t5 = _sel_matrices_down(N, H2 // 4, W2 // 4)          # 2x2 -> 1x1
    su5, tu5 = _sel_matrices_up(N, H2 // 8, W2 // 8)          # 1x1 -> 2x2
    su4, tu4 = _sel_matrices_up(N, H2 // 4, W2 // 4)          # 2x2 -> 4x4

    def down_taps(w, taps):                                   # w: (Cout, Cin, 4, 4)
        return jnp.stack([w[:, :, ki, kj] for ki, kj in taps], axis=0)

    def up_taps(w, taps):                                     # w: (Cin, Cout, 4, 4)
        return jnp.stack([w[:, :, ki, kj].T for ki, kj in taps], axis=0)

    layers = [
        (down_taps(params['w_d3'], t3), jnp.asarray(s3)),
        (down_taps(params['w_d4'], t4), jnp.asarray(s4)),
        (down_taps(params['w_d5'], t5), jnp.asarray(s5)),
        (up_taps(params['w_u5'], tu5), jnp.asarray(su5)),
        (up_taps(params['w_u4'], tu4), jnp.asarray(su4)),
    ]
    flops = 0
    bytes_acc = x2.size * 4 + 64 * (N * 16) * 4
    for wt, st in layers:
        T, Co, Ci = wt.shape
        _, Mi, Mo = st.shape
        flops += 2 * T * (Ci * Mi * Mo + Co * Ci * Mo)
        bytes_acc += (wt.size + st.size) * 4
    cost = pl.CostEstimate(flops=flops, transcendentals=0, bytes_accessed=bytes_acc)

    col = lambda v: v.reshape(-1, 1)
    args = [x2,
            layers[0][0], layers[0][1], col(params['g_d3']), col(params['bt_d3']),
            layers[1][0], layers[1][1], col(params['g_d4']), col(params['bt_d4']),
            layers[2][0], layers[2][1], col(params['b_d5']),
            layers[3][0], layers[3][1], col(params['g_u5']), col(params['bt_u5']),
            layers[4][0], layers[4][1], col(params['g_u4']), col(params['bt_u4'])]

    out = _pallas_full_call(_fused_inner_kernel, args, (64, N * 16),
                            jnp.float32, cost)
    return out.reshape(64, N, H2 // 2, W2 // 2)


# ---------------------------------------------------------------------------
# UnetGenerator(input_nc=3, output_nc=3, num_downs=5, ngf=8) forward
# ---------------------------------------------------------------------------
def unet_forward(x, p):
    xc = jnp.transpose(x, (1, 0, 2, 3))                       # NCHW -> CNHW

    d1 = conv_down_layer(xc, p['w_d1'], bias=p['b_d1'], pre_act=None)
    d2 = conv_down_layer(d1, p['w_d2'], gamma=p['g_d2'], beta=p['bt_d2'],
                         pre_act="lrelu")
    mid = fused_inner_block(d2, p)                            # cat([u4, d3])
    u3 = conv_up_layer(mid, p['w_u3'], gamma=p['g_u3'], beta=p['bt_u3'])
    u2 = conv_up_layer(jnp.concatenate([u3, d2], axis=0), p['w_u2'],
                       gamma=p['g_u2'], beta=p['bt_u2'])
    u1 = conv_up_layer(jnp.concatenate([u2, d1], axis=0), p['w_u1'],
                       bias=p['b_u1'], post_act="tanh")
    return jnp.transpose(u1, (1, 0, 2, 3))                    # back to NCHW


def init_params(key, ngf=8, in_nc=3, out_nc=3):
    """Deterministic synthetic parameters (weights ~ N(0, 0.05), small biases,
    BatchNorm gamma=1 / beta=0 as in a freshly constructed nn module)."""
    ks = iter(jax.random.split(key, 32))

    def conv_w(co, ci):
        return 0.05 * jax.random.normal(next(ks), (co, ci, 4, 4), jnp.float32)

    def convT_w(ci, co):
        return 0.05 * jax.random.normal(next(ks), (ci, co, 4, 4), jnp.float32)

    def bias(c):
        return 0.01 * jax.random.normal(next(ks), (c,), jnp.float32)

    p = {}
    p['w_d1'], p['b_d1'] = conv_w(ngf, in_nc), bias(ngf)
    p['w_d2'], p['b_d2'] = conv_w(ngf * 2, ngf), bias(ngf * 2)
    p['w_d3'], p['b_d3'] = conv_w(ngf * 4, ngf * 2), bias(ngf * 4)
    p['w_d4'], p['b_d4'] = conv_w(ngf * 8, ngf * 4), bias(ngf * 8)
    p['w_d5'], p['b_d5'] = conv_w(ngf * 8, ngf * 8), bias(ngf * 8)
    for name, c in (('d2', ngf * 2), ('d3', ngf * 4), ('d4', ngf * 8)):
        p[f'g_{name}'] = jnp.ones((c,), jnp.float32)
        p[f'bt_{name}'] = jnp.zeros((c,), jnp.float32)
    p['w_u5'], p['b_u5'] = convT_w(ngf * 8, ngf * 8), bias(ngf * 8)
    p['w_u4'], p['b_u4'] = convT_w(ngf * 16, ngf * 4), bias(ngf * 4)
    p['w_u3'], p['b_u3'] = convT_w(ngf * 8, ngf * 2), bias(ngf * 2)
    p['w_u2'], p['b_u2'] = convT_w(ngf * 4, ngf), bias(ngf)
    p['w_u1'], p['b_u1'] = convT_w(ngf * 2, out_nc), bias(out_nc)
    for name, c in (('u5', ngf * 8), ('u4', ngf * 4), ('u3', ngf * 2), ('u2', ngf)):
        p[f'g_{name}'] = jnp.ones((c,), jnp.float32)
        p[f'bt_{name}'] = jnp.zeros((c,), jnp.float32)
    return p


# ---------------------------------------------------------------------------
# Pure-XLA f32 reference of the same PyTorch module (train-mode BatchNorm)
# ---------------------------------------------------------------------------
def reference_forward(x, p):
    hi = jax.lax.Precision.HIGHEST

    def conv(v, w, b):
        y = jax.lax.conv_general_dilated(
            v, w, window_strides=(2, 2), padding=((1, 1), (1, 1)),
            dimension_numbers=("NCHW", "OIHW", "NCHW"), precision=hi)
        return y + b.reshape(1, -1, 1, 1)

    def convT(v, w, b):
        wt = jnp.flip(w, (2, 3)).transpose(1, 0, 2, 3)
        y = jax.lax.conv_general_dilated(
            v, wt, window_strides=(1, 1), padding=((2, 2), (2, 2)),
            lhs_dilation=(2, 2),
            dimension_numbers=("NCHW", "OIHW", "NCHW"), precision=hi)
        return y + b.reshape(1, -1, 1, 1)

    def bn(v, g, b):
        m = v.mean(axis=(0, 2, 3), keepdims=True)
        var = v.var(axis=(0, 2, 3), keepdims=True)
        return (v - m) * jax.lax.rsqrt(var + _BN_EPS) * g.reshape(1, -1, 1, 1) \
            + b.reshape(1, -1, 1, 1)

    lrelu = lambda v: jnp.where(v >= 0, v, 0.2 * v)
    relu = lambda v: jnp.maximum(v, 0.0)
    cat = lambda a, b: jnp.concatenate([a, b], axis=1)

    d1 = conv(x, p['w_d1'], p['b_d1'])
    d2 = bn(conv(lrelu(d1), p['w_d2'], p['b_d2']), p['g_d2'], p['bt_d2'])
    d3 = bn(conv(lrelu(d2), p['w_d3'], p['b_d3']), p['g_d3'], p['bt_d3'])
    d4 = bn(conv(lrelu(d3), p['w_d4'], p['b_d4']), p['g_d4'], p['bt_d4'])
    d5 = conv(lrelu(d4), p['w_d5'], p['b_d5'])
    u5 = bn(convT(relu(d5), p['w_u5'], p['b_u5']), p['g_u5'], p['bt_u5'])
    u4 = bn(convT(relu(cat(u5, d4)), p['w_u4'], p['b_u4']), p['g_u4'], p['bt_u4'])
    u3 = bn(convT(relu(cat(u4, d3)), p['w_u3'], p['b_u3']), p['g_u3'], p['bt_u3'])
    u2 = bn(convT(relu(cat(u3, d2)), p['w_u2'], p['b_u2']), p['g_u2'], p['bt_u2'])
    u1 = jnp.tanh(convT(relu(cat(u2, d1)), p['w_u1'], p['b_u1']))
    return u1


if __name__ == "__main__":
    key = jax.random.PRNGKey(0)
    kx, kp = jax.random.split(key)
    # UnetGenerator(3, 3, num_downs=5, ngf=8): spatial extent must be >= 2^5.
    x = jax.random.normal(kx, (2, 3, 32, 32), jnp.float32)
    params = init_params(kp, ngf=8, in_nc=3, out_nc=3)

    out = jax.block_until_ready(jax.jit(unet_forward)(x, params))
    assert out.shape == (2, 3, 32, 32), out.shape
    assert bool(jnp.isfinite(out).all())

    # Cross-check against a pure-XLA f32 reference (bf16 MXU inputs => tolerance).
    ref = jax.block_until_ready(jax.jit(reference_forward)(x, params))
    err = float(jnp.max(jnp.abs(out - ref)))
    assert err < 0.15, f"mismatch vs reference: max abs err = {err}"
    print("KERNEL_OK")
</pallas_src>

<mosaic_0001>
module attributes {stable_mosaic.version = 11 : i64} {
  func.func @kernel(%arg0: i32, %arg1: memref<8x48xbf16, #tpu.memory_space<vmem>>, %arg2: memref<48x512xbf16, #tpu.memory_space<vmem>>, %arg3: memref<8x1xf32, #tpu.memory_space<vmem>>, %arg4: memref<8x512xf32, #tpu.memory_space<vmem>>) attributes {dimension_semantics = [#tpu.dimension_semantics<arbitrary>], iteration_bounds = array<i64: 1>, scalar_prefetch = 0 : i64, scratch_operands = 0 : i64, tpu.core_type = #tpu.core_type<tc>, window_params = [{pipeline_mode = #tpu.pipeline_mode<synchronous>, transform_indices = @transform_0, window_bounds = array<i64: 8, 48>}, {pipeline_mode = #tpu.pipeline_mode<synchronous>, transform_indices = @transform_1, window_bounds = array<i64: 48, 512>}, {pipeline_mode = #tpu.pipeline_mode<synchronous>, transform_indices = @transform_2, window_bounds = array<i64: 8, 1>}, {pipeline_mode = #tpu.pipeline_mode<synchronous>, transform_indices = @transform_3, window_bounds = array<i64: 8, 512>}]} {
    %c0 = arith.constant 0 : index
    %c0_0 = arith.constant 0 : index
    %0 = vector.load %arg1[%c0, %c0_0] : memref<8x48xbf16, #tpu.memory_space<vmem>>, vector<8x48xbf16>
    %c0_1 = arith.constant 0 : index
    %c0_2 = arith.constant 0 : index
    %1 = vector.load %arg2[%c0_1, %c0_2] : memref<48x512xbf16, #tpu.memory_space<vmem>>, vector<48x512xbf16>
    %cst = arith.constant dense<0.000000e+00> : vector<8x512xf32>
    %2 = tpu.matmul %0, %1, %cst {dimension_numbers = #tpu.dot_dimension_numbers<[1], [0], [0], [1], [0, 0, 1, 1], [], []>} : vector<8x48xbf16>, vector<48x512xbf16>, vector<8x512xf32> -> vector<8x512xf32>
    %c0_3 = arith.constant 0 : index
    %c0_4 = arith.constant 0 : index
    %3 = vector.load %arg3[%c0_3, %c0_4] : memref<8x1xf32, #tpu.memory_space<vmem>>, vector<8x1xf32>
    %4 = vector.broadcast %3 : vector<8x1xf32> to vector<8x512xf32>
    %5 = arith.addf %2, %4 : vector<8x512xf32>
    %c0_5 = arith.constant 0 : index
    %c0_6 = arith.constant 0 : index
    %6 = vector.load %arg4[%c0_5, %c0_6] : memref<8x512xf32, #tpu.memory_space<vmem>>, vector<8x512xf32>
    tpu.vector_store %arg4[%c0_5, %c0_6], %5 {strides = array<i32>} : memref<8x512xf32, #tpu.memory_space<vmem>>, vector<8x512xf32>,
    return
  }
  func.func @transform_0(%arg0: i32) -> (i32, i32) {
    %c0_i32 = arith.constant 0 : i32
    %c0_i32_0 = arith.constant 0 : i32
    %c0_i32_1 = arith.constant 0 : i32
    return %c0_i32, %c0_i32_0 : i32, i32
  }
  func.func @transform_1(%arg0: i32) -> (i32, i32) {
    %c0_i32 = arith.constant 0 : i32
    %c0_i32_0 = arith.constant 0 : i32
    %c0_i32_1 = arith.constant 0 : i32
    return %c0_i32, %c0_i32_0 : i32, i32
  }
  func.func @transform_2(%arg0: i32) -> (i32, i32) {
    %c0_i32 = arith.constant 0 : i32
    %c0_i32_0 = arith.constant 0 : i32
    %c0_i32_1 = arith.constant 0 : i32
    return %c0_i32, %c0_i32_0 : i32, i32
  }
  func.func @transform_3(%arg0: i32) -> (i32, i32) {
    %c0_i32 = arith.constant 0 : i32
    %c0_i32_0 = arith.constant 0 : i32
    %c0_i32_1 = arith.constant 0 : i32
    return %c0_i32, %c0_i32_0 : i32, i32
  }
}

module attributes {stable_mosaic.version = 11 : i64} {
  func.func @kernel(%arg0: i32, %arg1: memref<16x128xbf16, #tpu.memory_space<vmem>>, %arg2: memref<128x128xbf16, #tpu.memory_space<vmem>>, %arg3: memref<16x1xf32, #tpu.memory_space<vmem>>, %arg4: memref<16x1xf32, #tpu.memory_space<vmem>>, %arg5: memref<16x128xf32, #tpu.memory_space<vmem>>) attributes {dimension_semantics = [#tpu.dimension_semantics<arbitrary>], iteration_bounds = array<i64: 1>, scalar_prefetch = 0 : i64, scratch_operands = 0 : i64, tpu.core_type = #tpu.core_type<tc>, window_params = [{pipeline_mode = #tpu.pipeline_mode<synchronous>, transform_indices = @transform_0, window_bounds = array<i64: 16, 128>}, {pipeline_mode = #tpu.pipeline_mode<synchronous>, transform_indices = @transform_1, window_bounds = array<i64: 128, 128>}, {pipeline_mode = #tpu.pipeline_mode<synchronous>, transform_indices = @transform_2, window_bounds = array<i64: 16, 1>}, {pipeline_mode = #tpu.pipeline_mode<synchronous>, transform_indices = @transform_3, window_bounds = array<i64: 16, 1>}, {pipeline_mode = #tpu.pipeline_mode<synchronous>, transform_indices = @transform_4, window_bounds = array<i64: 16, 128>}]} {
    %c0 = arith.constant 0 : index
    %c0_0 = arith.constant 0 : index
    %0 = vector.load %arg1[%c0, %c0_0] : memref<16x128xbf16, #tpu.memory_space<vmem>>, vector<16x128xbf16>
    %c0_1 = arith.constant 0 : index
    %c0_2 = arith.constant 0 : index
    %1 = vector.load %arg2[%c0_1, %c0_2] : memref<128x128xbf16, #tpu.memory_space<vmem>>, vector<128x128xbf16>
    %cst = arith.constant dense<0.000000e+00> : vector<16x128xf32>
    %2 = tpu.matmul %0, %1, %cst {dimension_numbers = #tpu.dot_dimension_numbers<[1], [0], [0], [1], [0, 0, 1, 1], [], []>} : vector<16x128xbf16>, vector<128x128xbf16>, vector<16x128xf32> -> vector<16x128xf32>
    %cst_3 = arith.constant dense<0.000000e+00> : vector<16xf32>
    %3 = vector.multi_reduction <add>, %2, %cst_3 [1] : vector<16x128xf32> to vector<16xf32>
    %4 = vector.shape_cast %3 : vector<16xf32> to vector<16x1xf32>
    %cst_4 = arith.constant 7.812500e-03 : f32
    %5 = vector.broadcast %cst_4 : f32 to vector<16x1xf32>
    %6 = arith.mulf %4, %5 : vector<16x1xf32>
    %7 = vector.broadcast %6 : vector<16x1xf32> to vector<16x128xf32>
    %8 = arith.subf %2, %7 : vector<16x128xf32>
    %9 = arith.mulf %8, %8 : vector<16x128xf32>
    %cst_5 = arith.constant dense<0.000000e+00> : vector<16xf32>
    %10 = vector.multi_reduction <add>, %9, %cst_5 [1] : vector<16x128xf32> to vector<16xf32>
    %11 = vector.shape_cast %10 : vector<16xf32> to vector<16x1xf32>
    %cst_6 = arith.constant 7.812500e-03 : f32
    %12 = vector.broadcast %cst_6 : f32 to vector<16x1xf32>
    %13 = arith.mulf %11, %12 : vector<16x1xf32>
    %cst_7 = arith.constant 9.99999974E-6 : f32
    %14 = vector.broadcast %cst_7 : f32 to vector<16x1xf32>
    %15 = arith.addf %13, %14 : vector<16x1xf32>
    %16 = math.rsqrt %15 : vector<16x1xf32>
    %17 = vector.broadcast %16 : vector<16x1xf32> to vector<16x128xf32>
    %18 = arith.mulf %8, %17 : vector<16x128xf32>
    %c0_8 = arith.constant 0 : index
    %c0_9 = arith.constant 0 : index
    %19 = vector.load %arg3[%c0_8, %c0_9] : memref<16x1xf32, #tpu.memory_space<vmem>>, vector<16x1xf32>
    %20 = vector.broadcast %19 : vector<16x1xf32> to vector<16x128xf32>
    %21 = arith.mulf %18, %20 : vector<16x128xf32>
    %c0_10 = arith.constant 0 : index
    %c0_11 = arith.constant 0 : index
    %22 = vector.load %arg4[%c0_10, %c0_11] : memref<16x1xf32, #tpu.memory_space<vmem>>, vector<16x1xf32>
    %23 = vector.broadcast %22 : vector<16x1xf32> to vector<16x128xf32>
    %24 = arith.addf %21, %23 : vector<16x128xf32>
    %c0_12 = arith.constant 0 : index
    %c0_13 = arith.constant 0 : index
    %25 = vector.load %arg5[%c0_12, %c0_13] : memref<16x128xf32, #tpu.memory_space<vmem>>, vector<16x128xf32>
    tpu.vector_store %arg5[%c0_12, %c0_13], %24 {strides = array<i32>} : memref<16x128xf32, #tpu.memory_space<vmem>>, vector<16x128xf32>,
    return
  }
  func.func @transform_0(%arg0: i32) -> (i32, i32) {
    %c0_i32 = arith.constant 0 : i32
    %c0_i32_0 = arith.constant 0 : i32
    %c0_i32_1 = arith.constant 0 : i32
    return %c0_i32, %c0_i32_0 : i32, i32
  }
  func.func @transform_1(%arg0: i32) -> (i32, i32) {
    %c0_i32 = arith.constant 0 : i32
    %c0_i32_0 = arith.constant 0 : i32
    %c0_i32_1 = arith.constant 0 : i32
    return %c0_i32, %c0_i32_0 : i32, i32
  }
  func.func @transform_2(%arg0: i32) -> (i32, i32) {
    %c0_i32 = arith.constant 0 : i32
    %c0_i32_0 = arith.constant 0 : i32
    %c0_i32_1 = arith.constant 0 : i32
    return %c0_i32, %c0_i32_0 : i32, i32
  }
  func.func @transform_3(%arg0: i32) -> (i32, i32) {
    %c0_i32 = arith.constant 0 : i32
    %c0_i32_0 = arith.constant 0 : i32
    %c0_i32_1 = arith.constant 0 : i32
    return %c0_i32, %c0_i32_0 : i32, i32
  }
  func.func @transform_4(%arg0: i32) -> (i32, i32) {
    %c0_i32 = arith.constant 0 : i32
    %c0_i32_0 = arith.constant 0 : i32
    %c0_i32_1 = arith.constant 0 : i32
    return %c0_i32, %c0_i32_0 : i32, i32
  }
}

module attributes {stable_mosaic.version = 11 : i64} {
  func.func @_fused_inner_kernel(%arg0: i32, %arg1: memref<16x128xf32, #tpu.memory_space<vmem>>, %arg2: memref<16x32x16xf32, #tpu.memory_space<vmem>>, %arg3: memref<16x128x32xf32, #tpu.memory_space<vmem>>, %arg4: memref<32x1xf32, #tpu.memory_space<vmem>>, %arg5: memref<32x1xf32, #tpu.memory_space<vmem>>, %arg6: memref<16x64x32xf32, #tpu.memory_space<vmem>>, %arg7: memref<16x32x8xf32, #tpu.memory_space<vmem>>, %arg8: memref<64x1xf32, #tpu.memory_space<vmem>>, %arg9: memref<64x1xf32, #tpu.memory_space<vmem>>, %arg10: memref<4x64x64xf32, #tpu.memory_space<vmem>>, %arg11: memref<4x8x2xf32, #tpu.memory_space<vmem>>, %arg12: memref<64x1xf32, #tpu.memory_space<vmem>>, %arg13: memref<4x64x64xf32, #tpu.memory_space<vmem>>, %arg14: memref<4x2x8xf32, #tpu.memory_space<vmem>>, %arg15: memref<64x1xf32, #tpu.memory_space<vmem>>, %arg16: memref<64x1xf32, #tpu.memory_space<vmem>>, %arg17: memref<16x32x128xf32, #tpu.memory_space<vmem>>, %arg18: memref<16x8x32xf32, #tpu.memory_space<vmem>>, %arg19: memref<32x1xf32, #tpu.memory_space<vmem>>, %arg20: memref<32x1xf32, #tpu.memory_space<vmem>>, %arg21: memref<64x32xf32, #tpu.memory_space<vmem>>) attributes {dimension_semantics = [#tpu.dimension_semantics<arbitrary>], iteration_bounds = array<i64: 1>, scalar_prefetch = 0 : i64, scratch_operands = 0 : i64, tpu.core_type = #tpu.core_type<tc>, window_params = [{pipeline_mode = #tpu.pipeline_mode<synchronous>, transform_indices = @transform_0, window_bounds = array<i64: 16, 128>}, {pipeline_mode = #tpu.pipeline_mode<synchronous>, transform_indices = @transform_1, window_bounds = array<i64: 16, 32, 16>}, {pipeline_mode = #tpu.pipeline_mode<synchronous>, transform_indices = @transform_2, window_bounds = array<i64: 16, 128, 32>}, {pipeline_mode = #tpu.pipeline_mode<synchronous>, transform_indices = @transform_3, window_bounds = array<i64: 32, 1>}, {pipeline_mode = #tpu.pipeline_mode<synchronous>, transform_indices = @transform_4, window_bounds = array<i64: 32, 1>}, {pipeline_mode = #tpu.pipeline_mode<synchronous>, transform_indices = @transform_5, window_bounds = array<i64: 16, 64, 32>}, {pipeline_mode = #tpu.pipeline_mode<synchronous>, transform_indices = @transform_6, window_bounds = array<i64: 16, 32, 8>}, {pipeline_mode = #tpu.pipeline_mode<synchronous>, transform_indices = @transform_7, window_bounds = array<i64: 64, 1>}, {pipeline_mode = #tpu.pipeline_mode<synchronous>, transform_indices = @transform_8, window_bounds = array<i64: 64, 1>}, {pipeline_mode = #tpu.pipeline_mode<synchronous>, transform_indices = @transform_9, window_bounds = array<i64: 4, 64, 64>}, {pipeline_mode = #tpu.pipeline_mode<synchronous>, transform_indices = @transform_10, window_bounds = array<i64: 4, 8, 2>}, {pipeline_mode = #tpu.pipeline_mode<synchronous>, transform_indices = @transform_11, window_bounds = array<i64: 64, 1>}, {pipeline_mode = #tpu.pipeline_mode<synchronous>, transform_indices = @transform_12, window_bounds = array<i64: 4, 64, 64>}, {pipeline_mode = #tpu.pipeline_mode<synchronous>, transform_indices = @transform_13, window_bounds = array<i64: 4, 2, 8>}, {pipeline_mode = #tpu.pipeline_mode<synchronous>, transform_indices = @transform_14, window_bounds = array<i64: 64, 1>}, {pipeline_mode = #tpu.pipeline_mode<synchronous>, transform_indices = @transform_15, window_bounds = array<i64: 64, 1>}, {pipeline_mode = #tpu.pipeline_mode<synchronous>, transform_indices = @transform_16, window_bounds = array<i64: 16, 32, 128>}, {pipeline_mode = #tpu.pipeline_mode<synchronous>, transform_indices = @transform_17, window_bounds = array<i64: 16, 8, 32>}, {pipeline_mode = #tpu.pipeline_mode<synchronous>, transform_indices = @transform_18, window_bounds = array<i64: 32, 1>}, {pipeline_mode = #tpu.pipeline_mode<synchronous>, transform_indices = @transform_19, window_bounds = array<i64: 32, 1>}, {pipeline_mode = #tpu.pipeline_mode<synchronous>, transform_indices = @transform_20, window_bounds = array<i64: 64, 32>}]} {
    %c0 = arith.constant 0 : index
    %c0_0 = arith.constant 0 : index
    %0 = vector.load %arg1[%c0, %c0_0] : memref<16x128xf32, #tpu.memory_space<vmem>>, vector<16x128xf32>
    %cst = arith.constant 2.000000e-01 : f32
    %1 = vector.broadcast %cst : f32 to vector<16x128xf32>
    %2 = arith.mulf %1, %0 : vector<16x128xf32>
    %3 = arith.maximumf %0, %2 : vector<16x128xf32>
    %c0_1 = arith.constant 0 : index
    %c0_2 = arith.constant 0 : index
    %c0_3 = arith.constant 0 : index
    %4 = vector.load %arg3[%c0_1, %c0_2, %c0_3] : memref<16x128x32xf32, #tpu.memory_space<vmem>>, vector<1x128x32xf32>
    %5 = vector.shape_cast %4 : vector<1x128x32xf32> to vector<128x32xf32>
    %cst_4 = arith.constant dense<0.000000e+00> : vector<16x32xf32>
    %6 = tpu.matmul %3, %5, %cst_4 {dimension_numbers = #tpu.dot_dimension_numbers<[1], [0], [0], [1], [0, 0, 1, 1], [], []>} : vector<16x128xf32>, vector<128x32xf32>, vector<16x32xf32> -> vector<16x32xf32>
    %c0_5 = arith.constant 0 : index
    %c0_6 = arith.constant 0 : index
    %c0_7 = arith.constant 0 : index
    %7 = vector.load %arg2[%c0_5, %c0_6, %c0_7] : memref<16x32x16xf32, #tpu.memory_space<vmem>>, vector<1x32x16xf32>
    %8 = vector.shape_cast %7 : vector<1x32x16xf32> to vector<32x16xf32>
    %cst_8 = arith.constant dense<0.000000e+00> : vector<32x32xf32>
    %9 = tpu.matmul %8, %6, %cst_8 {dimension_numbers = #tpu.dot_dimension_numbers<[1], [0], [0], [1], [0, 0, 1, 1], [], []>} : vector<32x16xf32>, vector<16x32xf32>, vector<32x32xf32> -> vector<32x32xf32>
    %c1 = arith.constant 1 : index
    %c0_9 = arith.constant 0 : index
    %c0_10 = arith.constant 0 : index
    %10 = vector.load %arg3[%c1, %c0_9, %c0_10] : memref<16x128x32xf32, #tpu.memory_space<vmem>>, vector<1x128x32xf32>
    %11 = vector.shape_cast %10 : vector<1x128x32xf32> to vector<128x32xf32>
    %cst_11 = arith.constant dense<0.000000e+00> : vector<16x32xf32>
    %12 = tpu.matmul %3, %11, %cst_11 {dimension_numbers = #tpu.dot_dimension_numbers<[1], [0], [0], [1], [0, 0, 1, 1], [], []>} : vector<16x128xf32>, vector<128x32xf32>, vector<16x32xf32> -> vector<16x32xf32>
    %c1_12 = arith.constant 1 : index
    %c0_13 = arith.constant 0 : index
    %c0_14 = arith.constant 0 : index
    %13 = vector.load %arg2[%c1_12, %c0_13, %c0_14] : memref<16x32x16xf32, #tpu.memory_space<vmem>>, vector<1x32x16xf32>
    %14 = vector.shape_cast %13 : vector<1x32x16xf32> to vector<32x16xf32>
    %cst_15 = arith.constant dense<0.000000e+00> : vector<32x32xf32>
    %15 = tpu.matmul %14, %12, %cst_15 {dimension_numbers = #tpu.dot_dimension_numbers<[1], [0], [0], [1], [0, 0, 1, 1], [], []>} : vector<32x16xf32>, vector<16x32xf32>, vector<32x32xf32> -> vector<32x32xf32>
    %16 = arith.addf %9, %15 : vector<32x32xf32>
    %c2 = arith.constant 2 : index
    %c0_16 = arith.constant 0 : index
    %c0_17 = arith.constant 0 : index
    %17 = vector.load %arg3[%c2, %c0_16, %c0_17] : memref<16x128x32xf32, #tpu.memory_space<vmem>>, vector<1x128x32xf32>
    %18 = vector.shape_cast %17 : vector<1x128x32xf32> to vector<128x32xf32>
    %cst_18 = arith.constant dense<0.000000e+00> : vector<16x32xf32>
    %19 = tpu.matmul %3, %18, %cst_18 {dimension_numbers = #tpu.dot_dimension_numbers<[1], [0], [0], [1], [0, 0, 1, 1], [], []>} : vector<16x128xf32>, vector<128x32xf32>, vector<16x32xf32> -> vector<16x32xf32>
    %c2_19 = arith.constant 2 : index
    %c0_20 = arith.constant 0 : index
    %c0_21 = arith.constant 0 : index
    %20 = vector.load %arg2[%c2_19, %c0_20, %c0_21] : memref<16x32x16xf32, #tpu.memory_space<vmem>>, vector<1x32x16xf32>
    %21 = vector.shape_cast %20 : vector<1x32x16xf32> to vector<32x16xf32>
    %cst_22 = arith.constant dense<0.000000e+00> : vector<32x32xf32>
    %22 = tpu.matmul %21, %19, %cst_22 {dimension_numbers = #tpu.dot_dimension_numbers<[1], [0], [0], [1], [0, 0, 1, 1], [], []>} : vector<32x16xf32>, vector<16x32xf32>, vector<32x32xf32> -> vector<32x32xf32>
    %23 = arith.addf %16, %22 : vector<32x32xf32>
    %c3 = arith.constant 3 : index
    %c0_23 = arith.constant 0 : index
    %c0_24 = arith.constant 0 : index
    %24 = vector.load %arg3[%c3, %c0_23, %c0_24] : memref<16x128x32xf32, #tpu.memory_space<vmem>>, vector<1x128x32xf32>
    %25 = vector.shape_cast %24 : vector<1x128x32xf32> to vector<128x32xf32>
    %cst_25 = arith.constant dense<0.000000e+00> : vector<16x32xf32>
    %26 = tpu.matmul %3, %25, %cst_25 {dimension_numbers = #tpu.dot_dimension_numbers<[1], [0], [0], [1], [0, 0, 1, 1], [], []>} : vector<16x128xf32>, vector<128x32xf32>, vector<16x32xf32> -> vector<16x32xf32>
    %c3_26 = arith.constant 3 : index
    %c0_27 = arith.constant 0 : index
    %c0_28 = arith.constant 0 : index
    %27 = vector.load %arg2[%c3_26, %c0_27, %c0_28] : memref<16x32x16xf32, #tpu.memory_space<vmem>>, vector<1x32x16xf32>
    %28 = vector.shape_cast %27 : vector<1x32x16xf32> to vector<32x16xf32>
    %cst_29 = arith.constant dense<0.000000e+00> : vector<32x32xf32>
    %29 = tpu.matmul %28, %26, %cst_29 {dimension_numbers = #tpu.dot_dimension_numbers<[1], [0], [0], [1], [0, 0, 1, 1], [], []>} : vector<32x16xf32>, vector<16x32xf32>, vector<32x32xf32> -> vector<32x32xf32>
    %30 = arith.addf %23, %29 : vector<32x32xf32>
    %c4 = arith.constant 4 : index
    %c0_30 = arith.constant 0 : index
    %c0_31 = arith.constant 0 : index
    %31 = vector.load %arg3[%c4, %c0_30, %c0_31] : memref<16x128x32xf32, #tpu.memory_space<vmem>>, vector<1x128x32xf32>
    %32 = vector.shape_cast %31 : vector<1x128x32xf32> to vector<128x32xf32>
    %cst_32 = arith.constant dense<0.000000e+00> : vector<16x32xf32>
    %33 = tpu.matmul %3, %32, %cst_32 {dimension_numbers = #tpu.dot_dimension_numbers<[1], [0], [0], [1], [0, 0, 1, 1], [], []>} : vector<16x128xf32>, vector<128x32xf32>, vector<16x32xf32> -> vector<16x32xf32>
    %c4_33 = arith.constant 4 : index
    %c0_34 = arith.constant 0 : index
    %c0_35 = arith.constant 0 : index
    %34 = vector.load %arg2[%c4_33, %c0_34, %c0_35] : memref<16x32x16xf32, #tpu.memory_space<vmem>>, vector<1x32x16xf32>
    %35 = vector.shape_cast %34 : vector<1x32x16xf32> to vector<32x16xf32>
    %cst_36 = arith.constant dense<0.000000e+00> : vector<32x32xf32>
    %36 = tpu.matmul %35, %33, %cst_36 {dimension_numbers = #tpu.dot_dimension_numbers<[1], [0], [0], [1], [0, 0, 1, 1], [], []>} : vector<32x16xf32>, vector<16x32xf32>, vector<32x32xf32> -> vector<32x32xf32>
    %37 = arith.addf %30, %36 : vector<32x32xf32>
    %c5 = arith.constant 5 : index
    %c0_37 = arith.constant 0 : index
    %c0_38 = arith.constant 0 : index
    %38 = vector.load %arg3[%c5, %c0_37, %c0_38] : memref<16x128x32xf32, #tpu.memory_space<vmem>>, vector<1x128x32xf32>
    %39 = vector.shape_cast %38 : vector<1x128x32xf32> to vector<128x32xf32>
    %cst_39 = arith.constant dense<0.000000e+00> : vector<16x32xf32>
    %40 = tpu.matmul %3, %39, %cst_39 {dimension_numbers = #tpu.dot_dimension_numbers<[1], [0], [0], [1], [0, 0, 1, 1], [], []>} : vector<16x128xf32>, vector<128x32xf32>, vector<16x32xf32> -> vector<16x32xf32>
    %c5_40 = arith.constant 5 : index
    %c0_41 = arith.constant 0 : index
    %c0_42 = arith.constant 0 : index
    %41 = vector.load %arg2[%c5_40, %c0_41, %c0_42] : memref<16x32x16xf32, #tpu.memory_space<vmem>>, vector<1x32x16xf32>
    %42 = vector.shape_cast %41 : vector<1x32x16xf32> to vector<32x16xf32>
    %cst_43 = arith.constant dense<0.000000e+00> : vector<32x32xf32>
    %43 = tpu.matmul %42, %40, %cst_43 {dimension_numbers = #tpu.dot_dimension_numbers<[1], [0], [0], [1], [0, 0, 1, 1], [], []>} : vector<32x16xf32>, vector<16x32xf32>, vector<32x32xf32> -> vector<32x32xf32>
    %44 = arith.addf %37, %43 : vector<32x32xf32>
    %c6 = arith.constant 6 : index
    %c0_44 = arith.constant 0 : index
    %c0_45 = arith.constant 0 : index
    %45 = vector.load %arg3[%c6, %c0_44, %c0_45] : memref<16x128x32xf32, #tpu.memory_space<vmem>>, vector<1x128x32xf32>
    %46 = vector.shape_cast %45 : vector<1x128x32xf32> to vector<128x32xf32>
    %cst_46 = arith.constant dense<0.000000e+00> : vector<16x32xf32>
    %47 = tpu.matmul %3, %46, %cst_46 {dimension_numbers = #tpu.dot_dimension_numbers<[1], [0], [0], [1], [0, 0, 1, 1], [], []>} : vector<16x128xf32>, vector<128x32xf32>, vector<16x32xf32> -> vector<16x32xf32>
    %c6_47 = arith.constant 6 : index
    %c0_48 = arith.constant 0 : index
    %c0_49 = arith.constant 0 : index
    %48 = vector.load %arg2[%c6_47, %c0_48, %c0_49] : memref<16x32x16xf32, #tpu.memory_space<vmem>>, vector<1x32x16xf32>
    %49 = vector.shape_cast %48 : vector<1x32x16xf32> to vector<32x16xf32>
    %cst_50 = arith.constant dense<0.000000e+00> : vector<32x32xf32>
    %50 = tpu.matmul %49, %47, %cst_50 {dimension_numbers = #tpu.dot_dimension_numbers<[1], [0], [0], [1], [0, 0, 1, 1], [], []>} : vector<32x16xf32>, vector<16x32xf32>, vector<32x32xf32> -> vector<32x32xf32>
    %51 = arith.addf %44, %50 : vector<32x32xf32>
    %c7 = arith.constant 7 : index
    %c0_51 = arith.constant 0 : index
    %c0_52 = arith.constant 0 : index
    %52 = vector.load %arg3[%c7, %c0_51, %c0_52] : memref<16x128x32xf32, #tpu.memory_space<vmem>>, vector<1x128x32xf32>
    %53 = vector.shape_cast %52 : vector<1x128x32xf32> to vector<128x32xf32>
    %cst_53 = arith.constant dense<0.000000e+00> : vector<16x32xf32>
    %54 = tpu.matmul %3, %53, %cst_53 {dimension_numbers = #tpu.dot_dimension_numbers<[1], [0], [0], [1], [0, 0, 1, 1], [], []>} : vector<16x128xf32>, vector<128x32xf32>, vector<16x32xf32> -> vector<16x32xf32>
    %c7_54 = arith.constant 7 : index
    %c0_55 = arith.constant 0 : index
    %c0_56 = arith.constant 0 : index
    %55 = vector.load %arg2[%c7_54, %c0_55, %c0_56] : memref<16x32x16xf32, #tpu.memory_space<vmem>>, vector<1x32x16xf32>
    %56 = vector.shape_cast %55 : vector<1x32x16xf32> to vector<32x16xf32>
    %cst_57 = arith.constant dense<0.000000e+00> : vector<32x32xf32>
    %57 = tpu.matmul %56, %54, %cst_57 {dimension_numbers = #tpu.dot_dimension_numbers<[1], [0], [0], [1], [0, 0, 1, 1], [], []>} : vector<32x16xf32>, vector<16x32xf32>, vector<32x32xf32> -> vector<32x32xf32>
    %58 = arith.addf %51, %57 : vector<32x32xf32>
    %c8 = arith.constant 8 : index
    %c0_58 = arith.constant 0 : index
    %c0_59 = arith.constant 0 : index
    %59 = vector.load %arg3[%c8, %c0_58, %c0_59] : memref<16x128x32xf32, #tpu.memory_space<vmem>>, vector<1x128x32xf32>
    %60 = vector.shape_cast %59 : vector<1x128x32xf32> to vector<128x32xf32>
    %cst_60 = arith.constant dense<0.000000e+00> : vector<16x32xf32>
    %61 = tpu.matmul %3, %60, %cst_60 {dimension_numbers = #tpu.dot_dimension_numbers<[1], [0], [0], [1], [0, 0, 1, 1], [], []>} : vector<16x128xf32>, vector<128x32xf32>, vector<16x32xf32> -> vector<16x32xf32>
    %c8_61 = arith.constant 8 : index
    %c0_62 = arith.constant 0 : index
    %c0_63 = arith.constant 0 : index
    %62 = vector.load %arg2[%c8_61, %c0_62, %c0_63] : memref<16x32x16xf32, #tpu.memory_space<vmem>>, vector<1x32x16xf32>
    %63 = vector.shape_cast %62 : vector<1x32x16xf32> to vector<32x16xf32>
    %cst_64 = arith.constant dense<0.000000e+00> : vector<32x32xf32>
    %64 = tpu.matmul %63, %61, %cst_64 {dimension_numbers = #tpu.dot_dimension_numbers<[1], [0], [0], [1], [0, 0, 1, 1], [], []>} : vector<32x16xf32>, vector<16x32xf32>, vector<32x32xf32> -> vector<32x32xf32>
    %65 = arith.addf %58, %64 : vector<32x32xf32>
    %c9 = arith.constant 9 : index
    %c0_65 = arith.constant 0 : index
    %c0_66 = arith.constant 0 : index
    %66 = vector.load %arg3[%c9, %c0_65, %c0_66] : memref<16x128x32xf32, #tpu.memory_space<vmem>>, vector<1x128x32xf32>
    %67 = vector.shape_cast %66 : vector<1x128x32xf32> to vector<128x32xf32>
    %cst_67 = arith.constant dense<0.000000e+00> : vector<16x32xf32>
    %68 = tpu.matmul %3, %67, %cst_67 {dimension_numbers = #tpu.dot_dimension_numbers<[1], [0], [0], [1], [0, 0, 1, 1], [], []>} : vector<16x128xf32>, vector<128x32xf32>, vector<16x32xf32> -> vector<16x32xf32>
    %c9_68 = arith.constant 9 : index
    %c0_69 = arith.constant 0 : index
    %c0_70 = arith.constant 0 : index
    %69 = vector.load %arg2[%c9_68, %c0_69, %c0_70] : memref<16x32x16xf32, #tpu.memory_space<vmem>>, vector<1x32x16xf32>
    %70 = vector.shape_cast %69 : vector<1x32x16xf32> to vector<32x16xf32>
    %cst_71 = arith.constant dense<0.000000e+00> : vector<32x32xf32>
    %71 = tpu.matmul %70, %68, %cst_71 {dimension_numbers = #tpu.dot_dimension_numbers<[1], [0], [0], [1], [0, 0, 1, 1], [], []>} : vector<32x16xf32>, vector<16x32xf32>, vector<32x32xf32> -> vector<32x32xf32>
    %72 = arith.addf %65, %71 : vector<32x32xf32>
    %c10 = arith.constant 10 : index
    %c0_72 = arith.constant 0 : index
    %c0_73 = arith.constant 0 : index
    %73 = vector.load %arg3[%c10, %c0_72, %c0_73] : memref<16x128x32xf32, #tpu.memory_space<vmem>>, vector<1x128x32xf32>
    %74 = vector.shape_cast %73 : vector<1x128x32xf32> to vector<128x32xf32>
    %cst_74 = arith.constant dense<0.000000e+00> : vector<16x32xf32>
    %75 = tpu.matmul %3, %74, %cst_74 {dimension_numbers = #tpu.dot_dimension_numbers<[1], [0], [0], [1], [0, 0, 1, 1], [], []>} : vector<16x128xf32>, vector<128x32xf32>, vector<16x32xf32> -> vector<16x32xf32>
    %c10_75 = arith.constant 10 : index
    %c0_76 = arith.constant 0 : index
    %c0_77 = arith.constant 0 : index
    %76 = vector.load %arg2[%c10_75, %c0_76, %c0_77] : memref<16x32x16xf32, #tpu.memory_space<vmem>>, vector<1x32x16xf32>
    %77 = vector.shape_cast %76 : vector<1x32x16xf32> to vector<32x16xf32>
    %cst_78 = arith.constant dense<0.000000e+00> : vector<32x32xf32>
    %78 = tpu.matmul %77, %75, %cst_78 {dimension_numbers = #tpu.dot_dimension_numbers<[1], [0], [0], [1], [0, 0, 1, 1], [], []>} : vector<32x16xf32>, vector<16x32xf32>, vector<32x32xf32> -> vector<32x32xf32>
    %79 = arith.addf %72, %78 : vector<32x32xf32>
    %c11 = arith.constant 11 : index
    %c0_79 = arith.constant 0 : index
    %c0_80 = arith.constant 0 : index
    %80 = vector.load %arg3[%c11, %c0_79, %c0_80] : memref<16x128x32xf32, #tpu.memory_space<vmem>>, vector<1x128x32xf32>
    %81 = vector.shape_cast %80 : vector<1x128x32xf32> to vector<128x32xf32>
    %cst_81 = arith.constant dense<0.000000e+00> : vector<16x32xf32>
    %82 = tpu.matmul %3, %81, %cst_81 {dimension_numbers = #tpu.dot_dimension_numbers<[1], [0], [0], [1], [0, 0, 1, 1], [], []>} : vector<16x128xf32>, vector<128x32xf32>, vector<16x32xf32> -> vector<16x32xf32>
    %c11_82 = arith.constant 11 : index
    %c0_83 = arith.constant 0 : index
    %c0_84 = arith.constant 0 : index
    %83 = vector.load %arg2[%c11_82, %c0_83, %c0_84] : memref<16x32x16xf32, #tpu.memory_space<vmem>>, vector<1x32x16xf32>
    %84 = vector.shape_cast %83 : vector<1x32x16xf32> to vector<32x16xf32>
    %cst_85 = arith.constant dense<0.000000e+00> : vector<32x32xf32>
    %85 = tpu.matmul %84, %82, %cst_85 {dimension_numbers = #tpu.dot_dimension_numbers<[1], [0], [0], [1], [0, 0, 1, 1], [], []>} : vector<32x16xf32>, vector<16x32xf32>, vector<32x32xf32> -> vector<32x32xf32>
    %86 = arith.addf %79, %85 : vector<32x32xf32>
    %c12 = arith.constant 12 : index
    %c0_86 = arith.constant 0 : index
    %c0_87 = arith.constant 0 : index
    %87 = vector.load %arg3[%c12, %c0_86, %c0_87] : memref<16x128x32xf32, #tpu.memory_space<vmem>>, vector<1x128x32xf32>
    %88 = vector.shape_cast %87 : vector<1x128x32xf32> to vector<128x32xf32>
    %cst_88 = arith.constant dense<0.000000e+00> : vector<16x32xf32>
    %89 = tpu.matmul %3, %88, %cst_88 {dimension_numbers = #tpu.dot_dimension_numbers<[1], [0], [0], [1], [0, 0, 1, 1], [], []>} : vector<16x128xf32>, vector<128x32xf32>, vector<16x32xf32> -> vector<16x32xf32>
    %c12_89 = arith.constant 12 : index
    %c0_90 = arith.constant 0 : index
    %c0_91 = arith.constant 0 : index
    %90 = vector.load %arg2[%c12_89, %c0_90, %c0_91] : memref<16x32x16xf32, #tpu.memory_space<vmem>>, vector<1x32x16xf32>
    %91 = vector.shape_cast %90 : vector<1x32x16xf32> to vector<32x16xf32>
    %cst_92 = arith.constant dense<0.000000e+00> : vector<32x32xf32>
    %92 = tpu.matmul %91, %89, %cst_92 {dimension_numbers = #tpu.dot_dimension_numbers<[1], [0], [0], [1], [0, 0, 1, 1], [], []>} : vector<32x16xf32>, vector<16x32xf32>, vector<32x32xf32> -> vector<32x32xf32>
    %93 = arith.addf %86, %92 : vector<32x32xf32>
    %c13 = arith.constant 13 : index
    %c0_93 = arith.constant 0 : index
    %c0_94 = arith.constant 0 : index
    %94 = vector.load %arg3[%c13, %c0_93, %c0_94] : memref<16x128x32xf32, #tpu.memory_space<vmem>>, vector<1x128x32xf32>
    %95 = vector.shape_cast %94 : vector<1x128x32xf32> to vector<128x32xf32>
    %cst_95 = arith.constant dense<0.000000e+00> : vector<16x32xf32>
    %96 = tpu.matmul %3, %95, %cst_95 {dimension_numbers = #tpu.dot_dimension_numbers<[1], [0], [0], [1], [0, 0, 1, 1], [], []>} : vector<16x128xf32>, vector<128x32xf32>, vector<16x32xf32> -> vector<16x32xf32>
    %c13_96 = arith.constant 13 : index
    %c0_97 = arith.constant 0 : index
    %c0_98 = arith.constant 0 : index
    %97 = vector.load %arg2[%c13_96, %c0_97, %c0_98] : memref<16x32x16xf32, #tpu.memory_space<vmem>>, vector<1x32x16xf32>
    %98 = vector.shape_cast %97 : vector<1x32x16xf32> to vector<32x16xf32>
    %cst_99 = arith.constant dense<0.000000e+00> : vector<32x32xf32>
    %99 = tpu.matmul %98, %96, %cst_99 {dimension_numbers = #tpu.dot_dimension_numbers<[1], [0], [0], [1], [0, 0, 1, 1], [], []>} : vector<32x16xf32>, vector<16x32xf32>, vector<32x32xf32> -> vector<32x32xf32>
    %100 = arith.addf %93, %99 : vector<32x32xf32>
    %c14 = arith.constant 14 : index
    %c0_100 = arith.constant 0 : index
    %c0_101 = arith.constant 0 : index
    %101 = vector.load %arg3[%c14, %c0_100, %c0_101] : memref<16x128x32xf32, #tpu.memory_space<vmem>>, vector<1x128x32xf32>
    %102 = vector.shape_cast %101 : vector<1x128x32xf32> to vector<128x32xf32>
    %cst_102 = arith.constant dense<0.000000e+00> : vector<16x32xf32>
    %103 = tpu.matmul %3, %102, %cst_102 {dimension_numbers = #tpu.dot_dimension_numbers<[1], [0], [0], [1], [0, 0, 1, 1], [], []>} : vector<16x128xf32>, vector<128x32xf32>, vector<16x32xf32> -> vector<16x32xf32>
    %c14_103 = arith.constant 14 : index
    %c0_104 = arith.constant 0 : index
    %c0_105 = arith.constant 0 : index
    %104 = vector.load %arg2[%c14_103, %c0_104, %c0_105] : memref<16x32x16xf32, #tpu.memory_space<vmem>>, vector<1x32x16xf32>
    %105 = vector.shape_cast %104 : vector<1x32x16xf32> to vector<32x16xf32>
    %cst_106 = arith.constant dense<0.000000e+00> : vector<32x32xf32>
    %106 = tpu.matmul %105, %103, %cst_106 {dimension_numbers = #tpu.dot_dimension_numbers<[1], [0], [0], [1], [0, 0, 1, 1], [], []>} : vector<32x16xf32>, vector<16x32xf32>, vector<32x32xf32> -> vector<32x32xf32>
    %107 = arith.addf %100, %106 : vector<32x32xf32>
    %c15 = arith.constant 15 : index
    %c0_107 = arith.constant 0 : index
    %c0_108 = arith.constant 0 : index
    %108 = vector.load %arg3[%c15, %c0_107, %c0_108] : memref<16x128x32xf32, #tpu.memory_space<vmem>>, vector<1x128x32xf32>
    %109 = vector.shape_cast %108 : vector<1x128x32xf32> to vector<128x32xf32>
    %cst_109 = arith.constant dense<0.000000e+00> : vector<16x32xf32>
    %110 = tpu.matmul %3, %109, %cst_109 {dimension_numbers = #tpu.dot_dimension_numbers<[1], [0], [0], [1], [0, 0, 1, 1], [], []>} : vector<16x128xf32>, vector<128x32xf32>, vector<16x32xf32> -> vector<16x32xf32>
    %c15_110 = arith.constant 15 : index
    %c0_111 = arith.constant 0 : index
    %c0_112 = arith.constant 0 : index
    %111 = vector.load %arg2[%c15_110, %c0_111, %c0_112] : memref<16x32x16xf32, #tpu.memory_space<vmem>>, vector<1x32x16xf32>
    %112 = vector.shape_cast %111 : vector<1x32x16xf32> to vector<32x16xf32>
    %cst_113 = arith.constant dense<0.000000e+00> : vector<32x32xf32>
    %113 = tpu.matmul %112, %110, %cst_113 {dimension_numbers = #tpu.dot_dimension_numbers<[1], [0], [0], [1], [0, 0, 1, 1], [], []>} : vector<32x16xf32>, vector<16x32xf32>, vector<32x32xf32> -> vector<32x32xf32>
    %114 = arith.addf %107, %113 : vector<32x32xf32>
    %cst_114 = arith.constant dense<0.000000e+00> : vector<32xf32>
    %115 = vector.multi_reduction <add>, %114, %cst_114 [1] : vector<32x32xf32> to vector<32xf32>
    %116 = vector.shape_cast %115 : vector<32xf32> to vector<32x1xf32>
    %cst_115 = arith.constant 3.125000e-02 : f32
    %117 = vector.broadcast %cst_115 : f32 to vector<32x1xf32>
    %118 = arith.mulf %116, %117 : vector<32x1xf32>
    %119 = vector.broadcast %118 : vector<32x1xf32> to vector<32x32xf32>
    %120 = arith.subf %114, %119 : vector<32x32xf32>
    %121 = arith.mulf %120, %120 : vector<32x32xf32>
    %cst_116 = arith.constant dense<0.000000e+00> : vector<32xf32>
    %122 = vector.multi_reduction <add>, %121, %cst_116 [1] : vector<32x32xf32> to vector<32xf32>
    %123 = vector.shape_cast %122 : vector<32xf32> to vector<32x1xf32>
    %cst_117 = arith.constant 3.125000e-02 : f32
    %124 = vector.broadcast %cst_117 : f32 to vector<32x1xf32>
    %125 = arith.mulf %123, %124 : vector<32x1xf32>
    %cst_118 = arith.constant 9.99999974E-6 : f32
    %126 = vector.broadcast %cst_118 : f32 to vector<32x1xf32>
    %127 = arith.addf %125, %126 : vector<32x1xf32>
    %128 = math.rsqrt %127 : vector<32x1xf32>
    %129 = vector.broadcast %128 : vector<32x1xf32> to vector<32x32xf32>
    %130 = arith.mulf %120, %129 : vector<32x32xf32>
    %c0_119 = arith.constant 0 : index
    %c0_120 = arith.constant 0 : index
    %131 = vector.load %arg4[%c0_119, %c0_120] : memref<32x1xf32, #tpu.memory_space<vmem>>, vector<32x1xf32>
    %132 = vector.broadcast %131 : vector<32x1xf32> to vector<32x32xf32>
    %133 = arith.mulf %130, %132 : vector<32x32xf32>
    %c0_121 = arith.constant 0 : index
    %c0_122 = arith.constant 0 : index
    %134 = vector.load %arg5[%c0_121, %c0_122] : memref<32x1xf32, #tpu.memory_space<vmem>>, vector<32x1xf32>
    %135 = vector.broadcast %134 : vector<32x1xf32> to vector<32x32xf32>
    %136 = arith.addf %133, %135 : vector<32x32xf32>
    %cst_123 = arith.constant 2.000000e-01 : f32
    %137 = vector.broadcast %cst_123 : f32 to vector<32x32xf32>
    %138 = arith.mulf %137, %136 : vector<32x32xf32>
    %139 = arith.maximumf %136, %138 : vector<32x32xf32>
    %c0_124 = arith.constant 0 : index
    %c0_125 = arith.constant 0 : index
    %c0_126 = arith.constant 0 : index
    %140 = vector.load %arg7[%c0_124, %c0_125, %c0_126] : memref<16x32x8xf32, #tpu.memory_space<vmem>>, vector<1x32x8xf32>
    %141 = vector.shape_cast %140 : vector<1x32x8xf32> to vector<32x8xf32>
    %cst_127 = arith.constant dense<0.000000e+00> : vector<32x8xf32>
    %142 = tpu.matmul %139, %141, %cst_127 {dimension_numbers = #tpu.dot_dimension_numbers<[1], [0], [0], [1], [0, 0, 1, 1], [], []>} : vector<32x32xf32>, vector<32x8xf32>, vector<32x8xf32> -> vector<32x8xf32>
    %c0_128 = arith.constant 0 : index
    %c0_129 = arith.constant 0 : index
    %c0_130 = arith.constant 0 : index
    %143 = vector.load %arg6[%c0_128, %c0_129, %c0_130] : memref<16x64x32xf32, #tpu.memory_space<vmem>>, vector<1x64x32xf32>
    %144 = vector.shape_cast %143 : vector<1x64x32xf32> to vector<64x32xf32>
    %cst_131 = arith.constant dense<0.000000e+00> : vector<64x8xf32>
    %145 = tpu.matmul %144, %142, %cst_131 {dimension_numbers = #tpu.dot_dimension_numbers<[1], [0], [0], [1], [0, 0, 1, 1], [], []>} : vector<64x32xf32>, vector<32x8xf32>, vector<64x8xf32> -> vector<64x8xf32>
    %c1_132 = arith.constant 1 : index
    %c0_133 = arith.constant 0 : index
    %c0_134 = arith.constant 0 : index
    %146 = vector.load %arg7[%c1_132, %c0_133, %c0_134] : memref<16x32x8xf32, #tpu.memory_space<vmem>>, vector<1x32x8xf32>
    %147 = vector.shape_cast %146 : vector<1x32x8xf32> to vector<32x8xf32>
    %cst_135 = arith.constant dense<0.000000e+00> : vector<32x8xf32>
    %148 = tpu.matmul %139, %147, %cst_135 {dimension_numbers = #tpu.dot_dimension_numbers<[1], [0], [0], [1], [0, 0, 1, 1], [], []>} : vector<32x32xf32>, vector<32x8xf32>, vector<32x8xf32> -> vector<32x8xf32>
    %c1_136 = arith.constant 1 : index
    %c0_137 = arith.constant 0 : index
    %c0_138 = arith.constant 0 : index
    %149 = vector.load %arg6[%c1_136, %c0_137, %c0_138] : memref<16x64x32xf32, #tpu.memory_space<vmem>>, vector<1x64x32xf32>
    %150 = vector.shape_cast %149 : vector<1x64x32xf32> to vector<64x32xf32>
    %cst_139 = arith.constant dense<0.000000e+00> : vector<64x8xf32>
    %151 = tpu.matmul %150, %148, %cst_139 {dimension_numbers = #tpu.dot_dimension_numbers<[1], [0], [0], [1], [0, 0, 1, 1], [], []>} : vector<64x32xf32>, vector<32x8xf32>, vector<64x8xf32> -> vector<64x8xf32>
    %152 = arith.addf %145, %151 : vector<64x8xf32>
    %c2_140 = arith.constant 2 : index
    %c0_141 = arith.constant 0 : index
    %c0_142 = arith.constant 0 : index
    %153 = vector.load %arg7[%c2_140, %c0_141, %c0_142] : memref<16x32x8xf32, #tpu.memory_space<vmem>>, vector<1x32x8xf32>
    %154 = vector.shape_cast %153 : vector<1x32x8xf32> to vector<32x8xf32>
    %cst_143 = arith.constant dense<0.000000e+00> : vector<32x8xf32>
    %155 = tpu.matmul %139, %154, %cst_143 {dimension_numbers = #tpu.dot_dimension_numbers<[1], [0], [0], [1], [0, 0, 1, 1], [], []>} : vector<32x32xf32>, vector<32x8xf32>, vector<32x8xf32> -> vector<32x8xf32>
    %c2_144 = arith.constant 2 : index
    %c0_145 = arith.constant 0 : index
    %c0_146 = arith.constant 0 : index
    %156 = vector.load %arg6[%c2_144, %c0_145, %c0_146] : memref<16x64x32xf32, #tpu.memory_space<vmem>>, vector<1x64x32xf32>
    %157 = vector.shape_cast %156 : vector<1x64x32xf32> to vector<64x32xf32>
    %cst_147 = arith.constant dense<0.000000e+00> : vector<64x8xf32>
    %158 = tpu.matmul %157, %155, %cst_147 {dimension_numbers = #tpu.dot_dimension_numbers<[1], [0], [0], [1], [0, 0, 1, 1], [], []>} : vector<64x32xf32>, vector<32x8xf32>, vector<64x8xf32> -> vector<64x8xf32>
    %159 = arith.addf %152, %158 : vector<64x8xf32>
    %c3_148 = arith.constant 3 : index
    %c0_149 = arith.constant 0 : index
    %c0_150 = arith.constant 0 : index
    %160 = vector.load %arg7[%c3_148, %c0_149, %c0_150] : memref<16x32x8xf32, #tpu.memory_space<vmem>>, vector<1x32x8xf32>
    %161 = vector.shape_cast %160 : vector<1x32x8xf32> to vector<32x8xf32>
    %cst_151 = arith.constant dense<0.000000e+00> : vector<32x8xf32>
    %162 = tpu.matmul %139, %161, %cst_151 {dimension_numbers = #tpu.dot_dimension_numbers<[1], [0], [0], [1], [0, 0, 1, 1], [], []>} : vector<32x32xf32>, vector<32x8xf32>, vector<32x8xf32> -> vector<32x8xf32>
    %c3_152 = arith.constant 3 : index
    %c0_153 = arith.constant 0 : index
    %c0_154 = arith.constant 0 : index
    %163 = vector.load %arg6[%c3_152, %c0_153, %c0_154] : memref<16x64x32xf32, #tpu.memory_space<vmem>>, vector<1x64x32xf32>
    %164 = vector.shape_cast %163 : vector<1x64x32xf32> to vector<64x32xf32>
    %cst_155 = arith.constant dense<0.000000e+00> : vector<64x8xf32>
    %165 = tpu.matmul %164, %162, %cst_155 {dimension_numbers = #tpu.dot_dimension_numbers<[1], [0], [0], [1], [0, 0, 1, 1], [], []>} : vector<64x32xf32>, vector<32x8xf32>, vector<64x8xf32> -> vector<64x8xf32>
    %166 = arith.addf %159, %165 : vector<64x8xf32>
    %c4_156 = arith.constant 4 : index
    %c0_157 = arith.constant 0 : index
    %c0_158 = arith.constant 0 : index
    %167 = vector.load %arg7[%c4_156, %c0_157, %c0_158] : memref<16x32x8xf32, #tpu.memory_space<vmem>>, vector<1x32x8xf32>
    %168 = vector.shape_cast %167 : vector<1x32x8xf32> to vector<32x8xf32>
    %cst_159 = arith.constant dense<0.000000e+00> : vector<32x8xf32>
    %169 = tpu.matmul %139, %168, %cst_159 {dimension_numbers = #tpu.dot_dimension_numbers<[1], [0], [0], [1], [0, 0, 1, 1], [], []>} : vector<32x32xf32>, vector<32x8xf32>, vector<32x8xf32> -> vector<32x8xf32>
    %c4_160 = arith.constant 4 : index
    %c0_161 = arith.constant 0 : index
    %c0_162 = arith.constant 0 : index
    %170 = vector.load %arg6[%c4_160, %c0_161, %c0_162] : memref<16x64x32xf32, #tpu.memory_space<vmem>>, vector<1x64x32xf32>
    %171 = vector.shape_cast %170 : vector<1x64x32xf32> to vector<64x32xf32>
    %cst_163 = arith.constant dense<0.000000e+00> : vector<64x8xf32>
    %172 = tpu.matmul %171, %169, %cst_163 {dimension_numbers = #tpu.dot_dimension_numbers<[1], [0], [0], [1], [0, 0, 1, 1], [], []>} : vector<64x32xf32>, vector<32x8xf32>, vector<64x8xf32> -> vector<64x8xf32>
    %173 = arith.addf %166, %172 : vector<64x8xf32>
    %c5_164 = arith.constant 5 : index
    %c0_165 = arith.constant 0 : index
    %c0_166 = arith.constant 0 : index
    %174 = vector.load %arg7[%c5_164, %c0_165, %c0_166] : memref<16x32x8xf32, #tpu.memory_space<vmem>>, vector<1x32x8xf32>
    %175 = vector.shape_cast %174 : vector<1x32x8xf32> to vector<32x8xf32>
    %cst_167 = arith.constant dense<0.000000e+00> : vector<32x8xf32>
    %176 = tpu.matmul %139, %175, %cst_167 {dimension_numbers = #tpu.dot_dimension_numbers<[1], [0], [0], [1], [0, 0, 1, 1], [], []>} : vector<32x32xf32>, vector<32x8xf32>, vector<32x8xf32> -> vector<32x8xf32>
    %c5_168 = arith.constant 5 : index
    %c0_169 = arith.constant 0 : index
    %c0_170 = arith.constant 0 : index
    %177 = vector.load %arg6[%c5_168, %c0_169, %c0_170] : memref<16x64x32xf32, #tpu.memory_space<vmem>>, vector<1x64x32xf32>
    %178 = vector.shape_cast %177 : vector<1x64x32xf32> to vector<64x32xf32>
    %cst_171 = arith.constant dense<0.000000e+00> : vector<64x8xf32>
    %179 = tpu.matmul %178, %176, %cst_171 {dimension_numbers = #tpu.dot_dimension_numbers<[1], [0], [0], [1], [0, 0, 1, 1], [], []>} : vector<64x32xf32>, vector<32x8xf32>, vector<64x8xf32> -> vector<64x8xf32>
    %180 = arith.addf %173, %179 : vector<64x8xf32>
    %c6_172 = arith.constant 6 : index
    %c0_173 = arith.constant 0 : index
    %c0_174 = arith.constant 0 : index
    %181 = vector.load %arg7[%c6_172, %c0_173, %c0_174] : memref<16x32x8xf32, #tpu.memory_space<vmem>>, vector<1x32x8xf32>
    %182 = vector.shape_cast %181 : vector<1x32x8xf32> to vector<32x8xf32>
    %cst_175 = arith.constant dense<0.000000e+00> : vector<32x8xf32>
    %183 = tpu.matmul %139, %182, %cst_175 {dimension_numbers = #tpu.dot_dimension_numbers<[1], [0], [0], [1], [0, 0, 1, 1], [], []>} : vector<32x32xf32>, vector<32x8xf32>, vector<32x8xf32> -> vector<32x8xf32>
    %c6_176 = arith.constant 6 : index
    %c0_177 = arith.constant 0 : index
    %c0_178 = arith.constant 0 : index
    %184 = vector.load %arg6[%c6_176, %c0_177, %c0_178] : memref<16x64x32xf32, #tpu.memory_space<vmem>>, vector<1x64x32xf32>
    %185 = vector.shape_cast %184 : vector<1x64x32xf32> to vector<64x32xf32>
    %cst_179 = arith.constant dense<0.000000e+00> : vector<64x8xf32>
    %186 = tpu.matmul %185, %183, %cst_179 {dimension_numbers = #tpu.dot_dimension_numbers<[1], [0], [0], [1], [0, 0, 1, 1], [], []>} : vector<64x32xf32>, vector<32x8xf32>, vector<64x8xf32> -> vector<64x8xf32>
    %187 = arith.addf %180, %186 : vector<64x8xf32>
    %c7_180 = arith.constant 7 : index
    %c0_181 = arith.constant 0 : index
    %c0_182 = arith.constant 0 : index
    %188 = vector.load %arg7[%c7_180, %c0_181, %c0_182] : memref<16x32x8xf32, #tpu.memory_space<vmem>>, vector<1x32x8xf32>
    %189 = vector.shape_cast %188 : vector<1x32x8xf32> to vector<32x8xf32>
    %cst_183 = arith.constant dense<0.000000e+00> : vector<32x8xf32>
    %190 = tpu.matmul %139, %189, %cst_183 {dimension_numbers = #tpu.dot_dimension_numbers<[1], [0], [0], [1], [0, 0, 1, 1], [], []>} : vector<32x32xf32>, vector<32x8xf32>, vector<32x8xf32> -> vector<32x8xf32>
    %c7_184 = arith.constant 7 : index
    %c0_185 = arith.constant 0 : index
    %c0_186 = arith.constant 0 : index
    %191 = vector.load %arg6[%c7_184, %c0_185, %c0_186] : memref<16x64x32xf32, #tpu.memory_space<vmem>>, vector<1x64x32xf32>
    %192 = vector.shape_cast %191 : vector<1x64x32xf32> to vector<64x32xf32>
    %cst_187 = arith.constant dense<0.000000e+00> : vector<64x8xf32>
    %193 = tpu.matmul %192, %190, %cst_187 {dimension_numbers = #tpu.dot_dimension_numbers<[1], [0], [0], [1], [0, 0, 1, 1], [], []>} : vector<64x32xf32>, vector<32x8xf32>, vector<64x8xf32> -> vector<64x8xf32>
    %194 = arith.addf %187, %193 : vector<64x8xf32>
    %c8_188 = arith.constant 8 : index
    %c0_189 = arith.constant 0 : index
    %c0_190 = arith.constant 0 : index
    %195 = vector.load %arg7[%c8_188, %c0_189, %c0_190] : memref<16x32x8xf32, #tpu.memory_space<vmem>>, vector<1x32x8xf32>
    %196 = vector.shape_cast %195 : vector<1x32x8xf32> to vector<32x8xf32>
    %cst_191 = arith.constant dense<0.000000e+00> : vector<32x8xf32>
    %197 = tpu.matmul %139, %196, %cst_191 {dimension_numbers = #tpu.dot_dimension_numbers<[1], [0], [0], [1], [0, 0, 1, 1], [], []>} : vector<32x32xf32>, vector<32x8xf32>, vector<32x8xf32> -> vector<32x8xf32>
    %c8_192 = arith.constant 8 : index
    %c0_193 = arith.constant 0 : index
    %c0_194 = arith.constant 0 : index
    %198 = vector.load %arg6[%c8_192, %c0_193, %c0_194] : memref<16x64x32xf32, #tpu.memory_space<vmem>>, vector<1x64x32xf32>
    %199 = vector.shape_cast %198 : vector<1x64x32xf32> to vector<64x32xf32>
    %cst_195 = arith.constant dense<0.000000e+00> : vector<64x8xf32>
    %200 = tpu.matmul %199, %197, %cst_195 {dimension_numbers = #tpu.dot_dimension_numbers<[1], [0], [0], [1], [0, 0, 1, 1], [], []>} : vector<64x32xf32>, vector<32x8xf32>, vector<64x8xf32> -> vector<64x8xf32>
    %201 = arith.addf %194, %200 : vector<64x8xf32>
    %c9_196 = arith.constant 9 : index
    %c0_197 = arith.constant 0 : index
    %c0_198 = arith.constant 0 : index
    %202 = vector.load %arg7[%c9_196, %c0_197, %c0_198] : memref<16x32x8xf32, #tpu.memory_space<vmem>>, vector<1x32x8xf32>
    %203 = vector.shape_cast %202 : vector<1x32x8xf32> to vector<32x8xf32>
    %cst_199 = arith.constant dense<0.000000e+00> : vector<32x8xf32>
    %204 = tpu.matmul %139, %203, %cst_199 {dimension_numbers = #tpu.dot_dimension_numbers<[1], [0], [0], [1], [0, 0, 1, 1], [], []>} : vector<32x32xf32>, vector<32x8xf32>, vector<32x8xf32> -> vector<32x8xf32>
    %c9_200 = arith.constant 9 : index
    %c0_201 = arith.constant 0 : index
    %c0_202 = arith.constant 0 : index
    %205 = vector.load %arg6[%c9_200, %c0_201, %c0_202] : memref<16x64x32xf32, #tpu.memory_space<vmem>>, vector<1x64x32xf32>
    %206 = vector.shape_cast %205 : vector<1x64x32xf32> to vector<64x32xf32>
    %cst_203 = arith.constant dense<0.000000e+00> : vector<64x8xf32>
    %207 = tpu.matmul %206, %204, %cst_203 {dimension_numbers = #tpu.dot_dimension_numbers<[1], [0], [0], [1], [0, 0, 1, 1], [], []>} : vector<64x32xf32>, vector<32x8xf32>, vector<64x8xf32> -> vector<64x8xf32>
    %208 = arith.addf %201, %207 : vector<64x8xf32>
    %c10_204 = arith.constant 10 : index
    %c0_205 = arith.constant 0 : index
    %c0_206 = arith.constant 0 : index
    %209 = vector.load %arg7[%c10_204, %c0_205, %c0_206] : memref<16x32x8xf32, #tpu.memory_space<vmem>>, vector<1x32x8xf32>
    %210 = vector.shape_cast %209 : vector<1x32x8xf32> to vector<32x8xf32>
    %cst_207 = arith.constant dense<0.000000e+00> : vector<32x8xf32>
    %211 = tpu.matmul %139, %210, %cst_207 {dimension_numbers = #tpu.dot_dimension_numbers<[1], [0], [0], [1], [0, 0, 1, 1], [], []>} : vector<32x32xf32>, vector<32x8xf32>, vector<32x8xf32> -> vector<32x8xf32>
    %c10_208 = arith.constant 10 : index
    %c0_209 = arith.constant 0 : index
    %c0_210 = arith.constant 0 : index
    %212 = vector.load %arg6[%c10_208, %c0_209, %c0_210] : memref<16x64x32xf32, #tpu.memory_space<vmem>>, vector<1x64x32xf32>
    %213 = vector.shape_cast %212 : vector<1x64x32xf32> to vector<64x32xf32>
    %cst_211 = arith.constant dense<0.000000e+00> : vector<64x8xf32>
    %214 = tpu.matmul %213, %211, %cst_211 {dimension_numbers = #tpu.dot_dimension_numbers<[1], [0], [0], [1], [0, 0, 1, 1], [], []>} : vector<64x32xf32>, vector<32x8xf32>, vector<64x8xf32> -> vector<64x8xf32>
    %215 = arith.addf %208, %214 : vector<64x8xf32>
    %c11_212 = arith.constant 11 : index
    %c0_213 = arith.constant 0 : index
    %c0_214 = arith.constant 0 : index
    %216 = vector.load %arg7[%c11_212, %c0_213, %c0_214] : memref<16x32x8xf32, #tpu.memory_space<vmem>>, vector<1x32x8xf32>
    %217 = vector.shape_cast %216 : vector<1x32x8xf32> to vector<32x8xf32>
    %cst_215 = arith.constant dense<0.000000e+00> : vector<32x8xf32>
    %218 = tpu.matmul %139, %217, %cst_215 {dimension_numbers = #tpu.dot_dimension_numbers<[1], [0], [0], [1], [0, 0, 1, 1], [], []>} : vector<32x32xf32>, vector<32x8xf32>, vector<32x8xf32> -> vector<32x8xf32>
    %c11_216 = arith.constant 11 : index
    %c0_217 = arith.constant 0 : index
    %c0_218 = arith.constant 0 : index
    %219 = vector.load %arg6[%c11_216, %c0_217, %c0_218] : memref<16x64x32xf32, #tpu.memory_space<vmem>>, vector<1x64x32xf32>
    %220 = vector.shape_cast %219 : vector<1x64x32xf32> to vector<64x32xf32>
    %cst_219 = arith.constant dense<0.000000e+00> : vector<64x8xf32>
    %221 = tpu.matmul %220, %218, %cst_219 {dimension_numbers = #tpu.dot_dimension_numbers<[1], [0], [0], [1], [0, 0, 1, 1], [], []>} : vector<64x32xf32>, vector<32x8xf32>, vector<64x8xf32> -> vector<64x8xf32>
    %222 = arith.addf %215, %221 : vector<64x8xf32>
    %c12_220 = arith.constant 12 : index
    %c0_221 = arith.constant 0 : index
    %c0_222 = arith.constant 0 : index
    %223 = vector.load %arg7[%c12_220, %c0_221, %c0_222] : memref<16x32x8xf32, #tpu.memory_space<vmem>>, vector<1x32x8xf32>
    %224 = vector.shape_cast %223 : vector<1x32x8xf32> to vector<32x8xf32>
    %cst_223 = arith.constant dense<0.000000e+00> : vector<32x8xf32>
    %225 = tpu.matmul %139, %224, %cst_223 {dimension_numbers = #tpu.dot_dimension_numbers<[1], [0], [0], [1], [0, 0, 1, 1], [], []>} : vector<32x32xf32>, vector<32x8xf32>, vector<32x8xf32> -> vector<32x8xf32>
    %c12_224 = arith.constant 12 : index
    %c0_225 = arith.constant 0 : index
    %c0_226 = arith.constant 0 : index
    %226 = vector.load %arg6[%c12_224, %c0_225, %c0_226] : memref<16x64x32xf32, #tpu.memory_space<vmem>>, vector<1x64x32xf32>
    %227 = vector.shape_cast %226 : vector<1x64x32xf32> to vector<64x32xf32>
    %cst_227 = arith.constant dense<0.000000e+00> : vector<64x8xf32>
    %228 = tpu.matmul %227, %225, %cst_227 {dimension_numbers = #tpu.dot_dimension_numbers<[1], [0], [0], [1], [0, 0, 1, 1], [], []>} : vector<64x32xf32>, vector<32x8xf32>, vector<64x8xf32> -> vector<64x8xf32>
    %229 = arith.addf %222, %228 : vector<64x8xf32>
    %c13_228 = arith.constant 13 : index
    %c0_229 = arith.constant 0 : index
    %c0_230 = arith.constant 0 : index
    %230 = vector.load %arg7[%c13_228, %c0_229, %c0_230] : memref<16x32x8xf32, #tpu.memory_space<vmem>>, vector<1x32x8xf32>
    %231 = vector.shape_cast %230 : vector<1x32x8xf32> to vector<32x8xf32>
    %cst_231 = arith.constant dense<0.000000e+00> : vector<32x8xf32>
    %232 = tpu.matmul %139, %231, %cst_231 {dimension_numbers = #tpu.dot_dimension_numbers<[1], [0], [0], [1], [0, 0, 1, 1], [], []>} : vector<32x32xf32>, vector<32x8xf32>, vector<32x8xf32> -> vector<32x8xf32>
    %c13_232 = arith.constant 13 : index
    %c0_233 = arith.constant 0 : index
    %c0_234 = arith.constant 0 : index
    %233 = vector.load %arg6[%c13_232, %c0_233, %c0_234] : memref<16x64x32xf32, #tpu.memory_space<vmem>>, vector<1x64x32xf32>
    %234 = vector.shape_cast %233 : vector<1x64x32xf32> to vector<64x32xf32>
    %cst_235 = arith.constant dense<0.000000e+00> : vector<64x8xf32>
    %235 = tpu.matmul %234, %232, %cst_235 {dimension_numbers = #tpu.dot_dimension_numbers<[1], [0], [0], [1], [0, 0, 1, 1], [], []>} : vector<64x32xf32>, vector<32x8xf32>, vector<64x8xf32> -> vector<64x8xf32>
    %236 = arith.addf %229, %235 : vector<64x8xf32>
    %c14_236 = arith.constant 14 : index
    %c0_237 = arith.constant 0 : index
    %c0_238 = arith.constant 0 : index
    %237 = vector.load %arg7[%c14_236, %c0_237, %c0_238] : memref<16x32x8xf32, #tpu.memory_space<vmem>>, vector<1x32x8xf32>
    %238 = vector.shape_cast %237 : vector<1x32x8xf32> to vector<32x8xf32>
    %cst_239 = arith.constant dense<0.000000e+00> : vector<32x8xf32>
    %239 = tpu.matmul %139, %238, %cst_239 {dimension_numbers = #tpu.dot_dimension_numbers<[1], [0], [0], [1], [0, 0, 1, 1], [], []>} : vector<32x32xf32>, vector<32x8xf32>, vector<32x8xf32> -> vector<32x8xf32>
    %c14_240 = arith.constant 14 : index
    %c0_241 = arith.constant 0 : index
    %c0_242 = arith.constant 0 : index
    %240 = vector.load %arg6[%c14_240, %c0_241, %c0_242] : memref<16x64x32xf32, #tpu.memory_space<vmem>>, vector<1x64x32xf32>
    %241 = vector.shape_cast %240 : vector<1x64x32xf32> to vector<64x32xf32>
    %cst_243 = arith.constant dense<0.000000e+00> : vector<64x8xf32>
    %242 = tpu.matmul %241, %239, %cst_243 {dimension_numbers = #tpu.dot_dimension_numbers<[1], [0], [0], [1], [0, 0, 1, 1], [], []>} : vector<64x32xf32>, vector<32x8xf32>, vector<64x8xf32> -> vector<64x8xf32>
    %243 = arith.addf %236, %242 : vector<64x8xf32>
    %c15_244 = arith.constant 15 : index
    %c0_245 = arith.constant 0 : index
    %c0_246 = arith.constant 0 : index
    %244 = vector.load %arg7[%c15_244, %c0_245, %c0_246] : memref<16x32x8xf32, #tpu.memory_space<vmem>>, vector<1x32x8xf32>
    %245 = vector.shape_cast %244 : vector<1x32x8xf32> to vector<32x8xf32>
    %cst_247 = arith.constant dense<0.000000e+00> : vector<32x8xf32>
    %246 = tpu.matmul %139, %245, %cst_247 {dimension_numbers = #tpu.dot_dimension_numbers<[1], [0], [0], [1], [0, 0, 1, 1], [], []>} : vector<32x32xf32>, vector<32x8xf32>, vector<32x8xf32> -> vector<32x8xf32>
    %c15_248 = arith.constant 15 : index
    %c0_249 = arith.constant 0 : index
    %c0_250 = arith.constant 0 : index
    %247 = vector.load %arg6[%c15_248, %c0_249, %c0_250] : memref<16x64x32xf32, #tpu.memory_space<vmem>>, vector<1x64x32xf32>
    %248 = vector.shape_cast %247 : vector<1x64x32xf32> to vector<64x32xf32>
    %cst_251 = arith.constant dense<0.000000e+00> : vector<64x8xf32>
    %249 = tpu.matmul %248, %246, %cst_251 {dimension_numbers = #tpu.dot_dimension_numbers<[1], [0], [0], [1], [0, 0, 1, 1], [], []>} : vector<64x32xf32>, vector<32x8xf32>, vector<64x8xf32> -> vector<64x8xf32>
    %250 = arith.addf %243, %249 : vector<64x8xf32>
    %cst_252 = arith.constant dense<0.000000e+00> : vector<64xf32>
    %251 = vector.multi_reduction <add>, %250, %cst_252 [1] : vector<64x8xf32> to vector<64xf32>
    %252 = vector.shape_cast %251 : vector<64xf32> to vector<64x1xf32>
    %cst_253 = arith.constant 1.250000e-01 : f32
    %253 = vector.broadcast %cst_253 : f32 to vector<64x1xf32>
    %254 = arith.mulf %252, %253 : vector<64x1xf32>
    %255 = vector.broadcast %254 : vector<64x1xf32> to vector<64x8xf32>
    %256 = arith.subf %250, %255 : vector<64x8xf32>
    %257 = arith.mulf %256, %256 : vector<64x8xf32>
    %cst_254 = arith.constant dense<0.000000e+00> : vector<64xf32>
    %258 = vector.multi_reduction <add>, %257, %cst_254 [1] : vector<64x8xf32> to vector<64xf32>
    %259 = vector.shape_cast %258 : vector<64xf32> to vector<64x1xf32>
    %cst_255 = arith.constant 1.250000e-01 : f32
    %260 = vector.broadcast %cst_255 : f32 to vector<64x1xf32>
    %261 = arith.mulf %259, %260 : vector<64x1xf32>
    %cst_256 = arith.constant 9.99999974E-6 : f32
    %262 = vector.broadcast %cst_256 : f32 to vector<64x1xf32>
    %263 = arith.addf %261, %262 : vector<64x1xf32>
    %264 = math.rsqrt %263 : vector<64x1xf32>
    %265 = vector.broadcast %264 : vector<64x1xf32> to vector<64x8xf32>
    %266 = arith.mulf %256, %265 : vector<64x8xf32>
    %c0_257 = arith.constant 0 : index
    %c0_258 = arith.constant 0 : index
    %267 = vector.load %arg8[%c0_257, %c0_258] : memref<64x1xf32, #tpu.memory_space<vmem>>, vector<64x1xf32>
    %268 = vector.broadcast %267 : vector<64x1xf32> to vector<64x8xf32>
    %269 = arith.mulf %266, %268 : vector<64x8xf32>
    %c0_259 = arith.constant 0 : index
    %c0_260 = arith.constant 0 : index
    %270 = vector.load %arg9[%c0_259, %c0_260] : memref<64x1xf32, #tpu.memory_space<vmem>>, vector<64x1xf32>
    %271 = vector.broadcast %270 : vector<64x1xf32> to vector<64x8xf32>
    %272 = arith.addf %269, %271 : vector<64x8xf32>
    %cst_261 = arith.constant 2.000000e-01 : f32
    %273 = vector.broadcast %cst_261 : f32 to vector<64x8xf32>
    %274 = arith.mulf %273, %272 : vector<64x8xf32>
    %275 = arith.maximumf %272, %274 : vector<64x8xf32>
    %c0_262 = arith.constant 0 : index
    %c0_263 = arith.constant 0 : index
    %c0_264 = arith.constant 0 : index
    %276 = vector.load %arg11[%c0_262, %c0_263, %c0_264] : memref<4x8x2xf32, #tpu.memory_space<vmem>>, vector<1x8x2xf32>
    %277 = vector.shape_cast %276 : vector<1x8x2xf32> to vector<8x2xf32>
    %cst_265 = arith.constant dense<0.000000e+00> : vector<64x2xf32>
    %278 = tpu.matmul %275, %277, %cst_265 {dimension_numbers = #tpu.dot_dimension_numbers<[1], [0], [0], [1], [0, 0, 1, 1], [], []>} : vector<64x8xf32>, vector<8x2xf32>, vector<64x2xf32> -> vector<64x2xf32>
    %c0_266 = arith.constant 0 : index
    %c0_267 = arith.constant 0 : index
    %c0_268 = arith.constant 0 : index
    %279 = vector.load %arg10[%c0_266, %c0_267, %c0_268] : memref<4x64x64xf32, #tpu.memory_space<vmem>>, vector<1x64x64xf32>
    %280 = vector.shape_cast %279 : vector<1x64x64xf32> to vector<64x64xf32>
    %cst_269 = arith.constant dense<0.000000e+00> : vector<64x2xf32>
    %281 = tpu.matmul %280, %278, %cst_269 {dimension_numbers = #tpu.dot_dimension_numbers<[1], [0], [0], [1], [0, 0, 1, 1], [], []>} : vector<64x64xf32>, vector<64x2xf32>, vector<64x2xf32> -> vector<64x2xf32>
    %c1_270 = arith.constant 1 : index
    %c0_271 = arith.constant 0 : index
    %c0_272 = arith.constant 0 : index
    %282 = vector.load %arg11[%c1_270, %c0_271, %c0_272] : memref<4x8x2xf32, #tpu.memory_space<vmem>>, vector<1x8x2xf32>
    %283 = vector.shape_cast %282 : vector<1x8x2xf32> to vector<8x2xf32>
    %cst_273 = arith.constant dense<0.000000e+00> : vector<64x2xf32>
    %284 = tpu.matmul %275, %283, %cst_273 {dimension_numbers = #tpu.dot_dimension_numbers<[1], [0], [0], [1], [0, 0, 1, 1], [], []>} : vector<64x8xf32>, vector<8x2xf32>, vector<64x2xf32> -> vector<64x2xf32>
    %c1_274 = arith.constant 1 : index
    %c0_275 = arith.constant 0 : index
    %c0_276 = arith.constant 0 : index
    %285 = vector.load %arg10[%c1_274, %c0_275, %c0_276] : memref<4x64x64xf32, #tpu.memory_space<vmem>>, vector<1x64x64xf32>
    %286 = vector.shape_cast %285 : vector<1x64x64xf32> to vector<64x64xf32>
    %cst_277 = arith.constant dense<0.000000e+00> : vector<64x2xf32>
    %287 = tpu.matmul %286, %284, %cst_277 {dimension_numbers = #tpu.dot_dimension_numbers<[1], [0], [0], [1], [0, 0, 1, 1], [], []>} : vector<64x64xf32>, vector<64x2xf32>, vector<64x2xf32> -> vector<64x2xf32>
    %288 = arith.addf %281, %287 : vector<64x2xf32>
    %c2_278 = arith.constant 2 : index
    %c0_279 = arith.constant 0 : index
    %c0_280 = arith.constant 0 : index
    %289 = vector.load %arg11[%c2_278, %c0_279, %c0_280] : memref<4x8x2xf32, #tpu.memory_space<vmem>>, vector<1x8x2xf32>
    %290 = vector.shape_cast %289 : vector<1x8x2xf32> to vector<8x2xf32>
    %cst_281 = arith.constant dense<0.000000e+00> : vector<64x2xf32>
    %291 = tpu.matmul %275, %290, %cst_281 {dimension_numbers = #tpu.dot_dimension_numbers<[1], [0], [0], [1], [0, 0, 1, 1], [], []>} : vector<64x8xf32>, vector<8x2xf32>, vector<64x2xf32> -> vector<64x2xf32>
    %c2_282 = arith.constant 2 : index
    %c0_283 = arith.constant 0 : index
    %c0_284 = arith.constant 0 : index
    %292 = vector.load %arg10[%c2_282, %c0_283, %c0_284] : memref<4x64x64xf32, #tpu.memory_space<vmem>>, vector<1x64x64xf32>
    %293 = vector.shape_cast %292 : vector<1x64x64xf32> to vector<64x64xf32>
    %cst_285 = arith.constant dense<0.000000e+00> : vector<64x2xf32>
    %294 = tpu.matmul %293, %291, %cst_285 {dimension_numbers = #tpu.dot_dimension_numbers<[1], [0], [0], [1], [0, 0, 1, 1], [], []>} : vector<64x64xf32>, vector<64x2xf32>, vector<64x2xf32> -> vector<64x2xf32>
    %295 = arith.addf %288, %294 : vector<64x2xf32>
    %c3_286 = arith.constant 3 : index
    %c0_287 = arith.constant 0 : index
    %c0_288 = arith.constant 0 : index
    %296 = vector.load %arg11[%c3_286, %c0_287, %c0_288] : memref<4x8x2xf32, #tpu.memory_space<vmem>>, vector<1x8x2xf32>
    %297 = vector.shape_cast %296 : vector<1x8x2xf32> to vector<8x2xf32>
    %cst_289 = arith.constant dense<0.000000e+00> : vector<64x2xf32>
    %298 = tpu.matmul %275, %297, %cst_289 {dimension_numbers = #tpu.dot_dimension_numbers<[1], [0], [0], [1], [0, 0, 1, 1], [], []>} : vector<64x8xf32>, vector<8x2xf32>, vector<64x2xf32> -> vector<64x2xf32>
    %c3_290 = arith.constant 3 : index
    %c0_291 = arith.constant 0 : index
    %c0_292 = arith.constant 0 : index
    %299 = vector.load %arg10[%c3_290, %c0_291, %c0_292] : memref<4x64x64xf32, #tpu.memory_space<vmem>>, vector<1x64x64xf32>
    %300 = vector.shape_cast %299 : vector<1x64x64xf32> to vector<64x64xf32>
    %cst_293 = arith.constant dense<0.000000e+00> : vector<64x2xf32>
    %301 = tpu.matmul %300, %298, %cst_293 {dimension_numbers = #tpu.dot_dimension_numbers<[1], [0], [0], [1], [0, 0, 1, 1], [], []>} : vector<64x64xf32>, vector<64x2xf32>, vector<64x2xf32> -> vector<64x2xf32>
    %302 = arith.addf %295, %301 : vector<64x2xf32>
    %c0_294 = arith.constant 0 : index
    %c0_295 = arith.constant 0 : index
    %303 = vector.load %arg12[%c0_294, %c0_295] : memref<64x1xf32, #tpu.memory_space<vmem>>, vector<64x1xf32>
    %304 = vector.broadcast %303 : vector<64x1xf32> to vector<64x2xf32>
    %305 = arith.addf %302, %304 : vector<64x2xf32>
    %cst_296 = arith.constant 0.000000e+00 : f32
    %306 = vector.broadcast %cst_296 : f32 to vector<64x2xf32>
    %307 = arith.maximumf %305, %306 : vector<64x2xf32>
    %c0_297 = arith.constant 0 : index
    %c0_298 = arith.constant 0 : index
    %c0_299 = arith.constant 0 : index
    %308 = vector.load %arg14[%c0_297, %c0_298, %c0_299] : memref<4x2x8xf32, #tpu.memory_space<vmem>>, vector<1x2x8xf32>
    %309 = vector.shape_cast %308 : vector<1x2x8xf32> to vector<2x8xf32>
    %cst_300 = arith.constant dense<0.000000e+00> : vector<64x8xf32>
    %310 = tpu.matmul %307, %309, %cst_300 {dimension_numbers = #tpu.dot_dimension_numbers<[1], [0], [0], [1], [0, 0, 1, 1], [], []>} : vector<64x2xf32>, vector<2x8xf32>, vector<64x8xf32> -> vector<64x8xf32>
    %c0_301 = arith.constant 0 : index
    %c0_302 = arith.constant 0 : index
    %c0_303 = arith.constant 0 : index
    %311 = vector.load %arg13[%c0_301, %c0_302, %c0_303] : memref<4x64x64xf32, #tpu.memory_space<vmem>>, vector<1x64x64xf32>
    %312 = vector.shape_cast %311 : vector<1x64x64xf32> to vector<64x64xf32>
    %cst_304 = arith.constant dense<0.000000e+00> : vector<64x8xf32>
    %313 = tpu.matmul %312, %310, %cst_304 {dimension_numbers = #tpu.dot_dimension_numbers<[1], [0], [0], [1], [0, 0, 1, 1], [], []>} : vector<64x64xf32>, vector<64x8xf32>, vector<64x8xf32> -> vector<64x8xf32>
    %c1_305 = arith.constant 1 : index
    %c0_306 = arith.constant 0 : index
    %c0_307 = arith.constant 0 : index
    %314 = vector.load %arg14[%c1_305, %c0_306, %c0_307] : memref<4x2x8xf32, #tpu.memory_space<vmem>>, vector<1x2x8xf32>
    %315 = vector.shape_cast %314 : vector<1x2x8xf32> to vector<2x8xf32>
    %cst_308 = arith.constant dense<0.000000e+00> : vector<64x8xf32>
    %316 = tpu.matmul %307, %315, %cst_308 {dimension_numbers = #tpu.dot_dimension_numbers<[1], [0], [0], [1], [0, 0, 1, 1], [], []>} : vector<64x2xf32>, vector<2x8xf32>, vector<64x8xf32> -> vector<64x8xf32>
    %c1_309 = arith.constant 1 : index
    %c0_310 = arith.constant 0 : index
    %c0_311 = arith.constant 0 : index
    %317 = vector.load %arg13[%c1_309, %c0_310, %c0_311] : memref<4x64x64xf32, #tpu.memory_space<vmem>>, vector<1x64x64xf32>
    %318 = vector.shape_cast %317 : vector<1x64x64xf32> to vector<64x64xf32>
    %cst_312 = arith.constant dense<0.000000e+00> : vector<64x8xf32>
    %319 = tpu.matmul %318, %316, %cst_312 {dimension_numbers = #tpu.dot_dimension_numbers<[1], [0], [0], [1], [0, 0, 1, 1], [], []>} : vector<64x64xf32>, vector<64x8xf32>, vector<64x8xf32> -> vector<64x8xf32>
    %320 = arith.addf %313, %319 : vector<64x8xf32>
    %c2_313 = arith.constant 2 : index
    %c0_314 = arith.constant 0 : index
    %c0_315 = arith.constant 0 : index
    %321 = vector.load %arg14[%c2_313, %c0_314, %c0_315] : memref<4x2x8xf32, #tpu.memory_space<vmem>>, vector<1x2x8xf32>
    %322 = vector.shape_cast %321 : vector<1x2x8xf32> to vector<2x8xf32>
    %cst_316 = arith.constant dense<0.000000e+00> : vector<64x8xf32>
    %323 = tpu.matmul %307, %322, %cst_316 {dimension_numbers = #tpu.dot_dimension_numbers<[1], [0], [0], [1], [0, 0, 1, 1], [], []>} : vector<64x2xf32>, vector<2x8xf32>, vector<64x8xf32> -> vector<64x8xf32>
    %c2_317 = arith.constant 2 : index
    %c0_318 = arith.constant 0 : index
    %c0_319 = arith.constant 0 : index
    %324 = vector.load %arg13[%c2_317, %c0_318, %c0_319] : memref<4x64x64xf32, #tpu.memory_space<vmem>>, vector<1x64x64xf32>
    %325 = vector.shape_cast %324 : vector<1x64x64xf32> to vector<64x64xf32>
    %cst_320 = arith.constant dense<0.000000e+00> : vector<64x8xf32>
    %326 = tpu.matmul %325, %323, %cst_320 {dimension_numbers = #tpu.dot_dimension_numbers<[1], [0], [0], [1], [0, 0, 1, 1], [], []>} : vector<64x64xf32>, vector<64x8xf32>, vector<64x8xf32> -> vector<64x8xf32>
    %327 = arith.addf %320, %326 : vector<64x8xf32>
    %c3_321 = arith.constant 3 : index
    %c0_322 = arith.constant 0 : index
    %c0_323 = arith.constant 0 : index
    %328 = vector.load %arg14[%c3_321, %c0_322, %c0_323] : memref<4x2x8xf32, #tpu.memory_space<vmem>>, vector<1x2x8xf32>
    %329 = vector.shape_cast %328 : vector<1x2x8xf32> to vector<2x8xf32>
    %cst_324 = arith.constant dense<0.000000e+00> : vector<64x8xf32>
    %330 = tpu.matmul %307, %329, %cst_324 {dimension_numbers = #tpu.dot_dimension_numbers<[1], [0], [0], [1], [0, 0, 1, 1], [], []>} : vector<64x2xf32>, vector<2x8xf32>, vector<64x8xf32> -> vector<64x8xf32>
    %c3_325 = arith.constant 3 : index
    %c0_326 = arith.constant 0 : index
    %c0_327 = arith.constant 0 : index
    %331 = vector.load %arg13[%c3_325, %c0_326, %c0_327] : memref<4x64x64xf32, #tpu.memory_space<vmem>>, vector<1x64x64xf32>
    %332 = vector.shape_cast %331 : vector<1x64x64xf32> to vector<64x64xf32>
    %cst_328 = arith.constant dense<0.000000e+00> : vector<64x8xf32>
    %333 = tpu.matmul %332, %330, %cst_328 {dimension_numbers = #tpu.dot_dimension_numbers<[1], [0], [0], [1], [0, 0, 1, 1], [], []>} : vector<64x64xf32>, vector<64x8xf32>, vector<64x8xf32> -> vector<64x8xf32>
    %334 = arith.addf %327, %333 : vector<64x8xf32>
    %cst_329 = arith.constant dense<0.000000e+00> : vector<64xf32>
    %335 = vector.multi_reduction <add>, %334, %cst_329 [1] : vector<64x8xf32> to vector<64xf32>
    %336 = vector.shape_cast %335 : vector<64xf32> to vector<64x1xf32>
    %cst_330 = arith.constant 1.250000e-01 : f32
    %337 = vector.broadcast %cst_330 : f32 to vector<64x1xf32>
    %338 = arith.mulf %336, %337 : vector<64x1xf32>
    %339 = vector.broadcast %338 : vector<64x1xf32> to vector<64x8xf32>
    %340 = arith.subf %334, %339 : vector<64x8xf32>
    %341 = arith.mulf %340, %340 : vector<64x8xf32>
    %cst_331 = arith.constant dense<0.000000e+00> : vector<64xf32>
    %342 = vector.multi_reduction <add>, %341, %cst_331 [1] : vector<64x8xf32> to vector<64xf32>
    %343 = vector.shape_cast %342 : vector<64xf32> to vector<64x1xf32>
    %cst_332 = arith.constant 1.250000e-01 : f32
    %344 = vector.broadcast %cst_332 : f32 to vector<64x1xf32>
    %345 = arith.mulf %343, %344 : vector<64x1xf32>
    %cst_333 = arith.constant 9.99999974E-6 : f32
    %346 = vector.broadcast %cst_333 : f32 to vector<64x1xf32>
    %347 = arith.addf %345, %346 : vector<64x1xf32>
    %348 = math.rsqrt %347 : vector<64x1xf32>
    %349 = vector.broadcast %348 : vector<64x1xf32> to vector<64x8xf32>
    %350 = arith.mulf %340, %349 : vector<64x8xf32>
    %c0_334 = arith.constant 0 : index
    %c0_335 = arith.constant 0 : index
    %351 = vector.load %arg15[%c0_334, %c0_335] : memref<64x1xf32, #tpu.memory_space<vmem>>, vector<64x1xf32>
    %352 = vector.broadcast %351 : vector<64x1xf32> to vector<64x8xf32>
    %353 = arith.mulf %350, %352 : vector<64x8xf32>
    %c0_336 = arith.constant 0 : index
    %c0_337 = arith.constant 0 : index
    %354 = vector.load %arg16[%c0_336, %c0_337] : memref<64x1xf32, #tpu.memory_space<vmem>>, vector<64x1xf32>
    %355 = vector.broadcast %354 : vector<64x1xf32> to vector<64x8xf32>
    %356 = arith.addf %353, %355 : vector<64x8xf32>
    %357 = tpu.concatenate %356, %272 in 0 : vector<64x8xf32>, vector<64x8xf32> -> vector<128x8xf32>
    %cst_338 = arith.constant 0.000000e+00 : f32
    %358 = vector.broadcast %cst_338 : f32 to vector<128x8xf32>
    %359 = arith.maximumf %357, %358 : vector<128x8xf32>
    %c0_339 = arith.constant 0 : index
    %c0_340 = arith.constant 0 : index
    %c0_341 = arith.constant 0 : index
    %360 = vector.load %arg18[%c0_339, %c0_340, %c0_341] : memref<16x8x32xf32, #tpu.memory_space<vmem>>, vector<1x8x32xf32>
    %361 = vector.shape_cast %360 : vector<1x8x32xf32> to vector<8x32xf32>
    %cst_342 = arith.constant dense<0.000000e+00> : vector<128x32xf32>
    %362 = tpu.matmul %359, %361, %cst_342 {dimension_numbers = #tpu.dot_dimension_numbers<[1], [0], [0], [1], [0, 0, 1, 1], [], []>} : vector<128x8xf32>, vector<8x32xf32>, vector<128x32xf32> -> vector<128x32xf32>
    %c0_343 = arith.constant 0 : index
    %c0_344 = arith.constant 0 : index
    %c0_345 = arith.constant 0 : index
    %363 = vector.load %arg17[%c0_343, %c0_344, %c0_345] : memref<16x32x128xf32, #tpu.memory_space<vmem>>, vector<1x32x128xf32>
    %364 = vector.shape_cast %363 : vector<1x32x128xf32> to vector<32x128xf32>
    %cst_346 = arith.constant dense<0.000000e+00> : vector<32x32xf32>
    %365 = tpu.matmul %364, %362, %cst_346 {dimension_numbers = #tpu.dot_dimension_numbers<[1], [0], [0], [1], [0, 0, 1, 1], [], []>} : vector<32x128xf32>, vector<128x32xf32>, vector<32x32xf32> -> vector<32x32xf32>
    %c1_347 = arith.constant 1 : index
    %c0_348 = arith.constant 0 : index
    %c0_349 = arith.constant 0 : index
    %366 = vector.load %arg18[%c1_347, %c0_348, %c0_349] : memref<16x8x32xf32, #tpu.memory_space<vmem>>, vector<1x8x32xf32>
    %367 = vector.shape_cast %366 : vector<1x8x32xf32> to vector<8x32xf32>
    %cst_350 = arith.constant dense<0.000000e+00> : vector<128x32xf32>
    %368 = tpu.matmul %359, %367, %cst_350 {dimension_numbers = #tpu.dot_dimension_numbers<[1], [0], [0], [1], [0, 0, 1, 1], [], []>} : vector<128x8xf32>, vector<8x32xf32>, vector<128x32xf32> -> vector<128x32xf32>
    %c1_351 = arith.constant 1 : index
    %c0_352 = arith.constant 0 : index
    %c0_353 = arith.constant 0 : index
    %369 = vector.load %arg17[%c1_351, %c0_352, %c0_353] : memref<16x32x128xf32, #tpu.memory_space<vmem>>, vector<1x32x128xf32>
    %370 = vector.shape_cast %369 : vector<1x32x128xf32> to vector<32x128xf32>
    %cst_354 = arith.constant dense<0.000000e+00> : vector<32x32xf32>
    %371 = tpu.matmul %370, %368, %cst_354 {dimension_numbers = #tpu.dot_dimension_numbers<[1], [0], [0], [1], [0, 0, 1, 1], [], []>} : vector<32x128xf32>, vector<128x32xf32>, vector<32x32xf32> -> vector<32x32xf32>
    %372 = arith.addf %365, %371 : vector<32x32xf32>
    %c2_355 = arith.constant 2 : index
    %c0_356 = arith.constant 0 : index
    %c0_357 = arith.constant 0 : index
    %373 = vector.load %arg18[%c2_355, %c0_356, %c0_357] : memref<16x8x32xf32, #tpu.memory_space<vmem>>, vector<1x8x32xf32>
    %374 = vector.shape_cast %373 : vector<1x8x32xf32> to vector<8x32xf32>
    %cst_358 = arith.constant dense<0.000000e+00> : vector<128x32xf32>
    %375 = tpu.matmul %359, %374, %cst_358 {dimension_numbers = #tpu.dot_dimension_numbers<[1], [0], [0], [1], [0, 0, 1, 1], [], []>} : vector<128x8xf32>, vector<8x32xf32>, vector<128x32xf32> -> vector<128x32xf32>
    %c2_359 = arith.constant 2 : index
    %c0_360 = arith.constant 0 : index
    %c0_361 = arith.constant 0 : index
    %376 = vector.load %arg17[%c2_359, %c0_360, %c0_361] : memref<16x32x128xf32, #tpu.memory_space<vmem>>, vector<1x32x128xf32>
    %377 = vector.shape_cast %376 : vector<1x32x128xf32> to vector<32x128xf32>
    %cst_362 = arith.constant dense<0.000000e+00> : vector<32x32xf32>
    %378 = tpu.matmul %377, %375, %cst_362 {dimension_numbers = #tpu.dot_dimension_numbers<[1], [0], [0], [1], [0, 0, 1, 1], [], []>} : vector<32x128xf32>, vector<128x32xf32>, vector<32x32xf32> -> vector<32x32xf32>
    %379 = arith.addf %372, %378 : vector<32x32xf32>
    %c3_363 = arith.constant 3 : index
    %c0_364 = arith.constant 0 : index
    %c0_365 = arith.constant 0 : index
    %380 = vector.load %arg18[%c3_363, %c0_364, %c0_365] : memref<16x8x32xf32, #tpu.memory_space<vmem>>, vector<1x8x32xf32>
    %381 = vector.shape_cast %380 : vector<1x8x32xf32> to vector<8x32xf32>
    %cst_366 = arith.constant dense<0.000000e+00> : vector<128x32xf32>
    %382 = tpu.matmul %359, %381, %cst_366 {dimension_numbers = #tpu.dot_dimension_numbers<[1], [0], [0], [1], [0, 0, 1, 1], [], []>} : vector<128x8xf32>, vector<8x32xf32>, vector<128x32xf32> -> vector<128x32xf32>
    %c3_367 = arith.constant 3 : index
    %c0_368 = arith.constant 0 : index
    %c0_369 = arith.constant 0 : index
    %383 = vector.load %arg17[%c3_367, %c0_368, %c0_369] : memref<16x32x128xf32, #tpu.memory_space<vmem>>, vector<1x32x128xf32>
    %384 = vector.shape_cast %383 : vector<1x32x128xf32> to vector<32x128xf32>
    %cst_370 = arith.constant dense<0.000000e+00> : vector<32x32xf32>
    %385 = tpu.matmul %384, %382, %cst_370 {dimension_numbers = #tpu.dot_dimension_numbers<[1], [0], [0], [1], [0, 0, 1, 1], [], []>} : vector<32x128xf32>, vector<128x32xf32>, vector<32x32xf32> -> vector<32x32xf32>
    %386 = arith.addf %379, %385 : vector<32x32xf32>
    %c4_371 = arith.constant 4 : index
    %c0_372 = arith.constant 0 : index
    %c0_373 = arith.constant 0 : index
    %387 = vector.load %arg18[%c4_371, %c0_372, %c0_373] : memref<16x8x32xf32, #tpu.memory_space<vmem>>, vector<1x8x32xf32>
    %388 = vector.shape_cast %387 : vector<1x8x32xf32> to vector<8x32xf32>
    %cst_374 = arith.constant dense<0.000000e+00> : vector<128x32xf32>
    %389 = tpu.matmul %359, %388, %cst_374 {dimension_numbers = #tpu.dot_dimension_numbers<[1], [0], [0], [1], [0, 0, 1, 1], [], []>} : vector<128x8xf32>, vector<8x32xf32>, vector<128x32xf32> -> vector<128x32xf32>
    %c4_375 = arith.constant 4 : index
    %c0_376 = arith.constant 0 : index
    %c0_377 = arith.constant 0 : index
    %390 = vector.load %arg17[%c4_375, %c0_376, %c0_377] : memref<16x32x128xf32, #tpu.memory_space<vmem>>, vector<1x32x128xf32>
    %391 = vector.shape_cast %390 : vector<1x32x128xf32> to vector<32x128xf32>
    %cst_378 = arith.constant dense<0.000000e+00> : vector<32x32xf32>
    %392 = tpu.matmul %391, %389, %cst_378 {dimension_numbers = #tpu.dot_dimension_numbers<[1], [0], [0], [1], [0, 0, 1, 1], [], []>} : vector<32x128xf32>, vector<128x32xf32>, vector<32x32xf32> -> vector<32x32xf32>
    %393 = arith.addf %386, %392 : vector<32x32xf32>
    %c5_379 = arith.constant 5 : index
    %c0_380 = arith.constant 0 : index
    %c0_381 = arith.constant 0 : index
    %394 = vector.load %arg18[%c5_379, %c0_380, %c0_381] : memref<16x8x32xf32, #tpu.memory_space<vmem>>, vector<1x8x32xf32>
    %395 = vector.shape_cast %394 : vector<1x8x32xf32> to vector<8x32xf32>
    %cst_382 = arith.constant dense<0.000000e+00> : vector<128x32xf32>
    %396 = tpu.matmul %359, %395, %cst_382 {dimension_numbers = #tpu.dot_dimension_numbers<[1], [0], [0], [1], [0, 0, 1, 1], [], []>} : vector<128x8xf32>, vector<8x32xf32>, vector<128x32xf32> -> vector<128x32xf32>
    %c5_383 = arith.constant 5 : index
    %c0_384 = arith.constant 0 : index
    %c0_385 = arith.constant 0 : index
    %397 = vector.load %arg17[%c5_383, %c0_384, %c0_385] : memref<16x32x128xf32, #tpu.memory_space<vmem>>, vector<1x32x128xf32>
    %398 = vector.shape_cast %397 : vector<1x32x128xf32> to vector<32x128xf32>
    %cst_386 = arith.constant dense<0.000000e+00> : vector<32x32xf32>
    %399 = tpu.matmul %398, %396, %cst_386 {dimension_numbers = #tpu.dot_dimension_numbers<[1], [0], [0], [1], [0, 0, 1, 1], [], []>} : vector<32x128xf32>, vector<128x32xf32>, vector<32x32xf32> -> vector<32x32xf32>
    %400 = arith.addf %393, %399 : vector<32x32xf32>
    %c6_387 = arith.constant 6 : index
    %c0_388 = arith.constant 0 : index
    %c0_389 = arith.constant 0 : index
    %401 = vector.load %arg18[%c6_387, %c0_388, %c0_389] : memref<16x8x32xf32, #tpu.memory_space<vmem>>, vector<1x8x32xf32>
    %402 = vector.shape_cast %401 : vector<1x8x32xf32> to vector<8x32xf32>
    %cst_390 = arith.constant dense<0.000000e+00> : vector<128x32xf32>
    %403 = tpu.matmul %359, %402, %cst_390 {dimension_numbers = #tpu.dot_dimension_numbers<[1], [0], [0], [1], [0, 0, 1, 1], [], []>} : vector<128x8xf32>, vector<8x32xf32>, vector<128x32xf32> -> vector<128x32xf32>
    %c6_391 = arith.constant 6 : index
    %c0_392 = arith.constant 0 : index
    %c0_393 = arith.constant 0 : index
    %404 = vector.load %arg17[%c6_391, %c0_392, %c0_393] : memref<16x32x128xf32, #tpu.memory_space<vmem>>, vector<1x32x128xf32>
    %405 = vector.shape_cast %404 : vector<1x32x128xf32> to vector<32x128xf32>
    %cst_394 = arith.constant dense<0.000000e+00> : vector<32x32xf32>
    %406 = tpu.matmul %405, %403, %cst_394 {dimension_numbers = #tpu.dot_dimension_numbers<[1], [0], [0], [1], [0, 0, 1, 1], [], []>} : vector<32x128xf32>, vector<128x32xf32>, vector<32x32xf32> -> vector<32x32xf32>
    %407 = arith.addf %400, %406 : vector<32x32xf32>
    %c7_395 = arith.constant 7 : index
    %c0_396 = arith.constant 0 : index
    %c0_397 = arith.constant 0 : index
    %408 = vector.load %arg18[%c7_395, %c0_396, %c0_397] : memref<16x8x32xf32, #tpu.memory_space<vmem>>, vector<1x8x32xf32>
    %409 = vector.shape_cast %408 : vector<1x8x32xf32> to vector<8x32xf32>
    %cst_398 = arith.constant dense<0.000000e+00> : vector<128x32xf32>
    %410 = tpu.matmul %359, %409, %cst_398 {dimension_numbers = #tpu.dot_dimension_numbers<[1], [0], [0], [1], [0, 0, 1, 1], [], []>} : vector<128x8xf32>, vector<8x32xf32>, vector<128x32xf32> -> vector<128x32xf32>
    %c7_399 = arith.constant 7 : index
    %c0_400 = arith.constant 0 : index
    %c0_401 = arith.constant 0 : index
    %411 = vector.load %arg17[%c7_399, %c0_400, %c0_401] : memref<16x32x128xf32, #tpu.memory_space<vmem>>, vector<1x32x128xf32>
    %412 = vector.shape_cast %411 : vector<1x32x128xf32> to vector<32x128xf32>
    %cst_402 = arith.constant dense<0.000000e+00> : vector<32x32xf32>
    %413 = tpu.matmul %412, %410, %cst_402 {dimension_numbers = #tpu.dot_dimension_numbers<[1], [0], [0], [1], [0, 0, 1, 1], [], []>} : vector<32x128xf32>, vector<128x32xf32>, vector<32x32xf32> -> vector<32x32xf32>
    %414 = arith.addf %407, %413 : vector<32x32xf32>
    %c8_403 = arith.constant 8 : index
    %c0_404 = arith.constant 0 : index
    %c0_405 = arith.constant 0 : index
    %415 = vector.load %arg18[%c8_403, %c0_404, %c0_405] : memref<16x8x32xf32, #tpu.memory_space<vmem>>, vector<1x8x32xf32>
    %416 = vector.shape_cast %415 : vector<1x8x32xf32> to vector<8x32xf32>
    %cst_406 = arith.constant dense<0.000000e+00> : vector<128x32xf32>
    %417 = tpu.matmul %359, %416, %cst_406 {dimension_numbers = #tpu.dot_dimension_numbers<[1], [0], [0], [1], [0, 0, 1, 1], [], []>} : vector<128x8xf32>, vector<8x32xf32>, vector<128x32xf32> -> vector<128x32xf32>
    %c8_407 = arith.constant 8 : index
    %c0_408 = arith.constant 0 : index
    %c0_409 = arith.constant 0 : index
    %418 = vector.load %arg17[%c8_407, %c0_408, %c0_409] : memref<16x32x128xf32, #tpu.memory_space<vmem>>, vector<1x32x128xf32>
    %419 = vector.shape_cast %418 : vector<1x32x128xf32> to vector<32x128xf32>
    %cst_410 = arith.constant dense<0.000000e+00> : vector<32x32xf32>
    %420 = tpu.matmul %419, %417, %cst_410 {dimension_numbers = #tpu.dot_dimension_numbers<[1], [0], [0], [1], [0, 0, 1, 1], [], []>} : vector<32x128xf32>, vector<128x32xf32>, vector<32x32xf32> -> vector<32x32xf32>
    %421 = arith.addf %414, %420 : vector<32x32xf32>
    %c9_411 = arith.constant 9 : index
    %c0_412 = arith.constant 0 : index
    %c0_413 = arith.constant 0 : index
    %422 = vector.load %arg18[%c9_411, %c0_412, %c0_413] : memref<16x8x32xf32, #tpu.memory_space<vmem>>, vector<1x8x32xf32>
    %423 = vector.shape_cast %422 : vector<1x8x32xf32> to vector<8x32xf32>
    %cst_414 = arith.constant dense<0.000000e+00> : vector<128x32xf32>
    %424 = tpu.matmul %359, %423, %cst_414 {dimension_numbers = #tpu.dot_dimension_numbers<[1], [0], [0], [1], [0, 0, 1, 1], [], []>} : vector<128x8xf32>, vector<8x32xf32>, vector<128x32xf32> -> vector<128x32xf32>
    %c9_415 = arith.constant 9 : index
    %c0_416 = arith.constant 0 : index
    %c0_417 = arith.constant 0 : index
    %425 = vector.load %arg17[%c9_415, %c0_416, %c0_417] : memref<16x32x128xf32, #tpu.memory_space<vmem>>, vector<1x32x128xf32>
    %426 = vector.shape_cast %425 : vector<1x32x128xf32> to vector<32x128xf32>
    %cst_418 = arith.constant dense<0.000000e+00> : vector<32x32xf32>
    %427 = tpu.matmul %426, %424, %cst_418 {dimension_numbers = #tpu.dot_dimension_numbers<[1], [0], [0], [1], [0, 0, 1, 1], [], []>} : vector<32x128xf32>, vector<128x32xf32>, vector<32x32xf32> -> vector<32x32xf32>
    %428 = arith.addf %421, %427 : vector<32x32xf32>
    %c10_419 = arith.constant 10 : index
    %c0_420 = arith.constant 0 : index
    %c0_421 = arith.constant 0 : index
    %429 = vector.load %arg18[%c10_419, %c0_420, %c0_421] : memref<16x8x32xf32, #tpu.memory_space<vmem>>, vector<1x8x32xf32>
    %430 = vector.shape_cast %429 : vector<1x8x32xf32> to vector<8x32xf32>
    %cst_422 = arith.constant dense<0.000000e+00> : vector<128x32xf32>
    %431 = tpu.matmul %359, %430, %cst_422 {dimension_numbers = #tpu.dot_dimension_numbers<[1], [0], [0], [1], [0, 0, 1, 1], [], []>} : vector<128x8xf32>, vector<8x32xf32>, vector<128x32xf32> -> vector<128x32xf32>
    %c10_423 = arith.constant 10 : index
    %c0_424 = arith.constant 0 : index
    %c0_425 = arith.constant 0 : index
    %432 = vector.load %arg17[%c10_423, %c0_424, %c0_425] : memref<16x32x128xf32, #tpu.memory_space<vmem>>, vector<1x32x128xf32>
    %433 = vector.shape_cast %432 : vector<1x32x128xf32> to vector<32x128xf32>
    %cst_426 = arith.constant dense<0.000000e+00> : vector<32x32xf32>
    %434 = tpu.matmul %433, %431, %cst_426 {dimension_numbers = #tpu.dot_dimension_numbers<[1], [0], [0], [1], [0, 0, 1, 1], [], []>} : vector<32x128xf32>, vector<128x32xf32>, vector<32x32xf32> -> vector<32x32xf32>
    %435 = arith.addf %428, %434 : vector<32x32xf32>
    %c11_427 = arith.constant 11 : index
    %c0_428 = arith.constant 0 : index
    %c0_429 = arith.constant 0 : index
    %436 = vector.load %arg18[%c11_427, %c0_428, %c0_429] : memref<16x8x32xf32, #tpu.memory_space<vmem>>, vector<1x8x32xf32>
    %437 = vector.shape_cast %436 : vector<1x8x32xf32> to vector<8x32xf32>
    %cst_430 = arith.constant dense<0.000000e+00> : vector<128x32xf32>
    %438 = tpu.matmul %359, %437, %cst_430 {dimension_numbers = #tpu.dot_dimension_numbers<[1], [0], [0], [1], [0, 0, 1, 1], [], []>} : vector<128x8xf32>, vector<8x32xf32>, vector<128x32xf32> -> vector<128x32xf32>
    %c11_431 = arith.constant 11 : index
    %c0_432 = arith.constant 0 : index
    %c0_433 = arith.constant 0 : index
    %439 = vector.load %arg17[%c11_431, %c0_432, %c0_433] : memref<16x32x128xf32, #tpu.memory_space<vmem>>, vector<1x32x128xf32>
    %440 = vector.shape_cast %439 : vector<1x32x128xf32> to vector<32x128xf32>
    %cst_434 = arith.constant dense<0.000000e+00> : vector<32x32xf32>
    %441 = tpu.matmul %440, %438, %cst_434 {dimension_numbers = #tpu.dot_dimension_numbers<[1], [0], [0], [1], [0, 0, 1, 1], [], []>} : vector<32x128xf32>, vector<128x32xf32>, vector<32x32xf32> -> vector<32x32xf32>
    %442 = arith.addf %435, %441 : vector<32x32xf32>
    %c12_435 = arith.constant 12 : index
    %c0_436 = arith.constant 0 : index
    %c0_437 = arith.constant 0 : index
    %443 = vector.load %arg18[%c12_435, %c0_436, %c0_437] : memref<16x8x32xf32, #tpu.memory_space<vmem>>, vector<1x8x32xf32>
    %444 = vector.shape_cast %443 : vector<1x8x32xf32> to vector<8x32xf32>
    %cst_438 = arith.constant dense<0.000000e+00> : vector<128x32xf32>
    %445 = tpu.matmul %359, %444, %cst_438 {dimension_numbers = #tpu.dot_dimension_numbers<[1], [0], [0], [1], [0, 0, 1, 1], [], []>} : vector<128x8xf32>, vector<8x32xf32>, vector<128x32xf32> -> vector<128x32xf32>
    %c12_439 = arith.constant 12 : index
    %c0_440 = arith.constant 0 : index
    %c0_441 = arith.constant 0 : index
    %446 = vector.load %arg17[%c12_439, %c0_440, %c0_441] : memref<16x32x128xf32, #tpu.memory_space<vmem>>, vector<1x32x128xf32>
    %447 = vector.shape_cast %446 : vector<1x32x128xf32> to vector<32x128xf32>
    %cst_442 = arith.constant dense<0.000000e+00> : vector<32x32xf32>
    %448 = tpu.matmul %447, %445, %cst_442 {dimension_numbers = #tpu.dot_dimension_numbers<[1], [0], [0], [1], [0, 0, 1, 1], [], []>} : vector<32x128xf32>, vector<128x32xf32>, vector<32x32xf32> -> vector<32x32xf32>
    %449 = arith.addf %442, %448 : vector<32x32xf32>
    %c13_443 = arith.constant 13 : index
    %c0_444 = arith.constant 0 : index
    %c0_445 = arith.constant 0 : index
    %450 = vector.load %arg18[%c13_443, %c0_444, %c0_445] : memref<16x8x32xf32, #tpu.memory_space<vmem>>, vector<1x8x32xf32>
    %451 = vector.shape_cast %450 : vector<1x8x32xf32> to vector<8x32xf32>
    %cst_446 = arith.constant dense<0.000000e+00> : vector<128x32xf32>
    %452 = tpu.matmul %359, %451, %cst_446 {dimension_numbers = #tpu.dot_dimension_numbers<[1], [0], [0], [1], [0, 0, 1, 1], [], []>} : vector<128x8xf32>, vector<8x32xf32>, vector<128x32xf32> -> vector<128x32xf32>
    %c13_447 = arith.constant 13 : index
    %c0_448 = arith.constant 0 : index
    %c0_449 = arith.constant 0 : index
    %453 = vector.load %arg17[%c13_447, %c0_448, %c0_449] : memref<16x32x128xf32, #tpu.memory_space<vmem>>, vector<1x32x128xf32>
    %454 = vector.shape_cast %453 : vector<1x32x128xf32> to vector<32x128xf32>
    %cst_450 = arith.constant dense<0.000000e+00> : vector<32x32xf32>
    %455 = tpu.matmul %454, %452, %cst_450 {dimension_numbers = #tpu.dot_dimension_numbers<[1], [0], [0], [1], [0, 0, 1, 1], [], []>} : vector<32x128xf32>, vector<128x32xf32>, vector<32x32xf32> -> vector<32x32xf32>
    %456 = arith.addf %449, %455 : vector<32x32xf32>
    %c14_451 = arith.constant 14 : index
    %c0_452 = arith.constant 0 : index
    %c0_453 = arith.constant 0 : index
    %457 = vector.load %arg18[%c14_451, %c0_452, %c0_453] : memref<16x8x32xf32, #tpu.memory_space<vmem>>, vector<1x8x32xf32>
    %458 = vector.shape_cast %457 : vector<1x8x32xf32> to vector<8x32xf32>
    %cst_454 = arith.constant dense<0.000000e+00> : vector<128x32xf32>
    %459 = tpu.matmul %359, %458, %cst_454 {dimension_numbers = #tpu.dot_dimension_numbers<[1], [0], [0], [1], [0, 0, 1, 1], [], []>} : vector<128x8xf32>, vector<8x32xf32>, vector<128x32xf32> -> vector<128x32xf32>
    %c14_455 = arith.constant 14 : index
    %c0_456 = arith.constant 0 : index
    %c0_457 = arith.constant 0 : index
    %460 = vector.load %arg17[%c14_455, %c0_456, %c0_457] : memref<16x32x128xf32, #tpu.memory_space<vmem>>, vector<1x32x128xf32>
    %461 = vector.shape_cast %460 : vector<1x32x128xf32> to vector<32x128xf32>
    %cst_458 = arith.constant dense<0.000000e+00> : vector<32x32xf32>
    %462 = tpu.matmul %461, %459, %cst_458 {dimension_numbers = #tpu.dot_dimension_numbers<[1], [0], [0], [1], [0, 0, 1, 1], [], []>} : vector<32x128xf32>, vector<128x32xf32>, vector<32x32xf32> -> vector<32x32xf32>
    %463 = arith.addf %456, %462 : vector<32x32xf32>
    %c15_459 = arith.constant 15 : index
    %c0_460 = arith.constant 0 : index
    %c0_461 = arith.constant 0 : index
    %464 = vector.load %arg18[%c15_459, %c0_460, %c0_461] : memref<16x8x32xf32, #tpu.memory_space<vmem>>, vector<1x8x32xf32>
    %465 = vector.shape_cast %464 : vector<1x8x32xf32> to vector<8x32xf32>
    %cst_462 = arith.constant dense<0.000000e+00> : vector<128x32xf32>
    %466 = tpu.matmul %359, %465, %cst_462 {dimension_numbers = #tpu.dot_dimension_numbers<[1], [0], [0], [1], [0, 0, 1, 1], [], []>} : vector<128x8xf32>, vector<8x32xf32>, vector<128x32xf32> -> vector<128x32xf32>
    %c15_463 = arith.constant 15 : index
    %c0_464 = arith.constant 0 : index
    %c0_465 = arith.constant 0 : index
    %467 = vector.load %arg17[%c15_463, %c0_464, %c0_465] : memref<16x32x128xf32, #tpu.memory_space<vmem>>, vector<1x32x128xf32>
    %468 = vector.shape_cast %467 : vector<1x32x128xf32> to vector<32x128xf32>
    %cst_466 = arith.constant dense<0.000000e+00> : vector<32x32xf32>
    %469 = tpu.matmul %468, %466, %cst_466 {dimension_numbers = #tpu.dot_dimension_numbers<[1], [0], [0], [1], [0, 0, 1, 1], [], []>} : vector<32x128xf32>, vector<128x32xf32>, vector<32x32xf32> -> vector<32x32xf32>
    %470 = arith.addf %463, %469 : vector<32x32xf32>
    %cst_467 = arith.constant dense<0.000000e+00> : vector<32xf32>
    %471 = vector.multi_reduction <add>, %470, %cst_467 [1] : vector<32x32xf32> to vector<32xf32>
    %472 = vector.shape_cast %471 : vector<32xf32> to vector<32x1xf32>
    %cst_468 = arith.constant 3.125000e-02 : f32
    %473 = vector.broadcast %cst_468 : f32 to vector<32x1xf32>
    %474 = arith.mulf %472, %473 : vector<32x1xf32>
    %475 = vector.broadcast %474 : vector<32x1xf32> to vector<32x32xf32>
    %476 = arith.subf %470, %475 : vector<32x32xf32>
    %477 = arith.mulf %476, %476 : vector<32x32xf32>
    %cst_469 = arith.constant dense<0.000000e+00> : vector<32xf32>
    %478 = vector.multi_reduction <add>, %477, %cst_469 [1] : vector<32x32xf32> to vector<32xf32>
    %479 = vector.shape_cast %478 : vector<32xf32> to vector<32x1xf32>
    %cst_470 = arith.constant 3.125000e-02 : f32
    %480 = vector.broadcast %cst_470 : f32 to vector<32x1xf32>
    %481 = arith.mulf %479, %480 : vector<32x1xf32>
    %cst_471 = arith.constant 9.99999974E-6 : f32
    %482 = vector.broadcast %cst_471 : f32 to vector<32x1xf32>
    %483 = arith.addf %481, %482 : vector<32x1xf32>
    %484 = math.rsqrt %483 : vector<32x1xf32>
    %485 = vector.broadcast %484 : vector<32x1xf32> to vector<32x32xf32>
    %486 = arith.mulf %476, %485 : vector<32x32xf32>
    %c0_472 = arith.constant 0 : index
    %c0_473 = arith.constant 0 : index
    %487 = vector.load %arg19[%c0_472, %c0_473] : memref<32x1xf32, #tpu.memory_space<vmem>>, vector<32x1xf32>
    %488 = vector.broadcast %487 : vector<32x1xf32> to vector<32x32xf32>
    %489 = arith.mulf %486, %488 : vector<32x32xf32>
    %c0_474 = arith.constant 0 : index
    %c0_475 = arith.constant 0 : index
    %490 = vector.load %arg20[%c0_474, %c0_475] : memref<32x1xf32, #tpu.memory_space<vmem>>, vector<32x1xf32>
    %491 = vector.broadcast %490 : vector<32x1xf32> to vector<32x32xf32>
    %492 = arith.addf %489, %491 : vector<32x32xf32>
    %493 = tpu.concatenate %492, %136 in 0 : vector<32x32xf32>, vector<32x32xf32> -> vector<64x32xf32>
    %c0_476 = arith.constant 0 : index
    %c0_477 = arith.constant 0 : index
    %494 = vector.load %arg21[%c0_476, %c0_477] : memref<64x32xf32, #tpu.memory_space<vmem>>, vector<64x32xf32>
    tpu.vector_store %arg21[%c0_476, %c0_477], %493 {strides = array<i32>} : memref<64x32xf32, #tpu.memory_space<vmem>>, vector<64x32xf32>,
    return
  }
  func.func @transform_0(%arg0: i32) -> (i32, i32) {
    %c0_i32 = arith.constant 0 : i32
    %c0_i32_0 = arith.constant 0 : i32
    %c0_i32_1 = arith.constant 0 : i32
    return %c0_i32, %c0_i32_0 : i32, i32
  }
  func.func @transform_1(%arg0: i32) -> (i32, i32, i32) {
    %c0_i32 = arith.constant 0 : i32
    %c0_i32_0 = arith.constant 0 : i32
    %c0_i32_1 = arith.constant 0 : i32
    %c0_i32_2 = arith.constant 0 : i32
    return %c0_i32, %c0_i32_0, %c0_i32_1 : i32, i32, i32
  }
  func.func @transform_2(%arg0: i32) -> (i32, i32, i32) {
    %c0_i32 = arith.constant 0 : i32
    %c0_i32_0 = arith.constant 0 : i32
    %c0_i32_1 = arith.constant 0 : i32
    %c0_i32_2 = arith.constant 0 : i32
    return %c0_i32, %c0_i32_0, %c0_i32_1 : i32, i32, i32
  }
  func.func @transform_3(%arg0: i32) -> (i32, i32) {
    %c0_i32 = arith.constant 0 : i32
    %c0_i32_0 = arith.constant 0 : i32
    %c0_i32_1 = arith.constant 0 : i32
    return %c0_i32, %c0_i32_0 : i32, i32
  }
  func.func @transform_4(%arg0: i32) -> (i32, i32) {
    %c0_i32 = arith.constant 0 : i32
    %c0_i32_0 = arith.constant 0 : i32
    %c0_i32_1 = arith.constant 0 : i32
    return %c0_i32, %c0_i32_0 : i32, i32
  }
  func.func @transform_5(%arg0: i32) -> (i32, i32, i32) {
    %c0_i32 = arith.constant 0 : i32
    %c0_i32_0 = arith.constant 0 : i32
    %c0_i32_1 = arith.constant 0 : i32
    %c0_i32_2 = arith.constant 0 : i32
    return %c0_i32, %c0_i32_0, %c0_i32_1 : i32, i32, i32
  }
  func.func @transform_6(%arg0: i32) -> (i32, i32, i32) {
    %c0_i32 = arith.constant 0 : i32
    %c0_i32_0 = arith.constant 0 : i32
    %c0_i32_1 = arith.constant 0 : i32
    %c0_i32_2 = arith.constant 0 : i32
    return %c0_i32, %c0_i32_0, %c0_i32_1 : i32, i32, i32
  }
  func.func @transform_7(%arg0: i32) -> (i32, i32) {
    %c0_i32 = arith.constant 0 : i32
    %c0_i32_0 = arith.constant 0 : i32
    %c0_i32_1 = arith.constant 0 : i32
    return %c0_i32, %c0_i32_0 : i32, i32
  }
  func.func @transform_8(%arg0: i32) -> (i32, i32) {
    %c0_i32 = arith.constant 0 : i32
    %c0_i32_0 = arith.constant 0 : i32
    %c0_i32_1 = arith.constant 0 : i32
    return %c0_i32, %c0_i32_0 : i32, i32
  }
  func.func @transform_9(%arg0: i32) -> (i32, i32, i32) {
    %c0_i32 = arith.constant 0 : i32
    %c0_i32_0 = arith.constant 0 : i32
    %c0_i32_1 = arith.constant 0 : i32
    %c0_i32_2 = arith.constant 0 : i32
    return %c0_i32, %c0_i32_0, %c0_i32_1 : i32, i32, i32
  }
  func.func @transform_10(%arg0: i32) -> (i32, i32, i32) {
    %c0_i32 = arith.constant 0 : i32
    %c0_i32_0 = arith.constant 0 : i32
    %c0_i32_1 = arith.constant 0 : i32
    %c0_i32_2 = arith.constant 0 : i32
    return %c0_i32, %c0_i32_0, %c0_i32_1 : i32, i32, i32
  }
  func.func @transform_11(%arg0: i32) -> (i32, i32) {
    %c0_i32 = arith.constant 0 : i32
    %c0_i32_0 = arith.constant 0 : i32
    %c0_i32_1 = arith.constant 0 : i32
    return %c0_i32, %c0_i32_0 : i32, i32
  }
  func.func @transform_12(%arg0: i32) -> (i32, i32, i32) {
    %c0_i32 = arith.constant 0 : i32
    %c0_i32_0 = arith.constant 0 : i32
    %c0_i32_1 = arith.constant 0 : i32
    %c0_i32_2 = arith.constant 0 : i32
    return %c0_i32, %c0_i32_0, %c0_i32_1 : i32, i32, i32
  }
  func.func @transform_13(%arg0: i32) -> (i32, i32, i32) {
    %c0_i32 = arith.constant 0 : i32
    %c0_i32_0 = arith.constant 0 : i32
    %c0_i32_1 = arith.constant 0 : i32
    %c0_i32_2 = arith.constant 0 : i32
    return %c0_i32, %c0_i32_0, %c0_i32_1 : i32, i32, i32
  }
  func.func @transform_14(%arg0: i32) -> (i32, i32) {
    %c0_i32 = arith.constant 0 : i32
    %c0_i32_0 = arith.constant 0 : i32
    %c0_i32_1 = arith.constant 0 : i32
    return %c0_i32, %c0_i32_0 : i32, i32
  }
  func.func @transform_15(%arg0: i32) -> (i32, i32) {
    %c0_i32 = arith.constant 0 : i32
    %c0_i32_0 = arith.constant 0 : i32
    %c0_i32_1 = arith.constant 0 : i32
    return %c0_i32, %c0_i32_0 : i32, i32
  }
  func.func @transform_16(%arg0: i32) -> (i32, i32, i32) {
    %c0_i32 = arith.constant 0 : i32
    %c0_i32_0 = arith.constant 0 : i32
    %c0_i32_1 = arith.constant 0 : i32
    %c0_i32_2 = arith.constant 0 : i32
    return %c0_i32, %c0_i32_0, %c0_i32_1 : i32, i32, i32
  }
  func.func @transform_17(%arg0: i32) -> (i32, i32, i32) {
    %c0_i32 = arith.constant 0 : i32
    %c0_i32_0 = arith.constant 0 : i32
    %c0_i32_1 = arith.constant 0 : i32
    %c0_i32_2 = arith.constant 0 : i32
    return %c0_i32, %c0_i32_0, %c0_i32_1 : i32, i32, i32
  }
  func.func @transform_18(%arg0: i32) -> (i32, i32) {
    %c0_i32 = arith.constant 0 : i32
    %c0_i32_0 = arith.constant 0 : i32
    %c0_i32_1 = arith.constant 0 : i32
    return %c0_i32, %c0_i32_0 : i32, i32
  }
  func.func @transform_19(%arg0: i32) -> (i32, i32) {
    %c0_i32 = arith.constant 0 : i32
    %c0_i32_0 = arith.constant 0 : i32
    %c0_i32_1 = arith.constant 0 : i32
    return %c0_i32, %c0_i32_0 : i32, i32
  }
  func.func @transform_20(%arg0: i32) -> (i32, i32) {
    %c0_i32 = arith.constant 0 : i32
    %c0_i32_0 = arith.constant 0 : i32
    %c0_i32_1 = arith.constant 0 : i32
    return %c0_i32, %c0_i32_0 : i32, i32
  }
}

module attributes {stable_mosaic.version = 11 : i64} {
  func.func @kernel(%arg0: i32, %arg1: memref<64x576xbf16, #tpu.memory_space<vmem>>, %arg2: memref<576x32xbf16, #tpu.memory_space<vmem>>, %arg3: memref<64x1xf32, #tpu.memory_space<vmem>>, %arg4: memref<64x1xf32, #tpu.memory_space<vmem>>, %arg5: memref<64x32xf32, #tpu.memory_space<vmem>>) attributes {dimension_semantics = [#tpu.dimension_semantics<arbitrary>], iteration_bounds = array<i64: 1>, scalar_prefetch = 0 : i64, scratch_operands = 0 : i64, tpu.core_type = #tpu.core_type<tc>, window_params = [{pipeline_mode = #tpu.pipeline_mode<synchronous>, transform_indices = @transform_0, window_bounds = array<i64: 64, 576>}, {pipeline_mode = #tpu.pipeline_mode<synchronous>, transform_indices = @transform_1, window_bounds = array<i64: 576, 32>}, {pipeline_mode = #tpu.pipeline_mode<synchronous>, transform_indices = @transform_2, window_bounds = array<i64: 64, 1>}, {pipeline_mode = #tpu.pipeline_mode<synchronous>, transform_indices = @transform_3, window_bounds = array<i64: 64, 1>}, {pipeline_mode = #tpu.pipeline_mode<synchronous>, transform_indices = @transform_4, window_bounds = array<i64: 64, 32>}]} {
    %c0 = arith.constant 0 : index
    %c0_0 = arith.constant 0 : index
    %0 = vector.load %arg1[%c0, %c0_0] : memref<64x576xbf16, #tpu.memory_space<vmem>>, vector<64x576xbf16>
    %c0_1 = arith.constant 0 : index
    %c0_2 = arith.constant 0 : index
    %1 = vector.load %arg2[%c0_1, %c0_2] : memref<576x32xbf16, #tpu.memory_space<vmem>>, vector<576x32xbf16>
    %cst = arith.constant dense<0.000000e+00> : vector<64x32xf32>
    %2 = tpu.matmul %0, %1, %cst {dimension_numbers = #tpu.dot_dimension_numbers<[1], [0], [0], [1], [0, 0, 1, 1], [], []>} : vector<64x576xbf16>, vector<576x32xbf16>, vector<64x32xf32> -> vector<64x32xf32>
    %cst_3 = arith.constant dense<0.000000e+00> : vector<64xf32>
    %3 = vector.multi_reduction <add>, %2, %cst_3 [1] : vector<64x32xf32> to vector<64xf32>
    %4 = vector.shape_cast %3 : vector<64xf32> to vector<64x1xf32>
    %5 = vector.extract_strided_slice %4 {offsets = [0, 0], sizes = [16, 1], strides = [1, 1]} : vector<64x1xf32> to vector<16x1xf32>
    %6 = vector.extract_strided_slice %4 {offsets = [16, 0], sizes = [16, 1], strides = [1, 1]} : vector<64x1xf32> to vector<16x1xf32>
    %7 = arith.addf %5, %6 : vector<16x1xf32>
    %8 = vector.extract_strided_slice %4 {offsets = [32, 0], sizes = [16, 1], strides = [1, 1]} : vector<64x1xf32> to vector<16x1xf32>
    %9 = arith.addf %7, %8 : vector<16x1xf32>
    %10 = vector.extract_strided_slice %4 {offsets = [48, 0], sizes = [16, 1], strides = [1, 1]} : vector<64x1xf32> to vector<16x1xf32>
    %11 = arith.addf %9, %10 : vector<16x1xf32>
    %cst_4 = arith.constant 7.812500e-03 : f32
    %12 = vector.broadcast %cst_4 : f32 to vector<16x1xf32>
    %13 = arith.mulf %11, %12 : vector<16x1xf32>
    %14 = tpu.concatenate %13, %13, %13, %13 in 0 : vector<16x1xf32>, vector<16x1xf32>, vector<16x1xf32>, vector<16x1xf32> -> vector<64x1xf32>
    %15 = vector.broadcast %14 : vector<64x1xf32> to vector<64x32xf32>
    %16 = arith.subf %2, %15 : vector<64x32xf32>
    %17 = arith.mulf %16, %16 : vector<64x32xf32>
    %cst_5 = arith.constant dense<0.000000e+00> : vector<64xf32>
    %18 = vector.multi_reduction <add>, %17, %cst_5 [1] : vector<64x32xf32> to vector<64xf32>
    %19 = vector.shape_cast %18 : vector<64xf32> to vector<64x1xf32>
    %20 = vector.extract_strided_slice %19 {offsets = [0, 0], sizes = [16, 1], strides = [1, 1]} : vector<64x1xf32> to vector<16x1xf32>
    %21 = vector.extract_strided_slice %19 {offsets = [16, 0], sizes = [16, 1], strides = [1, 1]} : vector<64x1xf32> to vector<16x1xf32>
    %22 = arith.addf %20, %21 : vector<16x1xf32>
    %23 = vector.extract_strided_slice %19 {offsets = [32, 0], sizes = [16, 1], strides = [1, 1]} : vector<64x1xf32> to vector<16x1xf32>
    %24 = arith.addf %22, %23 : vector<16x1xf32>
    %25 = vector.extract_strided_slice %19 {offsets = [48, 0], sizes = [16, 1], strides = [1, 1]} : vector<64x1xf32> to vector<16x1xf32>
    %26 = arith.addf %24, %25 : vector<16x1xf32>
    %cst_6 = arith.constant 7.812500e-03 : f32
    %27 = vector.broadcast %cst_6 : f32 to vector<16x1xf32>
    %28 = arith.mulf %26, %27 : vector<16x1xf32>
    %cst_7 = arith.constant 9.99999974E-6 : f32
    %29 = vector.broadcast %cst_7 : f32 to vector<16x1xf32>
    %30 = arith.addf %28, %29 : vector<16x1xf32>
    %31 = math.rsqrt %30 : vector<16x1xf32>
    %32 = tpu.concatenate %31, %31, %31, %31 in 0 : vector<16x1xf32>, vector<16x1xf32>, vector<16x1xf32>, vector<16x1xf32> -> vector<64x1xf32>
    %33 = vector.broadcast %32 : vector<64x1xf32> to vector<64x32xf32>
    %34 = arith.mulf %16, %33 : vector<64x32xf32>
    %c0_8 = arith.constant 0 : index
    %c0_9 = arith.constant 0 : index
    %35 = vector.load %arg3[%c0_8, %c0_9] : memref<64x1xf32, #tpu.memory_space<vmem>>, vector<64x1xf32>
    %36 = vector.broadcast %35 : vector<64x1xf32> to vector<64x32xf32>
    %37 = arith.mulf %34, %36 : vector<64x32xf32>
    %c0_10 = arith.constant 0 : index
    %c0_11 = arith.constant 0 : index
    %38 = vector.load %arg4[%c0_10, %c0_11] : memref<64x1xf32, #tpu.memory_space<vmem>>, vector<64x1xf32>
    %39 = vector.broadcast %38 : vector<64x1xf32> to vector<64x32xf32>
    %40 = arith.addf %37, %39 : vector<64x32xf32>
    %c0_12 = arith.constant 0 : index
    %c0_13 = arith.constant 0 : index
    %41 = vector.load %arg5[%c0_12, %c0_13] : memref<64x32xf32, #tpu.memory_space<vmem>>, vector<64x32xf32>
    tpu.vector_store %arg5[%c0_12, %c0_13], %40 {strides = array<i32>} : memref<64x32xf32, #tpu.memory_space<vmem>>, vector<64x32xf32>,
    return
  }
  func.func @transform_0(%arg0: i32) -> (i32, i32) {
    %c0_i32 = arith.constant 0 : i32
    %c0_i32_0 = arith.constant 0 : i32
    %c0_i32_1 = arith.constant 0 : i32
    return %c0_i32, %c0_i32_0 : i32, i32
  }
  func.func @transform_1(%arg0: i32) -> (i32, i32) {
    %c0_i32 = arith.constant 0 : i32
    %c0_i32_0 = arith.constant 0 : i32
    %c0_i32_1 = arith.constant 0 : i32
    return %c0_i32, %c0_i32_0 : i32, i32
  }
  func.func @transform_2(%arg0: i32) -> (i32, i32) {
    %c0_i32 = arith.constant 0 : i32
    %c0_i32_0 = arith.constant 0 : i32
    %c0_i32_1 = arith.constant 0 : i32
    return %c0_i32, %c0_i32_0 : i32, i32
  }
  func.func @transform_3(%arg0: i32) -> (i32, i32) {
    %c0_i32 = arith.constant 0 : i32
    %c0_i32_0 = arith.constant 0 : i32
    %c0_i32_1 = arith.constant 0 : i32
    return %c0_i32, %c0_i32_0 : i32, i32
  }
  func.func @transform_4(%arg0: i32) -> (i32, i32) {
    %c0_i32 = arith.constant 0 : i32
    %c0_i32_0 = arith.constant 0 : i32
    %c0_i32_1 = arith.constant 0 : i32
    return %c0_i32, %c0_i32_0 : i32, i32
  }
}

module attributes {stable_mosaic.version = 11 : i64} {
  func.func @kernel(%arg0: i32, %arg1: memref<32x288xbf16, #tpu.memory_space<vmem>>, %arg2: memref<288x128xbf16, #tpu.memory_space<vmem>>, %arg3: memref<32x1xf32, #tpu.memory_space<vmem>>, %arg4: memref<32x1xf32, #tpu.memory_space<vmem>>, %arg5: memref<32x128xf32, #tpu.memory_space<vmem>>) attributes {dimension_semantics = [#tpu.dimension_semantics<arbitrary>], iteration_bounds = array<i64: 1>, scalar_prefetch = 0 : i64, scratch_operands = 0 : i64, tpu.core_type = #tpu.core_type<tc>, window_params = [{pipeline_mode = #tpu.pipeline_mode<synchronous>, transform_indices = @transform_0, window_bounds = array<i64: 32, 288>}, {pipeline_mode = #tpu.pipeline_mode<synchronous>, transform_indices = @transform_1, window_bounds = array<i64: 288, 128>}, {pipeline_mode = #tpu.pipeline_mode<synchronous>, transform_indices = @transform_2, window_bounds = array<i64: 32, 1>}, {pipeline_mode = #tpu.pipeline_mode<synchronous>, transform_indices = @transform_3, window_bounds = array<i64: 32, 1>}, {pipeline_mode = #tpu.pipeline_mode<synchronous>, transform_indices = @transform_4, window_bounds = array<i64: 32, 128>}]} {
    %c0 = arith.constant 0 : index
    %c0_0 = arith.constant 0 : index
    %0 = vector.load %arg1[%c0, %c0_0] : memref<32x288xbf16, #tpu.memory_space<vmem>>, vector<32x288xbf16>
    %c0_1 = arith.constant 0 : index
    %c0_2 = arith.constant 0 : index
    %1 = vector.load %arg2[%c0_1, %c0_2] : memref<288x128xbf16, #tpu.memory_space<vmem>>, vector<288x128xbf16>
    %cst = arith.constant dense<0.000000e+00> : vector<32x128xf32>
    %2 = tpu.matmul %0, %1, %cst {dimension_numbers = #tpu.dot_dimension_numbers<[1], [0], [0], [1], [0, 0, 1, 1], [], []>} : vector<32x288xbf16>, vector<288x128xbf16>, vector<32x128xf32> -> vector<32x128xf32>
    %cst_3 = arith.constant dense<0.000000e+00> : vector<32xf32>
    %3 = vector.multi_reduction <add>, %2, %cst_3 [1] : vector<32x128xf32> to vector<32xf32>
    %4 = vector.shape_cast %3 : vector<32xf32> to vector<32x1xf32>
    %5 = vector.extract_strided_slice %4 {offsets = [0, 0], sizes = [8, 1], strides = [1, 1]} : vector<32x1xf32> to vector<8x1xf32>
    %6 = vector.extract_strided_slice %4 {offsets = [8, 0], sizes = [8, 1], strides = [1, 1]} : vector<32x1xf32> to vector<8x1xf32>
    %7 = arith.addf %5, %6 : vector<8x1xf32>
    %8 = vector.extract_strided_slice %4 {offsets = [16, 0], sizes = [8, 1], strides = [1, 1]} : vector<32x1xf32> to vector<8x1xf32>
    %9 = arith.addf %7, %8 : vector<8x1xf32>
    %10 = vector.extract_strided_slice %4 {offsets = [24, 0], sizes = [8, 1], strides = [1, 1]} : vector<32x1xf32> to vector<8x1xf32>
    %11 = arith.addf %9, %10 : vector<8x1xf32>
    %cst_4 = arith.constant 0.001953125 : f32
    %12 = vector.broadcast %cst_4 : f32 to vector<8x1xf32>
    %13 = arith.mulf %11, %12 : vector<8x1xf32>
    %14 = tpu.concatenate %13, %13, %13, %13 in 0 : vector<8x1xf32>, vector<8x1xf32>, vector<8x1xf32>, vector<8x1xf32> -> vector<32x1xf32>
    %15 = vector.broadcast %14 : vector<32x1xf32> to vector<32x128xf32>
    %16 = arith.subf %2, %15 : vector<32x128xf32>
    %17 = arith.mulf %16, %16 : vector<32x128xf32>
    %cst_5 = arith.constant dense<0.000000e+00> : vector<32xf32>
    %18 = vector.multi_reduction <add>, %17, %cst_5 [1] : vector<32x128xf32> to vector<32xf32>
    %19 = vector.shape_cast %18 : vector<32xf32> to vector<32x1xf32>
    %20 = vector.extract_strided_slice %19 {offsets = [0, 0], sizes = [8, 1], strides = [1, 1]} : vector<32x1xf32> to vector<8x1xf32>
    %21 = vector.extract_strided_slice %19 {offsets = [8, 0], sizes = [8, 1], strides = [1, 1]} : vector<32x1xf32> to vector<8x1xf32>
    %22 = arith.addf %20, %21 : vector<8x1xf32>
    %23 = vector.extract_strided_slice %19 {offsets = [16, 0], sizes = [8, 1], strides = [1, 1]} : vector<32x1xf32> to vector<8x1xf32>
    %24 = arith.addf %22, %23 : vector<8x1xf32>
    %25 = vector.extract_strided_slice %19 {offsets = [24, 0], sizes = [8, 1], strides = [1, 1]} : vector<32x1xf32> to vector<8x1xf32>
    %26 = arith.addf %24, %25 : vector<8x1xf32>
    %cst_6 = arith.constant 0.001953125 : f32
    %27 = vector.broadcast %cst_6 : f32 to vector<8x1xf32>
    %28 = arith.mulf %26, %27 : vector<8x1xf32>
    %cst_7 = arith.constant 9.99999974E-6 : f32
    %29 = vector.broadcast %cst_7 : f32 to vector<8x1xf32>
    %30 = arith.addf %28, %29 : vector<8x1xf32>
    %31 = math.rsqrt %30 : vector<8x1xf32>
    %32 = tpu.concatenate %31, %31, %31, %31 in 0 : vector<8x1xf32>, vector<8x1xf32>, vector<8x1xf32>, vector<8x1xf32> -> vector<32x1xf32>
    %33 = vector.broadcast %32 : vector<32x1xf32> to vector<32x128xf32>
    %34 = arith.mulf %16, %33 : vector<32x128xf32>
    %c0_8 = arith.constant 0 : index
    %c0_9 = arith.constant 0 : index
    %35 = vector.load %arg3[%c0_8, %c0_9] : memref<32x1xf32, #tpu.memory_space<vmem>>, vector<32x1xf32>
    %36 = vector.broadcast %35 : vector<32x1xf32> to vector<32x128xf32>
    %37 = arith.mulf %34, %36 : vector<32x128xf32>
    %c0_10 = arith.constant 0 : index
    %c0_11 = arith.constant 0 : index
    %38 = vector.load %arg4[%c0_10, %c0_11] : memref<32x1xf32, #tpu.memory_space<vmem>>, vector<32x1xf32>
    %39 = vector.broadcast %38 : vector<32x1xf32> to vector<32x128xf32>
    %40 = arith.addf %37, %39 : vector<32x128xf32>
    %c0_12 = arith.constant 0 : index
    %c0_13 = arith.constant 0 : index
    %41 = vector.load %arg5[%c0_12, %c0_13] : memref<32x128xf32, #tpu.memory_space<vmem>>, vector<32x128xf32>
    tpu.vector_store %arg5[%c0_12, %c0_13], %40 {strides = array<i32>} : memref<32x128xf32, #tpu.memory_space<vmem>>, vector<32x128xf32>,
    return
  }
  func.func @transform_0(%arg0: i32) -> (i32, i32) {
    %c0_i32 = arith.constant 0 : i32
    %c0_i32_0 = arith.constant 0 : i32
    %c0_i32_1 = arith.constant 0 : i32
    return %c0_i32, %c0_i32_0 : i32, i32
  }
  func.func @transform_1(%arg0: i32) -> (i32, i32) {
    %c0_i32 = arith.constant 0 : i32
    %c0_i32_0 = arith.constant 0 : i32
    %c0_i32_1 = arith.constant 0 : i32
    return %c0_i32, %c0_i32_0 : i32, i32
  }
  func.func @transform_2(%arg0: i32) -> (i32, i32) {
    %c0_i32 = arith.constant 0 : i32
    %c0_i32_0 = arith.constant 0 : i32
    %c0_i32_1 = arith.constant 0 : i32
    return %c0_i32, %c0_i32_0 : i32, i32
  }
  func.func @transform_3(%arg0: i32) -> (i32, i32) {
    %c0_i32 = arith.constant 0 : i32
    %c0_i32_0 = arith.constant 0 : i32
    %c0_i32_1 = arith.constant 0 : i32
    return %c0_i32, %c0_i32_0 : i32, i32
  }
  func.func @transform_4(%arg0: i32) -> (i32, i32) {
    %c0_i32 = arith.constant 0 : i32
    %c0_i32_0 = arith.constant 0 : i32
    %c0_i32_1 = arith.constant 0 : i32
    return %c0_i32, %c0_i32_0 : i32, i32
  }
}

module attributes {stable_mosaic.version = 11 : i64} {
  func.func @kernel(%arg0: i32, %arg1: memref<12x144xbf16, #tpu.memory_space<vmem>>, %arg2: memref<144x512xbf16, #tpu.memory_space<vmem>>, %arg3: memref<12x1xf32, #tpu.memory_space<vmem>>, %arg4: memref<12x512xf32, #tpu.memory_space<vmem>>) attributes {dimension_semantics = [#tpu.dimension_semantics<arbitrary>], iteration_bounds = array<i64: 1>, scalar_prefetch = 0 : i64, scratch_operands = 0 : i64, tpu.core_type = #tpu.core_type<tc>, window_params = [{pipeline_mode = #tpu.pipeline_mode<synchronous>, transform_indices = @transform_0, window_bounds = array<i64: 12, 144>}, {pipeline_mode = #tpu.pipeline_mode<synchronous>, transform_indices = @transform_1, window_bounds = array<i64: 144, 512>}, {pipeline_mode = #tpu.pipeline_mode<synchronous>, transform_indices = @transform_2, window_bounds = array<i64: 12, 1>}, {pipeline_mode = #tpu.pipeline_mode<synchronous>, transform_indices = @transform_3, window_bounds = array<i64: 12, 512>}]} {
    %c0 = arith.constant 0 : index
    %c0_0 = arith.constant 0 : index
    %0 = vector.load %arg1[%c0, %c0_0] : memref<12x144xbf16, #tpu.memory_space<vmem>>, vector<12x144xbf16>
    %c0_1 = arith.constant 0 : index
    %c0_2 = arith.constant 0 : index
    %1 = vector.load %arg2[%c0_1, %c0_2] : memref<144x512xbf16, #tpu.memory_space<vmem>>, vector<144x512xbf16>
    %cst = arith.constant dense<0.000000e+00> : vector<12x512xf32>
    %2 = tpu.matmul %0, %1, %cst {dimension_numbers = #tpu.dot_dimension_numbers<[1], [0], [0], [1], [0, 0, 1, 1], [], []>} : vector<12x144xbf16>, vector<144x512xbf16>, vector<12x512xf32> -> vector<12x512xf32>
    %c0_3 = arith.constant 0 : index
    %c0_4 = arith.constant 0 : index
    %3 = vector.load %arg3[%c0_3, %c0_4] : memref<12x1xf32, #tpu.memory_space<vmem>>, vector<12x1xf32>
    %4 = vector.broadcast %3 : vector<12x1xf32> to vector<12x512xf32>
    %5 = arith.addf %2, %4 : vector<12x512xf32>
    %6 = math.tanh %5 : vector<12x512xf32>
    %c0_5 = arith.constant 0 : index
    %c0_6 = arith.constant 0 : index
    %7 = vector.load %arg4[%c0_5, %c0_6] : memref<12x512xf32, #tpu.memory_space<vmem>>, vector<12x512xf32>
    tpu.vector_store %arg4[%c0_5, %c0_6], %6 {strides = array<i32>} : memref<12x512xf32, #tpu.memory_space<vmem>>, vector<12x512xf32>,
    return
  }
  func.func @transform_0(%arg0: i32) -> (i32, i32) {
    %c0_i32 = arith.constant 0 : i32
    %c0_i32_0 = arith.constant 0 : i32
    %c0_i32_1 = arith.constant 0 : i32
    return %c0_i32, %c0_i32_0 : i32, i32
  }
  func.func @transform_1(%arg0: i32) -> (i32, i32) {
    %c0_i32 = arith.constant 0 : i32
    %c0_i32_0 = arith.constant 0 : i32
    %c0_i32_1 = arith.constant 0 : i32
    return %c0_i32, %c0_i32_0 : i32, i32
  }
  func.func @transform_2(%arg0: i32) -> (i32, i32) {
    %c0_i32 = arith.constant 0 : i32
    %c0_i32_0 = arith.constant 0 : i32
    %c0_i32_1 = arith.constant 0 : i32
    return %c0_i32, %c0_i32_0 : i32, i32
  }
  func.func @transform_3(%arg0: i32) -> (i32, i32) {
    %c0_i32 = arith.constant 0 : i32
    %c0_i32_0 = arith.constant 0 : i32
    %c0_i32_1 = arith.constant 0 : i32
    return %c0_i32, %c0_i32_0 : i32, i32
  }
}

</mosaic_0001>

<bundles_post_ra>
// kernel: unet_forward.6
= control target key start
LH: loop header
LB: loop body
LE: loop exit
PB: predicated region body
PF: predicated region fallthrough
CT: control target
= control target key end

     0   :  { %v222_v1 = vmov 0   ;;  %vm94_vm0 = vcmask 392192   ;;  %s297_s1 = inlined_call_operand.vmem [shape: bf16[48,512], index: 1, kind: input, shape index: {}]   ;;  %s298_s2 = inlined_call_operand.vmem [shape: f32[8,1], index: 2, kind: input, shape index: {}]   ;;  %s299_s0 = inlined_call_operand.vmem [shape: bf16[8,48], index: 0, kind: input, shape index: {}]   ;;  %s300_s3 = inlined_call_operand.vmem [shape: f32[8,512], index: 3, kind: output, shape index: {}]  }
   0x1   :  { %v204_v0 = vld [vmem:[%s297_s1 + $0x44] ss:$16 sps:$4 sm:$0xff]   ;;  %130 = vmatprep.mubr.bf16.mxu0 %v222_v1  ;;  %171 = vmatprep.mubr.bf16.mxu1 %v222_v1  ;;  %v206_v2 = vld [vmem:[%s297_s1 + $0x4c] ss:$16 sps:$4 sm:$0xff]   ;;  %v208_v3 = vld [vmem:[%s297_s1 + $0x40] ss:$16 sps:$4 sm:$0xff]  }
   0x2   :  { %203 = vset.pattern.permute.xlu0 %v222_v1  ;;  %108 = vmatprep.subr.bf16.mxu0 %v204_v0  ;;  %v209_v4 = vld [vmem:[%s297_s1 + $0x48] ss:$16 sps:$4 sm:$0xff]   ;;  %v210_v5 = vld [vmem:[%s297_s1 + $0x24] ss:$16 sps:$4 sm:$0xff]   ;;  %v212_v6 = vld [vmem:[%s297_s1 + $0x2c] ss:$16 sps:$4 sm:$0xff]  }
   0x3   :  { %149 = vmatprep.subr.bf16.mxu1 %v206_v2  ;;  %109 = vmatpush1.bf16.msra.mxu0 %v208_v3  ;;  %v214_v7 = vld [vmem:[%s297_s1 + $0x20] ss:$16 sps:$4 sm:$0xff]   ;;  %v215_v8 = vld [vmem:[%s297_s1 + $0x28] ss:$16 sps:$4 sm:$0xff]   ;;  %v216_v9 = vld [vmem:[%s297_s1 + $0x4] ss:$16 sps:$4 sm:$0xff]  }
   0x4   :  { %150 = vmatpush1.bf16.msra.mxu1 %v209_v4  ;;  %110 = vmatprep.subr.bf16.mxu0 %v210_v5  ;;  %v218_v10 = vld [vmem:[%s297_s1 + $0xc] ss:$16 sps:$4 sm:$0xff]   ;;  %v220_v11 = vld [vmem:[%s297_s1] ss:$16 sps:$4 sm:$0xff]   ;;  %v221_v12 = vld [vmem:[%s297_s1 + $0x8] ss:$16 sps:$4 sm:$0xff]  }
   0x5   :  { %151 = vmatprep.subr.bf16.mxu1 %v212_v6  ;;  %v28_v13 = vld [vmem:[%s298_s2] sm:$0xff] }
   0x6   :  { %31 = vperm.xlu0 %203, %v28_v13   ;;  %v15_v14 = vld [vmem:[%s299_s0] sm:$0xf] }
   0x7   :  { %111 = vmatpush1.bf16.msra.mxu0 %v214_v7 }
   0x8   :  { %152 = vmatpush1.bf16.msra.mxu1 %v215_v8  ;;  %112 = vmatprep.subr.bf16.mxu0 %v216_v9 }
   0x9   :  { %153 = vmatprep.subr.bf16.mxu1 %v218_v10 }
   0xb   :  { %113 = vmatpush1.bf16.msra.mxu0 %v220_v11 }
   0xc   :  { %154 = vmatpush1.bf16.msra.mxu1 %v221_v12 }
   0xe   :  { %200 = vmatmul.mubr.msk.bf16.vlgmr.msra.gmra.mxu0 %vm94_vm0, %v15_v14 }
   0xf   :  { %201 = vmatmul.mubr.msk.bf16.vlgmr.msra.gmra.mxu1 %vm94_vm0, %v15_v14 }
  0x81   :  { %v32_v15 = vpop.permute.xlu0 %31 }
  0xce   :  { %v132_v16 = vpop.f32.mrf.mxu0 }
  0xcf   :  { %v173_v17 = vpop.f32.mrf.mxu1  ;;  %v133_v18 = vadd.f32 %v132_v16, %v32_v15 }
  0xd0   :  { %v174_v19 = vadd.f32 %v173_v17, %v32_v15  ;;  %v134_v20 = vpop.f32.mrf.mxu0 }
  0xd1   :  { %v175_v21 = vpop.f32.mrf.mxu1  ;;  %180 = vst [vmem:[%s300_s3] sm:$0xff] %v133_v18  ;;  %v135_v22 = vadd.f32 %v134_v20, %v32_v15 }
  0xd2   :  { %182 = vst [vmem:[%s300_s3 + $0x10] sm:$0xff] %v174_v19  ;;  %v176_v23 = vadd.f32 %v175_v21, %v32_v15  ;;  %v136_v24 = vpop.f32.mrf.mxu0 }
  0xd3   :  { %v177_v25 = vpop.f32.mrf.mxu1  ;;  %181 = vst [vmem:[%s300_s3 + $0x8] sm:$0xff] %v135_v22 }
  0xd4   :  { %183 = vst [vmem:[%s300_s3 + $0x18] sm:$0xff] %v176_v23  ;;  %v137_v26 = vpop.f32.mrf.mxu0 }
  0xd5   :  { %v178_v27 = vpop.f32.mrf.mxu1 }

// kernel: unet_forward.7
= control target key start
LH: loop header
LB: loop body
LE: loop exit
PB: predicated region body
PF: predicated region fallthrough
CT: control target
= control target key end

     0   :  { %v243_v0 = vmov 0.0   ;;  %vm244_vm0 = vmmov 0   ;;  %v245_v10 = vmov 0   ;;  %s316_s1 = inlined_call_operand.vmem [shape: bf16[128,128], index: 1, kind: input, shape index: {}]   ;;  %s317_s0 = inlined_call_operand.vmem [shape: bf16[16,128], index: 0, kind: input, shape index: {}]   ;;  %s318_s2 = inlined_call_operand.vmem [shape: f32[16,1], index: 2, kind: input, shape index: {}]   ;;  %s319_s3 = inlined_call_operand.vmem [shape: f32[16,1], index: 3, kind: input, shape index: {}]   ;;  %s320_s4 = inlined_call_operand.vmem [shape: f32[16,128], index: 4, kind: output, shape index: {}]  }
   0x1   :  { %205 = vmatprep.subr.bf16.mxu0 %v243_v0  ;;  %v230_v1 = vld [vmem:[%s316_s1 + $0x38] sm:$0xff]   ;;  %221 = vmatprep.mubr.msk.bf16.mxu0 %vm244_vm0, %v243_v0  ;;  %v231_v2 = vld [vmem:[%s316_s1 + $0x30] sm:$0xff]   ;;  %v232_v3 = vld [vmem:[%s316_s1 + $0x28] sm:$0xff]  }
   0x2   :  { %206 = vmatpush3.bf16.msra.mxu0 %v230_v1  ;;  %v233_v4 = vld [vmem:[%s316_s1 + $0x20] sm:$0xff]   ;;  %v234_v5 = vld [vmem:[%s316_s1 + $0x18] sm:$0xff]   ;;  %v235_v6 = vld [vmem:[%s316_s1 + $0x10] sm:$0xff]   ;;  %229 = vset.pattern.permute.xlu1 %v245_v10 }
   0x3   :  { %207 = vmatprep.subr.bf16.mxu0 %v243_v0  ;;  %v236_v7 = vld [vmem:[%s316_s1 + $0x8] sm:$0xff]   ;;  %v237_v8 = vld [vmem:[%s316_s1] sm:$0xff]   ;;  %228 = vset.pattern.permute.xlu0 %v245_v10 }
   0x4   :  { %v238_v9 = vld [vmem:[%s317_s0] sm:$0xff]   ;;  %v154_v11 = vld [vmem:[%s318_s2 + $0x8] sm:$0xff] }
   0x5   :  { %162 = vperm.xlu1 %229, %v154_v11   ;;  %v167_v12 = vld [vmem:[%s319_s3] sm:$0xff]  ;;  %v168_v26 = vld [vmem:[%s319_s3 + $0x8] sm:$0xff] }
   0x6   :  { %208 = vmatpush3.bf16.msra.mxu0 %v231_v2  ;;  %v153_v17 = vld [vmem:[%s318_s2] sm:$0xff] }
   0x7   :  { %209 = vmatprep.subr.bf16.mxu0 %v243_v0 }
   0x9   :  { %171 = vperm.xlu1 %229, %v167_v12  }
   0xa   :  { %210 = vmatpush3.bf16.msra.mxu0 %v232_v3 }
   0xb   :  { %211 = vmatprep.subr.bf16.mxu0 %v243_v0 }
   0xe   :  { %212 = vmatpush3.bf16.msra.mxu0 %v233_v4 }
   0xf   :  { %213 = vmatprep.subr.bf16.mxu0 %v243_v0 }
  0x12   :  { %214 = vmatpush3.bf16.msra.mxu0 %v234_v5 }
  0x13   :  { %215 = vmatprep.subr.bf16.mxu0 %v243_v0 }
  0x16   :  { %216 = vmatpush3.bf16.msra.mxu0 %v235_v6 }
  0x17   :  { %217 = vmatprep.subr.bf16.mxu0 %v243_v0 }
  0x1a   :  { %218 = vmatpush3.bf16.msra.mxu0 %v236_v7 }
  0x1b   :  { %219 = vmatprep.subr.bf16.mxu0 %v243_v0 }
  0x1e   :  { %220 = vmatpush3.bf16.msra.mxu0 %v237_v8 }
  0x21   :  { %222 = vmatmul.mubr.bf16.vlgmr.msra.gmra.mxu0 %v238_v9 }
  0x80   :  { %v163_v27 = vpop.permute.xlu1 %162 }
  0x84   :  { %v172_v28 = vpop.permute.xlu1 %171 }
  0xe1   :  { %v124_v13 = vpop.f32.mrf.mxu0 }
  0xe2   :  { %131 = vadd.xlane.f32.xlu0 %v124_v13 }
  0xe3   :  { %v223_v14 = vpop.f32.mrf.mxu0 }
  0xe5   :  { %v127_v15 = vpop.f32.mrf.mxu0 }
  0xe6   :  { %133 = vadd.xlane.f32.xlu0 %v127_v15 }
  0xe7   :  { %v224_v16 = vpop.f32.mrf.mxu0 }
  0xfc   :  { %157 = vperm.xlu0 %228, %v153_v17  }
 0x16b   :  { %v132_v18 = vpop.xlane.xlu0 %131 }
 0x16c   :  { %v135_v19 = vmul.f32 0.0078125, %v132_v18 }
 0x16e   :  { %v137_v20 = vsub.f32 %v124_v13, %v135_v19 }
 0x16f   :  { %v134_v21 = vpop.xlane.xlu0 %133 }
 0x170   :  { %v136_v22 = vmul.f32 0.0078125, %v134_v21  ;;  %v139_v23 = vmul.f32 %v137_v20, %v137_v20 }
 0x172   :  { %v138_v24 = vsub.f32 %v127_v15, %v136_v22  ;;  %141 = vadd.xlane.f32.xlu1 %v139_v23 }
 0x174   :  { %v140_v25 = vmul.f32 %v138_v24, %v138_v24 }
 0x176   :  { %143 = vadd.xlane.f32.xlu1 %v140_v25 }
 0x177   :  { %v158_v36 = vpop.permute.xlu0 %157 }
 0x187   :  { %176 = vperm.xlu1 %229, %v168_v26  }
 0x1fb   :  { %v142_v29 = vpop.xlane.xlu1 %141 }
 0x1fc   :  { %v145_v30 = vmul.f32 0.0078125, %v142_v29 }
 0x1fe   :  { %v147_v31 = vadd.f32 1e-05, %v145_v30 }
 0x1ff   :  { %v144_v32 = vpop.xlane.xlu1 %143 }
 0x200   :  { %239 = vrsqrt.f32 %v147_v31  ;;  %v146_v33 = vmul.f32 0.0078125, %v144_v32 }
 0x202   :  { %v148_v34 = vadd.f32 1e-05, %v146_v33 }
 0x203   :  { %v177_v43 = vpop.permute.xlu1 %176 }
 0x204   :  { %241 = vrsqrt.f32 %v148_v34 }
 0x20d   :  { %v240_v35 = vpop.eup %239 }
 0x20e   :  { %v151_v37 = vmul.f32 %v240_v35, %v137_v20 }
 0x210   :  { %v165_v38 = vmul.f32 %v158_v36, %v151_v37 }
 0x211   :  { %v242_v39 = vpop.eup %241 }
 0x212   :  { %v152_v40 = vmul.f32 %v242_v39, %v138_v24  ;;  %v179_v41 = vadd.f32 %v172_v28, %v165_v38 }
 0x214   :  { %v166_v42 = vmul.f32 %v163_v27, %v152_v40  ;;  %181 = vst [vmem:[%s320_s4] sm:$0xff] %v179_v41 }
 0x216   :  { %v180_v44 = vadd.f32 %v177_v43, %v166_v42 }
 0x218   :  { %182 = vst [vmem:[%s320_s4 + $0x8] sm:$0xff] %v180_v44 }

// kernel: unet_forward.9
= control target key start
LH: loop header
LB: loop body
LE: loop exit
PB: predicated region body
PF: predicated region fallthrough
CT: control target
= control target key end

     0   :  { %vm430_vm0 = vcmask 523264   ;;  %vm638_vm1 = vcmask 261120   ;;  %s1456_s1 = inlined_call_operand.vmem [shape: bf16[576,32], index: 1, kind: input, shape index: {}]   ;;  %s1457_s0 = inlined_call_operand.vmem [shape: bf16[64,576], index: 0, kind: input, shape index: {}]   ;;  %s1458_s2 = inlined_call_operand.vmem [shape: f32[64,1], index: 2, kind: input, shape index: {}]   ;;  %s1459_s3 = inlined_call_operand.vmem [shape: f32[64,1], index: 3, kind: input, shape index: {}]   ;;  %s1460_s4 = inlined_call_operand.vmem [shape: f32[64,32], index: 4, kind: output, shape index: {}]  }
   0x1   :  { %v1050_v0 = vld [vmem:[%s1456_s1 + $0x78] sm:$0xff]   ;;  %v1054_v4 = vld [vmem:[%s1456_s1 + $0x70] sm:$0xff]   ;;  %v1058_v8 = vld [vmem:[%s1456_s1 + $0x68] sm:$0xff]  }
   0x2   :  { %v1051_v1 = vld [vmem:[%s1456_s1 + $0xf8] sm:$0xff]   ;;  %935 = vmatprep.subr.bf16.mxu0 %v1050_v0  ;;  %v1055_v5 = vld [vmem:[%s1456_s1 + $0xf0] sm:$0xff]   ;;  %v1059_v9 = vld [vmem:[%s1456_s1 + $0xe8] sm:$0xff]  }
   0x3   :  { %v1052_v2 = vld [vmem:[%s1456_s1 + $0x38] sm:$0xff]   ;;  %975 = vmatprep.subr.bf16.mxu1 %v1051_v1  ;;  %v1056_v6 = vld [vmem:[%s1456_s1 + $0x30] sm:$0xff]   ;;  %v1060_v10 = vld [vmem:[%s1456_s1 + $0x28] sm:$0xff]  }
   0x4   :  { %v1053_v3 = vld [vmem:[%s1456_s1 + $0xb8] sm:$0xff]   ;;  %936 = vmatpush3.bf16.msra.mxu0 %v1052_v2  ;;  %v1057_v7 = vld [vmem:[%s1456_s1 + $0xb0] sm:$0xff]   ;;  %v1061_v11 = vld [vmem:[%s1456_s1 + $0xa8] sm:$0xff]  }
   0x5   :  { %976 = vmatpush3.bf16.msra.mxu1 %v1053_v3  ;;  %937 = vmatprep.subr.bf16.mxu0 %v1054_v4  ;;  %v1062_v12 = vld [vmem:[%s1456_s1 + $0x60] sm:$0xff]   ;;  %v1066_v16 = vld [vmem:[%s1456_s1 + $0x58] sm:$0xff]   ;;  %v1070_v20 = vld [vmem:[%s1456_s1 + $0x50] sm:$0xff]  }
   0x6   :  { %977 = vmatprep.subr.bf16.mxu1 %v1055_v5  ;;  %v1063_v13 = vld [vmem:[%s1456_s1 + $0xe0] sm:$0xff]   ;;  %v1067_v17 = vld [vmem:[%s1456_s1 + $0xd8] sm:$0xff]   ;;  %v1071_v21 = vld [vmem:[%s1456_s1 + $0xd0] sm:$0xff]  }
   0x7   :  { %v1064_v14 = vld [vmem:[%s1456_s1 + $0x20] sm:$0xff]   ;;  %v1068_v18 = vld [vmem:[%s1456_s1 + $0x18] sm:$0xff]   ;;  %v1072_v22 = vld [vmem:[%s1456_s1 + $0x10] sm:$0xff]  }
   0x8   :  { %938 = vmatpush3.bf16.msra.mxu0 %v1056_v6  ;;  %v1065_v15 = vld [vmem:[%s1456_s1 + $0xa0] sm:$0xff]   ;;  %v1069_v19 = vld [vmem:[%s1456_s1 + $0x98] sm:$0xff]   ;;  %v1073_v23 = vld [vmem:[%s1456_s1 + $0x90] sm:$0xff]  }
   0x9   :  { %978 = vmatpush3.bf16.msra.mxu1 %v1057_v7  ;;  %939 = vmatprep.subr.bf16.mxu0 %v1058_v8  ;;  %v1074_v24 = vld [vmem:[%s1456_s1 + $0x48] sm:$0xff]   ;;  %v1078_v28 = vld [vmem:[%s1456_s1 + $0x40] sm:$0xff]   ;;  %v1088_v36 = vld [vmem:[%s1456_s1 + $0x118] sm:$0xff]  }
   0xa   :  { %979 = vmatprep.subr.bf16.mxu1 %v1059_v9  ;;  %v1075_v25 = vld [vmem:[%s1456_s1 + $0xc8] sm:$0xff]   ;;  %v1079_v29 = vld [vmem:[%s1456_s1 + $0xc0] sm:$0xff]   ;;  %v1095_v39 = vld [vmem:[%s1456_s1 + $0x110] sm:$0xff]  }
   0xb   :  { %v1076_v26 = vld [vmem:[%s1456_s1 + $0x8] sm:$0xff]   ;;  %v1080_v30 = vld [vmem:[%s1456_s1] sm:$0xff]   ;;  %v1098_v43 = vld [vmem:[%s1457_s0 + $0x5c] ss:$20 sps:$4 sm:$0xff]  }
   0xc   :  { %940 = vmatpush3.bf16.msra.mxu0 %v1060_v10  ;;  %v1077_v27 = vld [vmem:[%s1456_s1 + $0x88] sm:$0xff]   ;;  %v1081_v31 = vld [vmem:[%s1456_s1 + $0x80] sm:$0xff]   ;;  %v1103_v48 = vld [vmem:[%s1457_s0 + $0x7c] ss:$20 sps:$4 sm:$0xff]  }
   0xd   :  { %980 = vmatpush3.bf16.msra.mxu1 %v1061_v11  ;;  %941 = vmatprep.subr.bf16.mxu0 %v1062_v12  ;;  %v1082_v32 = vld [vmem:[%s1457_s0] ss:$20 sps:$4 sm:$0xff]   ;;  %v1084_v33 = vld [vmem:[%s1457_s0 + $0x4] ss:$20 sps:$4 sm:$0xff]   ;;  %v1085_v34 = vld [vmem:[%s1457_s0 + $0x8] ss:$20 sps:$4 sm:$0xff]  }
   0xe   :  { %981 = vmatprep.subr.bf16.mxu1 %v1063_v13  ;;  %v1087_v35 = vld [vmem:[%s1457_s0 + $0xc] ss:$20 sps:$4 sm:$0xff]   ;;  %475 = vmatprep.mubr.bf16.mxu0 %v1084_v33  ;;  %v1091_v38 = vld [vmem:[%s1457_s0 + $0x34] ss:$20 sps:$4 sm:$0xff]   ;;  %v1094_v41 = vld [vmem:[%s1457_s0 + $0x30] ss:$20 sps:$4 sm:$0xff]  }
   0xf   :  { %540 = vmatprep.mubr.bf16.mxu1 %v1087_v35  ;;  %v1089_v37 = vld [vmem:[%s1457_s0 + $0x2c] ss:$20 sps:$4 sm:$0xff]   ;;  %v1093_v40 = vld [vmem:[%s1457_s0 + $0x28] ss:$20 sps:$4 sm:$0xff]   ;;  %v1100_v46 = vld [vmem:[%s1457_s0 + $0x50] ss:$20 sps:$4 sm:$0xff]  }
  0x10   :  { %942 = vmatpush3.bf16.msra.mxu0 %v1064_v14  ;;  %v1096_v42 = vld [vmem:[%s1457_s0 + $0x54] ss:$20 sps:$4 sm:$0xff]   ;;  %v1109_v45 = vld [vmem:[%s1456_s1 + $0x100] sm:$0xff]   ;;  %v1101_v47 = vld [vmem:[%s1457_s0 + $0x58] ss:$20 sps:$4 sm:$0xff]  }
  0x11   :  { %982 = vmatpush3.bf16.msra.mxu1 %v1065_v15  ;;  %943 = vmatprep.subr.bf16.mxu0 %v1066_v16  ;;  %v1102_v44 = vld [vmem:[%s1456_s1 + $0x108] sm:$0xff]   ;;  %v1105_v49 = vld [vmem:[%s1457_s0 + $0x84] ss:$20 sps:$4 sm:$0xff]   ;;  %v1108_v51 = vld [vmem:[%s1457_s0 + $0x80] ss:$20 sps:$4 sm:$0xff]  }
  0x12   :  { %983 = vmatprep.subr.bf16.mxu1 %v1067_v17  ;;  %v1107_v50 = vld [vmem:[%s1457_s0 + $0x78] ss:$20 sps:$4 sm:$0xff]   ;;  %v1110_v52 = vld [vmem:[%s1457_s0 + $0x10] ss:$20 sps:$4 sm:$0xff]   ;;  %v1111_v53 = vld [vmem:[%s1457_s0 + $0x60] ss:$20 sps:$4 sm:$0xff]  }
  0x13   :  { %v1112_v54 = vld [vmem:[%s1457_s0 + $0x38] ss:$20 sps:$4 sm:$0xff]   ;;  %v1113_v55 = vld [vmem:[%s1457_s0 + $0x88] ss:$20 sps:$4 sm:$0xff]  }
  0x14   :  { %944 = vmatpush3.bf16.msra.mxu0 %v1068_v18 }
  0x15   :  { %984 = vmatpush3.bf16.msra.mxu1 %v1069_v19  ;;  %945 = vmatprep.subr.bf16.mxu0 %v1070_v20 }
  0x16   :  { %985 = vmatprep.subr.bf16.mxu1 %v1071_v21 }
  0x18   :  { %946 = vmatpush3.bf16.msra.mxu0 %v1072_v22 }
  0x19   :  { %986 = vmatpush3.bf16.msra.mxu1 %v1073_v23  ;;  %947 = vmatprep.subr.bf16.mxu0 %v1074_v24 }
  0x1a   :  { %987 = vmatprep.subr.bf16.mxu1 %v1075_v25 }
  0x1c   :  { %948 = vmatpush3.bf16.msra.mxu0 %v1076_v26 }
  0x1d   :  { %988 = vmatpush3.bf16.msra.mxu1 %v1077_v27  ;;  %949 = vmatprep.subr.bf16.mxu0 %v1078_v28 }
  0x1e   :  { %989 = vmatprep.subr.bf16.mxu1 %v1079_v29 }
  0x20   :  { %950 = vmatpush3.bf16.msra.mxu0 %v1080_v30 }
  0x21   :  { %990 = vmatpush3.bf16.msra.mxu1 %v1081_v31  ;;  %1023 = vmatprep.subr.bf16.mxu0 %v1088_v36 }
  0x22   :  { %1039 = vmatprep.subr.bf16.mxu1 %v1088_v36 }
  0x23   :  { %476 = vmatmul.mubr.bf16.vlgmr.msra.gmra.mxu0 %v1082_v32 }
  0x24   :  { %541 = vmatmul.mubr.bf16.vlgmr.msra.gmra.mxu1 %v1085_v34  ;;  %1024 = vmatpush3.bf16.msra.mxu0 %v1088_v36 }
  0x25   :  { %1043 = vmatpush3.bf16.msra.mxu1 %v1088_v36  ;;  %483 = vmatprep.mubr.bf16.mxu0 %v1089_v37 }
  0x26   :  { %548 = vmatprep.mubr.bf16.mxu1 %v1091_v38  ;;  %1025 = vmatprep.subr.bf16.mxu0 %v1095_v39 }
  0x27   :  { %1040 = vmatprep.subr.bf16.mxu1 %v1095_v39 }
  0x28   :  { %1026 = vmatpush3.bf16.msra.mxu0 %v1095_v39 }
  0x29   :  { %1044 = vmatpush3.bf16.msra.mxu1 %v1095_v39  ;;  %1027 = vmatprep.subr.bf16.mxu0 %v1102_v44 }
  0x2a   :  { %1041 = vmatprep.subr.bf16.mxu1 %v1102_v44 }
  0x2b   :  { %484 = vmatmul.mubr.bf16.gmra.mxu0 %v1093_v40 }
  0x2c   :  { %549 = vmatmul.mubr.bf16.gmra.mxu1 %v1094_v41  ;;  %491 = vmatprep.mubr.bf16.mxu0 %v1096_v42 }
  0x2d   :  { %556 = vmatprep.mubr.bf16.mxu1 %v1098_v43  ;;  %1028 = vmatpush3.bf16.msra.mxu0 %v1102_v44 }
  0x2e   :  { %1045 = vmatpush3.bf16.msra.mxu1 %v1102_v44  ;;  %1029 = vmatprep.subr.bf16.mxu0 %v1109_v45 }
  0x2f   :  { %1042 = vmatprep.subr.bf16.mxu1 %v1109_v45 }
  0x31   :  { %1030 = vmatpush3.bf16.msra.mxu0 %v1109_v45 }
  0x32   :  { %1046 = vmatpush3.bf16.msra.mxu1 %v1109_v45 }
  0x33   :  { %492 = vmatmul.mubr.bf16.gmra.mxu0 %v1100_v46 }
  0x34   :  { %557 = vmatmul.mubr.bf16.gmra.mxu1 %v1101_v47  ;;  %499 = vmatprep.mubr.bf16.mxu0 %v1103_v48 }
  0x35   :  { %564 = vmatprep.mubr.bf16.mxu1 %v1105_v49 }
  0x3b   :  { %500 = vmatmul.mubr.bf16.gmra.mxu0 %v1107_v50 }
  0x3c   :  { %565 = vmatmul.mubr.bf16.gmra.mxu1 %v1108_v51  ;;  %1031 = vmatprep.mubr.msk.bf16.mxu0 %vm430_vm0, %v1110_v52 }
  0x3d   :  { %1035 = vmatprep.mubr.msk.bf16.mxu1 %vm430_vm0, %v1111_v53 }
  0x43   :  { %1032 = vmatmul.mubr.msk.bf16.vlgmr.msra.gmra.mxu0 %vm430_vm0, %v1112_v54 }
  0x44   :  { %1036 = vmatmul.mubr.msk.bf16.vlgmr.msra.gmra.mxu1 %vm430_vm0, %v1113_v55 }
  0xe3   :  { %v951_v56 = vpop.f32.mrf.mxu0 }
  0xe4   :  { %v991_v57 = vpop.f32.mrf.mxu1 }
  0xe5   :  { %v952_v58 = vpop.f32.mrf.mxu0 }
  0xe6   :  { %v992_v59 = vpop.f32.mrf.mxu1  ;;  %v953_v23 = vadd.f32 %v952_v58, %v951_v56 }
  0xe7   :  { %v954_v60 = vpop.f32.mrf.mxu0  ;;  %v993_v24 = vadd.f32 %v992_v59, %v991_v57 }
  0xe8   :  { %v994_v61 = vpop.f32.mrf.mxu1 }
  0xe9   :  { %v955_v62 = vpop.f32.mrf.mxu0  ;;  %v543_v36 = vadd.f32 %v993_v24, %v953_v23 }
  0xea   :  { %v995_v63 = vpop.f32.mrf.mxu1  ;;  %v956_v37 = vadd.f32 %v955_v62, %v954_v60 }
  0xeb   :  { %v957_v0 = vpop.f32.mrf.mxu0  ;;  %v996_v38 = vadd.f32 %v995_v63, %v994_v61 }
  0xec   :  { %v997_v1 = vpop.f32.mrf.mxu1 }
  0xed   :  { %v958_v2 = vpop.f32.mrf.mxu0  ;;  %v546_v58 = vadd.f32 %v996_v38, %v956_v37 }
  0xee   :  { %v998_v3 = vpop.f32.mrf.mxu1  ;;  %v959_v18 = vadd.f32 %v958_v2, %v957_v0 }
  0xef   :  { %v960_v4 = vpop.f32.mrf.mxu0  ;;  %v999_v19 = vadd.f32 %v998_v3, %v997_v1 }
  0xf0   :  { %v1000_v5 = vpop.f32.mrf.mxu1 }
  0xf1   :  { %v961_v6 = vpop.f32.mrf.mxu0  ;;  %v551_v27 = vadd.f32 %v999_v19, %v959_v18 }
  0xf2   :  { %v1001_v7 = vpop.f32.mrf.mxu1  ;;  %v962_v28 = vadd.f32 %v961_v6, %v960_v4 }
  0xf3   :  { %v963_v8 = vpop.f32.mrf.mxu0  ;;  %v1002_v29 = vadd.f32 %v1001_v7, %v1000_v5 }
  0xf4   :  { %v1003_v9 = vpop.f32.mrf.mxu1 }
  0xf5   :  { %v964_v10 = vpop.f32.mrf.mxu0  ;;  %v554_v45 = vadd.f32 %v1002_v29, %v962_v28 }
  0xf6   :  { %v1004_v11 = vpop.f32.mrf.mxu1  ;;  %v965_v30 = vadd.f32 %v964_v10, %v963_v8  ;;  %v1118_v8 = vmov 0  }
  0xf7   :  { %v966_v12 = vpop.f32.mrf.mxu0  ;;  %v1005_v31 = vadd.f32 %v1004_v11, %v1003_v9  ;;  %1049 = vset.pattern.permute.xlu1 %v1118_v8  ;;  %1048 = vset.pattern.permute.xlu0 %v1118_v8 }
  0xf8   :  { %v1006_v13 = vpop.f32.mrf.mxu1 }
  0xf9   :  { %v967_v14 = vpop.f32.mrf.mxu0  ;;  %v559_v43 = vadd.f32 %v1005_v31, %v965_v30 }
  0xfa   :  { %v1007_v15 = vpop.f32.mrf.mxu1  ;;  %v968_v39 = vadd.f32 %v967_v14, %v966_v12 }
  0xfb   :  { %v969_v16 = vpop.f32.mrf.mxu0  ;;  %v1008_v40 = vadd.f32 %v1007_v15, %v1006_v13 }
  0xfc   :  { %v1009_v17 = vpop.f32.mrf.mxu1 }
  0xfd   :  { %v970_v20 = vpop.f32.mrf.mxu0  ;;  %v562_v55 = vadd.f32 %v1008_v40, %v968_v39 }
  0xfe   :  { %v1010_v21 = vpop.f32.mrf.mxu1  ;;  %v971_v56 = vadd.f32 %v970_v20, %v969_v16 }
  0xff   :  { %v972_v22 = vpop.f32.mrf.mxu0  ;;  %v1011_v57 = vadd.f32 %v1010_v21, %v1009_v17 }
 0x100   :  { %v1012_v25 = vpop.f32.mrf.mxu1 }
 0x101   :  { %v973_v26 = vpop.f32.mrf.mxu0  ;;  %v567_v1 = vadd.f32 %v1011_v57, %v971_v56  ;;  %v751_v56 = vld [vmem:[%s1458_s2] sm:$0xff]  ;;  %v810_v57 = vld [vmem:[%s1459_s3 + $0x18] sm:$0xff] }
 0x102   :  { %v1013_v32 = vpop.f32.mrf.mxu1  ;;  %v974_v47 = vadd.f32 %v973_v26, %v972_v22 }
 0x103   :  { %v1033_v33 = vpop.f32.mrf.mxu0  ;;  %v1014_v49 = vadd.f32 %v1013_v32, %v1012_v25 }
 0x104   :  { %v1312_v34 = vadd.f32 %v1033_v33, %v551_v27  ;;  %v1037_v35 = vpop.f32.mrf.mxu1 }
 0x105   :  { %v607_v41 = vpop.f32.mrf.mxu0  ;;  %v570_v62 = vadd.f32 %v1014_v49, %v974_v47  ;;  %v632_v4 = vadd.f32 %v1037_v35, %v567_v1  ;;  %v752_v49 = vld [vmem:[%s1458_s2 + $0x8] sm:$0xff] }
 0x106   :  { %v608_v42 = vadd.f32 %v607_v41, %v543_v36  ;;  %v623_v44 = vpop.f32.mrf.mxu1  ;;  %v645_v46 = vsel %vm638_vm1, %v1312_v34, 0.0 }
 0x107   :  { %v1034_v48 = vpop.f32.mrf.mxu0  ;;  %646 = vadd.xlane.f32.xlu1 %v645_v46  ;;  %v624_v50 = vadd.f32 %v623_v44, %v559_v43  ;;  %v657_v7 = vsel %vm638_vm1, %v632_v4, 0.0 }
 0x108   :  { %v1316_v51 = vadd.f32 %v1034_v48, %v554_v45  ;;  %v1038_v52 = vpop.f32.mrf.mxu1  ;;  %v639_v53 = vsel %vm638_vm1, %v608_v42, 0.0 }
 0x109   :  { %v610_v54 = vpop.f32.mrf.mxu0  ;;  %640 = vadd.xlane.f32.xlu0 %v639_v53  ;;  %v651_v0 = vsel %vm638_vm1, %v624_v50, 0.0  ;;  %v635_v2 = vadd.f32 %v1038_v52, %v570_v62  ;;  %v754_v52 = vld [vmem:[%s1458_s2 + $0x18] sm:$0xff]  ;;  %v756_v53 = vld [vmem:[%s1458_s2 + $0x28] sm:$0xff]  ;;  %v807_v62 = vld [vmem:[%s1459_s3] sm:$0xff] }
 0x10a   :  { %v626_v59 = vpop.f32.mrf.mxu1  ;;  %v648_v60 = vsel %vm638_vm1, %v1316_v51, 0.0  ;;  %v611_v63 = vadd.f32 %v610_v54, %v546_v58  ;;  %v758_v54 = vld [vmem:[%s1458_s2 + $0x38] sm:$0xff]  ;;  %v753_v58 = vld [vmem:[%s1458_s2 + $0x10] sm:$0xff] }
 0x10b   :  { %v627_v61 = vadd.f32 %v626_v59, %v562_v55  ;;  %649 = vadd.xlane.f32.xlu1 %v648_v60  ;;  %v660_v6 = vsel %vm638_vm1, %v635_v2, 0.0  ;;  %v808_v55 = vld [vmem:[%s1459_s3 + $0x8] sm:$0xff]  ;;  %v755_v60 = vld [vmem:[%s1458_s2 + $0x20] sm:$0xff] }
 0x10c   :  { %v642_v5 = vsel %vm638_vm1, %v611_v63, 0.0  ;;  %v812_v59 = vld [vmem:[%s1459_s3 + $0x28] sm:$0xff] }
 0x10d   :  { %652 = vadd.xlane.f32.xlu0 %v651_v0  ;;  %v654_v3 = vsel %vm638_vm1, %v627_v61, 0.0  ;;  %v811_v0 = vld [vmem:[%s1459_s3 + $0x20] sm:$0xff] }
 0x10f   :  { %655 = vadd.xlane.f32.xlu1 %v654_v3 }
 0x111   :  { %643 = vadd.xlane.f32.xlu0 %v642_v5 }
 0x113   :  { %661 = vadd.xlane.f32.xlu1 %v660_v6 }
 0x115   :  { %658 = vadd.xlane.f32.xlu0 %v657_v7 }
 0x190   :  { %v647_v9 = vpop.xlane.xlu1 %646 }
 0x192   :  { %v641_v10 = vpop.xlane.xlu0 %640 }
 0x193   :  { %v663_v15 = vadd.f32 %v647_v9, %v641_v10 }
 0x194   :  { %v650_v11 = vpop.xlane.xlu1 %649 }
 0x196   :  { %v653_v12 = vpop.xlane.xlu0 %652 }
 0x197   :  { %v665_v17 = vadd.f32 %v663_v15, %v653_v12 }
 0x198   :  { %v656_v13 = vpop.xlane.xlu1 %655 }
 0x19a   :  { %v644_v14 = vpop.xlane.xlu0 %643 }
 0x19b   :  { %v664_v16 = vadd.f32 %v650_v11, %v644_v14 }
 0x19c   :  { %v662_v19 = vpop.xlane.xlu1 %661 }
 0x19d   :  { %v666_v18 = vadd.f32 %v664_v16, %v656_v13 }
 0x19e   :  { %v659_v20 = vpop.xlane.xlu0 %658 }
 0x19f   :  { %v668_v21 = vadd.f32 %v666_v18, %v662_v19  ;;  %v667_v22 = vadd.f32 %v665_v17, %v659_v20  ;;  %v814_v20 = vld [vmem:[%s1459_s3 + $0x38] sm:$0xff] }
 0x1a1   :  { %v670_v23 = vmul.f32 0.0078125, %v668_v21  ;;  %v669_v24 = vmul.f32 0.0078125, %v667_v22  ;;  %v813_v22 = vld [vmem:[%s1459_s3 + $0x30] sm:$0xff] }
 0x1a3   :  { %678 = vperm.xlu1 %1049, %v670_v23   ;;  %673 = vperm.xlu0 %1048, %v669_v24  }
 0x21e   :  { %v679_v25 = vpop.permute.xlu1 %678  ;;  %v674_v26 = vpop.permute.xlu0 %673 }
 0x21f   :  { %v1326_v27 = vsub.f32 %v611_v63, %v679_v25  ;;  %v1328_v28 = vsub.f32 %v608_v42, %v674_v26  ;;  %v1331_v29 = vsub.f32 %v1312_v34, %v674_v26  ;;  %v1341_v36 = vsub.f32 %v624_v50, %v674_v26  ;;  %v809_v63 = vld [vmem:[%s1459_s3 + $0x10] sm:$0xff] }
 0x220   :  { %v1346_v38 = vsub.f32 %v632_v4, %v674_v26  ;;  %v1352_v41 = vsub.f32 %v1316_v51, %v679_v25  ;;  %v1357_v44 = vsub.f32 %v627_v61, %v679_v25  ;;  %v1362_v47 = vsub.f32 %v635_v2, %v679_v25  ;;  %v757_v61 = vld [vmem:[%s1458_s2 + $0x30] sm:$0xff] }
 0x221   :  { %v690_v30 = vmul.f32 %v1326_v27, %v1326_v27  ;;  %v689_v31 = vmul.f32 %v1328_v28, %v1328_v28  ;;  %v691_v35 = vmul.f32 %v1331_v29, %v1331_v29  ;;  %v693_v37 = vmul.f32 %v1341_v36, %v1341_v36 }
 0x222   :  { %v695_v40 = vmul.f32 %v1346_v38, %v1346_v38  ;;  %v692_v43 = vmul.f32 %v1352_v41, %v1352_v41  ;;  %v694_v46 = vmul.f32 %v1357_v44, %v1357_v44  ;;  %v696_v50 = vmul.f32 %v1362_v47, %v1362_v47 }
 0x223   :  { %v700_v32 = vsel %vm638_vm1, %v690_v30, 0.0  ;;  %v697_v33 = vsel %vm638_vm1, %v689_v31, 0.0  ;;  %v703_v34 = vsel %vm638_vm1, %v691_v35, 0.0  ;;  %v709_v39 = vsel %vm638_vm1, %v693_v37, 0.0 }
 0x224   :  { %701 = vadd.xlane.f32.xlu0 %v700_v32  ;;  %698 = vadd.xlane.f32.xlu1 %v697_v33  ;;  %v715_v42 = vsel %vm638_vm1, %v695_v40, 0.0  ;;  %v706_v45 = vsel %vm638_vm1, %v692_v43, 0.0  ;;  %v712_v48 = vsel %vm638_vm1, %v694_v46, 0.0  ;;  %v718_v51 = vsel %vm638_vm1, %v696_v50, 0.0 }
 0x228   :  { %704 = vadd.xlane.f32.xlu1 %v703_v34 }
 0x22c   :  { %710 = vadd.xlane.f32.xlu1 %v709_v39 }
 0x230   :  { %716 = vadd.xlane.f32.xlu1 %v715_v42 }
 0x234   :  { %707 = vadd.xlane.f32.xlu1 %v706_v45 }
 0x238   :  { %713 = vadd.xlane.f32.xlu1 %v712_v48 }
 0x23a   :  { %766 = vperm.xlu0 %1048, %v752_v49  }
 0x23c   :  { %719 = vadd.xlane.f32.xlu1 %v718_v51 }
 0x23e   :  { %776 = vperm.xlu0 %1048, %v754_v52  }
 0x242   :  { %786 = vperm.xlu0 %1048, %v756_v53  }
 0x246   :  { %796 = vperm.xlu0 %1048, %v758_v54  }
 0x24a   :  { %822 = vperm.xlu0 %1048, %v808_v55  }
 0x24d   :  { %761 = vperm.xlu1 %1049, %v751_v56  }
 0x24e   :  { %832 = vperm.xlu0 %1048, %v810_v57  }
 0x251   :  { %771 = vperm.xlu1 %1049, %v753_v58  }
 0x252   :  { %842 = vperm.xlu0 %1048, %v812_v59  }
 0x255   :  { %781 = vperm.xlu1 %1049, %v755_v60  }
 0x259   :  { %791 = vperm.xlu1 %1049, %v757_v61  }
 0x25d   :  { %817 = vperm.xlu1 %1049, %v807_v62  }
 0x261   :  { %827 = vperm.xlu1 %1049, %v809_v63  }
 0x265   :  { %837 = vperm.xlu1 %1049, %v811_v0  }
 0x2ad   :  { %v699_v1 = vpop.xlane.xlu1 %698  ;;  %v702_v11 = vpop.xlane.xlu0 %701 }
 0x2b1   :  { %v705_v2 = vpop.xlane.xlu1 %704 }
 0x2b2   :  { %v721_v4 = vadd.f32 %v705_v2, %v699_v1 }
 0x2b5   :  { %v711_v3 = vpop.xlane.xlu1 %710  ;;  %v767_v23 = vpop.permute.xlu0 %766 }
 0x2b6   :  { %v723_v5 = vadd.f32 %v721_v4, %v711_v3 }
 0x2b9   :  { %v717_v6 = vpop.xlane.xlu1 %716  ;;  %v777_v24 = vpop.permute.xlu0 %776 }
 0x2ba   :  { %v725_v7 = vadd.f32 %v723_v5, %v717_v6 }
 0x2bc   :  { %v727_v8 = vmul.f32 0.0078125, %v725_v7 }
 0x2bd   :  { %v708_v9 = vpop.xlane.xlu1 %707  ;;  %v787_v26 = vpop.permute.xlu0 %786 }
 0x2be   :  { %v729_v10 = vadd.f32 1e-05, %v727_v8  ;;  %v722_v13 = vadd.f32 %v708_v9, %v702_v11 }
 0x2c0   :  { %1114 = vrsqrt.f32 %v729_v10 }
 0x2c1   :  { %v714_v12 = vpop.xlane.xlu1 %713  ;;  %v797_v31 = vpop.permute.xlu0 %796 }
 0x2c2   :  { %v724_v14 = vadd.f32 %v722_v13, %v714_v12 }
 0x2c5   :  { %v720_v15 = vpop.xlane.xlu1 %719  ;;  %v823_v33 = vpop.permute.xlu0 %822 }
 0x2c6   :  { %v726_v16 = vadd.f32 %v724_v14, %v720_v15 }
 0x2c8   :  { %v728_v17 = vmul.f32 0.0078125, %v726_v16 }
 0x2c9   :  { %v762_v25 = vpop.permute.xlu1 %761  ;;  %v833_v34 = vpop.permute.xlu0 %832 }
 0x2ca   :  { %v730_v18 = vadd.f32 1e-05, %v728_v17 }
 0x2cc   :  { %1116 = vrsqrt.f32 %v730_v18 }
 0x2cd   :  { %v1115_v19 = vpop.eup %1114  ;;  %v772_v30 = vpop.permute.xlu1 %771 }
 0x2ce   :  { %735 = vperm.xlu0 %1048, %v1115_v19   ;;  %v843_v39 = vpop.permute.xlu0 %842 }
 0x2d1   :  { %v782_v32 = vpop.permute.xlu1 %781 }
 0x2d2   :  { %852 = vperm.xlu0 %1048, %v814_v20  }
 0x2d5   :  { %v792_v35 = vpop.permute.xlu1 %791 }
 0x2d9   :  { %v1117_v21 = vpop.eup %1116  ;;  %v818_v37 = vpop.permute.xlu1 %817 }
 0x2da   :  { %740 = vperm.xlu1 %1049, %v1117_v21  }
 0x2dd   :  { %v828_v40 = vpop.permute.xlu1 %827 }
 0x2de   :  { %847 = vperm.xlu1 %1049, %v813_v22  }
 0x2e1   :  { %v838_v51 = vpop.permute.xlu1 %837 }
 0x349   :  { %v736_v42 = vpop.permute.xlu0 %735 }
 0x34a   :  { %v743_v43 = vmul.f32 %v736_v42, %v1328_v28  ;;  %v745_v45 = vmul.f32 %v736_v42, %v1331_v29  ;;  %v747_v46 = vmul.f32 %v736_v42, %v1341_v36  ;;  %v749_v29 = vmul.f32 %v736_v42, %v1346_v38 }
 0x34c   :  { %v799_v48 = vmul.f32 %v762_v25, %v743_v43  ;;  %v801_v49 = vmul.f32 %v772_v30, %v745_v45  ;;  %v803_v50 = vmul.f32 %v782_v32, %v747_v46  ;;  %v805_v0 = vmul.f32 %v792_v35, %v749_v29 }
 0x34d   :  { %v853_v62 = vpop.permute.xlu0 %852 }
 0x34e   :  { %v855_v52 = vadd.f32 %v818_v37, %v799_v48  ;;  %v857_v53 = vadd.f32 %v828_v40, %v801_v49  ;;  %v859_v54 = vadd.f32 %v838_v51, %v803_v50 }
 0x350   :  { %863 = vst.msk [vmem:[%s1460_s4] sm:$0xff] %vm638_vm1, %v855_v52  ;;  %865 = vst.msk [vmem:[%s1460_s4 + $0x10] sm:$0xff] %vm638_vm1, %v857_v53 }
 0x351   :  { %867 = vst.msk [vmem:[%s1460_s4 + $0x20] sm:$0xff] %vm638_vm1, %v859_v54 }
 0x355   :  { %v741_v28 = vpop.permute.xlu1 %740 }
 0x356   :  { %v744_v36 = vmul.f32 %v741_v28, %v1326_v27  ;;  %v746_v55 = vmul.f32 %v741_v28, %v1352_v41  ;;  %v748_v56 = vmul.f32 %v741_v28, %v1357_v44  ;;  %v750_v57 = vmul.f32 %v741_v28, %v1362_v47 }
 0x358   :  { %v800_v58 = vmul.f32 %v767_v23, %v744_v36  ;;  %v802_v59 = vmul.f32 %v777_v24, %v746_v55  ;;  %v804_v60 = vmul.f32 %v787_v26, %v748_v56  ;;  %v806_v61 = vmul.f32 %v797_v31, %v750_v57 }
 0x359   :  { %v848_v63 = vpop.permute.xlu1 %847 }
 0x35a   :  { %v856_v1 = vadd.f32 %v823_v33, %v800_v58  ;;  %v858_v2 = vadd.f32 %v833_v34, %v802_v59  ;;  %v860_v3 = vadd.f32 %v843_v39, %v804_v60  ;;  %v862_v4 = vadd.f32 %v853_v62, %v806_v61 }
 0x35b   :  { %v861_v38 = vadd.f32 %v848_v63, %v805_v0 }
 0x35c   :  { %864 = vst.msk [vmem:[%s1460_s4 + $0x8] sm:$0xff] %vm638_vm1, %v856_v1  ;;  %866 = vst.msk [vmem:[%s1460_s4 + $0x18] sm:$0xff] %vm638_vm1, %v858_v2 }
 0x35d   :  { %868 = vst.msk [vmem:[%s1460_s4 + $0x28] sm:$0xff] %vm638_vm1, %v860_v3  ;;  %870 = vst.msk [vmem:[%s1460_s4 + $0x38] sm:$0xff] %vm638_vm1, %v862_v4 }
 0x35e   :  { %869 = vst.msk [vmem:[%s1460_s4 + $0x30] sm:$0xff] %vm638_vm1, %v861_v38 }

// kernel: unet_forward.8
= control target key start
LH: loop header
LB: loop body
LE: loop exit
PB: predicated region body
PF: predicated region fallthrough
CT: control target
= control target key end

     0   :  { %vm263_vm0 = vcmask 130048   ;;  %vm3230_vm1 = vcmask 261120   ;;  %vm7117_vm2 = vcmask 64512   ;;  %vm7604_vm3 = vcmask 523264   ;;  %s23830_s2 = inlined_call_operand.vmem [shape: f32[16,128,32], index: 2, kind: input, shape index: {}]   ;;  %s23831_s0 = inlined_call_operand.vmem [shape: f32[16,128], index: 0, kind: input, shape index: {}]   ;;  %s23832_s1 = inlined_call_operand.vmem [shape: f32[16,32,16], index: 1, kind: input, shape index: {}]   ;;  %s23833_s3 = inlined_call_operand.vmem [shape: f32[32,1], index: 3, kind: input, shape index: {}]   ;;  %s23834_s4 = inlined_call_operand.vmem [shape: f32[32,1], index: 4, kind: input, shape index: {}]   ;;  %s23835_s7 = inlined_call_operand.vmem [shape: f32[64,1], index: 7, kind: input, shape index: {}]   ;;  %s23836_s8 = inlined_call_operand.vmem [shape: f32[64,1], index: 8, kind: input, shape index: {}]   ;;  %s23837_s6 = inlined_call_operand.vmem [shape: f32[16,32,8], index: 6, kind: input, shape index: {}]   ;;  %s23838_s20 = inlined_call_operand.vmem [shape: f32[64,32], index: 20, kind: output, shape index: {}]   ;;  %s23839_s5 = inlined_call_operand.vmem [shape: f32[16,64,32], index: 5, kind: input, shape index: {}]   ;;  %s23840_s11 = inlined_call_operand.vmem [shape: f32[64,1], index: 11, kind: input, shape index: {}]   ;;  %s23841_s10 = inlined_call_operand.vmem [shape: f32[4,8,2], index: 10, kind: input, shape index: {}]   ;;  %s23842_s14 = inlined_call_operand.vmem [shape: f32[64,1], index: 14, kind: input, shape index: {}]   ;;  %s23843_s15 = inlined_call_operand.vmem [shape: f32[64,1], index: 15, kind: input, shape index: {}]   ;;  %s23844_s9 = inlined_call_operand.vmem [shape: f32[4,64,64], index: 9, kind: input, shape index: {}]   ;;  %s23845_s13 = inlined_call_operand.vmem [shape: f32[4,2,8], index: 13, kind: input, shape index: {}]   ;;  %s23846_s12 = inlined_call_operand.vmem [shape: f32[4,64,64], index: 12, kind: input, shape index: {}]   ;;  %s23847_s17 = inlined_call_operand.vmem [shape: f32[16,8,32], index: 17, kind: input, shape index: {}]   ;;  %s23848_s16 = inlined_call_operand.vmem [shape: f32[16,32,128], index: 16, kind: input, shape index: {}]   ;;  %s23849_s18 = inlined_call_operand.vmem [shape: f32[32,1], index: 18, kind: input, shape index: {}]   ;;  %s23850_s19 = inlined_call_operand.vmem [shape: f32[32,1], index: 19, kind: input, shape index: {}]  }
   0x1   :  { %23856 = sst [smem:[#allocation9_spill]] %s23830_s2  ;;  %vm8459_vm4 = vcmask 1041408   ;;  %vm8434_vm5 = vcmask 15360  }
   0x2   :  { %23857 = sst [smem:[#allocation10_spill]] %s23831_s0 }
   0x3   :  { %23858 = sst [smem:[#allocation11_spill]] %s23832_s1 }
   0x4   :  { %23859 = sst [smem:[#allocation12_spill]] %s23833_s3 }
   0x5   :  { %23860 = sst [smem:[#allocation13_spill]] %s23834_s4 }
   0x6   :  { %s23861_s23 = sld [smem:[#allocation9_spill]] }
   0x7   :  { %s23862_s28 = sld [smem:[#allocation10_spill]] }
   0x8   :  { %s23863_s3 = sld [smem:[#allocation11_spill]] }
   0x9   :  { %s23864_s22 = sld [smem:[#allocation12_spill]] }
   0xa   :  { %s23865_s27 = sld [smem:[#allocation13_spill]] }
   0xc   :  { %v86_v0 = vld [vmem:[%s23861_s23 + $0x78] sm:$0xff]  ;;  %v85_v2 = vld [vmem:[%s23861_s23 + $0x70] sm:$0xff]  ;;  %v84_v4 = vld [vmem:[%s23861_s23 + $0x68] sm:$0xff] }
   0xd   :  { %v13726_v1 = vld [vmem:[%s23861_s23 + $0xf8] sm:$0xff]  ;;  %16460 = vmatprep.subr.mxu0 %v86_v0  ;;  %v13725_v3 = vld [vmem:[%s23861_s23 + $0xf0] sm:$0xff]  ;;  %v13724_v5 = vld [vmem:[%s23861_s23 + $0xe8] sm:$0xff] }
   0xe   :  { %16495 = vmatprep.subr.mxu1 %v13726_v1  ;;  %16461 = vmatpush3.msra.mxu0 %v86_v0  ;;  %v83_v6 = vld [vmem:[%s23861_s23 + $0x60] sm:$0xff]  ;;  %v82_v8 = vld [vmem:[%s23861_s23 + $0x58] sm:$0xff]  ;;  %v81_v10 = vld [vmem:[%s23861_s23 + $0x50] sm:$0xff] }
   0xf   :  { %16496 = vmatpush3.msra.mxu1 %v13726_v1  ;;  %16462 = vmatprep.subr.mxu0 %v85_v2  ;;  %v13723_v7 = vld [vmem:[%s23861_s23 + $0xe0] sm:$0xff]  ;;  %v13722_v9 = vld [vmem:[%s23861_s23 + $0xd8] sm:$0xff]  ;;  %v13721_v11 = vld [vmem:[%s23861_s23 + $0xd0] sm:$0xff] }
  0x10   :  { %16497 = vmatprep.subr.mxu1 %v13725_v3  ;;  %16463 = vmatpush3.msra.mxu0 %v85_v2  ;;  %v80_v12 = vld [vmem:[%s23861_s23 + $0x48] sm:$0xff]  ;;  %v79_v14 = vld [vmem:[%s23861_s23 + $0x40] sm:$0xff]  ;;  %v78_v16 = vld [vmem:[%s23861_s23 + $0x38] sm:$0xff] }
  0x11   :  { %16498 = vmatpush3.msra.mxu1 %v13725_v3  ;;  %16464 = vmatprep.subr.mxu0 %v84_v4  ;;  %v13720_v13 = vld [vmem:[%s23861_s23 + $0xc8] sm:$0xff]  ;;  %v13719_v15 = vld [vmem:[%s23861_s23 + $0xc0] sm:$0xff]  ;;  %v13718_v17 = vld [vmem:[%s23861_s23 + $0xb8] sm:$0xff] }
  0x12   :  { %16499 = vmatprep.subr.mxu1 %v13724_v5  ;;  %16465 = vmatpush3.msra.mxu0 %v84_v4  ;;  %v77_v18 = vld [vmem:[%s23861_s23 + $0x30] sm:$0xff]  ;;  %v76_v20 = vld [vmem:[%s23861_s23 + $0x28] sm:$0xff]  ;;  %v75_v22 = vld [vmem:[%s23861_s23 + $0x20] sm:$0xff] }
  0x13   :  { %16500 = vmatpush3.msra.mxu1 %v13724_v5  ;;  %16466 = vmatprep.subr.mxu0 %v83_v6  ;;  %v13717_v19 = vld [vmem:[%s23861_s23 + $0xb0] sm:$0xff]  ;;  %v13716_v21 = vld [vmem:[%s23861_s23 + $0xa8] sm:$0xff]  ;;  %v13715_v23 = vld [vmem:[%s23861_s23 + $0xa0] sm:$0xff] }
  0x14   :  { %16501 = vmatprep.subr.mxu1 %v13723_v7  ;;  %16467 = vmatpush3.msra.mxu0 %v83_v6  ;;  %v65_v24 = vld [vmem:[%s23862_s28] sm:$0xff]  ;;  %v74_v25 = vld [vmem:[%s23861_s23 + $0x18] sm:$0xff]  ;;  %v66_v27 = vld [vmem:[%s23862_s28 + $0x8] sm:$0xff] }
  0x15   :  { %16502 = vmatpush3.msra.mxu1 %v13723_v7  ;;  %16468 = vmatprep.subr.mxu0 %v82_v8  ;;  %v13714_v26 = vld [vmem:[%s23861_s23 + $0x98] sm:$0xff]  ;;  %v73_v28 = vld [vmem:[%s23861_s23 + $0x10] sm:$0xff]  ;;  %v67_v30 = vmul.f32 0.2, %v65_v24  ;;  %v72_v31 = vld [vmem:[%s23861_s23 + $0x8] sm:$0xff] }
  0x16   :  { %16503 = vmatprep.subr.mxu1 %v13722_v9  ;;  %16469 = vmatpush3.msra.mxu0 %v82_v8  ;;  %v13713_v29 = vld [vmem:[%s23861_s23 + $0x90] sm:$0xff]  ;;  %v13712_v32 = vld [vmem:[%s23861_s23 + $0x88] sm:$0xff]  ;;  %v68_v33 = vmul.f32 0.2, %v66_v27  ;;  %v71_v34 = vld [vmem:[%s23861_s23] sm:$0xff] }
  0x17   :  { %16504 = vmatpush3.msra.mxu1 %v13722_v9  ;;  %16470 = vmatprep.subr.mxu0 %v81_v10  ;;  %v13711_v35 = vld [vmem:[%s23861_s23 + $0x80] sm:$0xff]  ;;  %v19343_v36 = vmax.f32 %v65_v24, %v67_v30  ;;  %v13754_v38 = vld [vmem:[%s23861_s23 + $0x178] sm:$0xff]  ;;  %v13753_v39 = vld [vmem:[%s23861_s23 + $0x170] sm:$0xff] }
  0x18   :  { %16505 = vmatprep.subr.mxu1 %v13721_v11  ;;  %16471 = vmatpush3.msra.mxu0 %v81_v10  ;;  %v19345_v37 = vmax.f32 %v66_v27, %v68_v33  ;;  %v13752_v40 = vld [vmem:[%s23861_s23 + $0x168] sm:$0xff]  ;;  %v13751_v41 = vld [vmem:[%s23861_s23 + $0x160] sm:$0xff]  ;;  %v13750_v42 = vld [vmem:[%s23861_s23 + $0x158] sm:$0xff] }
  0x19   :  { %16506 = vmatpush3.msra.mxu1 %v13721_v11  ;;  %16472 = vmatprep.subr.mxu0 %v80_v12  ;;  %v13749_v43 = vld [vmem:[%s23861_s23 + $0x150] sm:$0xff]  ;;  %v13748_v44 = vld [vmem:[%s23861_s23 + $0x148] sm:$0xff]  ;;  %v13747_v45 = vld [vmem:[%s23861_s23 + $0x140] sm:$0xff] }
  0x1a   :  { %16507 = vmatprep.subr.mxu1 %v13720_v13  ;;  %16473 = vmatpush3.msra.mxu0 %v80_v12  ;;  %v13746_v46 = vld [vmem:[%s23861_s23 + $0x138] sm:$0xff]  ;;  %v13745_v47 = vld [vmem:[%s23861_s23 + $0x130] sm:$0xff]  ;;  %v13744_v48 = vld [vmem:[%s23861_s23 + $0x128] sm:$0xff] }
  0x1b   :  { %16508 = vmatpush3.msra.mxu1 %v13720_v13  ;;  %16474 = vmatprep.subr.mxu0 %v79_v14  ;;  %v13743_v49 = vld [vmem:[%s23861_s23 + $0x120] sm:$0xff]  ;;  %v13742_v50 = vld [vmem:[%s23861_s23 + $0x118] sm:$0xff]  ;;  %v13741_v51 = vld [vmem:[%s23861_s23 + $0x110] sm:$0xff] }
  0x1c   :  { %16509 = vmatprep.subr.mxu1 %v13719_v15  ;;  %16475 = vmatpush3.msra.mxu0 %v79_v14  ;;  %v13740_v52 = vld [vmem:[%s23861_s23 + $0x108] sm:$0xff]  ;;  %v13739_v53 = vld [vmem:[%s23861_s23 + $0x100] sm:$0xff]  ;;  %v13729_v59 = vld [vmem:[%s23863_s3 + $0x30] sm:$0xff] }
  0x1d   :  { %16510 = vmatpush3.msra.mxu1 %v13719_v15  ;;  %16476 = vmatprep.subr.mxu0 %v78_v16  ;;  %v13727_v54 = vld [vmem:[%s23863_s3 + $0x20] sm:$0xff]  ;;  %v13728_v58 = vld [vmem:[%s23863_s3 + $0x28] sm:$0xff]  ;;  %v13730_v61 = vld [vmem:[%s23863_s3 + $0x38] sm:$0xff] }
  0x1e   :  { %16511 = vmatprep.subr.mxu1 %v13718_v17  ;;  %16477 = vmatpush3.msra.mxu0 %v78_v16  ;;  %v162_v62 = vld [vmem:[%s23863_s3] sm:$0xff]  ;;  %v163_v63 = vld [vmem:[%s23863_s3 + $0x8] sm:$0xff]  ;;  %v164_v0 = vld [vmem:[%s23863_s3 + $0x10] sm:$0xff] }
  0x1f   :  { %16512 = vmatpush3.msra.mxu1 %v13718_v17  ;;  %16478 = vmatprep.subr.mxu0 %v77_v18  ;;  %v165_v1 = vld [vmem:[%s23863_s3 + $0x18] sm:$0xff]  ;;  %v13755_v2 = vld [vmem:[%s23863_s3 + $0x40] sm:$0xff]  ;;  %v13756_v5 = vld [vmem:[%s23863_s3 + $0x48] sm:$0xff] }
  0x20   :  { %16513 = vmatprep.subr.mxu1 %v13717_v19  ;;  %16479 = vmatpush3.msra.mxu0 %v77_v18  ;;  %v13778_v6 = vld [vmem:[%s23861_s23 + $0x1f8] sm:$0xff]  ;;  %v13757_v7 = vld [vmem:[%s23863_s3 + $0x50] sm:$0xff]  ;;  %v13776_v10 = vld [vmem:[%s23861_s23 + $0x1e8] sm:$0xff] }
  0x21   :  { %16514 = vmatpush3.msra.mxu1 %v13717_v19  ;;  %16480 = vmatprep.subr.mxu0 %v76_v20  ;;  %v13777_v8 = vld [vmem:[%s23861_s23 + $0x1f0] sm:$0xff]  ;;  %v13758_v9 = vld [vmem:[%s23863_s3 + $0x58] sm:$0xff]  ;;  %v13775_v11 = vld [vmem:[%s23861_s23 + $0x1e0] sm:$0xff] }
  0x22   :  { %16515 = vmatprep.subr.mxu1 %v13716_v21  ;;  %16481 = vmatpush3.msra.mxu0 %v76_v20  ;;  %v13774_v12 = vld [vmem:[%s23861_s23 + $0x1d8] sm:$0xff]  ;;  %v13773_v13 = vld [vmem:[%s23861_s23 + $0x1d0] sm:$0xff]  ;;  %v13772_v14 = vld [vmem:[%s23861_s23 + $0x1c8] sm:$0xff] }
  0x23   :  { %16516 = vmatpush3.msra.mxu1 %v13716_v21  ;;  %16482 = vmatprep.subr.mxu0 %v75_v22  ;;  %v13771_v15 = vld [vmem:[%s23861_s23 + $0x1c0] sm:$0xff]  ;;  %v13770_v16 = vld [vmem:[%s23861_s23 + $0x1b8] sm:$0xff]  ;;  %v13769_v17 = vld [vmem:[%s23861_s23 + $0x1b0] sm:$0xff] }
  0x24   :  { %16517 = vmatprep.subr.mxu1 %v13715_v23  ;;  %16483 = vmatpush3.msra.mxu0 %v75_v22  ;;  %v13768_v18 = vld [vmem:[%s23861_s23 + $0x1a8] sm:$0xff]  ;;  %v13767_v19 = vld [vmem:[%s23861_s23 + $0x1a0] sm:$0xff]  ;;  %v13766_v20 = vld [vmem:[%s23861_s23 + $0x198] sm:$0xff] }
  0x25   :  { %16518 = vmatpush3.msra.mxu1 %v13715_v23  ;;  %16484 = vmatprep.subr.mxu0 %v74_v25  ;;  %v13765_v21 = vld [vmem:[%s23861_s23 + $0x190] sm:$0xff]  ;;  %v13764_v22 = vld [vmem:[%s23861_s23 + $0x188] sm:$0xff]  ;;  %v13763_v23 = vld [vmem:[%s23861_s23 + $0x180] sm:$0xff] }
  0x26   :  { %16519 = vmatprep.subr.mxu1 %v13714_v26  ;;  %16485 = vmatpush3.msra.mxu0 %v74_v25  ;;  %v13779_v24 = vld [vmem:[%s23863_s3 + $0x60] sm:$0xff] }
  0x27   :  { %16520 = vmatpush3.msra.mxu1 %v13714_v26  ;;  %16486 = vmatprep.subr.mxu0 %v73_v28 }
  0x28   :  { %16521 = vmatprep.subr.mxu1 %v13713_v29  ;;  %16487 = vmatpush3.msra.mxu0 %v73_v28 }
  0x29   :  { %16522 = vmatpush3.msra.mxu1 %v13713_v29  ;;  %16488 = vmatprep.subr.mxu0 %v72_v31 }
  0x2a   :  { %16523 = vmatprep.subr.mxu1 %v13712_v32  ;;  %16489 = vmatpush3.msra.mxu0 %v72_v31 }
  0x2b   :  { %16524 = vmatpush3.msra.mxu1 %v13712_v32  ;;  %16490 = vmatprep.subr.mxu0 %v71_v34 }
  0x2c   :  { %16525 = vmatprep.subr.mxu1 %v13711_v35  ;;  %16491 = vmatpush3.msra.mxu0 %v71_v34 }
  0x2d   :  { %16492 = vmatprep.mubr.f32.mxu0 %v19343_v36  ;;  %16526 = vmatpush3.msra.mxu1 %v13711_v35 }
  0x2e   :  { %16527 = vmatprep.mubr.f32.mxu1 %v19343_v36  ;;  %16493 = vmatmul.mubr.f32.vlgmr.msra.gmra.mxu0 %v19345_v37 }
  0x2f   :  { %16528 = vmatmul.mubr.f32.vlgmr.msra.gmra.mxu1 %v19345_v37  ;;  %16550 = vmatprep.subr.mxu0 %v13754_v38 }
  0x30   :  { %16582 = vmatprep.mubr.f32.mxu0 %v19343_v36  ;;  %16551 = vmatpush3.msra.mxu0 %v13754_v38 }
  0x31   :  { %16552 = vmatprep.subr.mxu0 %v13753_v39  ;;  %16534 = vmatprep.mubr.msk.f32.mxu1 %vm263_vm0, %v13727_v54  ;;  %v13796_v54 = vld [vmem:[%s23861_s23 + $0x248] sm:$0xff] }
  0x32   :  { %16553 = vmatpush3.msra.mxu0 %v13753_v39 }
  0x33   :  { %16554 = vmatprep.subr.mxu0 %v13752_v40 }
  0x34   :  { %16555 = vmatpush3.msra.mxu0 %v13752_v40 }
  0x35   :  { %16556 = vmatprep.subr.mxu0 %v13751_v41 }
  0x36   :  { %16557 = vmatpush3.msra.mxu0 %v13751_v41 }
  0x37   :  { %16558 = vmatprep.subr.mxu0 %v13750_v42 }
  0x38   :  { %16559 = vmatpush3.msra.mxu0 %v13750_v42 }
  0x39   :  { %16560 = vmatprep.subr.mxu0 %v13749_v43 }
  0x3a   :  { %16561 = vmatpush3.msra.mxu0 %v13749_v43 }
  0x3b   :  { %16562 = vmatprep.subr.mxu0 %v13748_v44 }
  0x3c   :  { %16563 = vmatpush3.msra.mxu0 %v13748_v44 }
  0x3d   :  { %16564 = vmatprep.subr.mxu0 %v13747_v45 }
  0x3e   :  { %16565 = vmatpush3.msra.mxu0 %v13747_v45  ;;  %v13780_v45 = vld [vmem:[%s23863_s3 + $0x68] sm:$0xff] }
  0x3f   :  { %16566 = vmatprep.subr.mxu0 %v13746_v46 }
  0x40   :  { %16567 = vmatpush3.msra.mxu0 %v13746_v46  ;;  %v13802_v46 = vld [vmem:[%s23861_s23 + $0x278] sm:$0xff] }
  0x41   :  { %16568 = vmatprep.subr.mxu0 %v13745_v47 }
  0x42   :  { %16569 = vmatpush3.msra.mxu0 %v13745_v47  ;;  %v13781_v47 = vld [vmem:[%s23863_s3 + $0x70] sm:$0xff] }
  0x43   :  { %16570 = vmatprep.subr.mxu0 %v13744_v48 }
  0x44   :  { %16571 = vmatpush3.msra.mxu0 %v13744_v48  ;;  %v13801_v48 = vld [vmem:[%s23861_s23 + $0x270] sm:$0xff] }
  0x45   :  { %16572 = vmatprep.subr.mxu0 %v13743_v49 }
  0x46   :  { %16573 = vmatpush3.msra.mxu0 %v13743_v49  ;;  %v13782_v49 = vld [vmem:[%s23863_s3 + $0x78] sm:$0xff] }
  0x47   :  { %16574 = vmatprep.subr.mxu0 %v13742_v50 }
  0x48   :  { %16575 = vmatpush3.msra.mxu0 %v13742_v50  ;;  %v13800_v50 = vld [vmem:[%s23861_s23 + $0x268] sm:$0xff] }
  0x49   :  { %16576 = vmatprep.subr.mxu0 %v13741_v51 }
  0x4a   :  { %16577 = vmatpush3.msra.mxu0 %v13741_v51  ;;  %v13799_v51 = vld [vmem:[%s23861_s23 + $0x260] sm:$0xff] }
  0x4b   :  { %16578 = vmatprep.subr.mxu0 %v13740_v52 }
  0x4c   :  { %16579 = vmatpush3.msra.mxu0 %v13740_v52  ;;  %v13798_v52 = vld [vmem:[%s23861_s23 + $0x258] sm:$0xff] }
  0x4d   :  { %16580 = vmatprep.subr.mxu0 %v13739_v53 }
  0x4e   :  { %16581 = vmatpush3.msra.mxu0 %v13739_v53  ;;  %v13797_v53 = vld [vmem:[%s23861_s23 + $0x250] sm:$0xff] }
  0x4f   :  { %16583 = vmatmul.mubr.f32.vlgmr.msra.gmra.mxu0 %v19345_v37 }
  0x50   :  { %16634 = vmatprep.mubr.msk.f32.mxu0 %vm263_vm0, %v13779_v24  ;;  %v13814_v24 = vld [vmem:[%s23861_s23 + $0x298] sm:$0xff] }
  0xee   :  { %v16494_v56 = vpop.f32.mrf.mxu0 }
  0xef   :  { %v16529_v55 = vpop.f32.mrf.mxu1 }
  0xf0   :  { %16530 = vmatprep.subr.mxu1 %v16529_v55  ;;  %v153_v60 = vpop.f32.mrf.mxu0 }
  0xf1   :  { %v249_v57 = vpop.f32.mrf.mxu1  ;;  %16531 = vmatpush3.msra.mxu1 %v16529_v55  ;;  %v13795_v55 = vld [vmem:[%s23861_s23 + $0x240] sm:$0xff] }
  0xf2   :  { %16532 = vmatprep.subr.mxu1 %v249_v57 }
  0xf3   :  { %16533 = vmatpush3.msra.mxu1 %v249_v57  ;;  %v13793_v57 = vld [vmem:[%s23861_s23 + $0x230] sm:$0xff] }
  0xf4   :  { %16540 = vmatprep.subr.mxu1 %v16494_v56  ;;  %16535 = vmatmul.mubr.msk.f32.vlgmr.msra.gmra.mxu1 %vm263_vm0, %v13728_v58  ;;  %v13792_v58 = vld [vmem:[%s23861_s23 + $0x228] sm:$0xff] }
  0xf5   :  { %16541 = vmatpush3.msra.mxu1 %v16494_v56  ;;  %16537 = vmatprep.mubr.msk.f32.mxu1 %vm263_vm0, %v13729_v59  ;;  %v13794_v56 = vld [vmem:[%s23861_s23 + $0x238] sm:$0xff]  ;;  %v13791_v59 = vld [vmem:[%s23861_s23 + $0x220] sm:$0xff] }
  0xf6   :  { %16542 = vmatprep.subr.mxu1 %v153_v60 }
  0xf7   :  { %16543 = vmatpush3.msra.mxu1 %v153_v60  ;;  %v13790_v60 = vld [vmem:[%s23861_s23 + $0x218] sm:$0xff] }
  0xf8   :  { %16538 = vmatmul.mubr.msk.f32.gmra.mxu1 %vm263_vm0, %v13730_v61  ;;  %v13789_v61 = vld [vmem:[%s23861_s23 + $0x210] sm:$0xff] }
  0xf9   :  { %16544 = vmatprep.mubr.msk.f32.mxu1 %vm263_vm0, %v162_v62  ;;  %v13788_v62 = vld [vmem:[%s23861_s23 + $0x208] sm:$0xff] }
  0xfc   :  { %16545 = vmatmul.mubr.msk.f32.vlgmr.msra.gmra.mxu1 %vm263_vm0, %v163_v63  ;;  %v13787_v63 = vld [vmem:[%s23861_s23 + $0x200] sm:$0xff] }
  0xfd   :  { %16547 = vmatprep.mubr.msk.f32.mxu1 %vm263_vm0, %v164_v0  ;;  %v13803_v0 = vld [vmem:[%s23863_s3 + $0x80] sm:$0xff] }
 0x100   :  { %16548 = vmatmul.mubr.msk.f32.gmra.mxu1 %vm263_vm0, %v165_v1 }
 0x101   :  { %16589 = vmatprep.mubr.msk.f32.mxu1 %vm263_vm0, %v13755_v2 }
 0x10f   :  { %v16584_v3 = vpop.f32.mrf.mxu0 }
 0x110   :  { %16585 = vmatprep.subr.mxu1 %v16584_v3 }
 0x111   :  { %v541_v4 = vpop.f32.mrf.mxu0  ;;  %16586 = vmatpush3.msra.mxu1 %v16584_v3 }
 0x112   :  { %16587 = vmatprep.subr.mxu1 %v541_v4 }
 0x113   :  { %16588 = vmatpush3.msra.mxu1 %v541_v4 }
 0x114   :  { %16590 = vmatmul.mubr.msk.f32.vlgmr.msra.gmra.mxu1 %vm263_vm0, %v13756_v5  ;;  %16595 = vmatprep.subr.mxu1 %v13778_v6 }
 0x115   :  { %16596 = vmatpush3.msra.mxu1 %v13778_v6  ;;  %16592 = vmatprep.mubr.msk.f32.mxu1 %vm263_vm0, %v13757_v7 }
 0x116   :  { %16597 = vmatprep.subr.mxu1 %v13777_v8 }
 0x117   :  { %16598 = vmatpush3.msra.mxu1 %v13777_v8 }
 0x118   :  { %16593 = vmatmul.mubr.msk.f32.gmra.mxu1 %vm263_vm0, %v13758_v9  ;;  %16599 = vmatprep.subr.mxu1 %v13776_v10  ;;  %v13804_v9 = vld [vmem:[%s23863_s3 + $0x88] sm:$0xff] }
 0x119   :  { %16600 = vmatpush3.msra.mxu1 %v13776_v10  ;;  %16627 = vmatprep.mubr.f32.mxu1 %v19343_v36  ;;  %v13826_v10 = vld [vmem:[%s23861_s23 + $0x2f8] sm:$0xff] }
 0x11a   :  { %16601 = vmatprep.subr.mxu1 %v13775_v11 }
 0x11b   :  { %16602 = vmatpush3.msra.mxu1 %v13775_v11  ;;  %v13805_v11 = vld [vmem:[%s23863_s3 + $0x90] sm:$0xff] }
 0x11c   :  { %16603 = vmatprep.subr.mxu1 %v13774_v12 }
 0x11d   :  { %16604 = vmatpush3.msra.mxu1 %v13774_v12  ;;  %v13825_v12 = vld [vmem:[%s23861_s23 + $0x2f0] sm:$0xff] }
 0x11e   :  { %16605 = vmatprep.subr.mxu1 %v13773_v13 }
 0x11f   :  { %16606 = vmatpush3.msra.mxu1 %v13773_v13  ;;  %v13806_v13 = vld [vmem:[%s23863_s3 + $0x98] sm:$0xff] }
 0x120   :  { %16607 = vmatprep.subr.mxu1 %v13772_v14 }
 0x121   :  { %16608 = vmatpush3.msra.mxu1 %v13772_v14  ;;  %v13824_v14 = vld [vmem:[%s23861_s23 + $0x2e8] sm:$0xff] }
 0x122   :  { %16609 = vmatprep.subr.mxu1 %v13771_v15 }
 0x123   :  { %16610 = vmatpush3.msra.mxu1 %v13771_v15  ;;  %v13823_v15 = vld [vmem:[%s23861_s23 + $0x2e0] sm:$0xff] }
 0x124   :  { %16611 = vmatprep.subr.mxu1 %v13770_v16 }
 0x125   :  { %16612 = vmatpush3.msra.mxu1 %v13770_v16  ;;  %v13822_v16 = vld [vmem:[%s23861_s23 + $0x2d8] sm:$0xff] }
 0x126   :  { %16613 = vmatprep.subr.mxu1 %v13769_v17 }
 0x127   :  { %16614 = vmatpush3.msra.mxu1 %v13769_v17  ;;  %v13821_v17 = vld [vmem:[%s23861_s23 + $0x2d0] sm:$0xff] }
 0x128   :  { %16615 = vmatprep.subr.mxu1 %v13768_v18 }
 0x129   :  { %16616 = vmatpush3.msra.mxu1 %v13768_v18  ;;  %v13820_v18 = vld [vmem:[%s23861_s23 + $0x2c8] sm:$0xff] }
 0x12a   :  { %16617 = vmatprep.subr.mxu1 %v13767_v19 }
 0x12b   :  { %16618 = vmatpush3.msra.mxu1 %v13767_v19  ;;  %v13819_v19 = vld [vmem:[%s23861_s23 + $0x2c0] sm:$0xff] }
 0x12c   :  { %16619 = vmatprep.subr.mxu1 %v13766_v20 }
 0x12d   :  { %16620 = vmatpush3.msra.mxu1 %v13766_v20  ;;  %v13818_v20 = vld [vmem:[%s23861_s23 + $0x2b8] sm:$0xff] }
 0x12e   :  { %16621 = vmatprep.subr.mxu1 %v13765_v21 }
 0x12f   :  { %16622 = vmatpush3.msra.mxu1 %v13765_v21  ;;  %v13817_v21 = vld [vmem:[%s23861_s23 + $0x2b0] sm:$0xff] }
 0x130   :  { %16623 = vmatprep.subr.mxu1 %v13764_v22 }
 0x131   :  { %16624 = vmatpush3.msra.mxu1 %v13764_v22  ;;  %v13816_v22 = vld [vmem:[%s23861_s23 + $0x2a8] sm:$0xff] }
 0x132   :  { %16625 = vmatprep.subr.mxu1 %v13763_v23 }
 0x133   :  { %16626 = vmatpush3.msra.mxu1 %v13763_v23  ;;  %v13815_v23 = vld [vmem:[%s23861_s23 + $0x2a0] sm:$0xff] }
 0x134   :  { %16628 = vmatmul.mubr.f32.vlgmr.msra.gmra.mxu1 %v19345_v37 }
 0x135   :  { %16679 = vmatprep.mubr.msk.f32.mxu1 %vm263_vm0, %v13803_v0  ;;  %v13851_v0 = vld [vmem:[%s23863_s3 + $0xc0] sm:$0xff] }
 0x1b4   :  { %v16536_v25 = vpop.f32.mrf.mxu1 }
 0x1b6   :  { %v19503_v26 = vpop.f32.mrf.mxu1 }
 0x1b8   :  { %v16539_v27 = vpop.f32.mrf.mxu1 }
 0x1ba   :  { %v19505_v28 = vpop.f32.mrf.mxu1 }
 0x1bc   :  { %v16546_v29 = vpop.f32.mrf.mxu1 }
 0x1bd   :  { %v445_v30 = vadd.f32 %v16546_v29, %v16536_v25  ;;  %v13813_v25 = vld [vmem:[%s23861_s23 + $0x290] sm:$0xff]  ;;  %v13811_v29 = vld [vmem:[%s23861_s23 + $0x280] sm:$0xff] }
 0x1be   :  { %v19507_v31 = vpop.f32.mrf.mxu1 }
 0x1c0   :  { %v16549_v32 = vpop.f32.mrf.mxu1 }
 0x1c1   :  { %v455_v33 = vadd.f32 %v16549_v32, %v16539_v27  ;;  %v13812_v27 = vld [vmem:[%s23861_s23 + $0x288] sm:$0xff] }
 0x1c2   :  { %v19509_v34 = vpop.f32.mrf.mxu1 }
 0x1d4   :  { %v16591_v35 = vpop.f32.mrf.mxu1 }
 0x1d5   :  { %v19511_v38 = vadd.f32 %v16591_v35, %v445_v30  ;;  %v13827_v30 = vld [vmem:[%s23863_s3 + $0xa0] sm:$0xff] }
 0x1d6   :  { %v19513_v39 = vpop.f32.mrf.mxu1 }
 0x1d8   :  { %v16594_v40 = vpop.f32.mrf.mxu1 }
 0x1d9   :  { %v19515_v41 = vadd.f32 %v16594_v40, %v455_v33 }
 0x1da   :  { %v19517_v42 = vpop.f32.mrf.mxu1 }
 0x1f4   :  { %v16629_v43 = vpop.f32.mrf.mxu1 }
 0x1f5   :  { %16630 = vmatprep.subr.mxu0 %v16629_v43 }
 0x1f6   :  { %v739_v44 = vpop.f32.mrf.mxu1  ;;  %16631 = vmatpush3.msra.mxu0 %v16629_v43 }
 0x1f7   :  { %16632 = vmatprep.subr.mxu0 %v739_v44 }
 0x1f8   :  { %16633 = vmatpush3.msra.mxu0 %v739_v44 }
 0x1f9   :  { %16635 = vmatmul.mubr.msk.f32.vlgmr.msra.gmra.mxu0 %vm263_vm0, %v13780_v45  ;;  %16640 = vmatprep.subr.mxu0 %v13802_v46  ;;  %v13828_v45 = vld [vmem:[%s23863_s3 + $0xa8] sm:$0xff] }
 0x1fa   :  { %16641 = vmatpush3.msra.mxu0 %v13802_v46  ;;  %16637 = vmatprep.mubr.msk.f32.mxu0 %vm263_vm0, %v13781_v47  ;;  %v13850_v46 = vld [vmem:[%s23861_s23 + $0x378] sm:$0xff]  ;;  %v13829_v47 = vld [vmem:[%s23863_s3 + $0xb0] sm:$0xff] }
 0x1fb   :  { %16642 = vmatprep.subr.mxu0 %v13801_v48 }
 0x1fc   :  { %16643 = vmatpush3.msra.mxu0 %v13801_v48  ;;  %v13849_v48 = vld [vmem:[%s23861_s23 + $0x370] sm:$0xff] }
 0x1fd   :  { %16638 = vmatmul.mubr.msk.f32.gmra.mxu0 %vm263_vm0, %v13782_v49  ;;  %16644 = vmatprep.subr.mxu0 %v13800_v50  ;;  %v13830_v49 = vld [vmem:[%s23863_s3 + $0xb8] sm:$0xff] }
 0x1fe   :  { %16645 = vmatpush3.msra.mxu0 %v13800_v50  ;;  %16672 = vmatprep.mubr.f32.mxu0 %v19343_v36  ;;  %v13848_v50 = vld [vmem:[%s23861_s23 + $0x368] sm:$0xff] }
 0x1ff   :  { %16646 = vmatprep.subr.mxu0 %v13799_v51 }
 0x200   :  { %16647 = vmatpush3.msra.mxu0 %v13799_v51  ;;  %v13847_v51 = vld [vmem:[%s23861_s23 + $0x360] sm:$0xff] }
 0x201   :  { %16648 = vmatprep.subr.mxu0 %v13798_v52 }
 0x202   :  { %16649 = vmatpush3.msra.mxu0 %v13798_v52  ;;  %v13846_v52 = vld [vmem:[%s23861_s23 + $0x358] sm:$0xff] }
 0x203   :  { %16650 = vmatprep.subr.mxu0 %v13797_v53 }
 0x204   :  { %16651 = vmatpush3.msra.mxu0 %v13797_v53  ;;  %v13845_v53 = vld [vmem:[%s23861_s23 + $0x350] sm:$0xff] }
 0x205   :  { %16652 = vmatprep.subr.mxu0 %v13796_v54 }
 0x206   :  { %16653 = vmatpush3.msra.mxu0 %v13796_v54  ;;  %v13844_v54 = vld [vmem:[%s23861_s23 + $0x348] sm:$0xff] }
 0x207   :  { %16654 = vmatprep.subr.mxu0 %v13795_v55 }
 0x208   :  { %16655 = vmatpush3.msra.mxu0 %v13795_v55  ;;  %v13843_v55 = vld [vmem:[%s23861_s23 + $0x340] sm:$0xff] }
 0x209   :  { %16656 = vmatprep.subr.mxu0 %v13794_v56 }
 0x20a   :  { %16657 = vmatpush3.msra.mxu0 %v13794_v56  ;;  %v13842_v56 = vld [vmem:[%s23861_s23 + $0x338] sm:$0xff] }
 0x20b   :  { %16658 = vmatprep.subr.mxu0 %v13793_v57 }
 0x20c   :  { %16659 = vmatpush3.msra.mxu0 %v13793_v57  ;;  %v13841_v57 = vld [vmem:[%s23861_s23 + $0x330] sm:$0xff] }
 0x20d   :  { %16660 = vmatprep.subr.mxu0 %v13792_v58 }
 0x20e   :  { %16661 = vmatpush3.msra.mxu0 %v13792_v58  ;;  %v13840_v58 = vld [vmem:[%s23861_s23 + $0x328] sm:$0xff] }
 0x20f   :  { %16662 = vmatprep.subr.mxu0 %v13791_v59 }
 0x210   :  { %16663 = vmatpush3.msra.mxu0 %v13791_v59  ;;  %v13839_v59 = vld [vmem:[%s23861_s23 + $0x320] sm:$0xff] }
 0x211   :  { %16664 = vmatprep.subr.mxu0 %v13790_v60 }
 0x212   :  { %16665 = vmatpush3.msra.mxu0 %v13790_v60  ;;  %v13838_v60 = vld [vmem:[%s23861_s23 + $0x318] sm:$0xff] }
 0x213   :  { %16666 = vmatprep.subr.mxu0 %v13789_v61 }
 0x214   :  { %16667 = vmatpush3.msra.mxu0 %v13789_v61  ;;  %v13837_v61 = vld [vmem:[%s23861_s23 + $0x310] sm:$0xff] }
 0x215   :  { %16668 = vmatprep.subr.mxu0 %v13788_v62 }
 0x216   :  { %16669 = vmatpush3.msra.mxu0 %v13788_v62  ;;  %v13836_v62 = vld [vmem:[%s23861_s23 + $0x308] sm:$0xff] }
 0x217   :  { %16670 = vmatprep.subr.mxu0 %v13787_v63 }
 0x218   :  { %16671 = vmatpush3.msra.mxu0 %v13787_v63  ;;  %v13835_v63 = vld [vmem:[%s23861_s23 + $0x300] sm:$0xff] }
 0x219   :  { %16673 = vmatmul.mubr.f32.vlgmr.msra.gmra.mxu0 %v19345_v37 }
 0x21a   :  { %16724 = vmatprep.mubr.msk.f32.mxu0 %vm263_vm0, %v13827_v30  ;;  %v13860_v30 = vld [vmem:[%s23861_s23 + $0x388] sm:$0xff] }
 0x2b9   :  { %v16636_v1 = vpop.f32.mrf.mxu0 }
 0x2ba   :  { %v19586_v2 = vadd.f32 %v16636_v1, %v19511_v38 }
 0x2bb   :  { %v19588_v3 = vpop.f32.mrf.mxu0 }
 0x2bd   :  { %v16639_v4 = vpop.f32.mrf.mxu0 }
 0x2be   :  { %v19591_v5 = vadd.f32 %v16639_v4, %v19515_v41 }
 0x2bf   :  { %v19593_v6 = vpop.f32.mrf.mxu0 }
 0x2d9   :  { %v16674_v7 = vpop.f32.mrf.mxu0 }
 0x2da   :  { %16675 = vmatprep.subr.mxu1 %v16674_v7 }
 0x2db   :  { %v937_v8 = vpop.f32.mrf.mxu0  ;;  %16676 = vmatpush3.msra.mxu1 %v16674_v7 }
 0x2dc   :  { %16677 = vmatprep.subr.mxu1 %v937_v8 }
 0x2dd   :  { %16678 = vmatpush3.msra.mxu1 %v937_v8 }
 0x2de   :  { %16680 = vmatmul.mubr.msk.f32.vlgmr.msra.gmra.mxu1 %vm263_vm0, %v13804_v9  ;;  %16685 = vmatprep.subr.mxu1 %v13826_v10 }
 0x2df   :  { %16686 = vmatpush3.msra.mxu1 %v13826_v10  ;;  %16682 = vmatprep.mubr.msk.f32.mxu1 %vm263_vm0, %v13805_v11  ;;  %v13852_v11 = vld [vmem:[%s23863_s3 + $0xc8] sm:$0xff] }
 0x2e0   :  { %16687 = vmatprep.subr.mxu1 %v13825_v12 }
 0x2e1   :  { %16688 = vmatpush3.msra.mxu1 %v13825_v12  ;;  %v13874_v12 = vld [vmem:[%s23861_s23 + $0x3f8] sm:$0xff] }
 0x2e2   :  { %16683 = vmatmul.mubr.msk.f32.gmra.mxu1 %vm263_vm0, %v13806_v13  ;;  %16689 = vmatprep.subr.mxu1 %v13824_v14  ;;  %v13853_v13 = vld [vmem:[%s23863_s3 + $0xd0] sm:$0xff] }
 0x2e3   :  { %16690 = vmatpush3.msra.mxu1 %v13824_v14  ;;  %16717 = vmatprep.mubr.f32.mxu1 %v19343_v36  ;;  %v13873_v14 = vld [vmem:[%s23861_s23 + $0x3f0] sm:$0xff] }
 0x2e4   :  { %16691 = vmatprep.subr.mxu1 %v13823_v15 }
 0x2e5   :  { %16692 = vmatpush3.msra.mxu1 %v13823_v15  ;;  %v13854_v15 = vld [vmem:[%s23863_s3 + $0xd8] sm:$0xff] }
 0x2e6   :  { %16693 = vmatprep.subr.mxu1 %v13822_v16 }
 0x2e7   :  { %16694 = vmatpush3.msra.mxu1 %v13822_v16  ;;  %v13872_v16 = vld [vmem:[%s23861_s23 + $0x3e8] sm:$0xff] }
 0x2e8   :  { %16695 = vmatprep.subr.mxu1 %v13821_v17 }
 0x2e9   :  { %16696 = vmatpush3.msra.mxu1 %v13821_v17  ;;  %v13871_v17 = vld [vmem:[%s23861_s23 + $0x3e0] sm:$0xff] }
 0x2ea   :  { %16697 = vmatprep.subr.mxu1 %v13820_v18 }
 0x2eb   :  { %16698 = vmatpush3.msra.mxu1 %v13820_v18  ;;  %v13870_v18 = vld [vmem:[%s23861_s23 + $0x3d8] sm:$0xff] }
 0x2ec   :  { %16699 = vmatprep.subr.mxu1 %v13819_v19 }
 0x2ed   :  { %16700 = vmatpush3.msra.mxu1 %v13819_v19  ;;  %v13869_v19 = vld [vmem:[%s23861_s23 + $0x3d0] sm:$0xff] }
 0x2ee   :  { %16701 = vmatprep.subr.mxu1 %v13818_v20 }
 0x2ef   :  { %16702 = vmatpush3.msra.mxu1 %v13818_v20  ;;  %v13868_v20 = vld [vmem:[%s23861_s23 + $0x3c8] sm:$0xff] }
 0x2f0   :  { %16703 = vmatprep.subr.mxu1 %v13817_v21 }
 0x2f1   :  { %16704 = vmatpush3.msra.mxu1 %v13817_v21  ;;  %v13867_v21 = vld [vmem:[%s23861_s23 + $0x3c0] sm:$0xff] }
 0x2f2   :  { %16705 = vmatprep.subr.mxu1 %v13816_v22 }
 0x2f3   :  { %16706 = vmatpush3.msra.mxu1 %v13816_v22  ;;  %v13866_v22 = vld [vmem:[%s23861_s23 + $0x3b8] sm:$0xff] }
 0x2f4   :  { %16707 = vmatprep.subr.mxu1 %v13815_v23 }
 0x2f5   :  { %16708 = vmatpush3.msra.mxu1 %v13815_v23  ;;  %v13865_v23 = vld [vmem:[%s23861_s23 + $0x3b0] sm:$0xff] }
 0x2f6   :  { %16709 = vmatprep.subr.mxu1 %v13814_v24 }
 0x2f7   :  { %16710 = vmatpush3.msra.mxu1 %v13814_v24  ;;  %v13864_v24 = vld [vmem:[%s23861_s23 + $0x3a8] sm:$0xff] }
 0x2f8   :  { %16711 = vmatprep.subr.mxu1 %v13813_v25 }
 0x2f9   :  { %16712 = vmatpush3.msra.mxu1 %v13813_v25  ;;  %v13863_v25 = vld [vmem:[%s23861_s23 + $0x3a0] sm:$0xff] }
 0x2fa   :  { %16713 = vmatprep.subr.mxu1 %v13812_v27 }
 0x2fb   :  { %16714 = vmatpush3.msra.mxu1 %v13812_v27  ;;  %v13862_v27 = vld [vmem:[%s23861_s23 + $0x398] sm:$0xff] }
 0x2fc   :  { %16715 = vmatprep.subr.mxu1 %v13811_v29 }
 0x2fd   :  { %16716 = vmatpush3.msra.mxu1 %v13811_v29  ;;  %v13861_v29 = vld [vmem:[%s23861_s23 + $0x390] sm:$0xff] }
 0x2fe   :  { %16718 = vmatmul.mubr.f32.vlgmr.msra.gmra.mxu1 %v19345_v37 }
 0x2ff   :  { %16769 = vmatprep.mubr.msk.f32.mxu1 %vm263_vm0, %v13851_v0  ;;  %v13886_v0 = vld [vmem:[%s23861_s23 + $0x418] sm:$0xff] }
 0x39e   :  { %v16681_v32 = vpop.f32.mrf.mxu1 }
 0x39f   :  { %v19662_v33 = vadd.f32 %v16681_v32, %v19586_v2  ;;  %v13859_v32 = vld [vmem:[%s23861_s23 + $0x380] sm:$0xff] }
 0x3a0   :  { %v19664_v35 = vpop.f32.mrf.mxu1 }
 0x3a2   :  { %v16684_v38 = vpop.f32.mrf.mxu1 }
 0x3a3   :  { %v19667_v40 = vadd.f32 %v16684_v38, %v19591_v5 }
 0x3a4   :  { %v19669_v41 = vpop.f32.mrf.mxu1 }
 0x3be   :  { %v16719_v43 = vpop.f32.mrf.mxu1 }
 0x3bf   :  { %16720 = vmatprep.subr.mxu0 %v16719_v43 }
 0x3c0   :  { %v1135_v44 = vpop.f32.mrf.mxu1  ;;  %16721 = vmatpush3.msra.mxu0 %v16719_v43 }
 0x3c1   :  { %16722 = vmatprep.subr.mxu0 %v1135_v44 }
 0x3c2   :  { %16723 = vmatpush3.msra.mxu0 %v1135_v44 }
 0x3c3   :  { %16725 = vmatmul.mubr.msk.f32.vlgmr.msra.gmra.mxu0 %vm263_vm0, %v13828_v45  ;;  %16730 = vmatprep.subr.mxu0 %v13850_v46 }
 0x3c4   :  { %16731 = vmatpush3.msra.mxu0 %v13850_v46  ;;  %16727 = vmatprep.mubr.msk.f32.mxu0 %vm263_vm0, %v13829_v47 }
 0x3c5   :  { %16732 = vmatprep.subr.mxu0 %v13849_v48 }
 0x3c6   :  { %16733 = vmatpush3.msra.mxu0 %v13849_v48 }
 0x3c7   :  { %16728 = vmatmul.mubr.msk.f32.gmra.mxu0 %vm263_vm0, %v13830_v49  ;;  %16734 = vmatprep.subr.mxu0 %v13848_v50  ;;  %v13876_v49 = vld [vmem:[%s23863_s3 + $0xe8] sm:$0xff] }
 0x3c8   :  { %16735 = vmatpush3.msra.mxu0 %v13848_v50  ;;  %16762 = vmatprep.mubr.f32.mxu0 %v19343_v36  ;;  %v13898_v50 = vld [vmem:[%s23861_s23 + $0x478] sm:$0xff] }
 0x3c9   :  { %16736 = vmatprep.subr.mxu0 %v13847_v51 }
 0x3ca   :  { %16737 = vmatpush3.msra.mxu0 %v13847_v51  ;;  %v13877_v51 = vld [vmem:[%s23863_s3 + $0xf0] sm:$0xff] }
 0x3cb   :  { %16738 = vmatprep.subr.mxu0 %v13846_v52 }
 0x3cc   :  { %16739 = vmatpush3.msra.mxu0 %v13846_v52  ;;  %v13897_v52 = vld [vmem:[%s23861_s23 + $0x470] sm:$0xff] }
 0x3cd   :  { %16740 = vmatprep.subr.mxu0 %v13845_v53 }
 0x3ce   :  { %16741 = vmatpush3.msra.mxu0 %v13845_v53  ;;  %v13878_v53 = vld [vmem:[%s23863_s3 + $0xf8] sm:$0xff] }
 0x3cf   :  { %16742 = vmatprep.subr.mxu0 %v13844_v54 }
 0x3d0   :  { %16743 = vmatpush3.msra.mxu0 %v13844_v54  ;;  %v13896_v54 = vld [vmem:[%s23861_s23 + $0x468] sm:$0xff] }
 0x3d1   :  { %16744 = vmatprep.subr.mxu0 %v13843_v55 }
 0x3d2   :  { %16745 = vmatpush3.msra.mxu0 %v13843_v55  ;;  %v13895_v55 = vld [vmem:[%s23861_s23 + $0x460] sm:$0xff] }
 0x3d3   :  { %16746 = vmatprep.subr.mxu0 %v13842_v56 }
 0x3d4   :  { %16747 = vmatpush3.msra.mxu0 %v13842_v56  ;;  %v13894_v56 = vld [vmem:[%s23861_s23 + $0x458] sm:$0xff] }
 0x3d5   :  { %16748 = vmatprep.subr.mxu0 %v13841_v57 }
 0x3d6   :  { %16749 = vmatpush3.msra.mxu0 %v13841_v57  ;;  %v13893_v57 = vld [vmem:[%s23861_s23 + $0x450] sm:$0xff] }
 0x3d7   :  { %16750 = vmatprep.subr.mxu0 %v13840_v58 }
 0x3d8   :  { %16751 = vmatpush3.msra.mxu0 %v13840_v58  ;;  %v13892_v58 = vld [vmem:[%s23861_s23 + $0x448] sm:$0xff] }
 0x3d9   :  { %16752 = vmatprep.subr.mxu0 %v13839_v59 }
 0x3da   :  { %16753 = vmatpush3.msra.mxu0 %v13839_v59  ;;  %v13891_v59 = vld [vmem:[%s23861_s23 + $0x440] sm:$0xff] }
 0x3db   :  { %16754 = vmatprep.subr.mxu0 %v13838_v60 }
 0x3dc   :  { %16755 = vmatpush3.msra.mxu0 %v13838_v60  ;;  %v13890_v60 = vld [vmem:[%s23861_s23 + $0x438] sm:$0xff] }
 0x3dd   :  { %16756 = vmatprep.subr.mxu0 %v13837_v61 }
 0x3de   :  { %16757 = vmatpush3.msra.mxu0 %v13837_v61  ;;  %v13889_v61 = vld [vmem:[%s23861_s23 + $0x430] sm:$0xff] }
 0x3df   :  { %16758 = vmatprep.subr.mxu0 %v13836_v62 }
 0x3e0   :  { %16759 = vmatpush3.msra.mxu0 %v13836_v62  ;;  %v13888_v62 = vld [vmem:[%s23861_s23 + $0x428] sm:$0xff] }
 0x3e1   :  { %16760 = vmatprep.subr.mxu0 %v13835_v63 }
 0x3e2   :  { %16761 = vmatpush3.msra.mxu0 %v13835_v63  ;;  %v13887_v63 = vld [vmem:[%s23861_s23 + $0x420] sm:$0xff] }
 0x3e3   :  { %16763 = vmatmul.mubr.f32.vlgmr.msra.gmra.mxu0 %v19345_v37 }
 0x483   :  { %v16726_v1 = vpop.f32.mrf.mxu0 }
 0x484   :  { %v19738_v2 = vadd.f32 %v16726_v1, %v19662_v33  ;;  %v13875_v33 = vld [vmem:[%s23863_s3 + $0xe0] sm:$0xff]  ;;  %v13885_v1 = vld [vmem:[%s23861_s23 + $0x410] sm:$0xff] }
 0x485   :  { %v19740_v4 = vpop.f32.mrf.mxu0  ;;  %16814 = vmatprep.mubr.msk.f32.mxu0 %vm263_vm0, %v13875_v33  ;;  %v13912_v33 = vld [vmem:[%s23861_s23 + $0x4a8] sm:$0xff] }
 0x487   :  { %v16729_v5 = vpop.f32.mrf.mxu0 }
 0x488   :  { %v19743_v7 = vadd.f32 %v16729_v5, %v19667_v40  ;;  %v13883_v5 = vld [vmem:[%s23861_s23 + $0x400] sm:$0xff] }
 0x489   :  { %v19745_v8 = vpop.f32.mrf.mxu0 }
 0x4a3   :  { %v16764_v9 = vpop.f32.mrf.mxu0 }
 0x4a4   :  { %16765 = vmatprep.subr.mxu1 %v16764_v9 }
 0x4a5   :  { %v1333_v10 = vpop.f32.mrf.mxu0  ;;  %16766 = vmatpush3.msra.mxu1 %v16764_v9 }
 0x4a6   :  { %16767 = vmatprep.subr.mxu1 %v1333_v10 }
 0x4a7   :  { %16768 = vmatpush3.msra.mxu1 %v1333_v10 }
 0x4a8   :  { %16770 = vmatmul.mubr.msk.f32.vlgmr.msra.gmra.mxu1 %vm263_vm0, %v13852_v11  ;;  %16775 = vmatprep.subr.mxu1 %v13874_v12 }
 0x4a9   :  { %16776 = vmatpush3.msra.mxu1 %v13874_v12  ;;  %16772 = vmatprep.mubr.msk.f32.mxu1 %vm263_vm0, %v13853_v13 }
 0x4aa   :  { %16777 = vmatprep.subr.mxu1 %v13873_v14 }
 0x4ab   :  { %16778 = vmatpush3.msra.mxu1 %v13873_v14 }
 0x4ac   :  { %16773 = vmatmul.mubr.msk.f32.gmra.mxu1 %vm263_vm0, %v13854_v15  ;;  %16779 = vmatprep.subr.mxu1 %v13872_v16 }
 0x4ad   :  { %16780 = vmatpush3.msra.mxu1 %v13872_v16  ;;  %16807 = vmatprep.mubr.f32.mxu1 %v19343_v36 }
 0x4ae   :  { %16781 = vmatprep.subr.mxu1 %v13871_v17 }
 0x4af   :  { %16782 = vmatpush3.msra.mxu1 %v13871_v17  ;;  %v13900_v17 = vld [vmem:[%s23863_s3 + $0x108] sm:$0xff] }
 0x4b0   :  { %16783 = vmatprep.subr.mxu1 %v13870_v18 }
 0x4b1   :  { %16784 = vmatpush3.msra.mxu1 %v13870_v18  ;;  %v13922_v18 = vld [vmem:[%s23861_s23 + $0x4f8] sm:$0xff] }
 0x4b2   :  { %16785 = vmatprep.subr.mxu1 %v13869_v19 }
 0x4b3   :  { %16786 = vmatpush3.msra.mxu1 %v13869_v19  ;;  %v13901_v19 = vld [vmem:[%s23863_s3 + $0x110] sm:$0xff] }
 0x4b4   :  { %16787 = vmatprep.subr.mxu1 %v13868_v20 }
 0x4b5   :  { %16788 = vmatpush3.msra.mxu1 %v13868_v20  ;;  %v13921_v20 = vld [vmem:[%s23861_s23 + $0x4f0] sm:$0xff] }
 0x4b6   :  { %16789 = vmatprep.subr.mxu1 %v13867_v21 }
 0x4b7   :  { %16790 = vmatpush3.msra.mxu1 %v13867_v21  ;;  %v13902_v21 = vld [vmem:[%s23863_s3 + $0x118] sm:$0xff] }
 0x4b8   :  { %16791 = vmatprep.subr.mxu1 %v13866_v22 }
 0x4b9   :  { %16792 = vmatpush3.msra.mxu1 %v13866_v22  ;;  %v13920_v22 = vld [vmem:[%s23861_s23 + $0x4e8] sm:$0xff] }
 0x4ba   :  { %16793 = vmatprep.subr.mxu1 %v13865_v23 }
 0x4bb   :  { %16794 = vmatpush3.msra.mxu1 %v13865_v23  ;;  %v13919_v23 = vld [vmem:[%s23861_s23 + $0x4e0] sm:$0xff] }
 0x4bc   :  { %16795 = vmatprep.subr.mxu1 %v13864_v24 }
 0x4bd   :  { %16796 = vmatpush3.msra.mxu1 %v13864_v24  ;;  %v13918_v24 = vld [vmem:[%s23861_s23 + $0x4d8] sm:$0xff] }
 0x4be   :  { %16797 = vmatprep.subr.mxu1 %v13863_v25 }
 0x4bf   :  { %16798 = vmatpush3.msra.mxu1 %v13863_v25  ;;  %v13917_v25 = vld [vmem:[%s23861_s23 + $0x4d0] sm:$0xff] }
 0x4c0   :  { %16799 = vmatprep.subr.mxu1 %v13862_v27 }
 0x4c1   :  { %16800 = vmatpush3.msra.mxu1 %v13862_v27  ;;  %v13916_v27 = vld [vmem:[%s23861_s23 + $0x4c8] sm:$0xff] }
 0x4c2   :  { %16801 = vmatprep.subr.mxu1 %v13861_v29 }
 0x4c3   :  { %16802 = vmatpush3.msra.mxu1 %v13861_v29  ;;  %v13915_v29 = vld [vmem:[%s23861_s23 + $0x4c0] sm:$0xff] }
 0x4c4   :  { %16803 = vmatprep.subr.mxu1 %v13860_v30 }
 0x4c5   :  { %16804 = vmatpush3.msra.mxu1 %v13860_v30  ;;  %v13914_v30 = vld [vmem:[%s23861_s23 + $0x4b8] sm:$0xff] }
 0x4c6   :  { %16805 = vmatprep.subr.mxu1 %v13859_v32 }
 0x4c7   :  { %16806 = vmatpush3.msra.mxu1 %v13859_v32  ;;  %v13913_v32 = vld [vmem:[%s23861_s23 + $0x4b0] sm:$0xff] }
 0x4c8   :  { %16808 = vmatmul.mubr.f32.vlgmr.msra.gmra.mxu1 %v19345_v37 }
 0x568   :  { %v16771_v38 = vpop.f32.mrf.mxu1 }
 0x569   :  { %v19814_v40 = vadd.f32 %v16771_v38, %v19738_v2  ;;  %v13884_v2 = vld [vmem:[%s23861_s23 + $0x408] sm:$0xff]  ;;  %v13911_v38 = vld [vmem:[%s23861_s23 + $0x4a0] sm:$0xff] }
 0x56a   :  { %v19816_v43 = vpop.f32.mrf.mxu1 }
 0x56c   :  { %v16774_v44 = vpop.f32.mrf.mxu1 }
 0x56d   :  { %v19819_v45 = vadd.f32 %v16774_v44, %v19743_v7  ;;  %v13899_v7 = vld [vmem:[%s23863_s3 + $0x100] sm:$0xff]  ;;  %v13909_v44 = vld [vmem:[%s23861_s23 + $0x490] sm:$0xff] }
 0x56e   :  { %v19821_v46 = vpop.f32.mrf.mxu1  ;;  %16859 = vmatprep.mubr.msk.f32.mxu1 %vm263_vm0, %v13899_v7  ;;  %v13938_v7 = vld [vmem:[%s23861_s23 + $0x538] sm:$0xff] }
 0x588   :  { %v16809_v47 = vpop.f32.mrf.mxu1 }
 0x589   :  { %16810 = vmatprep.subr.mxu0 %v16809_v47 }
 0x58a   :  { %v1531_v48 = vpop.f32.mrf.mxu1  ;;  %16811 = vmatpush3.msra.mxu0 %v16809_v47  ;;  %v13907_v47 = vld [vmem:[%s23861_s23 + $0x480] sm:$0xff] }
 0x58b   :  { %16812 = vmatprep.subr.mxu0 %v1531_v48 }
 0x58c   :  { %16813 = vmatpush3.msra.mxu0 %v1531_v48  ;;  %v13923_v48 = vld [vmem:[%s23863_s3 + $0x120] sm:$0xff] }
 0x58d   :  { %16815 = vmatmul.mubr.msk.f32.vlgmr.msra.gmra.mxu0 %vm263_vm0, %v13876_v49  ;;  %16820 = vmatprep.subr.mxu0 %v13898_v50 }
 0x58e   :  { %16821 = vmatpush3.msra.mxu0 %v13898_v50  ;;  %16817 = vmatprep.mubr.msk.f32.mxu0 %vm263_vm0, %v13877_v51 }
 0x58f   :  { %16822 = vmatprep.subr.mxu0 %v13897_v52 }
 0x590   :  { %16823 = vmatpush3.msra.mxu0 %v13897_v52 }
 0x591   :  { %16818 = vmatmul.mubr.msk.f32.gmra.mxu0 %vm263_vm0, %v13878_v53  ;;  %16824 = vmatprep.subr.mxu0 %v13896_v54 }
 0x592   :  { %16825 = vmatpush3.msra.mxu0 %v13896_v54  ;;  %16852 = vmatprep.mubr.f32.mxu0 %v19343_v36 }
 0x593   :  { %16826 = vmatprep.subr.mxu0 %v13895_v55 }
 0x594   :  { %16827 = vmatpush3.msra.mxu0 %v13895_v55 }
 0x595   :  { %16828 = vmatprep.subr.mxu0 %v13894_v56 }
 0x596   :  { %16829 = vmatpush3.msra.mxu0 %v13894_v56 }
 0x597   :  { %16830 = vmatprep.subr.mxu0 %v13893_v57 }
 0x598   :  { %16831 = vmatpush3.msra.mxu0 %v13893_v57  ;;  %v13924_v57 = vld [vmem:[%s23863_s3 + $0x128] sm:$0xff] }
 0x599   :  { %16832 = vmatprep.subr.mxu0 %v13892_v58 }
 0x59a   :  { %16833 = vmatpush3.msra.mxu0 %v13892_v58  ;;  %v13946_v58 = vld [vmem:[%s23861_s23 + $0x578] sm:$0xff] }
 0x59b   :  { %16834 = vmatprep.subr.mxu0 %v13891_v59 }
 0x59c   :  { %16835 = vmatpush3.msra.mxu0 %v13891_v59  ;;  %v13925_v59 = vld [vmem:[%s23863_s3 + $0x130] sm:$0xff] }
 0x59d   :  { %16836 = vmatprep.subr.mxu0 %v13890_v60 }
 0x59e   :  { %16837 = vmatpush3.msra.mxu0 %v13890_v60  ;;  %v13945_v60 = vld [vmem:[%s23861_s23 + $0x570] sm:$0xff] }
 0x59f   :  { %16838 = vmatprep.subr.mxu0 %v13889_v61 }
 0x5a0   :  { %16839 = vmatpush3.msra.mxu0 %v13889_v61  ;;  %v13926_v61 = vld [vmem:[%s23863_s3 + $0x138] sm:$0xff] }
 0x5a1   :  { %16840 = vmatprep.subr.mxu0 %v13888_v62 }
 0x5a2   :  { %16841 = vmatpush3.msra.mxu0 %v13888_v62  ;;  %v13944_v62 = vld [vmem:[%s23861_s23 + $0x568] sm:$0xff] }
 0x5a3   :  { %16842 = vmatprep.subr.mxu0 %v13887_v63 }
 0x5a4   :  { %16843 = vmatpush3.msra.mxu0 %v13887_v63  ;;  %v13943_v63 = vld [vmem:[%s23861_s23 + $0x560] sm:$0xff] }
 0x5a5   :  { %16844 = vmatprep.subr.mxu0 %v13886_v0 }
 0x5a6   :  { %16845 = vmatpush3.msra.mxu0 %v13886_v0  ;;  %v13942_v0 = vld [vmem:[%s23861_s23 + $0x558] sm:$0xff] }
 0x5a7   :  { %16846 = vmatprep.subr.mxu0 %v13885_v1 }
 0x5a8   :  { %16847 = vmatpush3.msra.mxu0 %v13885_v1  ;;  %v13941_v1 = vld [vmem:[%s23861_s23 + $0x550] sm:$0xff] }
 0x5a9   :  { %16848 = vmatprep.subr.mxu0 %v13884_v2 }
 0x5aa   :  { %16849 = vmatpush3.msra.mxu0 %v13884_v2  ;;  %v13940_v2 = vld [vmem:[%s23861_s23 + $0x548] sm:$0xff] }
 0x5ab   :  { %16850 = vmatprep.subr.mxu0 %v13883_v5 }
 0x5ac   :  { %16851 = vmatpush3.msra.mxu0 %v13883_v5  ;;  %v13939_v5 = vld [vmem:[%s23861_s23 + $0x540] sm:$0xff] }
 0x5ad   :  { %16853 = vmatmul.mubr.f32.vlgmr.msra.gmra.mxu0 %v19345_v37 }
 0x5ae   :  { %16904 = vmatprep.mubr.msk.f32.mxu0 %vm263_vm0, %v13923_v48  ;;  %v13964_v48 = vld [vmem:[%s23861_s23 + $0x5c8] sm:$0xff] }
 0x64d   :  { %v16816_v9 = vpop.f32.mrf.mxu0 }
 0x64e   :  { %v19890_v10 = vadd.f32 %v16816_v9, %v19814_v40  ;;  %v13910_v40 = vld [vmem:[%s23861_s23 + $0x498] sm:$0xff]  ;;  %v13937_v9 = vld [vmem:[%s23861_s23 + $0x530] sm:$0xff] }
 0x64f   :  { %v19892_v11 = vpop.f32.mrf.mxu0 }
 0x651   :  { %v16819_v12 = vpop.f32.mrf.mxu0 }
 0x652   :  { %v19895_v13 = vadd.f32 %v16819_v12, %v19819_v45  ;;  %v13908_v45 = vld [vmem:[%s23861_s23 + $0x488] sm:$0xff]  ;;  %v13935_v12 = vld [vmem:[%s23861_s23 + $0x520] sm:$0xff] }
 0x653   :  { %v19897_v14 = vpop.f32.mrf.mxu0 }
 0x66d   :  { %v16854_v15 = vpop.f32.mrf.mxu0 }
 0x66e   :  { %16855 = vmatprep.subr.mxu1 %v16854_v15 }
 0x66f   :  { %v1729_v16 = vpop.f32.mrf.mxu0  ;;  %16856 = vmatpush3.msra.mxu1 %v16854_v15  ;;  %v13933_v15 = vld [vmem:[%s23861_s23 + $0x510] sm:$0xff] }
 0x670   :  { %16857 = vmatprep.subr.mxu1 %v1729_v16 }
 0x671   :  { %16858 = vmatpush3.msra.mxu1 %v1729_v16  ;;  %v13932_v16 = vld [vmem:[%s23861_s23 + $0x508] sm:$0xff] }
 0x672   :  { %16860 = vmatmul.mubr.msk.f32.vlgmr.msra.gmra.mxu1 %vm263_vm0, %v13900_v17  ;;  %16865 = vmatprep.subr.mxu1 %v13922_v18  ;;  %v13931_v17 = vld [vmem:[%s23861_s23 + $0x500] sm:$0xff] }
 0x673   :  { %16866 = vmatpush3.msra.mxu1 %v13922_v18  ;;  %16862 = vmatprep.mubr.msk.f32.mxu1 %vm263_vm0, %v13901_v19  ;;  %v13947_v18 = vld [vmem:[%s23863_s3 + $0x140] sm:$0xff] }
 0x674   :  { %16867 = vmatprep.subr.mxu1 %v13921_v20 }
 0x675   :  { %16868 = vmatpush3.msra.mxu1 %v13921_v20 }
 0x676   :  { %16863 = vmatmul.mubr.msk.f32.gmra.mxu1 %vm263_vm0, %v13902_v21  ;;  %16869 = vmatprep.subr.mxu1 %v13920_v22 }
 0x677   :  { %16870 = vmatpush3.msra.mxu1 %v13920_v22  ;;  %16897 = vmatprep.mubr.f32.mxu1 %v19343_v36 }
 0x678   :  { %16871 = vmatprep.subr.mxu1 %v13919_v23 }
 0x679   :  { %16872 = vmatpush3.msra.mxu1 %v13919_v23 }
 0x67a   :  { %16873 = vmatprep.subr.mxu1 %v13918_v24 }
 0x67b   :  { %16874 = vmatpush3.msra.mxu1 %v13918_v24 }
 0x67c   :  { %16875 = vmatprep.subr.mxu1 %v13917_v25 }
 0x67d   :  { %16876 = vmatpush3.msra.mxu1 %v13917_v25 }
 0x67e   :  { %16877 = vmatprep.subr.mxu1 %v13916_v27 }
 0x67f   :  { %16878 = vmatpush3.msra.mxu1 %v13916_v27 }
 0x680   :  { %16879 = vmatprep.subr.mxu1 %v13915_v29 }
 0x681   :  { %16880 = vmatpush3.msra.mxu1 %v13915_v29  ;;  %v13948_v29 = vld [vmem:[%s23863_s3 + $0x148] sm:$0xff] }
 0x682   :  { %16881 = vmatprep.subr.mxu1 %v13914_v30 }
 0x683   :  { %16882 = vmatpush3.msra.mxu1 %v13914_v30  ;;  %v13970_v30 = vld [vmem:[%s23861_s23 + $0x5f8] sm:$0xff] }
 0x684   :  { %16883 = vmatprep.subr.mxu1 %v13913_v32 }
 0x685   :  { %16884 = vmatpush3.msra.mxu1 %v13913_v32  ;;  %v13949_v32 = vld [vmem:[%s23863_s3 + $0x150] sm:$0xff] }
 0x686   :  { %16885 = vmatprep.subr.mxu1 %v13912_v33 }
 0x687   :  { %16886 = vmatpush3.msra.mxu1 %v13912_v33  ;;  %v13969_v33 = vld [vmem:[%s23861_s23 + $0x5f0] sm:$0xff] }
 0x688   :  { %16887 = vmatprep.subr.mxu1 %v13911_v38 }
 0x689   :  { %16888 = vmatpush3.msra.mxu1 %v13911_v38  ;;  %v13950_v38 = vld [vmem:[%s23863_s3 + $0x158] sm:$0xff] }
 0x68a   :  { %16889 = vmatprep.subr.mxu1 %v13910_v40 }
 0x68b   :  { %16890 = vmatpush3.msra.mxu1 %v13910_v40  ;;  %v13968_v40 = vld [vmem:[%s23861_s23 + $0x5e8] sm:$0xff] }
 0x68c   :  { %16891 = vmatprep.subr.mxu1 %v13909_v44 }
 0x68d   :  { %16892 = vmatpush3.msra.mxu1 %v13909_v44  ;;  %v13967_v44 = vld [vmem:[%s23861_s23 + $0x5e0] sm:$0xff] }
 0x68e   :  { %16893 = vmatprep.subr.mxu1 %v13908_v45 }
 0x68f   :  { %16894 = vmatpush3.msra.mxu1 %v13908_v45  ;;  %v13966_v45 = vld [vmem:[%s23861_s23 + $0x5d8] sm:$0xff] }
 0x690   :  { %16895 = vmatprep.subr.mxu1 %v13907_v47 }
 0x691   :  { %16896 = vmatpush3.msra.mxu1 %v13907_v47  ;;  %v13965_v47 = vld [vmem:[%s23861_s23 + $0x5d0] sm:$0xff] }
 0x692   :  { %16898 = vmatmul.mubr.f32.vlgmr.msra.gmra.mxu1 %v19345_v37 }
 0x693   :  { %16949 = vmatprep.mubr.msk.f32.mxu1 %vm263_vm0, %v13947_v18  ;;  %v13990_v18 = vld [vmem:[%s23861_s23 + $0x658] sm:$0xff] }
 0x732   :  { %v16861_v49 = vpop.f32.mrf.mxu1 }
 0x733   :  { %v19966_v50 = vadd.f32 %v16861_v49, %v19890_v10  ;;  %v13936_v10 = vld [vmem:[%s23861_s23 + $0x528] sm:$0xff]  ;;  %v13963_v49 = vld [vmem:[%s23861_s23 + $0x5c0] sm:$0xff] }
 0x734   :  { %v19968_v51 = vpop.f32.mrf.mxu1 }
 0x736   :  { %v16864_v52 = vpop.f32.mrf.mxu1 }
 0x737   :  { %v19971_v53 = vadd.f32 %v16864_v52, %v19895_v13  ;;  %v13934_v13 = vld [vmem:[%s23861_s23 + $0x518] sm:$0xff]  ;;  %v13961_v52 = vld [vmem:[%s23861_s23 + $0x5b0] sm:$0xff] }
 0x738   :  { %v19973_v54 = vpop.f32.mrf.mxu1 }
 0x752   :  { %v16899_v55 = vpop.f32.mrf.mxu1 }
 0x753   :  { %16900 = vmatprep.subr.mxu0 %v16899_v55 }
 0x754   :  { %v1927_v56 = vpop.f32.mrf.mxu1  ;;  %16901 = vmatpush3.msra.mxu0 %v16899_v55  ;;  %v13959_v55 = vld [vmem:[%s23861_s23 + $0x5a0] sm:$0xff] }
 0x755   :  { %16902 = vmatprep.subr.mxu0 %v1927_v56 }
 0x756   :  { %16903 = vmatpush3.msra.mxu0 %v1927_v56  ;;  %v13958_v56 = vld [vmem:[%s23861_s23 + $0x598] sm:$0xff] }
 0x757   :  { %16905 = vmatmul.mubr.msk.f32.vlgmr.msra.gmra.mxu0 %vm263_vm0, %v13924_v57  ;;  %16910 = vmatprep.subr.mxu0 %v13946_v58  ;;  %v13957_v57 = vld [vmem:[%s23861_s23 + $0x590] sm:$0xff] }
 0x758   :  { %16911 = vmatpush3.msra.mxu0 %v13946_v58  ;;  %16907 = vmatprep.mubr.msk.f32.mxu0 %vm263_vm0, %v13925_v59  ;;  %v13956_v58 = vld [vmem:[%s23861_s23 + $0x588] sm:$0xff]  ;;  %v13955_v59 = vld [vmem:[%s23861_s23 + $0x580] sm:$0xff] }
 0x759   :  { %16912 = vmatprep.subr.mxu0 %v13945_v60 }
 0x75a   :  { %16913 = vmatpush3.msra.mxu0 %v13945_v60  ;;  %v13971_v60 = vld [vmem:[%s23863_s3 + $0x160] sm:$0xff] }
 0x75b   :  { %16908 = vmatmul.mubr.msk.f32.gmra.mxu0 %vm263_vm0, %v13926_v61  ;;  %16914 = vmatprep.subr.mxu0 %v13944_v62 }
 0x75c   :  { %16915 = vmatpush3.msra.mxu0 %v13944_v62  ;;  %16942 = vmatprep.mubr.f32.mxu0 %v19343_v36 }
 0x75d   :  { %16916 = vmatprep.subr.mxu0 %v13943_v63 }
 0x75e   :  { %16917 = vmatpush3.msra.mxu0 %v13943_v63 }
 0x75f   :  { %16918 = vmatprep.subr.mxu0 %v13942_v0 }
 0x760   :  { %16919 = vmatpush3.msra.mxu0 %v13942_v0 }
 0x761   :  { %16920 = vmatprep.subr.mxu0 %v13941_v1 }
 0x762   :  { %16921 = vmatpush3.msra.mxu0 %v13941_v1 }
 0x763   :  { %16922 = vmatprep.subr.mxu0 %v13940_v2 }
 0x764   :  { %16923 = vmatpush3.msra.mxu0 %v13940_v2 }
 0x765   :  { %16924 = vmatprep.subr.mxu0 %v13939_v5 }
 0x766   :  { %16925 = vmatpush3.msra.mxu0 %v13939_v5 }
 0x767   :  { %16926 = vmatprep.subr.mxu0 %v13938_v7 }
 0x768   :  { %16927 = vmatpush3.msra.mxu0 %v13938_v7 }
 0x769   :  { %16928 = vmatprep.subr.mxu0 %v13937_v9 }
 0x76a   :  { %16929 = vmatpush3.msra.mxu0 %v13937_v9  ;;  %v13972_v9 = vld [vmem:[%s23863_s3 + $0x168] sm:$0xff] }
 0x76b   :  { %16930 = vmatprep.subr.mxu0 %v13936_v10 }
 0x76c   :  { %16931 = vmatpush3.msra.mxu0 %v13936_v10  ;;  %v13994_v10 = vld [vmem:[%s23861_s23 + $0x678] sm:$0xff] }
 0x76d   :  { %16932 = vmatprep.subr.mxu0 %v13935_v12 }
 0x76e   :  { %16933 = vmatpush3.msra.mxu0 %v13935_v12  ;;  %v13973_v12 = vld [vmem:[%s23863_s3 + $0x170] sm:$0xff] }
 0x76f   :  { %16934 = vmatprep.subr.mxu0 %v13934_v13 }
 0x770   :  { %16935 = vmatpush3.msra.mxu0 %v13934_v13  ;;  %v13993_v13 = vld [vmem:[%s23861_s23 + $0x670] sm:$0xff] }
 0x771   :  { %16936 = vmatprep.subr.mxu0 %v13933_v15 }
 0x772   :  { %16937 = vmatpush3.msra.mxu0 %v13933_v15  ;;  %v13974_v15 = vld [vmem:[%s23863_s3 + $0x178] sm:$0xff] }
 0x773   :  { %16938 = vmatprep.subr.mxu0 %v13932_v16 }
 0x774   :  { %16939 = vmatpush3.msra.mxu0 %v13932_v16  ;;  %v13992_v16 = vld [vmem:[%s23861_s23 + $0x668] sm:$0xff] }
 0x775   :  { %16940 = vmatprep.subr.mxu0 %v13931_v17 }
 0x776   :  { %16941 = vmatpush3.msra.mxu0 %v13931_v17  ;;  %v13991_v17 = vld [vmem:[%s23861_s23 + $0x660] sm:$0xff] }
 0x777   :  { %16943 = vmatmul.mubr.f32.vlgmr.msra.gmra.mxu0 %v19345_v37 }
 0x778   :  { %16994 = vmatprep.mubr.msk.f32.mxu0 %vm263_vm0, %v13971_v60  ;;  %v14016_v60 = vld [vmem:[%s23861_s23 + $0x6e8] sm:$0xff] }
 0x817   :  { %v16906_v19 = vpop.f32.mrf.mxu0 }
 0x818   :  { %v20042_v20 = vadd.f32 %v16906_v19, %v19966_v50  ;;  %v13962_v50 = vld [vmem:[%s23861_s23 + $0x5b8] sm:$0xff]  ;;  %v13989_v19 = vld [vmem:[%s23861_s23 + $0x650] sm:$0xff] }
 0x819   :  { %v20044_v21 = vpop.f32.mrf.mxu0 }
 0x81b   :  { %v16909_v22 = vpop.f32.mrf.mxu0 }
 0x81c   :  { %v20047_v23 = vadd.f32 %v16909_v22, %v19971_v53  ;;  %v13960_v53 = vld [vmem:[%s23861_s23 + $0x5a8] sm:$0xff]  ;;  %v13987_v22 = vld [vmem:[%s23861_s23 + $0x640] sm:$0xff] }
 0x81d   :  { %v20049_v24 = vpop.f32.mrf.mxu0 }
 0x837   :  { %v16944_v25 = vpop.f32.mrf.mxu0 }
 0x838   :  { %16945 = vmatprep.subr.mxu1 %v16944_v25 }
 0x839   :  { %v2125_v27 = vpop.f32.mrf.mxu0  ;;  %16946 = vmatpush3.msra.mxu1 %v16944_v25  ;;  %v13985_v25 = vld [vmem:[%s23861_s23 + $0x630] sm:$0xff] }
 0x83a   :  { %16947 = vmatprep.subr.mxu1 %v2125_v27 }
 0x83b   :  { %16948 = vmatpush3.msra.mxu1 %v2125_v27  ;;  %v13984_v27 = vld [vmem:[%s23861_s23 + $0x628] sm:$0xff] }
 0x83c   :  { %16950 = vmatmul.mubr.msk.f32.vlgmr.msra.gmra.mxu1 %vm263_vm0, %v13948_v29  ;;  %16955 = vmatprep.subr.mxu1 %v13970_v30  ;;  %v13983_v29 = vld [vmem:[%s23861_s23 + $0x620] sm:$0xff] }
 0x83d   :  { %16956 = vmatpush3.msra.mxu1 %v13970_v30  ;;  %16952 = vmatprep.mubr.msk.f32.mxu1 %vm263_vm0, %v13949_v32  ;;  %v13982_v30 = vld [vmem:[%s23861_s23 + $0x618] sm:$0xff]  ;;  %v13981_v32 = vld [vmem:[%s23861_s23 + $0x610] sm:$0xff] }
 0x83e   :  { %16957 = vmatprep.subr.mxu1 %v13969_v33 }
 0x83f   :  { %16958 = vmatpush3.msra.mxu1 %v13969_v33  ;;  %v13980_v33 = vld [vmem:[%s23861_s23 + $0x608] sm:$0xff] }
 0x840   :  { %16953 = vmatmul.mubr.msk.f32.gmra.mxu1 %vm263_vm0, %v13950_v38  ;;  %16959 = vmatprep.subr.mxu1 %v13968_v40  ;;  %v13979_v38 = vld [vmem:[%s23861_s23 + $0x600] sm:$0xff] }
 0x841   :  { %16960 = vmatpush3.msra.mxu1 %v13968_v40  ;;  %16987 = vmatprep.mubr.f32.mxu1 %v19343_v36  ;;  %v13995_v40 = vld [vmem:[%s23863_s3 + $0x180] sm:$0xff] }
 0x842   :  { %16961 = vmatprep.subr.mxu1 %v13967_v44 }
 0x843   :  { %16962 = vmatpush3.msra.mxu1 %v13967_v44 }
 0x844   :  { %16963 = vmatprep.subr.mxu1 %v13966_v45 }
 0x845   :  { %16964 = vmatpush3.msra.mxu1 %v13966_v45 }
 0x846   :  { %16965 = vmatprep.subr.mxu1 %v13965_v47 }
 0x847   :  { %16966 = vmatpush3.msra.mxu1 %v13965_v47 }
 0x848   :  { %16967 = vmatprep.subr.mxu1 %v13964_v48 }
 0x849   :  { %16968 = vmatpush3.msra.mxu1 %v13964_v48 }
 0x84a   :  { %16969 = vmatprep.subr.mxu1 %v13963_v49 }
 0x84b   :  { %16970 = vmatpush3.msra.mxu1 %v13963_v49 }
 0x84c   :  { %16971 = vmatprep.subr.mxu1 %v13962_v50 }
 0x84d   :  { %16972 = vmatpush3.msra.mxu1 %v13962_v50 }
 0x84e   :  { %16973 = vmatprep.subr.mxu1 %v13961_v52 }
 0x84f   :  { %16974 = vmatpush3.msra.mxu1 %v13961_v52 }
 0x850   :  { %16975 = vmatprep.subr.mxu1 %v13960_v53 }
 0x851   :  { %16976 = vmatpush3.msra.mxu1 %v13960_v53 }
 0x852   :  { %16977 = vmatprep.subr.mxu1 %v13959_v55 }
 0x853   :  { %16978 = vmatpush3.msra.mxu1 %v13959_v55  ;;  %v13996_v55 = vld [vmem:[%s23863_s3 + $0x188] sm:$0xff] }
 0x854   :  { %16979 = vmatprep.subr.mxu1 %v13958_v56 }
 0x855   :  { %16980 = vmatpush3.msra.mxu1 %v13958_v56  ;;  %v14018_v56 = vld [vmem:[%s23861_s23 + $0x6f8] sm:$0xff] }
 0x856   :  { %16981 = vmatprep.subr.mxu1 %v13957_v57 }
 0x857   :  { %16982 = vmatpush3.msra.mxu1 %v13957_v57  ;;  %v13997_v57 = vld [vmem:[%s23863_s3 + $0x190] sm:$0xff] }
 0x858   :  { %16983 = vmatprep.subr.mxu1 %v13956_v58 }
 0x859   :  { %16984 = vmatpush3.msra.mxu1 %v13956_v58  ;;  %v14017_v58 = vld [vmem:[%s23861_s23 + $0x6f0] sm:$0xff] }
 0x85a   :  { %16985 = vmatprep.subr.mxu1 %v13955_v59 }
 0x85b   :  { %16986 = vmatpush3.msra.mxu1 %v13955_v59  ;;  %v13998_v59 = vld [vmem:[%s23863_s3 + $0x198] sm:$0xff] }
 0x85c   :  { %16988 = vmatmul.mubr.f32.vlgmr.msra.gmra.mxu1 %v19345_v37 }
 0x85d   :  { %17039 = vmatprep.mubr.msk.f32.mxu1 %vm263_vm0, %v13995_v40  ;;  %v14041_v40 = vld [vmem:[%s23861_s23 + $0x770] sm:$0xff] }
 0x8fc   :  { %v16951_v61 = vpop.f32.mrf.mxu1 }
 0x8fd   :  { %v20118_v62 = vadd.f32 %v16951_v61, %v20042_v20  ;;  %v13988_v20 = vld [vmem:[%s23861_s23 + $0x648] sm:$0xff]  ;;  %v14015_v61 = vld [vmem:[%s23861_s23 + $0x6e0] sm:$0xff] }
 0x8fe   :  { %v20120_v63 = vpop.f32.mrf.mxu1 }
 0x900   :  { %v16954_v0 = vpop.f32.mrf.mxu1 }
 0x901   :  { %v20123_v1 = vadd.f32 %v16954_v0, %v20047_v23  ;;  %v13986_v23 = vld [vmem:[%s23861_s23 + $0x638] sm:$0xff]  ;;  %v14013_v0 = vld [vmem:[%s23861_s23 + $0x6d0] sm:$0xff] }
 0x902   :  { %v20125_v2 = vpop.f32.mrf.mxu1 }
 0x91c   :  { %v16989_v5 = vpop.f32.mrf.mxu1 }
 0x91d   :  { %16990 = vmatprep.subr.mxu0 %v16989_v5 }
 0x91e   :  { %v2323_v7 = vpop.f32.mrf.mxu1  ;;  %16991 = vmatpush3.msra.mxu0 %v16989_v5  ;;  %v14011_v5 = vld [vmem:[%s23861_s23 + $0x6c0] sm:$0xff] }
 0x91f   :  { %16992 = vmatprep.subr.mxu0 %v2323_v7 }
 0x920   :  { %16993 = vmatpush3.msra.mxu0 %v2323_v7  ;;  %v14010_v7 = vld [vmem:[%s23861_s23 + $0x6b8] sm:$0xff] }
 0x921   :  { %16995 = vmatmul.mubr.msk.f32.vlgmr.msra.gmra.mxu0 %vm263_vm0, %v13972_v9  ;;  %17000 = vmatprep.subr.mxu0 %v13994_v10  ;;  %v14009_v9 = vld [vmem:[%s23861_s23 + $0x6b0] sm:$0xff] }
 0x922   :  { %17001 = vmatpush3.msra.mxu0 %v13994_v10  ;;  %16997 = vmatprep.mubr.msk.f32.mxu0 %vm263_vm0, %v13973_v12  ;;  %v14008_v10 = vld [vmem:[%s23861_s23 + $0x6a8] sm:$0xff]  ;;  %v14007_v12 = vld [vmem:[%s23861_s23 + $0x6a0] sm:$0xff] }
 0x923   :  { %17002 = vmatprep.subr.mxu0 %v13993_v13 }
 0x924   :  { %17003 = vmatpush3.msra.mxu0 %v13993_v13  ;;  %v14006_v13 = vld [vmem:[%s23861_s23 + $0x698] sm:$0xff] }
 0x925   :  { %16998 = vmatmul.mubr.msk.f32.gmra.mxu0 %vm263_vm0, %v13974_v15  ;;  %17004 = vmatprep.subr.mxu0 %v13992_v16  ;;  %v14005_v15 = vld [vmem:[%s23861_s23 + $0x690] sm:$0xff] }
 0x926   :  { %17005 = vmatpush3.msra.mxu0 %v13992_v16  ;;  %17032 = vmatprep.mubr.f32.mxu0 %v19343_v36  ;;  %v14004_v16 = vld [vmem:[%s23861_s23 + $0x688] sm:$0xff] }
 0x927   :  { %17006 = vmatprep.subr.mxu0 %v13991_v17 }
 0x928   :  { %17007 = vmatpush3.msra.mxu0 %v13991_v17  ;;  %v14003_v17 = vld [vmem:[%s23861_s23 + $0x680] sm:$0xff] }
 0x929   :  { %17008 = vmatprep.subr.mxu0 %v13990_v18 }
 0x92a   :  { %17009 = vmatpush3.msra.mxu0 %v13990_v18  ;;  %v14019_v18 = vld [vmem:[%s23863_s3 + $0x1a0] sm:$0xff] }
 0x92b   :  { %17010 = vmatprep.subr.mxu0 %v13989_v19 }
 0x92c   :  { %17011 = vmatpush3.msra.mxu0 %v13989_v19 }
 0x92d   :  { %17012 = vmatprep.subr.mxu0 %v13988_v20 }
 0x92e   :  { %17013 = vmatpush3.msra.mxu0 %v13988_v20 }
 0x92f   :  { %17014 = vmatprep.subr.mxu0 %v13987_v22 }
 0x930   :  { %17015 = vmatpush3.msra.mxu0 %v13987_v22 }
 0x931   :  { %17016 = vmatprep.subr.mxu0 %v13986_v23 }
 0x932   :  { %17017 = vmatpush3.msra.mxu0 %v13986_v23 }
 0x933   :  { %17018 = vmatprep.subr.mxu0 %v13985_v25 }
 0x934   :  { %17019 = vmatpush3.msra.mxu0 %v13985_v25 }
 0x935   :  { %17020 = vmatprep.subr.mxu0 %v13984_v27 }
 0x936   :  { %17021 = vmatpush3.msra.mxu0 %v13984_v27 }
 0x937   :  { %17022 = vmatprep.subr.mxu0 %v13983_v29 }
 0x938   :  { %17023 = vmatpush3.msra.mxu0 %v13983_v29 }
 0x939   :  { %17024 = vmatprep.subr.mxu0 %v13982_v30 }
 0x93a   :  { %17025 = vmatpush3.msra.mxu0 %v13982_v30 }
 0x93b   :  { %17026 = vmatprep.subr.mxu0 %v13981_v32 }
 0x93c   :  { %17027 = vmatpush3.msra.mxu0 %v13981_v32  ;;  %v14020_v32 = vld [vmem:[%s23863_s3 + $0x1a8] sm:$0xff] }
 0x93d   :  { %17028 = vmatprep.subr.mxu0 %v13980_v33 }
 0x93e   :  { %17029 = vmatpush3.msra.mxu0 %v13980_v33  ;;  %v14042_v33 = vld [vmem:[%s23861_s23 + $0x778] sm:$0xff] }
 0x93f   :  { %17030 = vmatprep.subr.mxu0 %v13979_v38 }
 0x940   :  { %17031 = vmatpush3.msra.mxu0 %v13979_v38  ;;  %v14021_v38 = vld [vmem:[%s23863_s3 + $0x1b0] sm:$0xff] }
 0x941   :  { %17033 = vmatmul.mubr.f32.vlgmr.msra.gmra.mxu0 %v19345_v37 }
 0x942   :  { %17084 = vmatprep.mubr.msk.f32.mxu0 %vm263_vm0, %v14019_v18  ;;  %v14066_v18 = vld [vmem:[%s23861_s23 + $0x7f8] sm:$0xff] }
 0x9e1   :  { %v16996_v44 = vpop.f32.mrf.mxu0 }
 0x9e2   :  { %v20194_v45 = vadd.f32 %v16996_v44, %v20118_v62  ;;  %v14014_v62 = vld [vmem:[%s23861_s23 + $0x6d8] sm:$0xff] }
 0x9e3   :  { %v20196_v47 = vpop.f32.mrf.mxu0  ;;  %v14022_v44 = vld [vmem:[%s23863_s3 + $0x1b8] sm:$0xff] }
 0x9e5   :  { %v16999_v48 = vpop.f32.mrf.mxu0 }
 0x9e6   :  { %v20199_v49 = vadd.f32 %v16999_v48, %v20123_v1  ;;  %v14012_v1 = vld [vmem:[%s23861_s23 + $0x6c8] sm:$0xff]  ;;  %v14039_v48 = vld [vmem:[%s23861_s23 + $0x760] sm:$0xff] }
 0x9e7   :  { %v20201_v50 = vpop.f32.mrf.mxu0 }
 0xa01   :  { %v17034_v52 = vpop.f32.mrf.mxu0 }
 0xa02   :  { %17035 = vmatprep.subr.mxu1 %v17034_v52 }
 0xa03   :  { %v2521_v53 = vpop.f32.mrf.mxu0  ;;  %17036 = vmatpush3.msra.mxu1 %v17034_v52  ;;  %v14037_v52 = vld [vmem:[%s23861_s23 + $0x750] sm:$0xff] }
 0xa04   :  { %17037 = vmatprep.subr.mxu1 %v2521_v53 }
 0xa05   :  { %17038 = vmatpush3.msra.mxu1 %v2521_v53  ;;  %v14036_v53 = vld [vmem:[%s23861_s23 + $0x748] sm:$0xff] }
 0xa06   :  { %17040 = vmatmul.mubr.msk.f32.vlgmr.msra.gmra.mxu1 %vm263_vm0, %v13996_v55  ;;  %17045 = vmatprep.subr.mxu1 %v14018_v56  ;;  %v14035_v55 = vld [vmem:[%s23861_s23 + $0x740] sm:$0xff] }
 0xa07   :  { %17046 = vmatpush3.msra.mxu1 %v14018_v56  ;;  %17042 = vmatprep.mubr.msk.f32.mxu1 %vm263_vm0, %v13997_v57  ;;  %v14034_v56 = vld [vmem:[%s23861_s23 + $0x738] sm:$0xff]  ;;  %v14033_v57 = vld [vmem:[%s23861_s23 + $0x730] sm:$0xff] }
 0xa08   :  { %17047 = vmatprep.subr.mxu1 %v14017_v58 }
 0xa09   :  { %17048 = vmatpush3.msra.mxu1 %v14017_v58  ;;  %v14032_v58 = vld [vmem:[%s23861_s23 + $0x728] sm:$0xff] }
 0xa0a   :  { %17043 = vmatmul.mubr.msk.f32.gmra.mxu1 %vm263_vm0, %v13998_v59  ;;  %17049 = vmatprep.subr.mxu1 %v14016_v60  ;;  %v14031_v59 = vld [vmem:[%s23861_s23 + $0x720] sm:$0xff] }
 0xa0b   :  { %17050 = vmatpush3.msra.mxu1 %v14016_v60  ;;  %17077 = vmatprep.mubr.f32.mxu1 %v19343_v36  ;;  %v14030_v60 = vld [vmem:[%s23861_s23 + $0x718] sm:$0xff] }
 0xa0c   :  { %17051 = vmatprep.subr.mxu1 %v14015_v61 }
 0xa0d   :  { %17052 = vmatpush3.msra.mxu1 %v14015_v61  ;;  %v14029_v61 = vld [vmem:[%s23861_s23 + $0x710] sm:$0xff] }
 0xa0e   :  { %17053 = vmatprep.subr.mxu1 %v14014_v62 }
 0xa0f   :  { %17054 = vmatpush3.msra.mxu1 %v14014_v62  ;;  %v14028_v62 = vld [vmem:[%s23861_s23 + $0x708] sm:$0xff] }
 0xa10   :  { %17055 = vmatprep.subr.mxu1 %v14013_v0 }
 0xa11   :  { %17056 = vmatpush3.msra.mxu1 %v14013_v0  ;;  %v14027_v0 = vld [vmem:[%s23861_s23 + $0x700] sm:$0xff] }
 0xa12   :  { %17057 = vmatprep.subr.mxu1 %v14012_v1 }
 0xa13   :  { %17058 = vmatpush3.msra.mxu1 %v14012_v1  ;;  %v14043_v1 = vld [vmem:[%s23863_s3 + $0x1c0] sm:$0xff] }
 0xa14   :  { %17059 = vmatprep.subr.mxu1 %v14011_v5 }
 0xa15   :  { %17060 = vmatpush3.msra.mxu1 %v14011_v5 }
 0xa16   :  { %17061 = vmatprep.subr.mxu1 %v14010_v7 }
 0xa17   :  { %17062 = vmatpush3.msra.mxu1 %v14010_v7 }
 0xa18   :  { %17063 = vmatprep.subr.mxu1 %v14009_v9 }
 0xa19   :  { %17064 = vmatpush3.msra.mxu1 %v14009_v9 }
 0xa1a   :  { %17065 = vmatprep.subr.mxu1 %v14008_v10 }
 0xa1b   :  { %17066 = vmatpush3.msra.mxu1 %v14008_v10 }
 0xa1c   :  { %17067 = vmatprep.subr.mxu1 %v14007_v12 }
 0xa1d   :  { %17068 = vmatpush3.msra.mxu1 %v14007_v12 }
 0xa1e   :  { %17069 = vmatprep.subr.mxu1 %v14006_v13 }
 0xa1f   :  { %17070 = vmatpush3.msra.mxu1 %v14006_v13 }
 0xa20   :  { %17071 = vmatprep.subr.mxu1 %v14005_v15 }
 0xa21   :  { %17072 = vmatpush3.msra.mxu1 %v14005_v15 }
 0xa22   :  { %17073 = vmatprep.subr.mxu1 %v14004_v16 }
 0xa23   :  { %17074 = vmatpush3.msra.mxu1 %v14004_v16 }
 0xa24   :  { %17075 = vmatprep.subr.mxu1 %v14003_v17 }
 0xa25   :  { %17076 = vmatpush3.msra.mxu1 %v14003_v17  ;;  %v14044_v17 = vld [vmem:[%s23863_s3 + $0x1c8] sm:$0xff] }
 0xa26   :  { %17078 = vmatmul.mubr.f32.vlgmr.msra.gmra.mxu1 %v19345_v37 }
 0xa27   :  { %17129 = vmatprep.mubr.msk.f32.mxu1 %vm263_vm0, %v14043_v1  ;;  %v14069_v1 = vld [vmem:[%s23863_s3 + $0x1f0] sm:$0xff] }
 0xac6   :  { %v17041_v19 = vpop.f32.mrf.mxu1 }
 0xac7   :  { %v20270_v20 = vadd.f32 %v17041_v19, %v20194_v45  ;;  %v14040_v45 = vld [vmem:[%s23861_s23 + $0x768] sm:$0xff]  ;;  %v14045_v19 = vld [vmem:[%s23863_s3 + $0x1d0] sm:$0xff] }
 0xac8   :  { %v20272_v22 = vpop.f32.mrf.mxu1 }
 0xaca   :  { %v17044_v23 = vpop.f32.mrf.mxu1 }
 0xacb   :  { %v20275_v25 = vadd.f32 %v17044_v23, %v20199_v49  ;;  %v14038_v49 = vld [vmem:[%s23861_s23 + $0x758] sm:$0xff] }
 0xacc   :  { %v20277_v27 = vpop.f32.mrf.mxu1  ;;  %v14046_v23 = vld [vmem:[%s23863_s3 + $0x1d8] sm:$0xff] }
 0xae6   :  { %v17079_v29 = vpop.f32.mrf.mxu1 }
 0xae7   :  { %17080 = vmatprep.subr.mxu0 %v17079_v29 }
 0xae8   :  { %v2719_v30 = vpop.f32.mrf.mxu1  ;;  %17081 = vmatpush3.msra.mxu0 %v17079_v29  ;;  %v14063_v29 = vld [vmem:[%s23861_s23 + $0x7e0] sm:$0xff] }
 0xae9   :  { %17082 = vmatprep.subr.mxu0 %v2719_v30 }
 0xaea   :  { %17083 = vmatpush3.msra.mxu0 %v2719_v30  ;;  %v14062_v30 = vld [vmem:[%s23861_s23 + $0x7d8] sm:$0xff] }
 0xaeb   :  { %17085 = vmatmul.mubr.msk.f32.vlgmr.msra.gmra.mxu0 %vm263_vm0, %v14020_v32  ;;  %17090 = vmatprep.subr.mxu0 %v14042_v33  ;;  %v14061_v32 = vld [vmem:[%s23861_s23 + $0x7d0] sm:$0xff] }
 0xaec   :  { %17091 = vmatpush3.msra.mxu0 %v14042_v33  ;;  %17087 = vmatprep.mubr.msk.f32.mxu0 %vm263_vm0, %v14021_v38  ;;  %v14060_v33 = vld [vmem:[%s23861_s23 + $0x7c8] sm:$0xff]  ;;  %v14059_v38 = vld [vmem:[%s23861_s23 + $0x7c0] sm:$0xff] }
 0xaed   :  { %17092 = vmatprep.subr.mxu0 %v14041_v40 }
 0xaee   :  { %17093 = vmatpush3.msra.mxu0 %v14041_v40  ;;  %v14057_v40 = vld [vmem:[%s23861_s23 + $0x7b0] sm:$0xff] }
 0xaef   :  { %17088 = vmatmul.mubr.msk.f32.gmra.mxu0 %vm263_vm0, %v14022_v44  ;;  %17094 = vmatprep.subr.mxu0 %v14040_v45  ;;  %v14056_v44 = vld [vmem:[%s23861_s23 + $0x7a8] sm:$0xff] }
 0xaf0   :  { %17095 = vmatpush3.msra.mxu0 %v14040_v45  ;;  %17122 = vmatprep.mubr.f32.mxu0 %v19343_v36  ;;  %v14055_v45 = vld [vmem:[%s23861_s23 + $0x7a0] sm:$0xff] }
 0xaf1   :  { %17096 = vmatprep.subr.mxu0 %v14039_v48 }
 0xaf2   :  { %17097 = vmatpush3.msra.mxu0 %v14039_v48  ;;  %v14054_v48 = vld [vmem:[%s23861_s23 + $0x798] sm:$0xff] }
 0xaf3   :  { %17098 = vmatprep.subr.mxu0 %v14038_v49 }
 0xaf4   :  { %17099 = vmatpush3.msra.mxu0 %v14038_v49  ;;  %v14053_v49 = vld [vmem:[%s23861_s23 + $0x790] sm:$0xff] }
 0xaf5   :  { %17100 = vmatprep.subr.mxu0 %v14037_v52 }
 0xaf6   :  { %17101 = vmatpush3.msra.mxu0 %v14037_v52  ;;  %v14052_v52 = vld [vmem:[%s23861_s23 + $0x788] sm:$0xff] }
 0xaf7   :  { %17102 = vmatprep.subr.mxu0 %v14036_v53 }
 0xaf8   :  { %17103 = vmatpush3.msra.mxu0 %v14036_v53  ;;  %v14051_v53 = vld [vmem:[%s23861_s23 + $0x780] sm:$0xff] }
 0xaf9   :  { %17104 = vmatprep.subr.mxu0 %v14035_v55 }
 0xafa   :  { %17105 = vmatpush3.msra.mxu0 %v14035_v55  ;;  %v14067_v55 = vld [vmem:[%s23863_s3 + $0x1e0] sm:$0xff] }
 0xafb   :  { %17106 = vmatprep.subr.mxu0 %v14034_v56 }
 0xafc   :  { %17107 = vmatpush3.msra.mxu0 %v14034_v56 }
 0xafd   :  { %17108 = vmatprep.subr.mxu0 %v14033_v57 }
 0xafe   :  { %17109 = vmatpush3.msra.mxu0 %v14033_v57 }
 0xaff   :  { %17110 = vmatprep.subr.mxu0 %v14032_v58 }
 0xb00   :  { %17111 = vmatpush3.msra.mxu0 %v14032_v58 }
 0xb01   :  { %17112 = vmatprep.subr.mxu0 %v14031_v59 }
 0xb02   :  { %17113 = vmatpush3.msra.mxu0 %v14031_v59 }
 0xb03   :  { %17114 = vmatprep.subr.mxu0 %v14030_v60 }
 0xb04   :  { %17115 = vmatpush3.msra.mxu0 %v14030_v60 }
 0xb05   :  { %17116 = vmatprep.subr.mxu0 %v14029_v61 }
 0xb06   :  { %17117 = vmatpush3.msra.mxu0 %v14029_v61 }
 0xb07   :  { %17118 = vmatprep.subr.mxu0 %v14028_v62 }
 0xb08   :  { %17119 = vmatpush3.msra.mxu0 %v14028_v62 }
 0xb09   :  { %17120 = vmatprep.subr.mxu0 %v14027_v0 }
 0xb0a   :  { %17121 = vmatpush3.msra.mxu0 %v14027_v0 }
 0xb0b   :  { %17123 = vmatmul.mubr.f32.vlgmr.msra.gmra.mxu0 %v19345_v37 }
 0xb0c   :  { %17174 = vmatprep.mubr.msk.f32.mxu0 %vm263_vm0, %v14067_v55 }
 0xbab   :  { %v17086_v5 = vpop.f32.mrf.mxu0 }
 0xbac   :  { %v20346_v7 = vadd.f32 %v17086_v5, %v20270_v20  ;;  %v14065_v20 = vld [vmem:[%s23861_s23 + $0x7f0] sm:$0xff]  ;;  %v14070_v5 = vld [vmem:[%s23863_s3 + $0x1f8] sm:$0xff] }
 0xbad   :  { %v20348_v9 = vpop.f32.mrf.mxu0 }
 0xbaf   :  { %v17089_v10 = vpop.f32.mrf.mxu0 }
 0xbb0   :  { %v20351_v12 = vadd.f32 %v17089_v10, %v20275_v25  ;;  %v14064_v25 = vld [vmem:[%s23861_s23 + $0x7e8] sm:$0xff] }
 0xbb1   :  { %v20353_v13 = vpop.f32.mrf.mxu0 }
 0xbcb   :  { %v17124_v15 = vpop.f32.mrf.mxu0 }
 0xbcc   :  { %17125 = vmatprep.subr.mxu1 %v17124_v15 }
 0xbcd   :  { %v2917_v16 = vpop.f32.mrf.mxu0  ;;  %17126 = vmatpush3.msra.mxu1 %v17124_v15 }
 0xbce   :  { %17127 = vmatprep.subr.mxu1 %v2917_v16 }
 0xbcf   :  { %17128 = vmatpush3.msra.mxu1 %v2917_v16 }
 0xbd0   :  { %17130 = vmatmul.mubr.msk.f32.vlgmr.msra.gmra.mxu1 %vm263_vm0, %v14044_v17  ;;  %17135 = vmatprep.subr.mxu1 %v14066_v18 }
 0xbd1   :  { %17136 = vmatpush3.msra.mxu1 %v14066_v18  ;;  %17132 = vmatprep.mubr.msk.f32.mxu1 %vm263_vm0, %v14045_v19 }
 0xbd2   :  { %17137 = vmatprep.subr.mxu1 %v14065_v20 }
 0xbd3   :  { %17138 = vmatpush3.msra.mxu1 %v14065_v20 }
 0xbd4   :  { %17133 = vmatmul.mubr.msk.f32.gmra.mxu1 %vm263_vm0, %v14046_v23  ;;  %17139 = vmatprep.subr.mxu1 %v14064_v25 }
 0xbd5   :  { %17140 = vmatpush3.msra.mxu1 %v14064_v25  ;;  %17167 = vmatprep.mubr.f32.mxu1 %v19343_v36  ;;  %v14058_v36 = vld [vmem:[%s23861_s23 + $0x7b8] sm:$0xff] }
 0xbd6   :  { %17141 = vmatprep.subr.mxu1 %v14063_v29 }
 0xbd7   :  { %17142 = vmatpush3.msra.mxu1 %v14063_v29 }
 0xbd8   :  { %17143 = vmatprep.subr.mxu1 %v14062_v30 }
 0xbd9   :  { %17144 = vmatpush3.msra.mxu1 %v14062_v30 }
 0xbda   :  { %17145 = vmatprep.subr.mxu1 %v14061_v32 }
 0xbdb   :  { %17146 = vmatpush3.msra.mxu1 %v14061_v32 }
 0xbdc   :  { %17147 = vmatprep.subr.mxu1 %v14060_v33 }
 0xbdd   :  { %17148 = vmatpush3.msra.mxu1 %v14060_v33 }
 0xbde   :  { %17149 = vmatprep.subr.mxu1 %v14059_v38 }
 0xbdf   :  { %17150 = vmatpush3.msra.mxu1 %v14059_v38 }
 0xbe0   :  { %17151 = vmatprep.subr.mxu1 %v14058_v36 }
 0xbe1   :  { %17152 = vmatpush3.msra.mxu1 %v14058_v36 }
 0xbe2   :  { %17153 = vmatprep.subr.mxu1 %v14057_v40 }
 0xbe3   :  { %17154 = vmatpush3.msra.mxu1 %v14057_v40 }
 0xbe4   :  { %17155 = vmatprep.subr.mxu1 %v14056_v44 }
 0xbe5   :  { %17156 = vmatpush3.msra.mxu1 %v14056_v44 }
 0xbe6   :  { %17157 = vmatprep.subr.mxu1 %v14055_v45 }
 0xbe7   :  { %17158 = vmatpush3.msra.mxu1 %v14055_v45 }
 0xbe8   :  { %17159 = vmatprep.subr.mxu1 %v14054_v48 }
 0xbe9   :  { %17160 = vmatpush3.msra.mxu1 %v14054_v48 }
 0xbea   :  { %17161 = vmatprep.subr.mxu1 %v14053_v49 }
 0xbeb   :  { %17162 = vmatpush3.msra.mxu1 %v14053_v49 }
 0xbec   :  { %17163 = vmatprep.subr.mxu1 %v14052_v52 }
 0xbed   :  { %17164 = vmatpush3.msra.mxu1 %v14052_v52 }
 0xbee   :  { %17165 = vmatprep.subr.mxu1 %v14051_v53 }
 0xbef   :  { %17166 = vmatpush3.msra.mxu1 %v14051_v53 }
 0xbf0   :  { %17168 = vmatmul.mubr.f32.vlgmr.msra.gmra.mxu1 %v19345_v37  ;;  %v14068_v37 = vld [vmem:[%s23863_s3 + $0x1e8] sm:$0xff] }
 0xc90   :  { %v17131_v56 = vpop.f32.mrf.mxu1 }
 0xc91   :  { %v3029_v57 = vadd.f32 %v17131_v56, %v20346_v7  ;;  %v440_v7 = vadd.f32 %v19507_v31, %v19503_v26 }
 0xc92   :  { %v3009_v58 = vpop.f32.mrf.mxu1 }
 0xc93   :  { %v652_v10 = vadd.f32 %v19513_v39, %v440_v7  ;;  %v7222_v7 = vld [vmem:[%s23835_s7] sm:$0xff] }
 0xc94   :  { %v17134_v59 = vpop.f32.mrf.mxu1 }
 0xc95   :  { %v3031_v60 = vadd.f32 %v17134_v59, %v20351_v12  ;;  %v450_v12 = vadd.f32 %v19509_v34, %v19505_v28  ;;  %v850_v15 = vadd.f32 %v19588_v3, %v652_v10  ;;  %v3312_v10 = vld [vmem:[%s23865_s27 + $0x8] sm:$0xff] }
 0xc96   :  { %v3019_v61 = vpop.f32.mrf.mxu1 }
 0xc97   :  { %v654_v16 = vadd.f32 %v19517_v42, %v450_v12  ;;  %v1048_v17 = vadd.f32 %v19664_v35, %v850_v15  ;;  %v7279_v12 = vld [vmem:[%s23836_s8 + $0x8] sm:$0xff]  ;;  %v3285_v15 = vld [vmem:[%s23864_s22 + $0x10] sm:$0xff] }
 0xc99   :  { %v852_v18 = vadd.f32 %v19593_v6, %v654_v16  ;;  %v1246_v19 = vadd.f32 %v19740_v4, %v1048_v17  ;;  %v3350_v16 = vld [vmem:[%s23837_s6 + $0x18] sm:$0xff] }
 0xc9a   :  { %v14082_v17 = vld [vmem:[%s23837_s6 + $0x38] sm:$0xff] }
 0xc9b   :  { %v1050_v20 = vadd.f32 %v19669_v41, %v852_v18  ;;  %v1444_v23 = vadd.f32 %v19816_v43, %v1246_v19  ;;  %v7225_v18 = vld [vmem:[%s23835_s7 + $0x18] sm:$0xff]  ;;  %17194 = vmatprep.subr.mxu1 %v14082_v17  ;;  %v3349_v19 = vld [vmem:[%s23837_s6 + $0x10] sm:$0xff] }
 0xc9c   :  { %17195 = vmatpush3.msra.mxu1 %v14082_v17 }
 0xc9d   :  { %v1248_v26 = vadd.f32 %v19745_v8, %v1050_v20  ;;  %v1642_v31 = vadd.f32 %v19892_v11, %v1444_v23  ;;  %v14081_v20 = vld [vmem:[%s23837_s6 + $0x30] sm:$0xff]  ;;  %v3286_v23 = vld [vmem:[%s23864_s22 + $0x18] sm:$0xff] }
 0xc9e   :  { %17196 = vmatprep.subr.mxu1 %v14081_v20 }
 0xc9f   :  { %v1446_v28 = vadd.f32 %v19821_v46, %v1248_v26  ;;  %v1840_v34 = vadd.f32 %v19968_v51, %v1642_v31  ;;  %v3348_v26 = vld [vmem:[%s23837_s6 + $0x8] sm:$0xff]  ;;  %17197 = vmatpush3.msra.mxu1 %v14081_v20 }
 0xca0   :  { %v14080_v31 = vld [vmem:[%s23837_s6 + $0x28] sm:$0xff] }
 0xca1   :  { %v1644_v39 = vadd.f32 %v19897_v14, %v1446_v28  ;;  %v2038_v42 = vadd.f32 %v20044_v21, %v1840_v34  ;;  %17198 = vmatprep.subr.mxu1 %v14080_v31  ;;  %v3347_v28 = vld [vmem:[%s23837_s6] sm:$0xff] }
 0xca2   :  { %v14079_v34 = vld [vmem:[%s23837_s6 + $0x20] sm:$0xff]  ;;  %17199 = vmatpush3.msra.mxu1 %v14080_v31  ;;  %v3449_v31 = vld [vmem:[%s23839_s5 + $0x8] sm:$0xff] }
 0xca3   :  { %v1842_v3 = vadd.f32 %v19973_v54, %v1644_v39  ;;  %v2236_v6 = vadd.f32 %v20120_v63, %v2038_v42  ;;  %v3313_v39 = vld [vmem:[%s23865_s27 + $0x10] sm:$0xff]  ;;  %17200 = vmatprep.subr.mxu1 %v14079_v34  ;;  %v3314_v42 = vld [vmem:[%s23865_s27 + $0x18] sm:$0xff] }
 0xca4   :  { %17201 = vmatpush3.msra.mxu1 %v14079_v34  ;;  %v3450_v34 = vld [vmem:[%s23839_s5 + $0x10] sm:$0xff] }
 0xca5   :  { %v2040_v35 = vadd.f32 %v20049_v24, %v1842_v3  ;;  %v2434_v41 = vadd.f32 %v20196_v47, %v2236_v6  ;;  %v7223_v3 = vld [vmem:[%s23835_s7 + $0x8] sm:$0xff]  ;;  %v7278_v6 = vld [vmem:[%s23836_s8] sm:$0xff] }
 0xca7   :  { %v2238_v4 = vadd.f32 %v20125_v2, %v2040_v35  ;;  %v2632_v8 = vadd.f32 %v20272_v22, %v2434_v41  ;;  %v7224_v35 = vld [vmem:[%s23835_s7 + $0x10] sm:$0xff] }
 0xca8   :  { %v7280_v41 = vld [vmem:[%s23836_s8 + $0x10] sm:$0xff] }
 0xca9   :  { %v2436_v43 = vadd.f32 %v20201_v50, %v2238_v4  ;;  %v2830_v46 = vadd.f32 %v20348_v9, %v2632_v8 }
 0xcab   :  { %v2634_v14 = vadd.f32 %v20277_v27, %v2436_v43  ;;  %v3028_v51 = vadd.f32 %v3009_v58, %v2830_v46 }
 0xcad   :  { %v2832_v54 = vadd.f32 %v20353_v13, %v2634_v14  ;;  %v19135_v13 = vmov 0  }
 0xcae   :  { %19086 = vset.pattern.permute.xlu1 %v19135_v13  ;;  %19085 = vset.pattern.permute.xlu0 %v19135_v13 }
 0xcaf   :  { %v3030_v24 = vadd.f32 %v3019_v61, %v2832_v54 }
 0xcb0   :  { %v17169_v62 = vpop.f32.mrf.mxu1 }
 0xcb1   :  { %17170 = vmatprep.subr.mxu0 %v17169_v62 }
 0xcb2   :  { %v3115_v0 = vpop.f32.mrf.mxu1  ;;  %17171 = vmatpush3.msra.mxu0 %v17169_v62 }
 0xcb3   :  { %17172 = vmatprep.subr.mxu0 %v3115_v0 }
 0xcb4   :  { %17173 = vmatpush3.msra.mxu0 %v3115_v0 }
 0xcb5   :  { %17175 = vmatmul.mubr.msk.f32.vlgmr.msra.gmra.mxu0 %vm263_vm0, %v14068_v37  ;;  %v3284_v37 = vld [vmem:[%s23864_s22 + $0x8] sm:$0xff]  ;;  %17180 = vmatprep.subr.mxu0 %v3350_v16 }
 0xcb6   :  { %17177 = vmatprep.mubr.msk.f32.mxu0 %vm263_vm0, %v14069_v1  ;;  %v3283_v1 = vld [vmem:[%s23864_s22] sm:$0xff]  ;;  %17181 = vmatpush3.msra.mxu0 %v3350_v16 }
 0xcb7   :  { %17182 = vmatprep.subr.mxu0 %v3349_v19 }
 0xcb8   :  { %17183 = vmatpush3.msra.mxu0 %v3349_v19 }
 0xcb9   :  { %17178 = vmatmul.mubr.msk.f32.gmra.mxu0 %vm263_vm0, %v14070_v5  ;;  %v3311_v5 = vld [vmem:[%s23865_s27] sm:$0xff]  ;;  %17184 = vmatprep.subr.mxu0 %v3348_v26 }
 0xcba   :  { %17185 = vmatpush3.msra.mxu0 %v3348_v26  ;;  %v14088_v26 = vld [vmem:[%s23839_s5 + $0x48] sm:$0xff] }
 0xcbb   :  { %17186 = vmatprep.subr.mxu0 %v3347_v28 }
 0xcbc   :  { %17187 = vmatpush3.msra.mxu0 %v3347_v28  ;;  %v14089_v28 = vld [vmem:[%s23839_s5 + $0x50] sm:$0xff] }
 0xd75   :  { %v17176_v11 = vpop.f32.mrf.mxu0 }
 0xd76   :  { %v3227_v47 = vadd.f32 %v17176_v11, %v3029_v57 }
 0xd77   :  { %v3207_v21 = vpop.f32.mrf.mxu0 }
 0xd78   :  { %v3226_v63 = vadd.f32 %v3207_v21, %v3028_v51  ;;  %v3234_v30 = vsel %vm3230_vm1, %v3227_v47, 0.0 }
 0xd79   :  { %v17179_v25 = vpop.f32.mrf.mxu0 }
 0xd7a   :  { %v3231_v2 = vsel %vm3230_vm1, %v3226_v63, 0.0  ;;  %v3229_v50 = vadd.f32 %v17179_v25, %v3031_v60 }
 0xd7b   :  { %v3217_v29 = vpop.f32.mrf.mxu0  ;;  %3232 = vadd.xlane.f32.xlu0 %v3231_v2 }
 0xd7c   :  { %v3228_v22 = vadd.f32 %v3217_v29, %v3030_v24  ;;  %v3240_v27 = vsel %vm3230_vm1, %v3229_v50, 0.0 }
 0xd7e   :  { %v3237_v9 = vsel %vm3230_vm1, %v3228_v22, 0.0 }
 0xd7f   :  { %3238 = vadd.xlane.f32.xlu1 %v3237_v9  ;;  %3235 = vadd.xlane.f32.xlu0 %v3234_v30 }
 0xd83   :  { %3241 = vadd.xlane.f32.xlu1 %v3240_v27 }
 0xe04   :  { %v3233_v32 = vpop.xlane.xlu0 %3232 }
 0xe05   :  { %v3243_v33 = vmul.f32 0.03125, %v3233_v32 }
 0xe07   :  { %v20467_v38 = vsub.f32 %v3226_v63, %v3243_v33 }
 0xe08   :  { %v3239_v36 = vpop.xlane.xlu1 %3238  ;;  %v3236_v40 = vpop.xlane.xlu0 %3235 }
 0xe09   :  { %v3245_v44 = vmul.f32 0.03125, %v3239_v36  ;;  %v3244_v45 = vmul.f32 0.03125, %v3236_v40  ;;  %v3251_v48 = vmul.f32 %v20467_v38, %v20467_v38 }
 0xe0b   :  { %v20471_v49 = vsub.f32 %v3228_v22, %v3245_v44  ;;  %v20473_v52 = vsub.f32 %v3227_v47, %v3244_v45  ;;  %v3255_v53 = vsel %vm3230_vm1, %v3251_v48, 0.0 }
 0xe0c   :  { %v3242_v55 = vpop.xlane.xlu1 %3241  ;;  %3256 = vadd.xlane.f32.xlu0 %v3255_v53 }
 0xe0d   :  { %v3246_v56 = vmul.f32 0.03125, %v3242_v55  ;;  %v3253_v57 = vmul.f32 %v20471_v49, %v20471_v49  ;;  %v3252_v58 = vmul.f32 %v20473_v52, %v20473_v52 }
 0xe0f   :  { %v20480_v59 = vsub.f32 %v3229_v50, %v3246_v56  ;;  %v3261_v60 = vsel %vm3230_vm1, %v3253_v57, 0.0  ;;  %v3258_v61 = vsel %vm3230_vm1, %v3252_v58, 0.0 }
 0xe10   :  { %3262 = vadd.xlane.f32.xlu0 %v3261_v60  ;;  %3259 = vadd.xlane.f32.xlu1 %v3258_v61 }
 0xe11   :  { %v3254_v62 = vmul.f32 %v20480_v59, %v20480_v59 }
 0xe13   :  { %v3264_v0 = vsel %vm3230_vm1, %v3254_v62, 0.0 }
 0xe14   :  { %3265 = vadd.xlane.f32.xlu1 %v3264_v0 }
 0xe25   :  { %3294 = vperm.xlu1 %19086, %v3284_v37  }
 0xe26   :  { %3289 = vperm.xlu0 %19085, %v3283_v1  }
 0xe29   :  { %3317 = vperm.xlu1 %19086, %v3311_v5  }
 0xe2a   :  { %7232 = vperm.xlu0 %19085, %v7222_v7   ;;  %v14087_v7 = vld [vmem:[%s23839_s5 + $0x40] sm:$0xff] }
 0xe2d   :  { %3322 = vperm.xlu1 %19086, %v3312_v10   ;;  %v3448_v10 = vld [vmem:[%s23839_s5] sm:$0xff] }
 0xe2e   :  { %7293 = vperm.xlu0 %19085, %v7279_v12  }
 0xe31   :  { %3299 = vperm.xlu1 %19086, %v3285_v15  }
 0xe32   :  { %7247 = vperm.xlu0 %19085, %v7225_v18  }
 0xe35   :  { %3304 = vperm.xlu1 %19086, %v3286_v23  }
 0xe39   :  { %3327 = vperm.xlu1 %19086, %v3313_v39   ;;  %v14114_v39 = vld [vmem:[%s23837_s6 + $0x58] sm:$0xff] }
 0xe3d   :  { %3332 = vperm.xlu1 %19086, %v3314_v42   ;;  %v14090_v42 = vld [vmem:[%s23839_s5 + $0x58] sm:$0xff] }
 0xe41   :  { %7237 = vperm.xlu1 %19086, %v7223_v3   ;;  %v3451_v3 = vld [vmem:[%s23839_s5 + $0x18] sm:$0xff] }
 0xe45   :  { %7288 = vperm.xlu1 %19086, %v7278_v6   ;;  %v14091_v6 = vld [vmem:[%s23839_s5 + $0x60] sm:$0xff] }
 0xe49   :  { %7242 = vperm.xlu1 %19086, %v7224_v35   ;;  %v3452_v35 = vld [vmem:[%s23839_s5 + $0x20] sm:$0xff] }
 0xe4d   :  { %7298 = vperm.xlu1 %19086, %v7280_v41   ;;  %v14113_v41 = vld [vmem:[%s23837_s6 + $0x50] sm:$0xff] }
 0xe95   :  { %v3257_v4 = vpop.xlane.xlu0 %3256 }
 0xe96   :  { %v3267_v8 = vmul.f32 0.03125, %v3257_v4  ;;  %v14092_v4 = vld [vmem:[%s23839_s5 + $0x68] sm:$0xff] }
 0xe98   :  { %v3271_v43 = vadd.f32 1e-05, %v3267_v8  ;;  %v3453_v8 = vld [vmem:[%s23839_s5 + $0x28] sm:$0xff] }
 0xe99   :  { %v3260_v46 = vpop.xlane.xlu1 %3259  ;;  %v3263_v11 = vpop.xlane.xlu0 %3262 }
 0xe9a   :  { %19087 = vrsqrt.f32 %v3271_v43  ;;  %v3268_v14 = vmul.f32 0.03125, %v3260_v46  ;;  %v3269_v51 = vmul.f32 0.03125, %v3263_v11  ;;  %v14093_v43 = vld [vmem:[%s23839_s5 + $0x70] sm:$0xff]  ;;  %v14112_v11 = vld [vmem:[%s23837_s6 + $0x48] sm:$0xff] }
 0xe9b   :  { %v3454_v46 = vld [vmem:[%s23839_s5 + $0x30] sm:$0xff] }
 0xe9c   :  { %v3272_v21 = vadd.f32 1e-05, %v3268_v14  ;;  %v3273_v54 = vadd.f32 1e-05, %v3269_v51  ;;  %v14094_v14 = vld [vmem:[%s23839_s5 + $0x78] sm:$0xff] }
 0xe9d   :  { %v3266_v63 = vpop.xlane.xlu1 %3265  ;;  %v3455_v51 = vld [vmem:[%s23839_s5 + $0x38] sm:$0xff] }
 0xe9e   :  { %19089 = vrsqrt.f32 %v3272_v21  ;;  %v3270_v25 = vmul.f32 0.03125, %v3266_v63  ;;  %v14111_v21 = vld [vmem:[%s23837_s6 + $0x40] sm:$0xff]  ;;  %v14137_v63 = vld [vmem:[%s23837_s6 + $0x70] sm:$0xff] }
 0xe9f   :  { %19091 = vrsqrt.f32 %v3273_v54  ;;  %v14138_v54 = vld [vmem:[%s23837_s6 + $0x78] sm:$0xff] }
 0xea0   :  { %v3274_v24 = vadd.f32 1e-05, %v3270_v25  ;;  %v14136_v25 = vld [vmem:[%s23837_s6 + $0x68] sm:$0xff] }
 0xea1   :  { %v3295_v47 = vpop.permute.xlu1 %3294  ;;  %v3290_v50 = vpop.permute.xlu0 %3289 }
 0xea2   :  { %19093 = vrsqrt.f32 %v3274_v24  ;;  %v14135_v24 = vld [vmem:[%s23837_s6 + $0x60] sm:$0xff] }
 0xea5   :  { %v3318_v2 = vpop.permute.xlu1 %3317 }
 0xea7   :  { %v19088_v29 = vpop.eup %19087 }
 0xea8   :  { %v3279_v22 = vmul.f32 %v19088_v29, %v20467_v38 }
 0xea9   :  { %v3323_v9 = vpop.permute.xlu1 %3322 }
 0xeaa   :  { %v3307_v30 = vmul.f32 %v3290_v50, %v3279_v22 }
 0xeab   :  { %v19090_v27 = vpop.eup %19089 }
 0xeac   :  { %v3280_v13 = vmul.f32 %v19090_v27, %v20473_v52  ;;  %v3335_v32 = vadd.f32 %v3318_v2, %v3307_v30  ;;  %v19092_v33 = vpop.eup %19091  ;;  %v14143_v2 = vld [vmem:[%s23839_s5 + $0xc0] sm:$0xff] }
 0xead   :  { %v3300_v36 = vpop.permute.xlu1 %3299  ;;  %v3281_v38 = vmul.f32 %v19092_v33, %v20471_v49 }
 0xeae   :  { %v3308_v40 = vmul.f32 %v3295_v47, %v3280_v13  ;;  %v3339_v44 = vmul.f32 0.2, %v3335_v32  ;;  %13703 = vst.msk [vmem:[%s23838_s20 + $0x20] sm:$0xff] %vm3230_vm1, %v3335_v32  ;;  %v14119_v47 = vld [vmem:[%s23839_s5 + $0x80] sm:$0xff] }
 0xeaf   :  { %v19094_v53 = vpop.eup %19093  ;;  %v3309_v57 = vmul.f32 %v3300_v36, %v3281_v38 }
 0xeb0   :  { %v20562_v45 = vmax.f32 %v3335_v32, %v3339_v44  ;;  %v3336_v48 = vadd.f32 %v3323_v9, %v3308_v40  ;;  %v3282_v58 = vmul.f32 %v19094_v53, %v20480_v59 }
 0xeb1   :  { %v3305_v55 = vpop.permute.xlu1 %3304 }
 0xeb2   :  { %v3340_v56 = vmul.f32 0.2, %v3336_v48  ;;  %13704 = vst.msk [vmem:[%s23838_s20 + $0x28] sm:$0xff] %vm3230_vm1, %v3336_v48  ;;  %17188 = vmatprep.mubr.msk.f32.mxu0 %vm3230_vm1, %v20562_v45  ;;  %17202 = vmatprep.mubr.msk.f32.mxu1 %vm3230_vm1, %v20562_v45  ;;  %v3310_v61 = vmul.f32 %v3305_v55, %v3282_v58 }
 0xeb4   :  { %v20573_v52 = vmax.f32 %v3336_v48, %v3340_v56 }
 0xeb5   :  { %v3328_v49 = vpop.permute.xlu1 %3327 }
 0xeb6   :  { %v3337_v60 = vadd.f32 %v3328_v49, %v3309_v57  ;;  %17189 = vmatmul.mubr.msk.f32.vlgmr.msra.gmra.mxu0 %vm3230_vm1, %v20573_v52  ;;  %17203 = vmatmul.mubr.msk.f32.vlgmr.msra.gmra.mxu1 %vm3230_vm1, %v20573_v52 }
 0xeb8   :  { %v3341_v62 = vmul.f32 0.2, %v3337_v60  ;;  %13705 = vst.msk [vmem:[%s23838_s20 + $0x30] sm:$0xff] %vm3230_vm1, %v3337_v60 }
 0xeb9   :  { %v3333_v0 = vpop.permute.xlu1 %3332 }
 0xeba   :  { %v20584_v37 = vmax.f32 %v3337_v60, %v3341_v62  ;;  %v3338_v1 = vadd.f32 %v3333_v0, %v3310_v61 }
 0xebc   :  { %v3342_v59 = vmul.f32 0.2, %v3338_v1  ;;  %13706 = vst.msk [vmem:[%s23838_s20 + $0x38] sm:$0xff] %vm3230_vm1, %v3338_v1  ;;  %17191 = vmatprep.mubr.msk.f32.mxu0 %vm3230_vm1, %v20584_v37  ;;  %17205 = vmatprep.mubr.msk.f32.mxu1 %vm3230_vm1, %v20584_v37 }
 0xebe   :  { %v20594_v5 = vmax.f32 %v3338_v1, %v3342_v59  ;;  %v14120_v59 = vld [vmem:[%s23839_s5 + $0x88] sm:$0xff] }
 0xec0   :  { %17192 = vmatmul.mubr.msk.f32.gmra.mxu0 %vm3230_vm1, %v20594_v5  ;;  %17206 = vmatmul.mubr.msk.f32.gmra.mxu1 %vm3230_vm1, %v20594_v5 }
 0xec1   :  { %17216 = vmatprep.mubr.msk.f32.mxu0 %vm3230_vm1, %v14087_v7  ;;  %17236 = vmatprep.mubr.msk.f32.mxu1 %vm3230_vm1, %v3448_v10  ;;  %v14121_v7 = vld [vmem:[%s23839_s5 + $0x90] sm:$0xff] }
 0xf76   :  { %v17190_v12 = vpop.f32.mrf.mxu0  ;;  %v17204_v15 = vpop.f32.mrf.mxu1 }
 0xf78   :  { %v3429_v16 = vpop.f32.mrf.mxu0  ;;  %v3527_v17 = vpop.f32.mrf.mxu1 }
 0xf80   :  { %v17193_v18 = vpop.f32.mrf.mxu0  ;;  %v17207_v19 = vpop.f32.mrf.mxu1 }
 0xf81   :  { %17208 = vmatprep.subr.mxu0 %v17207_v19  ;;  %17228 = vmatprep.subr.mxu1 %v17193_v18 }
 0xf82   :  { %v3439_v20 = vpop.f32.mrf.mxu0  ;;  %v3537_v23 = vpop.f32.mrf.mxu1  ;;  %17209 = vmatpush3.msra.mxu0 %v17207_v19  ;;  %17229 = vmatpush3.msra.mxu1 %v17193_v18  ;;  %v14161_v18 = vld [vmem:[%s23837_s6 + $0x90] sm:$0xff]  ;;  %v14124_v19 = vld [vmem:[%s23839_s5 + $0xa8] sm:$0xff] }
 0xf83   :  { %17210 = vmatprep.subr.mxu0 %v3537_v23  ;;  %17230 = vmatprep.subr.mxu1 %v3439_v20 }
 0xf84   :  { %17211 = vmatpush3.msra.mxu0 %v3537_v23  ;;  %17231 = vmatpush3.msra.mxu1 %v3439_v20  ;;  %v14144_v20 = vld [vmem:[%s23839_s5 + $0xc8] sm:$0xff]  ;;  %v14125_v23 = vld [vmem:[%s23839_s5 + $0xb0] sm:$0xff] }
 0xf85   :  { %17212 = vmatprep.subr.mxu0 %v17204_v15  ;;  %17232 = vmatprep.subr.mxu1 %v17190_v12 }
 0xf86   :  { %17213 = vmatpush3.msra.mxu0 %v17204_v15  ;;  %17233 = vmatpush3.msra.mxu1 %v17190_v12  ;;  %v14162_v12 = vld [vmem:[%s23837_s6 + $0x98] sm:$0xff] }
 0xf87   :  { %17214 = vmatprep.subr.mxu0 %v3527_v17  ;;  %17234 = vmatprep.subr.mxu1 %v3429_v16 }
 0xf88   :  { %17215 = vmatpush3.msra.mxu0 %v3527_v17  ;;  %17235 = vmatpush3.msra.mxu1 %v3429_v16  ;;  %v14122_v16 = vld [vmem:[%s23839_s5 + $0x98] sm:$0xff]  ;;  %v14123_v17 = vld [vmem:[%s23839_s5 + $0xa0] sm:$0xff] }
 0xf89   :  { %17217 = vmatmul.mubr.msk.f32.vlgmr.msra.gmra.mxu0 %vm3230_vm1, %v14088_v26  ;;  %17237 = vmatmul.mubr.msk.f32.vlgmr.msra.gmra.mxu1 %vm3230_vm1, %v3449_v31  ;;  %v14145_v26 = vld [vmem:[%s23839_s5 + $0xd0] sm:$0xff]  ;;  %v14186_v31 = vld [vmem:[%s23837_s6 + $0xb8] sm:$0xff] }
 0xf8a   :  { %17219 = vmatprep.mubr.msk.f32.mxu0 %vm3230_vm1, %v14089_v28  ;;  %17239 = vmatprep.mubr.msk.f32.mxu1 %vm3230_vm1, %v3450_v34  ;;  %v14160_v28 = vld [vmem:[%s23837_s6 + $0x88] sm:$0xff]  ;;  %v14126_v34 = vld [vmem:[%s23839_s5 + $0xb8] sm:$0xff] }
 0xf8b   :  { %17248 = vmatprep.subr.mxu0 %v14114_v39 }
 0xf8c   :  { %17249 = vmatpush3.msra.mxu0 %v14114_v39  ;;  %v14146_v39 = vld [vmem:[%s23839_s5 + $0xd8] sm:$0xff] }
 0xf8d   :  { %17220 = vmatmul.mubr.msk.f32.gmra.mxu0 %vm3230_vm1, %v14090_v42  ;;  %17240 = vmatmul.mubr.msk.f32.gmra.mxu1 %vm3230_vm1, %v3451_v3  ;;  %v14159_v42 = vld [vmem:[%s23837_s6 + $0x80] sm:$0xff] }
 0xf8e   :  { %17222 = vmatprep.mubr.msk.f32.mxu0 %vm3230_vm1, %v14091_v6  ;;  %17242 = vmatprep.mubr.msk.f32.mxu1 %vm3230_vm1, %v3452_v35  ;;  %v14147_v3 = vld [vmem:[%s23839_s5 + $0xe0] sm:$0xff]  ;;  %v14185_v6 = vld [vmem:[%s23837_s6 + $0xb0] sm:$0xff]  ;;  %v14148_v35 = vld [vmem:[%s23839_s5 + $0xe8] sm:$0xff] }
 0xf8f   :  { %17250 = vmatprep.subr.mxu0 %v14113_v41 }
 0xf90   :  { %17251 = vmatpush3.msra.mxu0 %v14113_v41  ;;  %v14149_v41 = vld [vmem:[%s23839_s5 + $0xf0] sm:$0xff] }
 0xf91   :  { %17223 = vmatmul.mubr.msk.f32.gmra.mxu0 %vm3230_vm1, %v14092_v4  ;;  %17243 = vmatmul.mubr.msk.f32.gmra.mxu1 %vm3230_vm1, %v3453_v8  ;;  %v14184_v4 = vld [vmem:[%s23837_s6 + $0xa8] sm:$0xff]  ;;  %v14150_v8 = vld [vmem:[%s23839_s5 + $0xf8] sm:$0xff] }
 0xf92   :  { %17225 = vmatprep.mubr.msk.f32.mxu0 %vm3230_vm1, %v14093_v43  ;;  %17245 = vmatprep.mubr.msk.f32.mxu1 %vm3230_vm1, %v3454_v46  ;;  %v14183_v43 = vld [vmem:[%s23837_s6 + $0xa0] sm:$0xff] }
 0xf93   :  { %17252 = vmatprep.subr.mxu0 %v14112_v11  ;;  %v14167_v46 = vld [vmem:[%s23839_s5 + $0x100] sm:$0xff] }
 0xf94   :  { %17253 = vmatpush3.msra.mxu0 %v14112_v11  ;;  %v14191_v11 = vld [vmem:[%s23839_s5 + $0x140] sm:$0xff] }
 0xf95   :  { %17226 = vmatmul.mubr.msk.f32.gmra.mxu0 %vm3230_vm1, %v14094_v14  ;;  %17246 = vmatmul.mubr.msk.f32.gmra.mxu1 %vm3230_vm1, %v3455_v51 }
 0xf96   :  { %17256 = vmatprep.mubr.msk.f32.mxu0 %vm3230_vm1, %v20562_v45  ;;  %17254 = vmatprep.subr.mxu0 %v14111_v21 }
 0xf97   :  { %17255 = vmatpush3.msra.mxu0 %v14111_v21  ;;  %17270 = vmatprep.mubr.msk.f32.mxu1 %vm3230_vm1, %v14119_v47 }
 0xf98   :  { %17282 = vmatprep.subr.mxu0 %v14138_v54 }
 0xf99   :  { %17257 = vmatmul.mubr.msk.f32.vlgmr.msra.gmra.mxu0 %vm3230_vm1, %v20573_v52 }
 0xf9a   :  { %17259 = vmatprep.mubr.msk.f32.mxu0 %vm3230_vm1, %v20584_v37  ;;  %17283 = vmatpush3.msra.mxu0 %v14138_v54 }
 0xf9b   :  { %17284 = vmatprep.subr.mxu0 %v14137_v63 }
 0xf9c   :  { %17285 = vmatpush3.msra.mxu0 %v14137_v63 }
 0xf9d   :  { %17260 = vmatmul.mubr.msk.f32.gmra.mxu0 %vm3230_vm1, %v20594_v5  ;;  %17286 = vmatprep.subr.mxu0 %v14136_v25 }
 0xf9e   :  { %17287 = vmatpush3.msra.mxu0 %v14136_v25  ;;  %17290 = vmatprep.mubr.msk.f32.mxu0 %vm3230_vm1, %v20562_v45 }
 0xf9f   :  { %17288 = vmatprep.subr.mxu0 %v14135_v24 }
 0xfa0   :  { %17289 = vmatpush3.msra.mxu0 %v14135_v24 }
 0xfa1   :  { %17291 = vmatmul.mubr.msk.f32.vlgmr.msra.gmra.mxu0 %vm3230_vm1, %v20573_v52 }
 0xfa2   :  { %17293 = vmatprep.mubr.msk.f32.mxu0 %vm3230_vm1, %v20584_v37 }
 0xfa5   :  { %17294 = vmatmul.mubr.msk.f32.gmra.mxu0 %vm3230_vm1, %v20594_v5 }
 0xfa6   :  { %17304 = vmatprep.mubr.msk.f32.mxu0 %vm3230_vm1, %v14143_v2 }
0x1049   :  { %v17218_v29 = vpop.f32.mrf.mxu0  ;;  %v17238_v22 = vpop.f32.mrf.mxu1 }
0x104a   :  { %v20712_v50 = vadd.f32 %v17238_v22, %v17218_v29 }
0x104b   :  { %v20714_v9 = vpop.f32.mrf.mxu0  ;;  %v20716_v30 = vpop.f32.mrf.mxu1 }
0x104d   :  { %v17221_v27 = vpop.f32.mrf.mxu0  ;;  %v17241_v13 = vpop.f32.mrf.mxu1 }
0x104e   :  { %v20718_v32 = vadd.f32 %v17241_v13, %v17221_v27 }
0x104f   :  { %v20720_v33 = vpop.f32.mrf.mxu0  ;;  %v20722_v36 = vpop.f32.mrf.mxu1 }
0x1051   :  { %v17224_v40 = vpop.f32.mrf.mxu0  ;;  %v17244_v44 = vpop.f32.mrf.mxu1 }
0x1052   :  { %v20724_v48 = vadd.f32 %v17244_v44, %v17224_v40 }
0x1053   :  { %v20726_v38 = vpop.f32.mrf.mxu0  ;;  %v20728_v53 = vpop.f32.mrf.mxu1 }
0x1055   :  { %v17227_v55 = vpop.f32.mrf.mxu0  ;;  %v17247_v56 = vpop.f32.mrf.mxu1 }
0x1056   :  { %v20730_v57 = vadd.f32 %v17247_v56, %v17227_v55 }
0x1057   :  { %v20732_v58 = vpop.f32.mrf.mxu0  ;;  %v20838_v14 = vpop.f32.mrf.mxu1 }
0x1059   :  { %v17258_v49 = vpop.f32.mrf.mxu0 }
0x105b   :  { %v3884_v60 = vpop.f32.mrf.mxu0 }
0x105d   :  { %v17261_v61 = vpop.f32.mrf.mxu0 }
0x105e   :  { %17262 = vmatprep.subr.mxu1 %v17261_v61 }
0x105f   :  { %v3894_v62 = vpop.f32.mrf.mxu0  ;;  %17263 = vmatpush3.msra.mxu1 %v17261_v61 }
0x1060   :  { %17264 = vmatprep.subr.mxu1 %v3894_v62 }
0x1061   :  { %17265 = vmatpush3.msra.mxu1 %v3894_v62  ;;  %v17292_v0 = vpop.f32.mrf.mxu0 }
0x1062   :  { %17266 = vmatprep.subr.mxu1 %v17258_v49 }
0x1063   :  { %17267 = vmatpush3.msra.mxu1 %v17258_v49  ;;  %v4120_v1 = vpop.f32.mrf.mxu0 }
0x1064   :  { %17268 = vmatprep.subr.mxu1 %v3884_v60 }
0x1065   :  { %17269 = vmatpush3.msra.mxu1 %v3884_v60  ;;  %v17295_v10 = vpop.f32.mrf.mxu0 }
0x1066   :  { %17271 = vmatmul.mubr.msk.f32.vlgmr.msra.gmra.mxu1 %vm3230_vm1, %v14120_v59  ;;  %17296 = vmatprep.subr.mxu0 %v17295_v10 }
0x1067   :  { %v4130_v15 = vpop.f32.mrf.mxu0  ;;  %17297 = vmatpush3.msra.mxu0 %v17295_v10  ;;  %17273 = vmatprep.mubr.msk.f32.mxu1 %vm3230_vm1, %v14121_v7 }
0x1068   :  { %17298 = vmatprep.subr.mxu0 %v4130_v15  ;;  %17316 = vmatprep.subr.mxu1 %v14162_v12 }
0x1069   :  { %17299 = vmatpush3.msra.mxu0 %v4130_v15  ;;  %17317 = vmatpush3.msra.mxu1 %v14162_v12  ;;  %v14168_v15 = vld [vmem:[%s23839_s5 + $0x108] sm:$0xff] }
0x106a   :  { %17274 = vmatmul.mubr.msk.f32.gmra.mxu1 %vm3230_vm1, %v14122_v16  ;;  %17300 = vmatprep.subr.mxu0 %v17292_v0  ;;  %v14169_v16 = vld [vmem:[%s23839_s5 + $0x110] sm:$0xff] }
0x106b   :  { %17301 = vmatpush3.msra.mxu0 %v17292_v0  ;;  %17276 = vmatprep.mubr.msk.f32.mxu1 %vm3230_vm1, %v14123_v17 }
0x106c   :  { %17302 = vmatprep.subr.mxu0 %v4120_v1  ;;  %17318 = vmatprep.subr.mxu1 %v14161_v18 }
0x106d   :  { %17303 = vmatpush3.msra.mxu0 %v4120_v1  ;;  %17319 = vmatpush3.msra.mxu1 %v14161_v18  ;;  %v14210_v18 = vld [vmem:[%s23837_s6 + $0xd8] sm:$0xff] }
0x106e   :  { %17277 = vmatmul.mubr.msk.f32.gmra.mxu1 %vm3230_vm1, %v14124_v19  ;;  %17305 = vmatmul.mubr.msk.f32.vlgmr.msra.gmra.mxu0 %vm3230_vm1, %v14144_v20  ;;  %v14170_v20 = vld [vmem:[%s23839_s5 + $0x118] sm:$0xff] }
0x106f   :  { %17279 = vmatprep.mubr.msk.f32.mxu1 %vm3230_vm1, %v14125_v23  ;;  %17307 = vmatprep.mubr.msk.f32.mxu0 %vm3230_vm1, %v14145_v26  ;;  %v14171_v23 = vld [vmem:[%s23839_s5 + $0x120] sm:$0xff]  ;;  %v14209_v26 = vld [vmem:[%s23837_s6 + $0xd0] sm:$0xff] }
0x1070   :  { %17350 = vmatprep.subr.mxu0 %v14186_v31  ;;  %17320 = vmatprep.subr.mxu1 %v14160_v28 }
0x1071   :  { %17351 = vmatpush3.msra.mxu0 %v14186_v31  ;;  %17321 = vmatpush3.msra.mxu1 %v14160_v28  ;;  %v14172_v31 = vld [vmem:[%s23839_s5 + $0x128] sm:$0xff] }
0x1072   :  { %17280 = vmatmul.mubr.msk.f32.gmra.mxu1 %vm3230_vm1, %v14126_v34  ;;  %17308 = vmatmul.mubr.msk.f32.gmra.mxu0 %vm3230_vm1, %v14146_v39  ;;  %v14192_v28 = vld [vmem:[%s23839_s5 + $0x148] sm:$0xff]  ;;  %v14173_v34 = vld [vmem:[%s23839_s5 + $0x130] sm:$0xff] }
0x1073   :  { %17324 = vmatprep.mubr.msk.f32.mxu1 %vm3230_vm1, %v20562_v45  ;;  %17322 = vmatprep.subr.mxu1 %v14159_v42  ;;  %v14193_v39 = vld [vmem:[%s23839_s5 + $0x150] sm:$0xff] }
0x1074   :  { %17310 = vmatprep.mubr.msk.f32.mxu0 %vm3230_vm1, %v14147_v3  ;;  %17323 = vmatpush3.msra.mxu1 %v14159_v42  ;;  %v14234_v42 = vld [vmem:[%s23837_s6 + $0xf8] sm:$0xff]  ;;  %v14208_v3 = vld [vmem:[%s23837_s6 + $0xc8] sm:$0xff] }
0x1075   :  { %17352 = vmatprep.subr.mxu0 %v14185_v6 }
0x1076   :  { %17311 = vmatmul.mubr.msk.f32.gmra.mxu0 %vm3230_vm1, %v14148_v35  ;;  %17325 = vmatmul.mubr.msk.f32.vlgmr.msra.gmra.mxu1 %vm3230_vm1, %v20573_v52  ;;  %v14194_v35 = vld [vmem:[%s23839_s5 + $0x158] sm:$0xff] }
0x1077   :  { %17353 = vmatpush3.msra.mxu0 %v14185_v6  ;;  %17327 = vmatprep.mubr.msk.f32.mxu1 %vm3230_vm1, %v20584_v37  ;;  %v14174_v6 = vld [vmem:[%s23839_s5 + $0x138] sm:$0xff] }
0x1078   :  { %17313 = vmatprep.mubr.msk.f32.mxu0 %vm3230_vm1, %v14149_v41  ;;  %17354 = vmatprep.subr.mxu0 %v14184_v4  ;;  %v14207_v41 = vld [vmem:[%s23837_s6 + $0xc0] sm:$0xff] }
0x1079   :  { %17355 = vmatpush3.msra.mxu0 %v14184_v4  ;;  %v14195_v4 = vld [vmem:[%s23839_s5 + $0x160] sm:$0xff] }
0x107a   :  { %17314 = vmatmul.mubr.msk.f32.gmra.mxu0 %vm3230_vm1, %v14150_v8  ;;  %17328 = vmatmul.mubr.msk.f32.gmra.mxu1 %vm3230_vm1, %v20594_v5  ;;  %v14233_v8 = vld [vmem:[%s23837_s6 + $0xf0] sm:$0xff] }
0x107b   :  { %17358 = vmatprep.mubr.msk.f32.mxu0 %vm3230_vm1, %v20562_v45  ;;  %17356 = vmatprep.subr.mxu0 %v14183_v43 }
0x107c   :  { %17357 = vmatpush3.msra.mxu0 %v14183_v43  ;;  %17338 = vmatprep.mubr.msk.f32.mxu1 %vm3230_vm1, %v14167_v46  ;;  %v14196_v43 = vld [vmem:[%s23839_s5 + $0x168] sm:$0xff]  ;;  %v14197_v46 = vld [vmem:[%s23839_s5 + $0x170] sm:$0xff] }
0x107e   :  { %17359 = vmatmul.mubr.msk.f32.vlgmr.msra.gmra.mxu0 %vm3230_vm1, %v20573_v52 }
0x107f   :  { %17361 = vmatprep.mubr.msk.f32.mxu0 %vm3230_vm1, %v20584_v37 }
0x1082   :  { %17362 = vmatmul.mubr.msk.f32.gmra.mxu0 %vm3230_vm1, %v20594_v5 }
0x1083   :  { %17372 = vmatprep.mubr.msk.f32.mxu0 %vm3230_vm1, %v14191_v11  ;;  %v14232_v11 = vld [vmem:[%s23837_s6 + $0xe8] sm:$0xff] }
0x1126   :  { %v17272_v51 = vpop.f32.mrf.mxu1 }
0x1127   :  { %v4042_v21 = vadd.f32 %v17272_v51, %v20712_v50  ;;  %v14198_v51 = vld [vmem:[%s23839_s5 + $0x178] sm:$0xff] }
0x1128   :  { %v20841_v54 = vpop.f32.mrf.mxu1 }
0x112a   :  { %v17275_v63 = vpop.f32.mrf.mxu1 }
0x112b   :  { %v4044_v25 = vadd.f32 %v17275_v63, %v20718_v32  ;;  %v14215_v63 = vld [vmem:[%s23839_s5 + $0x180] sm:$0xff] }
0x112c   :  { %v20844_v24 = vpop.f32.mrf.mxu1 }
0x112e   :  { %v17278_v47 = vpop.f32.mrf.mxu1  ;;  %v17306_v2 = vpop.f32.mrf.mxu0 }
0x112f   :  { %v4046_v29 = vadd.f32 %v17278_v47, %v20724_v48  ;;  %v20847_v22 = vadd.f32 %v17306_v2, %v4042_v21  ;;  %v14231_v21 = vld [vmem:[%s23837_s6 + $0xe0] sm:$0xff] }
0x1130   :  { %v20849_v27 = vpop.f32.mrf.mxu1  ;;  %v20851_v13 = vpop.f32.mrf.mxu0 }
0x1132   :  { %v17281_v40 = vpop.f32.mrf.mxu1  ;;  %v17309_v44 = vpop.f32.mrf.mxu0 }
0x1133   :  { %v4048_v50 = vadd.f32 %v17281_v40, %v20730_v57  ;;  %v20854_v55 = vadd.f32 %v17309_v44, %v4044_v25  ;;  %v14239_v25 = vld [vmem:[%s23839_s5 + $0x1c0] sm:$0xff] }
0x1134   :  { %v20856_v56 = vpop.f32.mrf.mxu1  ;;  %v20858_v32 = vpop.f32.mrf.mxu0 }
0x1136   :  { %v17312_v49 = vpop.f32.mrf.mxu0  ;;  %v17326_v60 = vpop.f32.mrf.mxu1 }
0x1137   :  { %v20860_v61 = vadd.f32 %v17312_v49, %v4046_v29 }
0x1138   :  { %v20862_v48 = vpop.f32.mrf.mxu0  ;;  %v4356_v62 = vpop.f32.mrf.mxu1 }
0x113a   :  { %v17315_v0 = vpop.f32.mrf.mxu0  ;;  %v17329_v1 = vpop.f32.mrf.mxu1 }
0x113b   :  { %v20864_v59 = vadd.f32 %v17315_v0, %v4048_v50  ;;  %17330 = vmatprep.subr.mxu1 %v17329_v1 }
0x113c   :  { %v20866_v7 = vpop.f32.mrf.mxu0  ;;  %v4366_v57 = vpop.f32.mrf.mxu1  ;;  %17331 = vmatpush3.msra.mxu1 %v17329_v1 }
0x113d   :  { %17332 = vmatprep.subr.mxu1 %v4366_v57 }
0x113e   :  { %17333 = vmatpush3.msra.mxu1 %v4366_v57  ;;  %v17360_v10 = vpop.f32.mrf.mxu0 }
0x113f   :  { %17334 = vmatprep.subr.mxu1 %v17326_v60 }
0x1140   :  { %17335 = vmatpush3.msra.mxu1 %v17326_v60  ;;  %v4592_v12 = vpop.f32.mrf.mxu0 }
0x1141   :  { %17336 = vmatprep.subr.mxu1 %v4356_v62 }
0x1142   :  { %17337 = vmatpush3.msra.mxu1 %v4356_v62  ;;  %v17363_v17 = vpop.f32.mrf.mxu0 }
0x1143   :  { %17339 = vmatmul.mubr.msk.f32.vlgmr.msra.gmra.mxu1 %vm3230_vm1, %v14168_v15  ;;  %17364 = vmatprep.subr.mxu0 %v17363_v17 }
0x1144   :  { %v4602_v19 = vpop.f32.mrf.mxu0  ;;  %17365 = vmatpush3.msra.mxu0 %v17363_v17  ;;  %17341 = vmatprep.mubr.msk.f32.mxu1 %vm3230_vm1, %v14169_v16 }
0x1145   :  { %17366 = vmatprep.subr.mxu0 %v4602_v19  ;;  %17384 = vmatprep.subr.mxu1 %v14210_v18 }
0x1146   :  { %17367 = vmatpush3.msra.mxu0 %v4602_v19  ;;  %17385 = vmatpush3.msra.mxu1 %v14210_v18 }
0x1147   :  { %17342 = vmatmul.mubr.msk.f32.gmra.mxu1 %vm3230_vm1, %v14170_v20  ;;  %17368 = vmatprep.subr.mxu0 %v17360_v10 }
0x1148   :  { %17369 = vmatpush3.msra.mxu0 %v17360_v10  ;;  %17344 = vmatprep.mubr.msk.f32.mxu1 %vm3230_vm1, %v14171_v23 }
0x1149   :  { %17370 = vmatprep.subr.mxu0 %v4592_v12  ;;  %17386 = vmatprep.subr.mxu1 %v14209_v26 }
0x114a   :  { %17371 = vmatpush3.msra.mxu0 %v4592_v12  ;;  %17387 = vmatpush3.msra.mxu1 %v14209_v26 }
0x114b   :  { %17345 = vmatmul.mubr.msk.f32.gmra.mxu1 %vm3230_vm1, %v14172_v31  ;;  %17373 = vmatmul.mubr.msk.f32.vlgmr.msra.gmra.mxu0 %vm3230_vm1, %v14192_v28 }
0x114c   :  { %17347 = vmatprep.mubr.msk.f32.mxu1 %vm3230_vm1, %v14173_v34  ;;  %17375 = vmatprep.mubr.msk.f32.mxu0 %vm3230_vm1, %v14193_v39 }
0x114d   :  { %17418 = vmatprep.subr.mxu0 %v14234_v42  ;;  %17388 = vmatprep.subr.mxu1 %v14208_v3 }
0x114e   :  { %17419 = vmatpush3.msra.mxu0 %v14234_v42  ;;  %17389 = vmatpush3.msra.mxu1 %v14208_v3  ;;  %v14216_v42 = vld [vmem:[%s23839_s5 + $0x188] sm:$0xff]  ;;  %v14217_v3 = vld [vmem:[%s23839_s5 + $0x190] sm:$0xff] }
0x114f   :  { %17348 = vmatmul.mubr.msk.f32.gmra.mxu1 %vm3230_vm1, %v14174_v6  ;;  %17376 = vmatmul.mubr.msk.f32.gmra.mxu0 %vm3230_vm1, %v14194_v35  ;;  %v14258_v35 = vld [vmem:[%s23837_s6 + $0x118] sm:$0xff] }
0x1150   :  { %17392 = vmatprep.mubr.msk.f32.mxu1 %vm3230_vm1, %v20562_v45  ;;  %17390 = vmatprep.subr.mxu1 %v14207_v41 }
0x1151   :  { %17378 = vmatprep.mubr.msk.f32.mxu0 %vm3230_vm1, %v14195_v4  ;;  %17391 = vmatpush3.msra.mxu1 %v14207_v41  ;;  %v14218_v4 = vld [vmem:[%s23839_s5 + $0x198] sm:$0xff] }
0x1152   :  { %17420 = vmatprep.subr.mxu0 %v14233_v8 }
0x1153   :  { %17379 = vmatmul.mubr.msk.f32.gmra.mxu0 %vm3230_vm1, %v14196_v43  ;;  %17393 = vmatmul.mubr.msk.f32.vlgmr.msra.gmra.mxu1 %vm3230_vm1, %v20573_v52  ;;  %v14257_v43 = vld [vmem:[%s23837_s6 + $0x110] sm:$0xff] }
0x1154   :  { %17421 = vmatpush3.msra.mxu0 %v14233_v8  ;;  %17395 = vmatprep.mubr.msk.f32.mxu1 %vm3230_vm1, %v20584_v37  ;;  %v14219_v8 = vld [vmem:[%s23839_s5 + $0x1a0] sm:$0xff] }
0x1155   :  { %17381 = vmatprep.mubr.msk.f32.mxu0 %vm3230_vm1, %v14197_v46  ;;  %17422 = vmatprep.subr.mxu0 %v14232_v11  ;;  %v14220_v46 = vld [vmem:[%s23839_s5 + $0x1a8] sm:$0xff] }
0x1156   :  { %17423 = vmatpush3.msra.mxu0 %v14232_v11  ;;  %v14240_v11 = vld [vmem:[%s23839_s5 + $0x1c8] sm:$0xff] }
0x1157   :  { %17382 = vmatmul.mubr.msk.f32.gmra.mxu0 %vm3230_vm1, %v14198_v51  ;;  %17396 = vmatmul.mubr.msk.f32.gmra.mxu1 %vm3230_vm1, %v20594_v5  ;;  %v14221_v51 = vld [vmem:[%s23839_s5 + $0x1b0] sm:$0xff] }
0x1158   :  { %17426 = vmatprep.mubr.msk.f32.mxu0 %vm3230_vm1, %v20562_v45  ;;  %17424 = vmatprep.subr.mxu0 %v14231_v21 }
0x1159   :  { %17425 = vmatpush3.msra.mxu0 %v14231_v21  ;;  %17406 = vmatprep.mubr.msk.f32.mxu1 %vm3230_vm1, %v14215_v63  ;;  %v14241_v21 = vld [vmem:[%s23839_s5 + $0x1d0] sm:$0xff]  ;;  %v14282_v63 = vld [vmem:[%s23837_s6 + $0x138] sm:$0xff] }
0x115b   :  { %17427 = vmatmul.mubr.msk.f32.vlgmr.msra.gmra.mxu0 %vm3230_vm1, %v20573_v52 }
0x115c   :  { %17429 = vmatprep.mubr.msk.f32.mxu0 %vm3230_vm1, %v20584_v37 }
0x115f   :  { %17430 = vmatmul.mubr.msk.f32.gmra.mxu0 %vm3230_vm1, %v20594_v5 }
0x1160   :  { %17440 = vmatprep.mubr.msk.f32.mxu0 %vm3230_vm1, %v14239_v25  ;;  %v14256_v25 = vld [vmem:[%s23837_s6 + $0x108] sm:$0xff] }
0x1203   :  { %v17340_v47 = vpop.f32.mrf.mxu1 }
0x1204   :  { %v4514_v2 = vadd.f32 %v17340_v47, %v20847_v22  ;;  %v14222_v47 = vld [vmem:[%s23839_s5 + $0x1b8] sm:$0xff] }
0x1205   :  { %v20973_v29 = vpop.f32.mrf.mxu1 }
0x1207   :  { %v17343_v40 = vpop.f32.mrf.mxu1 }
0x1208   :  { %v4516_v44 = vadd.f32 %v17343_v40, %v20854_v55  ;;  %v14255_v40 = vld [vmem:[%s23837_s6 + $0x100] sm:$0xff] }
0x1209   :  { %v20976_v50 = vpop.f32.mrf.mxu1 }
0x120b   :  { %v17346_v49 = vpop.f32.mrf.mxu1  ;;  %v17374_v60 = vpop.f32.mrf.mxu0 }
0x120c   :  { %v4518_v62 = vadd.f32 %v17346_v49, %v20860_v61  ;;  %v20979_v0 = vadd.f32 %v17374_v60, %v4514_v2  ;;  %v14242_v2 = vld [vmem:[%s23839_s5 + $0x1d8] sm:$0xff]  ;;  %v14281_v49 = vld [vmem:[%s23837_s6 + $0x130] sm:$0xff]  ;;  %v14244_v60 = vld [vmem:[%s23839_s5 + $0x1e8] sm:$0xff] }
0x120d   :  { %v20981_v1 = vpop.f32.mrf.mxu1  ;;  %v20983_v57 = vpop.f32.mrf.mxu0 }
0x120f   :  { %v17349_v10 = vpop.f32.mrf.mxu1  ;;  %v17377_v12 = vpop.f32.mrf.mxu0 }
0x1210   :  { %v4520_v22 = vadd.f32 %v17349_v10, %v20864_v59  ;;  %v20986_v15 = vadd.f32 %v17377_v12, %v4516_v44  ;;  %v14243_v44 = vld [vmem:[%s23839_s5 + $0x1e0] sm:$0xff]  ;;  %v14280_v10 = vld [vmem:[%s23837_s6 + $0x128] sm:$0xff]  ;;  %v14246_v12 = vld [vmem:[%s23839_s5 + $0x1f8] sm:$0xff] }
0x1211   :  { %v20988_v16 = vpop.f32.mrf.mxu1  ;;  %v20990_v55 = vpop.f32.mrf.mxu0 }
0x1213   :  { %v17380_v17 = vpop.f32.mrf.mxu0  ;;  %v17394_v18 = vpop.f32.mrf.mxu1 }
0x1214   :  { %v20992_v19 = vadd.f32 %v17380_v17, %v4518_v62  ;;  %v14245_v62 = vld [vmem:[%s23839_s5 + $0x1f0] sm:$0xff]  ;;  %v14263_v17 = vld [vmem:[%s23839_s5 + $0x200] sm:$0xff] }
0x1215   :  { %v20994_v61 = vpop.f32.mrf.mxu0  ;;  %v4828_v20 = vpop.f32.mrf.mxu1 }
0x1217   :  { %v17383_v23 = vpop.f32.mrf.mxu0  ;;  %v17397_v26 = vpop.f32.mrf.mxu1 }
0x1218   :  { %v20996_v31 = vadd.f32 %v17383_v23, %v4520_v22  ;;  %17398 = vmatprep.subr.mxu1 %v17397_v26  ;;  %v14279_v22 = vld [vmem:[%s23837_s6 + $0x120] sm:$0xff] }
0x1219   :  { %v20998_v28 = vpop.f32.mrf.mxu0  ;;  %v4838_v59 = vpop.f32.mrf.mxu1  ;;  %17399 = vmatpush3.msra.mxu1 %v17397_v26 }
0x121a   :  { %17400 = vmatprep.subr.mxu1 %v4838_v59 }
0x121b   :  { %17401 = vmatpush3.msra.mxu1 %v4838_v59  ;;  %v17428_v34 = vpop.f32.mrf.mxu0 }
0x121c   :  { %17402 = vmatprep.subr.mxu1 %v17394_v18 }
0x121d   :  { %17403 = vmatpush3.msra.mxu1 %v17394_v18  ;;  %v5064_v39 = vpop.f32.mrf.mxu0  ;;  %v14287_v18 = vld [vmem:[%s23839_s5 + $0x240] sm:$0xff] }
0x121e   :  { %17404 = vmatprep.subr.mxu1 %v4828_v20 }
0x121f   :  { %17405 = vmatpush3.msra.mxu1 %v4828_v20  ;;  %v17431_v6 = vpop.f32.mrf.mxu0 }
0x1220   :  { %17407 = vmatmul.mubr.msk.f32.vlgmr.msra.gmra.mxu1 %vm3230_vm1, %v14216_v42  ;;  %17432 = vmatprep.subr.mxu0 %v17431_v6 }
0x1221   :  { %v5074_v41 = vpop.f32.mrf.mxu0  ;;  %17433 = vmatpush3.msra.mxu0 %v17431_v6  ;;  %17409 = vmatprep.mubr.msk.f32.mxu1 %vm3230_vm1, %v14217_v3 }
0x1222   :  { %17434 = vmatprep.subr.mxu0 %v5074_v41  ;;  %17452 = vmatprep.subr.mxu1 %v14258_v35 }
0x1223   :  { %17435 = vmatpush3.msra.mxu0 %v5074_v41  ;;  %17453 = vmatpush3.msra.mxu1 %v14258_v35 }
0x1224   :  { %17410 = vmatmul.mubr.msk.f32.gmra.mxu1 %vm3230_vm1, %v14218_v4  ;;  %17436 = vmatprep.subr.mxu0 %v17428_v34 }
0x1225   :  { %17437 = vmatpush3.msra.mxu0 %v17428_v34  ;;  %17412 = vmatprep.mubr.msk.f32.mxu1 %vm3230_vm1, %v14219_v8 }
0x1226   :  { %17438 = vmatprep.subr.mxu0 %v5064_v39  ;;  %17454 = vmatprep.subr.mxu1 %v14257_v43 }
0x1227   :  { %17439 = vmatpush3.msra.mxu0 %v5064_v39  ;;  %17455 = vmatpush3.msra.mxu1 %v14257_v43 }
0x1228   :  { %17413 = vmatmul.mubr.msk.f32.gmra.mxu1 %vm3230_vm1, %v14220_v46  ;;  %17441 = vmatmul.mubr.msk.f32.vlgmr.msra.gmra.mxu0 %vm3230_vm1, %v14240_v11 }
0x1229   :  { %17415 = vmatprep.mubr.msk.f32.mxu1 %vm3230_vm1, %v14221_v51  ;;  %17443 = vmatprep.mubr.msk.f32.mxu0 %vm3230_vm1, %v14241_v21 }
0x122a   :  { %17486 = vmatprep.subr.mxu0 %v14282_v63  ;;  %17456 = vmatprep.subr.mxu1 %v14256_v25 }
0x122b   :  { %17487 = vmatpush3.msra.mxu0 %v14282_v63  ;;  %17457 = vmatpush3.msra.mxu1 %v14256_v25 }
0x122c   :  { %17416 = vmatmul.mubr.msk.f32.gmra.mxu1 %vm3230_vm1, %v14222_v47  ;;  %17444 = vmatmul.mubr.msk.f32.gmra.mxu0 %vm3230_vm1, %v14242_v2 }
0x122d   :  { %17460 = vmatprep.mubr.msk.f32.mxu1 %vm3230_vm1, %v20562_v45  ;;  %17458 = vmatprep.subr.mxu1 %v14255_v40 }
0x122e   :  { %17446 = vmatprep.mubr.msk.f32.mxu0 %vm3230_vm1, %v14243_v44  ;;  %17459 = vmatpush3.msra.mxu1 %v14255_v40 }
0x122f   :  { %17488 = vmatprep.subr.mxu0 %v14281_v49 }
0x1230   :  { %17447 = vmatmul.mubr.msk.f32.gmra.mxu0 %vm3230_vm1, %v14244_v60  ;;  %17461 = vmatmul.mubr.msk.f32.vlgmr.msra.gmra.mxu1 %vm3230_vm1, %v20573_v52 }
0x1231   :  { %17489 = vmatpush3.msra.mxu0 %v14281_v49  ;;  %17463 = vmatprep.mubr.msk.f32.mxu1 %vm3230_vm1, %v20584_v37 }
0x1232   :  { %17449 = vmatprep.mubr.msk.f32.mxu0 %vm3230_vm1, %v14245_v62  ;;  %17490 = vmatprep.subr.mxu0 %v14280_v10  ;;  %v14264_v62 = vld [vmem:[%s23839_s5 + $0x208] sm:$0xff] }
0x1233   :  { %17491 = vmatpush3.msra.mxu0 %v14280_v10  ;;  %v14265_v10 = vld [vmem:[%s23839_s5 + $0x210] sm:$0xff] }
0x1234   :  { %17450 = vmatmul.mubr.msk.f32.gmra.mxu0 %vm3230_vm1, %v14246_v12  ;;  %17464 = vmatmul.mubr.msk.f32.gmra.mxu1 %vm3230_vm1, %v20594_v5 }
0x1235   :  { %17494 = vmatprep.mubr.msk.f32.mxu0 %vm3230_vm1, %v20562_v45  ;;  %17492 = vmatprep.subr.mxu0 %v14279_v22 }
0x1236   :  { %17493 = vmatpush3.msra.mxu0 %v14279_v22  ;;  %17474 = vmatprep.mubr.msk.f32.mxu1 %vm3230_vm1, %v14263_v17  ;;  %v14306_v22 = vld [vmem:[%s23837_s6 + $0x158] sm:$0xff] }
0x1238   :  { %17495 = vmatmul.mubr.msk.f32.vlgmr.msra.gmra.mxu0 %vm3230_vm1, %v20573_v52 }
0x1239   :  { %17497 = vmatprep.mubr.msk.f32.mxu0 %vm3230_vm1, %v20584_v37 }
0x123c   :  { %17498 = vmatmul.mubr.msk.f32.gmra.mxu0 %vm3230_vm1, %v20594_v5 }
0x123d   :  { %17508 = vmatprep.mubr.msk.f32.mxu0 %vm3230_vm1, %v14287_v18  ;;  %v14266_v18 = vld [vmem:[%s23839_s5 + $0x218] sm:$0xff] }
0x12e0   :  { %v17408_v20 = vpop.f32.mrf.mxu1 }
0x12e1   :  { %v4986_v23 = vadd.f32 %v17408_v20, %v20979_v0  ;;  %v14267_v20 = vld [vmem:[%s23839_s5 + $0x220] sm:$0xff] }
0x12e2   :  { %v21105_v26 = vpop.f32.mrf.mxu1 }
0x12e4   :  { %v17411_v59 = vpop.f32.mrf.mxu1 }
0x12e5   :  { %v4988_v34 = vadd.f32 %v17411_v59, %v20986_v15  ;;  %v14268_v59 = vld [vmem:[%s23839_s5 + $0x228] sm:$0xff] }
0x12e6   :  { %v21108_v39 = vpop.f32.mrf.mxu1 }
0x12e8   :  { %v17414_v42 = vpop.f32.mrf.mxu1  ;;  %v17442_v3 = vpop.f32.mrf.mxu0 }
0x12e9   :  { %v4990_v6 = vadd.f32 %v17414_v42, %v20992_v19  ;;  %v21111_v35 = vadd.f32 %v17442_v3, %v4986_v23  ;;  %v14305_v23 = vld [vmem:[%s23837_s6 + $0x150] sm:$0xff] }
0x12ea   :  { %v21113_v41 = vpop.f32.mrf.mxu1  ;;  %v21115_v4 = vpop.f32.mrf.mxu0  ;;  %v14269_v42 = vld [vmem:[%s23839_s5 + $0x230] sm:$0xff] }
0x12eb   :  { %v14289_v3 = vld [vmem:[%s23839_s5 + $0x250] sm:$0xff] }
0x12ec   :  { %v17417_v8 = vpop.f32.mrf.mxu1  ;;  %v17445_v43 = vpop.f32.mrf.mxu0 }
0x12ed   :  { %v4992_v0 = vadd.f32 %v17417_v8, %v20996_v31  ;;  %v21118_v46 = vadd.f32 %v17445_v43, %v4988_v34  ;;  %v14288_v34 = vld [vmem:[%s23839_s5 + $0x248] sm:$0xff]  ;;  %v14270_v43 = vld [vmem:[%s23839_s5 + $0x238] sm:$0xff] }
0x12ee   :  { %v21120_v11 = vpop.f32.mrf.mxu1  ;;  %v21122_v15 = vpop.f32.mrf.mxu0  ;;  %v14304_v8 = vld [vmem:[%s23837_s6 + $0x148] sm:$0xff] }
0x12f0   :  { %v17448_v51 = vpop.f32.mrf.mxu0  ;;  %v17462_v21 = vpop.f32.mrf.mxu1 }
0x12f1   :  { %v21124_v63 = vadd.f32 %v17448_v51, %v4990_v6  ;;  %v14330_v6 = vld [vmem:[%s23837_s6 + $0x178] sm:$0xff]  ;;  %v14303_v51 = vld [vmem:[%s23837_s6 + $0x140] sm:$0xff] }
0x12f2   :  { %v21126_v19 = vpop.f32.mrf.mxu0  ;;  %v5300_v25 = vpop.f32.mrf.mxu1 }
0x12f4   :  { %v17451_v47 = vpop.f32.mrf.mxu0  ;;  %v17465_v2 = vpop.f32.mrf.mxu1 }
0x12f5   :  { %v21128_v40 = vadd.f32 %v17451_v47, %v4992_v0  ;;  %17466 = vmatprep.subr.mxu1 %v17465_v2  ;;  %v14290_v0 = vld [vmem:[%s23839_s5 + $0x258] sm:$0xff]  ;;  %v14292_v47 = vld [vmem:[%s23839_s5 + $0x268] sm:$0xff] }
0x12f6   :  { %v21130_v44 = vpop.f32.mrf.mxu0  ;;  %v5310_v31 = vpop.f32.mrf.mxu1  ;;  %17467 = vmatpush3.msra.mxu1 %v17465_v2  ;;  %v14293_v2 = vld [vmem:[%s23839_s5 + $0x270] sm:$0xff] }
0x12f7   :  { %17468 = vmatprep.subr.mxu1 %v5310_v31 }
0x12f8   :  { %17469 = vmatpush3.msra.mxu1 %v5310_v31  ;;  %v17496_v49 = vpop.f32.mrf.mxu0  ;;  %v14328_v31 = vld [vmem:[%s23837_s6 + $0x168] sm:$0xff] }
0x12f9   :  { %17470 = vmatprep.subr.mxu1 %v17462_v21 }
0x12fa   :  { %17471 = vmatpush3.msra.mxu1 %v17462_v21  ;;  %v5536_v60 = vpop.f32.mrf.mxu0  ;;  %v14291_v21 = vld [vmem:[%s23839_s5 + $0x260] sm:$0xff] }
0x12fb   :  { %17472 = vmatprep.subr.mxu1 %v5300_v25 }
0x12fc   :  { %17473 = vmatpush3.msra.mxu1 %v5300_v25  ;;  %v17499_v12 = vpop.f32.mrf.mxu0  ;;  %v14329_v25 = vld [vmem:[%s23837_s6 + $0x170] sm:$0xff] }
0x12fd   :  { %17475 = vmatmul.mubr.msk.f32.vlgmr.msra.gmra.mxu1 %vm3230_vm1, %v14264_v62  ;;  %17500 = vmatprep.subr.mxu0 %v17499_v12  ;;  %v14311_v62 = vld [vmem:[%s23839_s5 + $0x280] sm:$0xff] }
0x12fe   :  { %v5546_v17 = vpop.f32.mrf.mxu0  ;;  %17501 = vmatpush3.msra.mxu0 %v17499_v12  ;;  %17477 = vmatprep.mubr.msk.f32.mxu1 %vm3230_vm1, %v14265_v10  ;;  %v14335_v10 = vld [vmem:[%s23839_s5 + $0x2c0] sm:$0xff] }
0x12ff   :  { %17502 = vmatprep.subr.mxu0 %v5546_v17  ;;  %17520 = vmatprep.subr.mxu1 %v14306_v22 }
0x1300   :  { %17503 = vmatpush3.msra.mxu0 %v5546_v17  ;;  %17521 = vmatpush3.msra.mxu1 %v14306_v22 }
0x1301   :  { %17478 = vmatmul.mubr.msk.f32.gmra.mxu1 %vm3230_vm1, %v14266_v18  ;;  %17504 = vmatprep.subr.mxu0 %v17496_v49 }
0x1302   :  { %17505 = vmatpush3.msra.mxu0 %v17496_v49  ;;  %17480 = vmatprep.mubr.msk.f32.mxu1 %vm3230_vm1, %v14267_v20  ;;  %v14294_v49 = vld [vmem:[%s23839_s5 + $0x278] sm:$0xff] }
0x1303   :  { %17506 = vmatprep.subr.mxu0 %v5536_v60  ;;  %17522 = vmatprep.subr.mxu1 %v14305_v23 }
0x1304   :  { %17507 = vmatpush3.msra.mxu0 %v5536_v60  ;;  %17523 = vmatpush3.msra.mxu1 %v14305_v23  ;;  %v14327_v60 = vld [vmem:[%s23837_s6 + $0x160] sm:$0xff] }
0x1305   :  { %17481 = vmatmul.mubr.msk.f32.gmra.mxu1 %vm3230_vm1, %v14268_v59  ;;  %17509 = vmatmul.mubr.msk.f32.vlgmr.msra.gmra.mxu0 %vm3230_vm1, %v14288_v34 }
0x1306   :  { %17483 = vmatprep.mubr.msk.f32.mxu1 %vm3230_vm1, %v14269_v42  ;;  %17511 = vmatprep.mubr.msk.f32.mxu0 %vm3230_vm1, %v14289_v3 }
0x1307   :  { %17554 = vmatprep.subr.mxu0 %v14330_v6  ;;  %17524 = vmatprep.subr.mxu1 %v14304_v8 }
0x1308   :  { %17555 = vmatpush3.msra.mxu0 %v14330_v6  ;;  %17525 = vmatpush3.msra.mxu1 %v14304_v8 }
0x1309   :  { %17484 = vmatmul.mubr.msk.f32.gmra.mxu1 %vm3230_vm1, %v14270_v43  ;;  %17512 = vmatmul.mubr.msk.f32.gmra.mxu0 %vm3230_vm1, %v14290_v0 }
0x130a   :  { %17528 = vmatprep.mubr.msk.f32.mxu1 %vm3230_vm1, %v20562_v45  ;;  %17526 = vmatprep.subr.mxu1 %v14303_v51 }
0x130b   :  { %17514 = vmatprep.mubr.msk.f32.mxu0 %vm3230_vm1, %v14291_v21  ;;  %17527 = vmatpush3.msra.mxu1 %v14303_v51 }
0x130c   :  { %17556 = vmatprep.subr.mxu0 %v14329_v25 }
0x130d   :  { %17515 = vmatmul.mubr.msk.f32.gmra.mxu0 %vm3230_vm1, %v14292_v47  ;;  %17529 = vmatmul.mubr.msk.f32.vlgmr.msra.gmra.mxu1 %vm3230_vm1, %v20573_v52 }
0x130e   :  { %17557 = vmatpush3.msra.mxu0 %v14329_v25  ;;  %17531 = vmatprep.mubr.msk.f32.mxu1 %vm3230_vm1, %v20584_v37 }
0x130f   :  { %17517 = vmatprep.mubr.msk.f32.mxu0 %vm3230_vm1, %v14293_v2  ;;  %17558 = vmatprep.subr.mxu0 %v14328_v31 }
0x1310   :  { %17559 = vmatpush3.msra.mxu0 %v14328_v31 }
0x1311   :  { %17518 = vmatmul.mubr.msk.f32.gmra.mxu0 %vm3230_vm1, %v14294_v49  ;;  %17532 = vmatmul.mubr.msk.f32.gmra.mxu1 %vm3230_vm1, %v20594_v5 }
0x1312   :  { %17562 = vmatprep.mubr.msk.f32.mxu0 %vm3230_vm1, %v20562_v45  ;;  %17560 = vmatprep.subr.mxu0 %v14327_v60 }
0x1313   :  { %17561 = vmatpush3.msra.mxu0 %v14327_v60  ;;  %17542 = vmatprep.mubr.msk.f32.mxu1 %vm3230_vm1, %v14311_v62 }
0x1315   :  { %17563 = vmatmul.mubr.msk.f32.vlgmr.msra.gmra.mxu0 %vm3230_vm1, %v20573_v52 }
0x1316   :  { %17565 = vmatprep.mubr.msk.f32.mxu0 %vm3230_vm1, %v20584_v37 }
0x1319   :  { %17566 = vmatmul.mubr.msk.f32.gmra.mxu0 %vm3230_vm1, %v20594_v5 }
0x131a   :  { %17576 = vmatprep.mubr.msk.f32.mxu0 %vm3230_vm1, %v14335_v10 }
0x13bd   :  { %v17476_v12 = vpop.f32.mrf.mxu1 }
0x13be   :  { %v5458_v22 = vadd.f32 %v17476_v12, %v21111_v35 }
0x13bf   :  { %v21237_v17 = vpop.f32.mrf.mxu1 }
0x13c1   :  { %v17479_v18 = vpop.f32.mrf.mxu1 }
0x13c2   :  { %v5460_v20 = vadd.f32 %v17479_v18, %v21118_v46  ;;  %v14312_v18 = vld [vmem:[%s23839_s5 + $0x288] sm:$0xff] }
0x13c3   :  { %v21240_v23 = vpop.f32.mrf.mxu1 }
0x13c5   :  { %v17482_v59 = vpop.f32.mrf.mxu1  ;;  %v17510_v34 = vpop.f32.mrf.mxu0 }
0x13c6   :  { %v5462_v42 = vadd.f32 %v17482_v59, %v21124_v63  ;;  %v21243_v3 = vadd.f32 %v17510_v34, %v5458_v22  ;;  %v14354_v34 = vld [vmem:[%s23837_s6 + $0x198] sm:$0xff] }
0x13c7   :  { %v21245_v6 = vpop.f32.mrf.mxu1  ;;  %v21247_v8 = vpop.f32.mrf.mxu0 }
0x13c9   :  { %v17485_v43 = vpop.f32.mrf.mxu1  ;;  %v17513_v0 = vpop.f32.mrf.mxu0 }
0x13ca   :  { %v5464_v35 = vadd.f32 %v17485_v43, %v21128_v40  ;;  %v21250_v51 = vadd.f32 %v17513_v0, %v5460_v20  ;;  %v14313_v20 = vld [vmem:[%s23839_s5 + $0x290] sm:$0xff]  ;;  %v14314_v43 = vld [vmem:[%s23839_s5 + $0x298] sm:$0xff]  ;;  %v14315_v0 = vld [vmem:[%s23839_s5 + $0x2a0] sm:$0xff] }
0x13cb   :  { %v21252_v21 = vpop.f32.mrf.mxu1  ;;  %v21254_v46 = vpop.f32.mrf.mxu0 }
0x13cc   :  { %23866 = vst [vmem:[#allocation2_spill] sm:$0xff] %v21252_v21 }
0x13cd   :  { %v17516_v25 = vpop.f32.mrf.mxu0  ;;  %v17530_v47 = vpop.f32.mrf.mxu1 }
0x13ce   :  { %v21256_v2 = vadd.f32 %v17516_v25, %v5462_v42  ;;  %v14316_v25 = vld [vmem:[%s23839_s5 + $0x2a8] sm:$0xff] }
0x13cf   :  { %v21258_v63 = vpop.f32.mrf.mxu0  ;;  %v5772_v31 = vpop.f32.mrf.mxu1 }
0x13d1   :  { %v17519_v49 = vpop.f32.mrf.mxu0  ;;  %v17533_v60 = vpop.f32.mrf.mxu1 }
0x13d2   :  { %v21260_v62 = vadd.f32 %v17519_v49, %v5464_v35  ;;  %17534 = vmatprep.subr.mxu1 %v17533_v60  ;;  %v14353_v35 = vld [vmem:[%s23837_s6 + $0x190] sm:$0xff] }
0x13d3   :  { %v21262_v10 = vpop.f32.mrf.mxu0  ;;  %v5782_v40 = vpop.f32.mrf.mxu1  ;;  %17535 = vmatpush3.msra.mxu1 %v17533_v60  ;;  %v14337_v49 = vld [vmem:[%s23839_s5 + $0x2d0] sm:$0xff]  ;;  %v14378_v60 = vld [vmem:[%s23837_s6 + $0x1b8] sm:$0xff] }
0x13d4   :  { %23867 = vst [vmem:[#allocation3_spill] sm:$0xff] %v21262_v10  ;;  %17536 = vmatprep.subr.mxu1 %v5782_v40 }
0x13d5   :  { %17537 = vmatpush3.msra.mxu1 %v5782_v40  ;;  %v17564_v12 = vpop.f32.mrf.mxu0  ;;  %v14352_v40 = vld [vmem:[%s23837_s6 + $0x188] sm:$0xff] }
0x13d6   :  { %17538 = vmatprep.subr.mxu1 %v17530_v47 }
0x13d7   :  { %17539 = vmatpush3.msra.mxu1 %v17530_v47  ;;  %v6008_v22 = vpop.f32.mrf.mxu0  ;;  %v14336_v47 = vld [vmem:[%s23839_s5 + $0x2c8] sm:$0xff] }
0x13d8   :  { %17540 = vmatprep.subr.mxu1 %v5772_v31 }
0x13d9   :  { %17541 = vmatpush3.msra.mxu1 %v5772_v31  ;;  %v17567_v59 = vpop.f32.mrf.mxu0  ;;  %v14317_v31 = vld [vmem:[%s23839_s5 + $0x2b0] sm:$0xff] }
0x13da   :  { %17543 = vmatmul.mubr.msk.f32.vlgmr.msra.gmra.mxu1 %vm3230_vm1, %v14312_v18  ;;  %17568 = vmatprep.subr.mxu0 %v17567_v59  ;;  %v14351_v18 = vld [vmem:[%s23837_s6 + $0x180] sm:$0xff] }
0x13db   :  { %v6018_v42 = vpop.f32.mrf.mxu0  ;;  %17569 = vmatpush3.msra.mxu0 %v17567_v59  ;;  %17545 = vmatprep.mubr.msk.f32.mxu1 %vm3230_vm1, %v14313_v20  ;;  %v14339_v20 = vld [vmem:[%s23839_s5 + $0x2e0] sm:$0xff]  ;;  %v14377_v59 = vld [vmem:[%s23837_s6 + $0x1b0] sm:$0xff] }
0x13dc   :  { %17570 = vmatprep.subr.mxu0 %v6018_v42  ;;  %17588 = vmatprep.subr.mxu1 %v14354_v34 }
0x13dd   :  { %17571 = vmatpush3.msra.mxu0 %v6018_v42  ;;  %17589 = vmatpush3.msra.mxu1 %v14354_v34  ;;  %v14340_v34 = vld [vmem:[%s23839_s5 + $0x2e8] sm:$0xff]  ;;  %v14341_v42 = vld [vmem:[%s23839_s5 + $0x2f0] sm:$0xff] }
0x13de   :  { %17546 = vmatmul.mubr.msk.f32.gmra.mxu1 %vm3230_vm1, %v14314_v43  ;;  %17572 = vmatprep.subr.mxu0 %v17564_v12  ;;  %v14376_v43 = vld [vmem:[%s23837_s6 + $0x1a8] sm:$0xff] }
0x13df   :  { %17573 = vmatpush3.msra.mxu0 %v17564_v12  ;;  %17548 = vmatprep.mubr.msk.f32.mxu1 %vm3230_vm1, %v14315_v0  ;;  %v14318_v12 = vld [vmem:[%s23839_s5 + $0x2b8] sm:$0xff] }
0x13e0   :  { %17574 = vmatprep.subr.mxu0 %v6008_v22  ;;  %17590 = vmatprep.subr.mxu1 %v14353_v35  ;;  %v14342_v0 = vld [vmem:[%s23839_s5 + $0x2f8] sm:$0xff] }
0x13e1   :  { %17575 = vmatpush3.msra.mxu0 %v6008_v22  ;;  %17591 = vmatpush3.msra.mxu1 %v14353_v35  ;;  %v14338_v22 = vld [vmem:[%s23839_s5 + $0x2d8] sm:$0xff]  ;;  %v14375_v35 = vld [vmem:[%s23837_s6 + $0x1a0] sm:$0xff] }
0x13e2   :  { %17549 = vmatmul.mubr.msk.f32.gmra.mxu1 %vm3230_vm1, %v14316_v25  ;;  %17577 = vmatmul.mubr.msk.f32.vlgmr.msra.gmra.mxu0 %vm3230_vm1, %v14336_v47  ;;  %v14359_v25 = vld [vmem:[%s23839_s5 + $0x300] sm:$0xff] }
0x13e3   :  { %17551 = vmatprep.mubr.msk.f32.mxu1 %vm3230_vm1, %v14317_v31  ;;  %17579 = vmatprep.mubr.msk.f32.mxu0 %vm3230_vm1, %v14337_v49  ;;  %v14383_v47 = vld [vmem:[%s23839_s5 + $0x340] sm:$0xff] }
0x13e4   :  { %17622 = vmatprep.subr.mxu0 %v14378_v60  ;;  %17592 = vmatprep.subr.mxu1 %v14352_v40 }
0x13e5   :  { %17623 = vmatpush3.msra.mxu0 %v14378_v60  ;;  %17593 = vmatpush3.msra.mxu1 %v14352_v40 }
0x13e6   :  { %17552 = vmatmul.mubr.msk.f32.gmra.mxu1 %vm3230_vm1, %v14318_v12  ;;  %17580 = vmatmul.mubr.msk.f32.gmra.mxu0 %vm3230_vm1, %v14338_v22 }
0x13e7   :  { %17596 = vmatprep.mubr.msk.f32.mxu1 %vm3230_vm1, %v20562_v45  ;;  %17594 = vmatprep.subr.mxu1 %v14351_v18 }
0x13e8   :  { %17582 = vmatprep.mubr.msk.f32.mxu0 %vm3230_vm1, %v14339_v20  ;;  %17595 = vmatpush3.msra.mxu1 %v14351_v18 }
0x13e9   :  { %17624 = vmatprep.subr.mxu0 %v14377_v59 }
0x13ea   :  { %17583 = vmatmul.mubr.msk.f32.gmra.mxu0 %vm3230_vm1, %v14340_v34  ;;  %17597 = vmatmul.mubr.msk.f32.vlgmr.msra.gmra.mxu1 %vm3230_vm1, %v20573_v52 }
0x13eb   :  { %17625 = vmatpush3.msra.mxu0 %v14377_v59  ;;  %17599 = vmatprep.mubr.msk.f32.mxu1 %vm3230_vm1, %v20584_v37 }
0x13ec   :  { %17585 = vmatprep.mubr.msk.f32.mxu0 %vm3230_vm1, %v14341_v42  ;;  %17626 = vmatprep.subr.mxu0 %v14376_v43 }
0x13ed   :  { %17627 = vmatpush3.msra.mxu0 %v14376_v43 }
0x13ee   :  { %17586 = vmatmul.mubr.msk.f32.gmra.mxu0 %vm3230_vm1, %v14342_v0  ;;  %17600 = vmatmul.mubr.msk.f32.gmra.mxu1 %vm3230_vm1, %v20594_v5 }
0x13ef   :  { %17630 = vmatprep.mubr.msk.f32.mxu0 %vm3230_vm1, %v20562_v45  ;;  %17628 = vmatprep.subr.mxu0 %v14375_v35 }
0x13f0   :  { %17629 = vmatpush3.msra.mxu0 %v14375_v35  ;;  %17610 = vmatprep.mubr.msk.f32.mxu1 %vm3230_vm1, %v14359_v25 }
0x13f2   :  { %17631 = vmatmul.mubr.msk.f32.vlgmr.msra.gmra.mxu0 %vm3230_vm1, %v20573_v52 }
0x13f3   :  { %17633 = vmatprep.mubr.msk.f32.mxu0 %vm3230_vm1, %v20584_v37 }
0x13f6   :  { %17634 = vmatmul.mubr.msk.f32.gmra.mxu0 %vm3230_vm1, %v20594_v5 }
0x13f7   :  { %17644 = vmatprep.mubr.msk.f32.mxu0 %vm3230_vm1, %v14383_v47 }
0x149a   :  { %v17544_v31 = vpop.f32.mrf.mxu1 }
0x149b   :  { %v5930_v49 = vadd.f32 %v17544_v31, %v21243_v3 }
0x149c   :  { %v21369_v60 = vpop.f32.mrf.mxu1 }
0x149e   :  { %v17547_v40 = vpop.f32.mrf.mxu1 }
0x149f   :  { %v5932_v12 = vadd.f32 %v17547_v40, %v21250_v51 }
0x14a0   :  { %v21372_v22 = vpop.f32.mrf.mxu1 }
0x14a2   :  { %v17550_v18 = vpop.f32.mrf.mxu1  ;;  %v17578_v20 = vpop.f32.mrf.mxu0 }
0x14a3   :  { %v5934_v59 = vadd.f32 %v17550_v18, %v21256_v2  ;;  %v21375_v34 = vadd.f32 %v17578_v20, %v5930_v49 }
0x14a4   :  { %v21377_v42 = vpop.f32.mrf.mxu1  ;;  %v21379_v43 = vpop.f32.mrf.mxu0 }
0x14a5   :  { %23868 = vst [vmem:[#allocation4_spill] sm:$0xff] %v21377_v42 }
0x14a6   :  { %v17553_v0 = vpop.f32.mrf.mxu1  ;;  %v17581_v35 = vpop.f32.mrf.mxu0 }
0x14a7   :  { %v5936_v3 = vadd.f32 %v17553_v0, %v21260_v62  ;;  %v21382_v25 = vadd.f32 %v17581_v35, %v5932_v12  ;;  %v14361_v35 = vld [vmem:[%s23839_s5 + $0x310] sm:$0xff] }
0x14a8   :  { %v21384_v47 = vpop.f32.mrf.mxu1  ;;  %v21386_v51 = vpop.f32.mrf.mxu0 }
0x14a9   :  { %23869 = vst [vmem:[#allocation5_spill] sm:$0xff] %v21384_v47 }
0x14aa   :  { %v17584_v31 = vpop.f32.mrf.mxu0  ;;  %v17598_v40 = vpop.f32.mrf.mxu1 }
0x14ab   :  { %v21388_v10 = vadd.f32 %v17584_v31, %v5934_v59  ;;  %v14360_v59 = vld [vmem:[%s23839_s5 + $0x308] sm:$0xff]  ;;  %v14402_v31 = vld [vmem:[%s23837_s6 + $0x1d8] sm:$0xff] }
0x14ac   :  { %v21390_v2 = vpop.f32.mrf.mxu0  ;;  %v6244_v49 = vpop.f32.mrf.mxu1 }
0x14ad   :  { %23870 = vst [vmem:[#allocation6_spill] sm:$0xff] %v21390_v2 }
0x14ae   :  { %v17587_v18 = vpop.f32.mrf.mxu0  ;;  %v17601_v20 = vpop.f32.mrf.mxu1 }
0x14af   :  { %v21392_v42 = vadd.f32 %v17587_v18, %v5936_v3  ;;  %17602 = vmatprep.subr.mxu1 %v17601_v20  ;;  %v14362_v18 = vld [vmem:[%s23839_s5 + $0x318] sm:$0xff] }
0x14b0   :  { %v21394_v21 = vpop.f32.mrf.mxu0  ;;  %v6254_v62 = vpop.f32.mrf.mxu1  ;;  %17603 = vmatpush3.msra.mxu1 %v17601_v20  ;;  %v14401_v20 = vld [vmem:[%s23837_s6 + $0x1d0] sm:$0xff] }
0x14b1   :  { %23871 = vst [vmem:[#allocation7_spill] sm:$0xff] %v21394_v21  ;;  %17604 = vmatprep.subr.mxu1 %v6254_v62 }
0x14b2   :  { %17605 = vmatpush3.msra.mxu1 %v6254_v62  ;;  %v17632_v12 = vpop.f32.mrf.mxu0  ;;  %v14364_v62 = vld [vmem:[%s23839_s5 + $0x328] sm:$0xff] }
0x14b3   :  { %17606 = vmatprep.subr.mxu1 %v17598_v40 }
0x14b4   :  { %17607 = vmatpush3.msra.mxu1 %v17598_v40  ;;  %v6480_v0 = vpop.f32.mrf.mxu0 }
0x14b5   :  { %17608 = vmatprep.subr.mxu1 %v6244_v49 }
0x14b6   :  { %17609 = vmatpush3.msra.mxu1 %v6244_v49  ;;  %v17635_v3 = vpop.f32.mrf.mxu0  ;;  %v14363_v49 = vld [vmem:[%s23839_s5 + $0x320] sm:$0xff] }
0x14b7   :  { %17611 = vmatmul.mubr.msk.f32.vlgmr.msra.gmra.mxu1 %vm3230_vm1, %v14360_v59  ;;  %17636 = vmatprep.subr.mxu0 %v17635_v3  ;;  %v14384_v59 = vld [vmem:[%s23839_s5 + $0x348] sm:$0xff] }
0x14b8   :  { %v6490_v40 = vpop.f32.mrf.mxu0  ;;  %17637 = vmatpush3.msra.mxu0 %v17635_v3  ;;  %17613 = vmatprep.mubr.msk.f32.mxu1 %vm3230_vm1, %v14361_v35  ;;  %v14365_v35 = vld [vmem:[%s23839_s5 + $0x330] sm:$0xff]  ;;  %v14426_v3 = vld [vmem:[%s23837_s6 + $0x1f8] sm:$0xff] }
0x14b9   :  { %17638 = vmatprep.subr.mxu0 %v6490_v40  ;;  %17656 = vmatprep.subr.mxu1 %v14402_v31 }
0x14ba   :  { %17639 = vmatpush3.msra.mxu0 %v6490_v40  ;;  %17657 = vmatpush3.msra.mxu1 %v14402_v31  ;;  %v14400_v31 = vld [vmem:[%s23837_s6 + $0x1c8] sm:$0xff]  ;;  %v14386_v40 = vld [vmem:[%s23839_s5 + $0x358] sm:$0xff] }
0x14bb   :  { %17614 = vmatmul.mubr.msk.f32.gmra.mxu1 %vm3230_vm1, %v14362_v18  ;;  %17640 = vmatprep.subr.mxu0 %v17632_v12  ;;  %v14399_v18 = vld [vmem:[%s23837_s6 + $0x1c0] sm:$0xff] }
0x14bc   :  { %17641 = vmatpush3.msra.mxu0 %v17632_v12  ;;  %17616 = vmatprep.mubr.msk.f32.mxu1 %vm3230_vm1, %v14363_v49  ;;  %v14385_v12 = vld [vmem:[%s23839_s5 + $0x350] sm:$0xff]  ;;  %v14387_v49 = vld [vmem:[%s23839_s5 + $0x360] sm:$0xff] }
0x14bd   :  { %17642 = vmatprep.subr.mxu0 %v6480_v0  ;;  %17658 = vmatprep.subr.mxu1 %v14401_v20 }
0x14be   :  { %17643 = vmatpush3.msra.mxu0 %v6480_v0  ;;  %17659 = vmatpush3.msra.mxu1 %v14401_v20  ;;  %v14366_v0 = vld [vmem:[%s23839_s5 + $0x338] sm:$0xff]  ;;  %v14425_v20 = vld [vmem:[%s23837_s6 + $0x1f0] sm:$0xff] }
0x14bf   :  { %17617 = vmatmul.mubr.msk.f32.gmra.mxu1 %vm3230_vm1, %v14364_v62  ;;  %17645 = vmatmul.mubr.msk.f32.vlgmr.msra.gmra.mxu0 %vm3230_vm1, %v14384_v59  ;;  %v14388_v62 = vld [vmem:[%s23839_s5 + $0x368] sm:$0xff]  ;;  %v14389_v59 = vld [vmem:[%s23839_s5 + $0x370] sm:$0xff] }
0x14c0   :  { %17619 = vmatprep.mubr.msk.f32.mxu1 %vm3230_vm1, %v14365_v35  ;;  %17647 = vmatprep.mubr.msk.f32.mxu0 %vm3230_vm1, %v14385_v12  ;;  %v14424_v35 = vld [vmem:[%s23837_s6 + $0x1e8] sm:$0xff]  ;;  %v14390_v12 = vld [vmem:[%s23839_s5 + $0x378] sm:$0xff] }
0x14c1   :  { %17690 = vmatprep.subr.mxu0 %v14426_v3  ;;  %17660 = vmatprep.subr.mxu1 %v14400_v31 }
0x14c2   :  { %17691 = vmatpush3.msra.mxu0 %v14426_v3  ;;  %17661 = vmatpush3.msra.mxu1 %v14400_v31  ;;  %v14423_v3 = vld [vmem:[%s23837_s6 + $0x1e0] sm:$0xff] }
0x14c3   :  { %17620 = vmatmul.mubr.msk.f32.gmra.mxu1 %vm3230_vm1, %v14366_v0  ;;  %17648 = vmatmul.mubr.msk.f32.gmra.mxu0 %vm3230_vm1, %v14386_v40  ;;  %v14407_v31 = vld [vmem:[%s23839_s5 + $0x380] sm:$0xff] }
0x14c4   :  { %17664 = vmatprep.mubr.msk.f32.mxu1 %vm3230_vm1, %v20562_v45  ;;  %17662 = vmatprep.subr.mxu1 %v14399_v18 }
0x14c5   :  { %17650 = vmatprep.mubr.msk.f32.mxu0 %vm3230_vm1, %v14387_v49  ;;  %17663 = vmatpush3.msra.mxu1 %v14399_v18 }
0x14c6   :  { %17692 = vmatprep.subr.mxu0 %v14425_v20 }
0x14c7   :  { %17651 = vmatmul.mubr.msk.f32.gmra.mxu0 %vm3230_vm1, %v14388_v62  ;;  %17665 = vmatmul.mubr.msk.f32.vlgmr.msra.gmra.mxu1 %vm3230_vm1, %v20573_v52 }
0x14c8   :  { %17693 = vmatpush3.msra.mxu0 %v14425_v20  ;;  %17667 = vmatprep.mubr.msk.f32.mxu1 %vm3230_vm1, %v20584_v37 }
0x14c9   :  { %17653 = vmatprep.mubr.msk.f32.mxu0 %vm3230_vm1, %v14389_v59  ;;  %17694 = vmatprep.subr.mxu0 %v14424_v35 }
0x14ca   :  { %17695 = vmatpush3.msra.mxu0 %v14424_v35 }
0x14cb   :  { %17654 = vmatmul.mubr.msk.f32.gmra.mxu0 %vm3230_vm1, %v14390_v12  ;;  %17668 = vmatmul.mubr.msk.f32.gmra.mxu1 %vm3230_vm1, %v20594_v5 }
0x14cc   :  { %17698 = vmatprep.mubr.msk.f32.mxu0 %vm3230_vm1, %v20562_v45  ;;  %17696 = vmatprep.subr.mxu0 %v14423_v3  ;;  %v14431_v45 = vld [vmem:[%s23839_s5 + $0x3c0] sm:$0xff] }
0x14cd   :  { %17697 = vmatpush3.msra.mxu0 %v14423_v3  ;;  %17678 = vmatprep.mubr.msk.f32.mxu1 %vm3230_vm1, %v14407_v31 }
0x14cf   :  { %17699 = vmatmul.mubr.msk.f32.vlgmr.msra.gmra.mxu0 %vm3230_vm1, %v20573_v52 }
0x14d0   :  { %17701 = vmatprep.mubr.msk.f32.mxu0 %vm3230_vm1, %v20584_v37 }
0x14d3   :  { %17702 = vmatmul.mubr.msk.f32.gmra.mxu0 %vm3230_vm1, %v20594_v5 }
0x14d4   :  { %17712 = vmatprep.mubr.msk.f32.mxu0 %vm3230_vm1, %v14431_v45 }
0x1577   :  { %v17612_v0 = vpop.f32.mrf.mxu1 }
0x1578   :  { %v6402_v52 = vadd.f32 %v17612_v0, %v21375_v34 }
0x1579   :  { %v21501_v40 = vpop.f32.mrf.mxu1 }
0x157b   :  { %v17615_v37 = vpop.f32.mrf.mxu1 }
0x157c   :  { %v6404_v5 = vadd.f32 %v17615_v37, %v21382_v25 }
0x157d   :  { %v21504_v18 = vpop.f32.mrf.mxu1 }
0x157f   :  { %v17618_v49 = vpop.f32.mrf.mxu1  ;;  %v17646_v20 = vpop.f32.mrf.mxu0 }
0x1580   :  { %v6406_v62 = vadd.f32 %v17618_v49, %v21388_v10  ;;  %v21507_v59 = vadd.f32 %v17646_v20, %v6402_v52 }
0x1581   :  { %v21509_v35 = vpop.f32.mrf.mxu1  ;;  %v21511_v12 = vpop.f32.mrf.mxu0 }
0x1582   :  { %23872 = vst [vmem:[#allocation8_spill] sm:$0xff] %v21509_v35 }
0x1583   :  { %v17621_v3 = vpop.f32.mrf.mxu1  ;;  %v17649_v31 = vpop.f32.mrf.mxu0 }
0x1584   :  { %v6408_v34 = vadd.f32 %v17621_v3, %v21392_v42  ;;  %v21514_v45 = vadd.f32 %v17649_v31, %v6404_v5  ;;  %v14409_v31 = vld [vmem:[%s23839_s5 + $0x390] sm:$0xff] }
0x1585   :  { %v21516_v0 = vpop.f32.mrf.mxu1  ;;  %v21518_v25 = vpop.f32.mrf.mxu0 }
0x1587   :  { %v17652_v37 = vpop.f32.mrf.mxu0  ;;  %v17666_v21 = vpop.f32.mrf.mxu1 }
0x1588   :  { %v21520_v47 = vadd.f32 %v17652_v37, %v6406_v62  ;;  %v14408_v62 = vld [vmem:[%s23839_s5 + $0x388] sm:$0xff] }
0x1589   :  { %v21522_v10 = vpop.f32.mrf.mxu0  ;;  %v6716_v52 = vpop.f32.mrf.mxu1 }
0x158b   :  { %v17655_v49 = vpop.f32.mrf.mxu0  ;;  %v17669_v20 = vpop.f32.mrf.mxu1 }
0x158c   :  { %v21524_v35 = vadd.f32 %v17655_v49, %v6408_v34  ;;  %17670 = vmatprep.subr.mxu1 %v17669_v20  ;;  %v14411_v49 = vld [vmem:[%s23839_s5 + $0x3a0] sm:$0xff] }
0x158d   :  { %v21526_v2 = vpop.f32.mrf.mxu0  ;;  %v6726_v42 = vpop.f32.mrf.mxu1  ;;  %17671 = vmatpush3.msra.mxu1 %v17669_v20  ;;  %v14432_v20 = vld [vmem:[%s23839_s5 + $0x3c8] sm:$0xff] }
0x158e   :  { %17672 = vmatprep.subr.mxu1 %v6726_v42 }
0x158f   :  { %17673 = vmatpush3.msra.mxu1 %v6726_v42  ;;  %v17700_v5 = vpop.f32.mrf.mxu0  ;;  %v14413_v42 = vld [vmem:[%s23839_s5 + $0x3b0] sm:$0xff] }
0x1590   :  { %17674 = vmatprep.subr.mxu1 %v17666_v21 }
0x1591   :  { %17675 = vmatpush3.msra.mxu1 %v17666_v21  ;;  %v6952_v3 = vpop.f32.mrf.mxu0  ;;  %v14410_v21 = vld [vmem:[%s23839_s5 + $0x398] sm:$0xff] }
0x1592   :  { %17676 = vmatprep.subr.mxu1 %v6716_v52 }
0x1593   :  { %17677 = vmatpush3.msra.mxu1 %v6716_v52  ;;  %v17703_v34 = vpop.f32.mrf.mxu0  ;;  %v14412_v52 = vld [vmem:[%s23839_s5 + $0x3a8] sm:$0xff] }
0x1594   :  { %17679 = vmatmul.mubr.msk.f32.vlgmr.msra.gmra.mxu1 %vm3230_vm1, %v14408_v62  ;;  %17704 = vmatprep.subr.mxu0 %v17703_v34  ;;  %v14433_v62 = vld [vmem:[%s23839_s5 + $0x3d0] sm:$0xff] }
0x1595   :  { %v6962_v37 = vpop.f32.mrf.mxu0  ;;  %17705 = vmatpush3.msra.mxu0 %v17703_v34  ;;  %17681 = vmatprep.mubr.msk.f32.mxu1 %vm3230_vm1, %v14409_v31  ;;  %v14434_v31 = vld [vmem:[%s23839_s5 + $0x3d8] sm:$0xff]  ;;  %v14436_v34 = vld [vmem:[%s23839_s5 + $0x3e8] sm:$0xff] }
0x1596   :  { %17706 = vmatprep.subr.mxu0 %v6962_v37 }
0x1597   :  { %17707 = vmatpush3.msra.mxu0 %v6962_v37  ;;  %v14437_v37 = vld [vmem:[%s23839_s5 + $0x3f0] sm:$0xff] }
0x1598   :  { %17682 = vmatmul.mubr.msk.f32.gmra.mxu1 %vm3230_vm1, %v14410_v21  ;;  %17708 = vmatprep.subr.mxu0 %v17700_v5  ;;  %v14438_v21 = vld [vmem:[%s23839_s5 + $0x3f8] sm:$0xff] }
0x1599   :  { %17709 = vmatpush3.msra.mxu0 %v17700_v5  ;;  %17684 = vmatprep.mubr.msk.f32.mxu1 %vm3230_vm1, %v14411_v49  ;;  %v14414_v5 = vld [vmem:[%s23839_s5 + $0x3b8] sm:$0xff]  ;;  %v3775_v49 = vadd.f32 %v20716_v30, %v20714_v9 }
0x159a   :  { %17710 = vmatprep.subr.mxu0 %v6952_v3 }
0x159b   :  { %17711 = vmatpush3.msra.mxu0 %v6952_v3  ;;  %v14435_v3 = vld [vmem:[%s23839_s5 + $0x3e0] sm:$0xff] }
0x159c   :  { %17685 = vmatmul.mubr.msk.f32.gmra.mxu1 %vm3230_vm1, %v14412_v52  ;;  %17713 = vmatmul.mubr.msk.f32.vlgmr.msra.gmra.mxu0 %vm3230_vm1, %v14432_v20  ;;  %v4041_v52 = vadd.f32 %v20841_v54, %v3775_v49  ;;  %v3785_v20 = vadd.f32 %v20722_v36, %v20720_v33  ;;  %v3805_v33 = vadd.f32 %v20838_v14, %v20732_v58 }
0x159d   :  { %17687 = vmatprep.mubr.msk.f32.mxu1 %vm3230_vm1, %v14413_v42  ;;  %17715 = vmatprep.mubr.msk.f32.mxu0 %vm3230_vm1, %v14433_v62 }
0x159e   :  { %v4277_v42 = vadd.f32 %v20851_v13, %v4041_v52  ;;  %v4043_v62 = vadd.f32 %v20844_v24, %v3785_v20 }
0x15a0   :  { %17688 = vmatmul.mubr.msk.f32.gmra.mxu1 %vm3230_vm1, %v14414_v5  ;;  %17716 = vmatmul.mubr.msk.f32.gmra.mxu0 %vm3230_vm1, %v14434_v31  ;;  %v4513_v5 = vadd.f32 %v20973_v29, %v4277_v42  ;;  %v3795_v31 = vadd.f32 %v20728_v53, %v20726_v38  ;;  %v4047_v38 = vadd.f32 %v20856_v56, %v3805_v33  ;;  %v23876_v42 = vld [vmem:[#allocation6_spill] sm:$0xff] }
0x15a1   :  { %17718 = vmatprep.mubr.msk.f32.mxu0 %vm3230_vm1, %v14435_v3  ;;  %v4279_v3 = vadd.f32 %v20858_v32, %v4043_v62 }
0x15a2   :  { %v4045_v9 = vadd.f32 %v20849_v27, %v3795_v31  ;;  %v4283_v29 = vadd.f32 %v20866_v7, %v4047_v38 }
0x15a3   :  { %v4515_v30 = vadd.f32 %v20976_v50, %v4279_v3 }
0x15a4   :  { %17719 = vmatmul.mubr.msk.f32.gmra.mxu0 %vm3230_vm1, %v14436_v34  ;;  %v4749_v34 = vadd.f32 %v20983_v57, %v4513_v5  ;;  %v4281_v36 = vadd.f32 %v20862_v48, %v4045_v9  ;;  %v4519_v48 = vadd.f32 %v20988_v16, %v4283_v29 }
0x15a5   :  { %17721 = vmatprep.mubr.msk.f32.mxu0 %vm3230_vm1, %v14437_v37  ;;  %v4751_v24 = vadd.f32 %v20990_v55, %v4515_v30  ;;  %v23873_v37 = vld [vmem:[#allocation2_spill] sm:$0xff]  ;;  %v23878_v30 = vld [vmem:[#allocation8_spill] sm:$0xff] }
0x15a6   :  { %v4985_v54 = vadd.f32 %v21105_v26, %v4749_v34  ;;  %v4517_v53 = vadd.f32 %v20981_v1, %v4281_v36  ;;  %v4755_v26 = vadd.f32 %v20998_v28, %v4519_v48  ;;  %v23877_v34 = vld [vmem:[#allocation5_spill] sm:$0xff] }
0x15a7   :  { %v4987_v32 = vadd.f32 %v21108_v39, %v4751_v24 }
0x15a8   :  { %17722 = vmatmul.mubr.msk.f32.gmra.mxu0 %vm3230_vm1, %v14438_v21  ;;  %v5221_v13 = vadd.f32 %v21115_v4, %v4985_v54  ;;  %v4753_v50 = vadd.f32 %v20994_v61, %v4517_v53  ;;  %v23874_v21 = vld [vmem:[#allocation4_spill] sm:$0xff] }
0x15a9   :  { %v5223_v58 = vadd.f32 %v21122_v15, %v4987_v32  ;;  %v4991_v15 = vadd.f32 %v21120_v11, %v4755_v26 }
0x15aa   :  { %v5457_v27 = vadd.f32 %v21237_v17, %v5221_v13  ;;  %v4989_v57 = vadd.f32 %v21113_v41, %v4753_v50 }
0x15ab   :  { %v5459_v56 = vadd.f32 %v21240_v23, %v5223_v58 }
0x15ac   :  { %v5693_v14 = vadd.f32 %v21247_v8, %v5457_v27  ;;  %v5225_v39 = vadd.f32 %v21126_v19, %v4989_v57  ;;  %v5227_v8 = vadd.f32 %v21130_v44, %v4991_v15 }
0x15ad   :  { %v5695_v61 = vadd.f32 %v21254_v46, %v5459_v56 }
0x15ae   :  { %v5929_v1 = vadd.f32 %v21369_v60, %v5693_v14  ;;  %v5461_v16 = vadd.f32 %v21245_v6, %v5225_v39  ;;  %v5463_v11 = vadd.f32 %v23873_v37, %v5227_v8  ;;  %v7227_v8 = vld [vmem:[%s23835_s7 + $0x28] sm:$0xff] }
0x15af   :  { %v5931_v41 = vadd.f32 %v21372_v22, %v5695_v61 }
0x15b0   :  { %v6165_v4 = vadd.f32 %v21379_v43, %v5929_v1  ;;  %v5697_v28 = vadd.f32 %v21258_v63, %v5461_v16  ;;  %v23875_v63 = vld [vmem:[#allocation3_spill] sm:$0xff]  ;;  %v7226_v16 = vld [vmem:[%s23835_s7 + $0x20] sm:$0xff] }
0x15b1   :  { %v6167_v19 = vadd.f32 %v21386_v51, %v5931_v41  ;;  %v5699_v20 = vadd.f32 %v23875_v63, %v5463_v11  ;;  %v7281_v41 = vld [vmem:[%s23836_s8 + $0x18] sm:$0xff] }
0x15b2   :  { %v6401_v23 = vadd.f32 %v21501_v40, %v6165_v4  ;;  %v5933_v6 = vadd.f32 %v23874_v21, %v5697_v28  ;;  %v7283_v28 = vld [vmem:[%s23836_s8 + $0x28] sm:$0xff] }
0x15b3   :  { %v6403_v22 = vadd.f32 %v21504_v18, %v6167_v19  ;;  %v5935_v18 = vadd.f32 %v23877_v34, %v5699_v20  ;;  %v21694_v19 = vpop.permute.xlu1 %7237 }
0x15b4   :  { %v6637_v46 = vadd.f32 %v21511_v12, %v6401_v23  ;;  %v6169_v51 = vadd.f32 %v23876_v42, %v5933_v6  ;;  %v7228_v23 = vld [vmem:[%s23835_s7 + $0x30] sm:$0xff] }
0x15b6   :  { %v6405_v54 = vadd.f32 %v23878_v30, %v6169_v51 }
0x15b8   :  { %v6641_v53 = vadd.f32 %v21522_v10, %v6405_v54 }
0x1654   :  { %v17680_v55 = vpop.f32.mrf.mxu1 }
0x1655   :  { %v6874_v43 = vadd.f32 %v17680_v55, %v21507_v59  ;;  %v6639_v59 = vadd.f32 %v21518_v25, %v6403_v22  ;;  %v23879_v25 = vld [vmem:[#allocation7_spill] sm:$0xff] }
0x1656   :  { %v6834_v7 = vpop.f32.mrf.mxu1  ;;  %v6171_v13 = vadd.f32 %v23879_v25, %v5935_v18 }
0x1657   :  { %v6873_v40 = vadd.f32 %v6834_v7, %v6637_v46  ;;  %v21696_v46 = vpop.permute.xlu0 %7232 }
0x1658   :  { %v17683_v17 = vpop.f32.mrf.mxu1  ;;  %v6407_v29 = vadd.f32 %v21516_v0, %v6171_v13 }
0x1659   :  { %v6876_v5 = vadd.f32 %v17683_v17, %v21514_v45  ;;  %v7282_v17 = vld [vmem:[%s23836_s8 + $0x20] sm:$0xff] }
0x165a   :  { %v6844_v60 = vpop.f32.mrf.mxu1 }
0x165b   :  { %v6875_v33 = vadd.f32 %v6844_v60, %v6639_v59  ;;  %v7229_v60 = vld [vmem:[%s23835_s7 + $0x38] sm:$0xff]  ;;  %v21700_v37 = vpop.permute.xlu0 %7293 }
0x165c   :  { %v17686_v49 = vpop.f32.mrf.mxu1  ;;  %v17714_v52 = vpop.f32.mrf.mxu0 }
0x165d   :  { %v21632_v44 = vadd.f32 %v17714_v52, %v6874_v43  ;;  %v6878_v32 = vadd.f32 %v17686_v49, %v21520_v47  ;;  %v6643_v47 = vadd.f32 %v21526_v2, %v6407_v29  ;;  %v21698_v43 = vpop.permute.xlu1 %7288 }
0x165e   :  { %v6854_v62 = vpop.f32.mrf.mxu1  ;;  %v7070_v12 = vpop.f32.mrf.mxu0 }
0x165f   :  { %v21638_v31 = vadd.f32 %v7070_v12, %v6873_v40  ;;  %v7121_v3 = vsel %vm7117_vm2, %v21632_v44, 0.0  ;;  %v6877_v58 = vadd.f32 %v6854_v62, %v6641_v53  ;;  %v21704_v21 = vpop.permute.xlu0 %7247 }
0x1660   :  { %v17717_v9 = vpop.f32.mrf.mxu0  ;;  %7122 = vadd.xlane.f32.xlu0 %v7121_v3  ;;  %v17689_v45 = vpop.f32.mrf.mxu1 }
0x1661   :  { %v21644_v36 = vadd.f32 %v17717_v9, %v6876_v5  ;;  %v7118_v24 = vsel %vm7117_vm2, %v21638_v31, 0.0  ;;  %v6880_v10 = vadd.f32 %v17689_v45, %v21524_v35  ;;  %v21702_v11 = vpop.permute.xlu1 %7242 }
0x1662   :  { %v7080_v38 = vpop.f32.mrf.mxu0  ;;  %7119 = vadd.xlane.f32.xlu1 %v7118_v24  ;;  %v6864_v55 = vpop.f32.mrf.mxu1 }
0x1663   :  { %v21651_v27 = vadd.f32 %v7080_v38, %v6875_v33  ;;  %v7127_v48 = vsel %vm7117_vm2, %v21644_v36, 0.0  ;;  %v6879_v26 = vadd.f32 %v6864_v55, %v6643_v47 }
0x1664   :  { %v17720_v50 = vpop.f32.mrf.mxu0 }
0x1665   :  { %v21654_v14 = vadd.f32 %v17720_v50, %v6878_v32  ;;  %v7124_v57 = vsel %vm7117_vm2, %v21651_v27, 0.0  ;;  %v21706_v6 = vpop.permute.xlu1 %7298 }
0x1666   :  { %v7090_v56 = vpop.f32.mrf.mxu0  ;;  %7128 = vadd.xlane.f32.xlu1 %v7127_v48  ;;  %7125 = vadd.xlane.f32.xlu0 %v7124_v57 }
0x1667   :  { %v7113_v1 = vadd.f32 %v7090_v56, %v6877_v58  ;;  %v7133_v7 = vsel %vm7117_vm2, %v21654_v14, 0.0 }
0x1668   :  { %v17723_v0 = vpop.f32.mrf.mxu0 }
0x1669   :  { %v21662_v39 = vadd.f32 %v17723_v0, %v6880_v10  ;;  %v7130_v61 = vsel %vm7117_vm2, %v7113_v1, 0.0  ;;  %v8369_v0 = vld [vmem:[%s23840_s11] sm:$0xff] }
0x166a   :  { %v7100_v4 = vpop.f32.mrf.mxu0  ;;  %7134 = vadd.xlane.f32.xlu1 %v7133_v7  ;;  %7131 = vadd.xlane.f32.xlu0 %v7130_v61  ;;  %v8370_v7 = vld [vmem:[%s23840_s11 + $0x8] sm:$0xff] }
0x166b   :  { %v21667_v15 = vadd.f32 %v7100_v4, %v6879_v26  ;;  %v7139_v2 = vsel %vm7117_vm2, %v21662_v39, 0.0  ;;  %v7285_v26 = vld [vmem:[%s23836_s8 + $0x38] sm:$0xff]  ;;  %v14455_v61 = vld [vmem:[%s23841_s10 + $0x8] sm:$0xff]  ;;  %v7350_v4 = vld [vmem:[%s23841_s10] sm:$0xff] }
0x166c   :  { %17738 = vmatprep.subr.mxu0 %v14455_v61  ;;  %17724 = vmatprep.subr.mxu1 %v7350_v4 }
0x166d   :  { %v7136_v35 = vsel %vm7117_vm2, %v21667_v15, 0.0  ;;  %17739 = vmatpush3.msra.mxu0 %v14455_v61  ;;  %17725 = vmatpush3.msra.mxu1 %v7350_v4 }
0x166e   :  { %7140 = vadd.xlane.f32.xlu1 %v7139_v2  ;;  %7137 = vadd.xlane.f32.xlu0 %v7136_v35  ;;  %v8372_v2 = vld [vmem:[%s23840_s11 + $0x18] sm:$0xff]  ;;  %v8375_v35 = vld [vmem:[%s23840_s11 + $0x30] sm:$0xff] }
0x167f   :  { %7252 = vperm.xlu1 %19086, %v7226_v16   ;;  %v8374_v16 = vld [vmem:[%s23840_s11 + $0x28] sm:$0xff] }
0x1683   :  { %7308 = vperm.xlu1 %19086, %v7282_v17   ;;  %v9570_v17 = vld [vmem:[%s23842_s14 + $0x8] sm:$0xff] }
0x1684   :  { %7303 = vperm.xlu0 %19085, %v7281_v41   ;;  %v8376_v41 = vld [vmem:[%s23840_s11 + $0x38] sm:$0xff] }
0x1687   :  { %7262 = vperm.xlu1 %19086, %v7228_v23   ;;  %v9625_v23 = vld [vmem:[%s23843_s15] sm:$0xff] }
0x1688   :  { %7257 = vperm.xlu0 %19085, %v7227_v8   ;;  %v9569_v8 = vld [vmem:[%s23842_s14] sm:$0xff] }
0x168c   :  { %7313 = vperm.xlu0 %19085, %v7283_v28   ;;  %v9571_v28 = vld [vmem:[%s23842_s14 + $0x10] sm:$0xff] }
0x1690   :  { %7267 = vperm.xlu0 %19085, %v7229_v60   ;;  %v9626_v60 = vld [vmem:[%s23843_s15 + $0x8] sm:$0xff] }
0x16e9   :  { %v7123_v49 = vpop.xlane.xlu0 %7122 }
0x16ea   :  { %v7143_v52 = vmul.f32 0.125, %v7123_v49  ;;  %v9627_v49 = vld [vmem:[%s23843_s15 + $0x10] sm:$0xff] }
0x16eb   :  { %v7120_v22 = vpop.xlane.xlu1 %7119 }
0x16ec   :  { %v21709_v40 = vsub.f32 %v21632_v44, %v7143_v52  ;;  %v7142_v63 = vmul.f32 0.125, %v7120_v22  ;;  %v9572_v52 = vld [vmem:[%s23842_s14 + $0x18] sm:$0xff] }
0x16ee   :  { %v21712_v20 = vsub.f32 %v21638_v31, %v7142_v63  ;;  %v7159_v42 = vmul.f32 %v21709_v40, %v21709_v40 }
0x16ef   :  { %v7129_v51 = vpop.xlane.xlu1 %7128  ;;  %v7126_v62 = vpop.xlane.xlu0 %7125 }
0x16f0   :  { %v7145_v12 = vmul.f32 0.125, %v7129_v51  ;;  %v7144_v59 = vmul.f32 0.125, %v7126_v62  ;;  %v7169_v5 = vsel %vm7117_vm2, %v7159_v42, 0.0  ;;  %v7158_v3 = vmul.f32 %v21712_v20, %v21712_v20 }
0x16f1   :  { %7170 = vadd.xlane.f32.xlu1 %v7169_v5 }
0x16f2   :  { %v21720_v44 = vsub.f32 %v21644_v36, %v7145_v12  ;;  %v21723_v34 = vsub.f32 %v21651_v27, %v7144_v59  ;;  %v7166_v31 = vsel %vm7117_vm2, %v7158_v3, 0.0 }
0x16f3   :  { %v7135_v18 = vpop.xlane.xlu1 %7134  ;;  %7167 = vadd.xlane.f32.xlu0 %v7166_v31  ;;  %v7132_v9 = vpop.xlane.xlu0 %7131 }
0x16f4   :  { %v7147_v30 = vmul.f32 0.125, %v7135_v18  ;;  %v7146_v54 = vmul.f32 0.125, %v7132_v9  ;;  %v7161_v33 = vmul.f32 %v21720_v44, %v21720_v44  ;;  %v7160_v24 = vmul.f32 %v21723_v34, %v21723_v34 }
0x16f6   :  { %v21731_v25 = vsub.f32 %v21654_v14, %v7147_v30  ;;  %v21733_v36 = vsub.f32 %v7113_v1, %v7146_v54  ;;  %v7175_v13 = vsel %vm7117_vm2, %v7161_v33, 0.0  ;;  %v7172_v45 = vsel %vm7117_vm2, %v7160_v24, 0.0  ;;  %v7284_v1 = vld [vmem:[%s23836_s8 + $0x30] sm:$0xff] }
0x16f7   :  { %v7141_v38 = vpop.xlane.xlu1 %7140  ;;  %7176 = vadd.xlane.f32.xlu1 %v7175_v13  ;;  %7173 = vadd.xlane.f32.xlu0 %v7172_v45  ;;  %v7138_v53 = vpop.xlane.xlu0 %7137 }
0x16f8   :  { %v7149_v32 = vmul.f32 0.125, %v7141_v38  ;;  %v7148_v27 = vmul.f32 0.125, %v7138_v53  ;;  %v7163_v29 = vmul.f32 %v21731_v25, %v21731_v25  ;;  %v7162_v50 = vmul.f32 %v21733_v36, %v21733_v36 }
0x16fa   :  { %v21742_v58 = vsub.f32 %v21662_v39, %v7149_v32  ;;  %v21745_v14 = vsub.f32 %v21667_v15, %v7148_v27  ;;  %v7181_v48 = vsel %vm7117_vm2, %v7163_v29, 0.0  ;;  %v7178_v57 = vsel %vm7117_vm2, %v7162_v50, 0.0  ;;  %v8371_v39 = vld [vmem:[%s23840_s11 + $0x10] sm:$0xff]  ;;  %v8373_v15 = vld [vmem:[%s23840_s11 + $0x20] sm:$0xff] }
0x16fb   :  { %7182 = vadd.xlane.f32.xlu1 %v7181_v48  ;;  %7179 = vadd.xlane.f32.xlu0 %v7178_v57  ;;  %v21812_v63 = vpop.permute.xlu1 %7252 }
0x16fc   :  { %v7165_v55 = vmul.f32 %v21742_v58, %v21742_v58  ;;  %v7164_v56 = vmul.f32 %v21745_v14, %v21745_v14 }
0x16fe   :  { %v7187_v47 = vsel %vm7117_vm2, %v7165_v55, 0.0  ;;  %v7184_v10 = vsel %vm7117_vm2, %v7164_v56, 0.0 }
0x16ff   :  { %7188 = vadd.xlane.f32.xlu1 %v7187_v47  ;;  %7185 = vadd.xlane.f32.xlu0 %v7184_v10  ;;  %v7304_v22 = vpop.permute.xlu0 %7303  ;;  %v21814_v51 = vpop.permute.xlu1 %7308 }
0x1703   :  { %v7258_v42 = vpop.permute.xlu0 %7257  ;;  %v21818_v12 = vpop.permute.xlu1 %7262 }
0x1707   :  { %v21816_v62 = vpop.permute.xlu0 %7313 }
0x170b   :  { %v21820_v59 = vpop.permute.xlu0 %7267 }
0x1710   :  { %7318 = vperm.xlu1 %19086, %v7284_v1  }
0x1714   :  { %8379 = vperm.xlu1 %19086, %v8369_v0  }
0x1715   :  { %7323 = vperm.xlu0 %19085, %v7285_v26  }
0x1718   :  { %8389 = vperm.xlu1 %19086, %v8371_v39  }
0x1719   :  { %8384 = vperm.xlu0 %19085, %v8370_v7  }
0x171c   :  { %8399 = vperm.xlu1 %19086, %v8373_v15  }
0x171d   :  { %8394 = vperm.xlu0 %19085, %v8372_v2  }
0x1720   :  { %8409 = vperm.xlu1 %19086, %v8375_v35  }
0x1721   :  { %8404 = vperm.xlu0 %19085, %v8374_v16  }
0x1724   :  { %9584 = vperm.xlu1 %19086, %v9570_v17  }
0x1725   :  { %8414 = vperm.xlu0 %19085, %v8376_v41  }
0x1728   :  { %9635 = vperm.xlu1 %19086, %v9625_v23  }
0x1729   :  { %9579 = vperm.xlu0 %19085, %v9569_v8  }
0x172c   :  { %9589 = vperm.xlu1 %19086, %v9571_v28  }
0x172d   :  { %9640 = vperm.xlu0 %19085, %v9626_v60  }
0x1730   :  { %9645 = vperm.xlu1 %19086, %v9627_v49  }
0x1731   :  { %9594 = vperm.xlu0 %19085, %v9572_v52  }
0x177a   :  { %v7171_v5 = vpop.xlane.xlu1 %7170 }
0x177b   :  { %v7191_v3 = vmul.f32 0.125, %v7171_v5 }
0x177c   :  { %v7168_v31 = vpop.xlane.xlu0 %7167 }
0x177d   :  { %v7199_v18 = vadd.f32 1e-05, %v7191_v3  ;;  %v7190_v9 = vmul.f32 0.125, %v7168_v31 }
0x177f   :  { %19095 = vrsqrt.f32 %v7199_v18  ;;  %v7198_v30 = vadd.f32 1e-05, %v7190_v9 }
0x1780   :  { %v7177_v54 = vpop.xlane.xlu1 %7176  ;;  %v7174_v33 = vpop.xlane.xlu0 %7173 }
0x1781   :  { %19097 = vrsqrt.f32 %v7198_v30  ;;  %v7193_v24 = vmul.f32 0.125, %v7177_v54  ;;  %v7192_v13 = vmul.f32 0.125, %v7174_v33 }
0x1783   :  { %v7201_v45 = vadd.f32 1e-05, %v7193_v24  ;;  %v7200_v38 = vadd.f32 1e-05, %v7192_v13 }
0x1784   :  { %v7183_v53 = vpop.xlane.xlu1 %7182  ;;  %v7180_v32 = vpop.xlane.xlu0 %7179 }
0x1785   :  { %19099 = vrsqrt.f32 %v7201_v45  ;;  %v7195_v27 = vmul.f32 0.125, %v7183_v53  ;;  %v7194_v29 = vmul.f32 0.125, %v7180_v32  ;;  %v14464_v45 = vld [vmem:[%s23844_s9 + $0x40] sm:$0xff] }
0x1786   :  { %19101 = vrsqrt.f32 %v7200_v38  ;;  %v7480_v38 = vld [vmem:[%s23844_s9] sm:$0xff] }
0x1787   :  { %v7203_v50 = vadd.f32 1e-05, %v7195_v27  ;;  %v7202_v48 = vadd.f32 1e-05, %v7194_v29 }
0x1788   :  { %v7189_v57 = vpop.xlane.xlu1 %7188  ;;  %v7186_v55 = vpop.xlane.xlu0 %7185 }
0x1789   :  { %19103 = vrsqrt.f32 %v7203_v50  ;;  %v7197_v56 = vmul.f32 0.125, %v7189_v57  ;;  %v7196_v47 = vmul.f32 0.125, %v7186_v55 }
0x178a   :  { %19105 = vrsqrt.f32 %v7202_v48 }
0x178b   :  { %v7205_v10 = vadd.f32 1e-05, %v7197_v56  ;;  %v7204_v1 = vadd.f32 1e-05, %v7196_v47 }
0x178c   :  { %v19096_v0 = vpop.eup %19095 }
0x178d   :  { %v7215_v26 = vmul.f32 %v19096_v0, %v21709_v40  ;;  %19107 = vrsqrt.f32 %v7205_v10 }
0x178e   :  { %v19098_v39 = vpop.eup %19097  ;;  %19109 = vrsqrt.f32 %v7204_v1 }
0x178f   :  { %v7271_v7 = vmul.f32 %v21694_v19, %v7215_v26  ;;  %v7214_v61 = vmul.f32 %v19098_v39, %v21712_v20 }
0x1790   :  { %v7324_v9 = vpop.permute.xlu0 %7323 }
0x1791   :  { %v21826_v4 = vadd.f32 %v21700_v37, %v7271_v7  ;;  %v7270_v15 = vmul.f32 %v21696_v46, %v7214_v61  ;;  %v14465_v61 = vld [vmem:[%s23844_s9 + $0x48] sm:$0xff] }
0x1792   :  { %v19100_v2 = vpop.eup %19099 }
0x1793   :  { %v19102_v35 = vpop.eup %19101  ;;  %v7217_v16 = vmul.f32 %v19100_v2, %v21720_v44  ;;  %v21831_v17 = vadd.f32 %v21698_v43, %v7270_v15  ;;  %v7335_v40 = vmul.f32 0.2, %v21826_v4  ;;  %v7481_v15 = vld [vmem:[%s23844_s9 + $0x8] sm:$0xff]  ;;  %v14466_v2 = vld [vmem:[%s23844_s9 + $0x50] sm:$0xff] }
0x1794   :  { %v7216_v41 = vmul.f32 %v19102_v35, %v21723_v34  ;;  %v14488_v35 = vld [vmem:[%s23841_s10 + $0x10] sm:$0xff] }
0x1795   :  { %v7273_v19 = vmul.f32 %v21704_v21, %v7217_v16  ;;  %v7334_v20 = vmul.f32 0.2, %v21831_v17  ;;  %v21846_v60 = vmax.f32 %v21826_v4, %v7335_v40  ;;  %v7482_v16 = vld [vmem:[%s23844_s9 + $0x10] sm:$0xff]  ;;  %v14513_v40 = vld [vmem:[%s23841_s10 + $0x18] sm:$0xff] }
0x1796   :  { %v19104_v23 = vpop.eup %19103  ;;  %v7272_v37 = vmul.f32 %v21702_v11, %v7216_v41  ;;  %v14467_v41 = vld [vmem:[%s23844_s9 + $0x58] sm:$0xff] }
0x1797   :  { %v19106_v8 = vpop.eup %19105  ;;  %v7219_v46 = vmul.f32 %v19104_v23, %v21731_v25  ;;  %v21840_v28 = vmax.f32 %v21831_v17, %v7334_v20  ;;  %v21842_v44 = vadd.f32 %v7304_v22, %v7273_v19  ;;  %v7483_v19 = vld [vmem:[%s23844_s9 + $0x18] sm:$0xff]  ;;  %v14468_v20 = vld [vmem:[%s23844_s9 + $0x60] sm:$0xff] }
0x1798   :  { %v7218_v43 = vmul.f32 %v19106_v8, %v21733_v36  ;;  %v21849_v21 = vadd.f32 %v21706_v6, %v7272_v37  ;;  %v7484_v23 = vld [vmem:[%s23844_s9 + $0x20] sm:$0xff]  ;;  %v14469_v37 = vld [vmem:[%s23844_s9 + $0x68] sm:$0xff] }
0x1799   :  { %v7275_v34 = vmul.f32 %v7258_v42, %v7219_v46  ;;  %17726 = vmatprep.mubr.msk.f32.mxu1 %vm7117_vm2, %v21840_v28  ;;  %17740 = vmatprep.mubr.msk.f32.mxu0 %vm7117_vm2, %v21840_v28  ;;  %v7337_v11 = vmul.f32 0.2, %v21842_v44  ;;  %v7485_v8 = vld [vmem:[%s23844_s9 + $0x28] sm:$0xff]  ;;  %v14470_v46 = vld [vmem:[%s23844_s9 + $0x70] sm:$0xff] }
0x179a   :  { %v19108_v25 = vpop.eup %19107  ;;  %17727 = vmatmul.mubr.msk.f32.vlgmr.msra.gmra.mxu1 %vm7117_vm2, %v21846_v60  ;;  %17741 = vmatmul.mubr.msk.f32.vlgmr.msra.gmra.mxu0 %vm7117_vm2, %v21846_v60  ;;  %v7336_v36 = vmul.f32 0.2, %v21849_v21  ;;  %v7274_v6 = vmul.f32 %v21812_v63, %v7218_v43  ;;  %v7486_v43 = vld [vmem:[%s23844_s9 + $0x30] sm:$0xff] }
0x179b   :  { %v19110_v49 = vpop.eup %19109  ;;  %v7221_v52 = vmul.f32 %v19108_v25, %v21742_v58  ;;  %v21864_v22 = vmax.f32 %v21842_v44, %v7337_v11  ;;  %v21867_v42 = vadd.f32 %v21816_v62, %v7275_v34  ;;  %v7319_v62 = vpop.permute.xlu1 %7318  ;;  %v14471_v34 = vld [vmem:[%s23844_s9 + $0x78] sm:$0xff] }
0x179c   :  { %v7220_v5 = vmul.f32 %v19110_v49, %v21745_v14  ;;  %v21871_v3 = vmax.f32 %v21849_v21, %v7336_v36  ;;  %v21874_v31 = vadd.f32 %v21814_v51, %v7274_v6  ;;  %v7487_v11 = vld [vmem:[%s23844_s9 + $0x38] sm:$0xff] }
0x179d   :  { %v7277_v18 = vmul.f32 %v21820_v59, %v7221_v52  ;;  %v7339_v63 = vmul.f32 0.2, %v21867_v42 }
0x179e   :  { %v7276_v58 = vmul.f32 %v21818_v12, %v7220_v5  ;;  %17729 = vmatprep.mubr.msk.f32.mxu1 %vm7117_vm2, %v21871_v3  ;;  %17743 = vmatprep.mubr.msk.f32.mxu0 %vm7117_vm2, %v21871_v3  ;;  %v7338_v14 = vmul.f32 0.2, %v21874_v31 }
0x179f   :  { %v21884_v30 = vadd.f32 %v7324_v9, %v7277_v18  ;;  %17730 = vmatmul.mubr.msk.f32.gmra.mxu1 %vm7117_vm2, %v21864_v22  ;;  %17744 = vmatmul.mubr.msk.f32.gmra.mxu0 %vm7117_vm2, %v21864_v22  ;;  %v21891_v51 = vmax.f32 %v21867_v42, %v7339_v63 }
0x17a0   :  { %v21893_v12 = vadd.f32 %v7319_v62, %v7276_v58  ;;  %v21896_v59 = vmax.f32 %v21874_v31, %v7338_v14 }
0x17a1   :  { %v7341_v54 = vmul.f32 0.2, %v21884_v30 }
0x17a2   :  { %v7340_v33 = vmul.f32 0.2, %v21893_v12  ;;  %17732 = vmatprep.mubr.msk.f32.mxu1 %vm7117_vm2, %v21896_v59  ;;  %17746 = vmatprep.mubr.msk.f32.mxu0 %vm7117_vm2, %v21896_v59 }
0x17a3   :  { %v21905_v24 = vmax.f32 %v21884_v30, %v7341_v54  ;;  %17733 = vmatmul.mubr.msk.f32.gmra.mxu1 %vm7117_vm2, %v21891_v51  ;;  %17747 = vmatmul.mubr.msk.f32.gmra.mxu0 %vm7117_vm2, %v21891_v51 }
0x17a4   :  { %v21912_v13 = vmax.f32 %v21893_v12, %v7340_v33 }
0x17a6   :  { %17735 = vmatprep.mubr.msk.f32.mxu1 %vm7117_vm2, %v21912_v13  ;;  %17749 = vmatprep.mubr.msk.f32.mxu0 %vm7117_vm2, %v21912_v13 }
0x17a7   :  { %17736 = vmatmul.mubr.msk.f32.gmra.mxu1 %vm7117_vm2, %v21905_v24  ;;  %17750 = vmatmul.mubr.msk.f32.gmra.mxu0 %vm7117_vm2, %v21905_v24 }
0x17a8   :  { %17768 = vmatprep.mubr.msk.f32.mxu1 %vm7604_vm3, %v14464_v45  ;;  %17796 = vmatprep.mubr.msk.f32.mxu0 %vm7604_vm3, %v7480_v38  ;;  %v14498_v38 = vld [vmem:[%s23844_s9 + $0x88] sm:$0xff] }
0x185a   :  { %v17728_v53 = vpop.f32.mrf.mxu1  ;;  %v17742_v32 = vpop.f32.mrf.mxu0 }
0x185c   :  { %v7441_v27 = vpop.f32.mrf.mxu1  ;;  %v7556_v29 = vpop.f32.mrf.mxu0 }
0x185f   :  { %v17731_v50 = vpop.f32.mrf.mxu1  ;;  %v17745_v48 = vpop.f32.mrf.mxu0 }
0x1861   :  { %v7451_v57 = vpop.f32.mrf.mxu1  ;;  %v7566_v55 = vpop.f32.mrf.mxu0 }
0x1863   :  { %v17734_v56 = vpop.f32.mrf.mxu1  ;;  %v17748_v47 = vpop.f32.mrf.mxu0 }
0x1865   :  { %v7461_v10 = vpop.f32.mrf.mxu1  ;;  %v7576_v1 = vpop.f32.mrf.mxu0 }
0x1867   :  { %v17737_v0 = vpop.f32.mrf.mxu1  ;;  %v17751_v26 = vpop.f32.mrf.mxu0 }
0x1868   :  { %17752 = vmatprep.subr.mxu1 %v17751_v26  ;;  %17780 = vmatprep.subr.mxu0 %v17737_v0 }
0x1869   :  { %v7471_v39 = vpop.f32.mrf.mxu1  ;;  %v7586_v7 = vpop.f32.mrf.mxu0  ;;  %17753 = vmatpush3.msra.mxu1 %v17751_v26  ;;  %17781 = vmatpush3.msra.mxu0 %v17737_v0  ;;  %v14526_v0 = vld [vmem:[%s23844_s9 + $0xe0] sm:$0xff]  ;;  %v14527_v26 = vld [vmem:[%s23844_s9 + $0xe8] sm:$0xff] }
0x186a   :  { %17754 = vmatprep.subr.mxu1 %v7586_v7  ;;  %17782 = vmatprep.subr.mxu0 %v7471_v39 }
0x186b   :  { %17755 = vmatpush3.msra.mxu1 %v7586_v7  ;;  %17783 = vmatpush3.msra.mxu0 %v7471_v39  ;;  %v14528_v39 = vld [vmem:[%s23844_s9 + $0xf0] sm:$0xff]  ;;  %v14529_v7 = vld [vmem:[%s23844_s9 + $0xf8] sm:$0xff] }
0x186c   :  { %17756 = vmatprep.subr.mxu1 %v17748_v47  ;;  %17784 = vmatprep.subr.mxu0 %v17734_v56 }
0x186d   :  { %17757 = vmatpush3.msra.mxu1 %v17748_v47  ;;  %17785 = vmatpush3.msra.mxu0 %v17734_v56  ;;  %v14522_v56 = vld [vmem:[%s23844_s9 + $0xc0] sm:$0xff]  ;;  %v14523_v47 = vld [vmem:[%s23844_s9 + $0xc8] sm:$0xff] }
0x186e   :  { %17758 = vmatprep.subr.mxu1 %v7576_v1  ;;  %17786 = vmatprep.subr.mxu0 %v7461_v10 }
0x186f   :  { %17759 = vmatpush3.msra.mxu1 %v7576_v1  ;;  %17787 = vmatpush3.msra.mxu0 %v7461_v10  ;;  %v14524_v10 = vld [vmem:[%s23844_s9 + $0xd0] sm:$0xff]  ;;  %v14525_v1 = vld [vmem:[%s23844_s9 + $0xd8] sm:$0xff] }
0x1870   :  { %17760 = vmatprep.subr.mxu1 %v17745_v48  ;;  %17788 = vmatprep.subr.mxu0 %v17731_v50 }
0x1871   :  { %17761 = vmatpush3.msra.mxu1 %v17745_v48  ;;  %17789 = vmatpush3.msra.mxu0 %v17731_v50  ;;  %v14501_v50 = vld [vmem:[%s23844_s9 + $0xa0] sm:$0xff]  ;;  %v14502_v48 = vld [vmem:[%s23844_s9 + $0xa8] sm:$0xff] }
0x1872   :  { %17762 = vmatprep.subr.mxu1 %v7566_v55  ;;  %17790 = vmatprep.subr.mxu0 %v7451_v57 }
0x1873   :  { %17763 = vmatpush3.msra.mxu1 %v7566_v55  ;;  %17791 = vmatpush3.msra.mxu0 %v7451_v57  ;;  %v14503_v57 = vld [vmem:[%s23844_s9 + $0xb0] sm:$0xff]  ;;  %v14504_v55 = vld [vmem:[%s23844_s9 + $0xb8] sm:$0xff] }
0x1874   :  { %17764 = vmatprep.subr.mxu1 %v17742_v32  ;;  %17792 = vmatprep.subr.mxu0 %v17728_v53 }
0x1875   :  { %17765 = vmatpush3.msra.mxu1 %v17742_v32  ;;  %17793 = vmatpush3.msra.mxu0 %v17728_v53  ;;  %v14499_v53 = vld [vmem:[%s23844_s9 + $0x90] sm:$0xff] }
0x1876   :  { %17766 = vmatprep.subr.mxu1 %v7556_v29  ;;  %17794 = vmatprep.subr.mxu0 %v7441_v27 }
0x1877   :  { %17767 = vmatpush3.msra.mxu1 %v7556_v29  ;;  %17795 = vmatpush3.msra.mxu0 %v7441_v27  ;;  %v14500_v29 = vld [vmem:[%s23844_s9 + $0x98] sm:$0xff] }
0x1878   :  { %17769 = vmatmul.mubr.msk.f32.vlgmr.msra.gmra.mxu1 %vm7604_vm3, %v14465_v61  ;;  %17797 = vmatmul.mubr.msk.f32.vlgmr.msra.gmra.mxu0 %vm7604_vm3, %v7481_v15  ;;  %v14547_v61 = vld [vmem:[%s23845_s13 + $0x2] sm:$0x3]  ;;  %v8433_v15 = vld [vmem:[%s23845_s13] sm:$0x3] }
0x1879   :  { %17771 = vmatprep.mubr.msk.f32.mxu1 %vm7604_vm3, %v14466_v2  ;;  %17808 = vmatprep.subr.mxu1 %v14488_v35 }
0x187a   :  { %17799 = vmatprep.mubr.msk.f32.mxu0 %vm7604_vm3, %v7482_v16  ;;  %17809 = vmatpush3.msra.mxu1 %v14488_v35 }
0x187b   :  { %17850 = vmatprep.subr.mxu1 %v14513_v40 }
0x187c   :  { %17772 = vmatmul.mubr.msk.f32.gmra.mxu1 %vm7604_vm3, %v14467_v41  ;;  %17800 = vmatmul.mubr.msk.f32.gmra.mxu0 %vm7604_vm3, %v7483_v19 }
0x187d   :  { %17774 = vmatprep.mubr.msk.f32.mxu1 %vm7604_vm3, %v14468_v20  ;;  %17802 = vmatprep.mubr.msk.f32.mxu0 %vm7604_vm3, %v7484_v23 }
0x1880   :  { %17775 = vmatmul.mubr.msk.f32.gmra.mxu1 %vm7604_vm3, %v14469_v37  ;;  %17803 = vmatmul.mubr.msk.f32.gmra.mxu0 %vm7604_vm3, %v7485_v8 }
0x1881   :  { %17777 = vmatprep.mubr.msk.f32.mxu1 %vm7604_vm3, %v14470_v46  ;;  %17805 = vmatprep.mubr.msk.f32.mxu0 %vm7604_vm3, %v7486_v43 }
0x1884   :  { %17778 = vmatmul.mubr.msk.f32.gmra.mxu1 %vm7604_vm3, %v14471_v34  ;;  %17806 = vmatmul.mubr.msk.f32.gmra.mxu0 %vm7604_vm3, %v7487_v11 }
0x1885   :  { %17810 = vmatprep.mubr.msk.f32.mxu1 %vm7117_vm2, %v21840_v28 }
0x1888   :  { %17811 = vmatmul.mubr.msk.f32.vlgmr.msra.gmra.mxu1 %vm7117_vm2, %v21846_v60 }
0x1889   :  { %17813 = vmatprep.mubr.msk.f32.mxu1 %vm7117_vm2, %v21871_v3  ;;  %17851 = vmatpush3.msra.mxu1 %v14513_v40 }
0x188a   :  { %17892 = vmatprep.subr.msk.mxu1 %vm8459_vm4, %v8433_v15 }
0x188c   :  { %17814 = vmatmul.mubr.msk.f32.gmra.mxu1 %vm7117_vm2, %v21864_v22 }
0x188d   :  { %17816 = vmatprep.mubr.msk.f32.mxu1 %vm7117_vm2, %v21896_v59 }
0x1890   :  { %17817 = vmatmul.mubr.msk.f32.gmra.mxu1 %vm7117_vm2, %v21891_v51 }
0x1891   :  { %17819 = vmatprep.mubr.msk.f32.mxu1 %vm7117_vm2, %v21912_v13 }
0x1894   :  { %17820 = vmatmul.mubr.msk.f32.gmra.mxu1 %vm7117_vm2, %v21905_v24 }
0x1895   :  { %17852 = vmatprep.mubr.msk.f32.mxu1 %vm7117_vm2, %v21840_v28  ;;  %v14497_v28 = vld [vmem:[%s23844_s9 + $0x80] sm:$0xff] }
0x1896   :  { %17838 = vmatprep.mubr.msk.f32.mxu0 %vm7604_vm3, %v14497_v28 }
0x1898   :  { %17853 = vmatmul.mubr.msk.f32.vlgmr.msra.gmra.mxu1 %vm7117_vm2, %v21846_v60 }
0x1899   :  { %17855 = vmatprep.mubr.msk.f32.mxu1 %vm7117_vm2, %v21871_v3  ;;  %17893 = vmatpush3.msk.msra.mxu1 %vm8459_vm4, %v8433_v15 }
0x189c   :  { %17856 = vmatmul.mubr.msk.f32.gmra.mxu1 %vm7117_vm2, %v21864_v22 }
0x189d   :  { %17858 = vmatprep.mubr.msk.f32.mxu1 %vm7117_vm2, %v21896_v59 }
0x18a0   :  { %17859 = vmatmul.mubr.msk.f32.gmra.mxu1 %vm7117_vm2, %v21891_v51 }
0x18a1   :  { %17861 = vmatprep.mubr.msk.f32.mxu1 %vm7117_vm2, %v21912_v13 }
0x18a4   :  { %17862 = vmatmul.mubr.msk.f32.gmra.mxu1 %vm7117_vm2, %v21905_v24 }
0x1938   :  { %v22028_v60 = vpop.f32.mrf.mxu1  ;;  %v17798_v2 = vpop.f32.mrf.mxu0 }
0x193a   :  { %v22030_v25 = vpop.f32.mrf.mxu1  ;;  %v7824_v35 = vpop.f32.mrf.mxu0 }
0x193c   :  { %v22032_v36 = vpop.f32.mrf.mxu1  ;;  %v17801_v16 = vpop.f32.mrf.mxu0 }
0x193e   :  { %v22034_v6 = vpop.f32.mrf.mxu1  ;;  %v7834_v40 = vpop.f32.mrf.mxu0 }
0x1940   :  { %v22036_v49 = vpop.f32.mrf.mxu1  ;;  %v17804_v41 = vpop.f32.mrf.mxu0 }
0x1942   :  { %v22038_v52 = vpop.f32.mrf.mxu1  ;;  %v7844_v19 = vpop.f32.mrf.mxu0 }
0x1944   :  { %v22040_v22 = vpop.f32.mrf.mxu1  ;;  %v17807_v20 = vpop.f32.mrf.mxu0 }
0x1946   :  { %v22042_v5 = vpop.f32.mrf.mxu1  ;;  %v7854_v23 = vpop.f32.mrf.mxu0 }
0x1948   :  { %v17812_v3 = vpop.f32.mrf.mxu1 }
0x194a   :  { %v7931_v18 = vpop.f32.mrf.mxu1 }
0x194c   :  { %v17815_v63 = vpop.f32.mrf.mxu1 }
0x194e   :  { %v7941_v58 = vpop.f32.mrf.mxu1 }
0x1950   :  { %v17818_v9 = vpop.f32.mrf.mxu1 }
0x1952   :  { %v7951_v14 = vpop.f32.mrf.mxu1 }
0x1954   :  { %v17821_v62 = vpop.f32.mrf.mxu1 }
0x1955   :  { %17822 = vmatprep.subr.mxu0 %v17821_v62 }
0x1956   :  { %v7961_v51 = vpop.f32.mrf.mxu1  ;;  %17823 = vmatpush3.msra.mxu0 %v17821_v62 }
0x1957   :  { %17824 = vmatprep.subr.mxu0 %v7961_v51 }
0x1958   :  { %17825 = vmatpush3.msra.mxu0 %v7961_v51  ;;  %v17854_v59 = vpop.f32.mrf.mxu1  ;;  %v7840_v51 = vadd.f32 %v17801_v16, %v22032_v36  ;;  %v7845_v36 = vadd.f32 %v7844_v19, %v22038_v52 }
0x1959   :  { %17826 = vmatprep.subr.mxu0 %v17818_v9 }
0x195a   :  { %17827 = vmatpush3.msra.mxu0 %v17818_v9  ;;  %v8184_v54 = vpop.f32.mrf.mxu1  ;;  %v7825_v9 = vadd.f32 %v7824_v35, %v22030_v25 }
0x195b   :  { %17828 = vmatprep.subr.mxu0 %v7951_v14 }
0x195c   :  { %17829 = vmatpush3.msra.mxu0 %v7951_v14  ;;  %v17857_v33 = vpop.f32.mrf.mxu1 }
0x195d   :  { %17830 = vmatprep.subr.mxu0 %v17815_v63 }
0x195e   :  { %17831 = vmatpush3.msra.mxu0 %v17815_v63  ;;  %v8194_v24 = vpop.f32.mrf.mxu1  ;;  %v8380_v63 = vpop.permute.xlu1 %8379 }
0x195f   :  { %17832 = vmatprep.subr.mxu0 %v7941_v58 }
0x1960   :  { %17833 = vmatpush3.msra.mxu0 %v7941_v58  ;;  %v17860_v13 = vpop.f32.mrf.mxu1 }
0x1961   :  { %17834 = vmatprep.subr.mxu0 %v17812_v3 }
0x1962   :  { %17835 = vmatpush3.msra.mxu0 %v17812_v3  ;;  %v8204_v45 = vpop.f32.mrf.mxu1  ;;  %v8385_v3 = vpop.permute.xlu0 %8384 }
0x1963   :  { %17836 = vmatprep.subr.mxu0 %v7931_v18 }
0x1964   :  { %17837 = vmatpush3.msra.mxu0 %v7931_v18  ;;  %v17863_v32 = vpop.f32.mrf.mxu1  ;;  %v7830_v18 = vadd.f32 %v17798_v2, %v22028_v60  ;;  %v7850_v60 = vadd.f32 %v17804_v41, %v22036_v49 }
0x1965   :  { %17839 = vmatmul.mubr.msk.f32.vlgmr.msra.gmra.mxu0 %vm7604_vm3, %v14498_v38  ;;  %17864 = vmatprep.subr.mxu0 %v17863_v32 }
0x1966   :  { %v8214_v27 = vpop.f32.mrf.mxu1  ;;  %17865 = vmatpush3.msra.mxu0 %v17863_v32  ;;  %17841 = vmatprep.mubr.msk.f32.mxu0 %vm7604_vm3, %v14499_v53  ;;  %v8390_v53 = vpop.permute.xlu1 %8389 }
0x1967   :  { %17866 = vmatprep.subr.mxu0 %v8214_v27 }
0x1968   :  { %17867 = vmatpush3.msra.mxu0 %v8214_v27 }
0x1969   :  { %17842 = vmatmul.mubr.msk.f32.gmra.mxu0 %vm7604_vm3, %v14500_v29  ;;  %17868 = vmatprep.subr.mxu0 %v17860_v13 }
0x196a   :  { %17869 = vmatpush3.msra.mxu0 %v17860_v13  ;;  %17844 = vmatprep.mubr.msk.f32.mxu0 %vm7604_vm3, %v14501_v50  ;;  %v7835_v13 = vadd.f32 %v7834_v40, %v22034_v6  ;;  %v7860_v6 = vadd.f32 %v17807_v20, %v22040_v22  ;;  %v8400_v52 = vpop.permute.xlu1 %8399  ;;  %v7855_v22 = vadd.f32 %v7854_v23, %v22042_v5 }
0x196b   :  { %17870 = vmatprep.subr.mxu0 %v8204_v45 }
0x196c   :  { %17871 = vmatpush3.msra.mxu0 %v8204_v45 }
0x196d   :  { %17845 = vmatmul.mubr.msk.f32.gmra.mxu0 %vm7604_vm3, %v14502_v48  ;;  %17872 = vmatprep.subr.mxu0 %v17857_v33 }
0x196e   :  { %17873 = vmatpush3.msra.mxu0 %v17857_v33  ;;  %17847 = vmatprep.mubr.msk.f32.mxu0 %vm7604_vm3, %v14503_v57 }
0x196f   :  { %17874 = vmatprep.subr.mxu0 %v8194_v24 }
0x1970   :  { %17875 = vmatpush3.msra.mxu0 %v8194_v24  ;;  %v8395_v24 = vpop.permute.xlu0 %8394 }
0x1971   :  { %17848 = vmatmul.mubr.msk.f32.gmra.mxu0 %vm7604_vm3, %v14504_v55  ;;  %17876 = vmatprep.subr.mxu0 %v17854_v59 }
0x1972   :  { %17877 = vmatpush3.msra.mxu0 %v17854_v59  ;;  %17880 = vmatprep.mubr.msk.f32.mxu0 %vm7604_vm3, %v14522_v56 }
0x1973   :  { %17878 = vmatprep.subr.mxu0 %v8184_v54 }
0x1974   :  { %17879 = vmatpush3.msra.mxu0 %v8184_v54 }
0x1975   :  { %17881 = vmatmul.mubr.msk.f32.vlgmr.msra.gmra.mxu0 %vm7604_vm3, %v14523_v47  ;;  %17906 = vmatprep.subr.msk.mxu0 %vm8459_vm4, %v14547_v61 }
0x1976   :  { %17883 = vmatprep.mubr.msk.f32.mxu0 %vm7604_vm3, %v14524_v10  ;;  %17907 = vmatpush3.msk.msra.mxu0 %vm8459_vm4, %v14547_v61 }
0x1979   :  { %17884 = vmatmul.mubr.msk.f32.gmra.mxu0 %vm7604_vm3, %v14525_v1 }
0x197a   :  { %17886 = vmatprep.mubr.msk.f32.mxu0 %vm7604_vm3, %v14526_v0  ;;  %v8405_v0 = vpop.permute.xlu0 %8404 }
0x197d   :  { %17887 = vmatmul.mubr.msk.f32.gmra.mxu0 %vm7604_vm3, %v14527_v26 }
0x197e   :  { %17889 = vmatprep.mubr.msk.f32.mxu0 %vm7604_vm3, %v14528_v39  ;;  %v8415_v5 = vpop.permute.xlu0 %8414 }
0x1981   :  { %17890 = vmatmul.mubr.msk.f32.gmra.mxu0 %vm7604_vm3, %v14529_v7 }
0x1a25   :  { %v17840_v37 = vpop.f32.mrf.mxu0 }
0x1a26   :  { %v8109_v14 = vadd.f32 %v17840_v37, %v7830_v18  ;;  %v14557_v18 = vld [vmem:[%s23846_s12 + $0x40] sm:$0xff] }
0x1a27   :  { %v8069_v8 = vpop.f32.mrf.mxu0 }
0x1a28   :  { %v8108_v59 = vadd.f32 %v8069_v8, %v7825_v9 }
0x1a29   :  { %v17843_v46 = vpop.f32.mrf.mxu0 }
0x1a2a   :  { %v8111_v45 = vadd.f32 %v17843_v46, %v7840_v51  ;;  %v8410_v46 = vpop.permute.xlu1 %8409 }
0x1a2b   :  { %v8079_v43 = vpop.f32.mrf.mxu0 }
0x1a2c   :  { %v8110_v29 = vadd.f32 %v8079_v43, %v7835_v13 }
0x1a2d   :  { %v17846_v34 = vpop.f32.mrf.mxu0 }
0x1a2e   :  { %v8113_v57 = vadd.f32 %v17846_v34, %v7850_v60 }
0x1a2f   :  { %v8089_v11 = vpop.f32.mrf.mxu0 }
0x1a30   :  { %v8112_v26 = vadd.f32 %v8089_v11, %v7845_v36  ;;  %v8570_v36 = vld [vmem:[%s23846_s12 + $0x10] sm:$0xff] }
0x1a31   :  { %v17849_v28 = vpop.f32.mrf.mxu0 }
0x1a32   :  { %v8115_v61 = vadd.f32 %v17849_v28, %v7860_v6  ;;  %v8571_v6 = vld [vmem:[%s23846_s12 + $0x18] sm:$0xff] }
0x1a33   :  { %v8099_v58 = vpop.f32.mrf.mxu0 }
0x1a34   :  { %v8114_v41 = vadd.f32 %v8099_v58, %v7855_v22 }
0x1a35   :  { %v17882_v62 = vpop.f32.mrf.mxu0 }
0x1a36   :  { %v8362_v54 = vadd.f32 %v17882_v62, %v8109_v14 }
0x1a37   :  { %v8322_v33 = vpop.f32.mrf.mxu0 }
0x1a38   :  { %v8361_v38 = vadd.f32 %v8322_v33, %v8108_v59  ;;  %v8418_v32 = vadd.f32 %v8385_v3, %v8362_v54 }
0x1a39   :  { %v17885_v27 = vpop.f32.mrf.mxu0 }
0x1a3a   :  { %v8417_v50 = vadd.f32 %v8380_v63, %v8361_v38  ;;  %v8364_v25 = vadd.f32 %v17885_v27, %v8111_v45  ;;  %v22123_v47 = vmax.f32 %v8418_v32, 0.0  ;;  %v8568_v63 = vld [vmem:[%s23846_s12] sm:$0xff] }
0x1a3b   :  { %v8332_v48 = vpop.f32.mrf.mxu0 }
0x1a3c   :  { %v22120_v55 = vmax.f32 %v8417_v50, 0.0  ;;  %v8363_v56 = vadd.f32 %v8332_v48, %v8110_v29  ;;  %v8420_v10 = vadd.f32 %v8395_v24, %v8364_v25  ;;  %v14558_v29 = vld [vmem:[%s23846_s12 + $0x48] sm:$0xff]  ;;  %v14559_v25 = vld [vmem:[%s23846_s12 + $0x50] sm:$0xff]  ;;  %v14581_v48 = vld [vmem:[%s23845_s13 + $0x4] sm:$0x3] }
0x1a3d   :  { %v17888_v1 = vpop.f32.mrf.mxu0  ;;  %v8569_v50 = vld [vmem:[%s23846_s12 + $0x8] sm:$0xff] }
0x1a3e   :  { %v8419_v49 = vadd.f32 %v8390_v53, %v8363_v56  ;;  %v8366_v39 = vadd.f32 %v17888_v1, %v8113_v57  ;;  %17894 = vmatprep.mubr.msk.f32.mxu1 %vm8434_vm5, %v22120_v55  ;;  %17908 = vmatprep.mubr.msk.f32.mxu0 %vm8434_vm5, %v22120_v55  ;;  %v22136_v35 = vmax.f32 %v8420_v10, 0.0  ;;  %v14607_v57 = vld [vmem:[%s23845_s13 + $0x6] sm:$0x3]  ;;  %v14560_v56 = vld [vmem:[%s23846_s12 + $0x58] sm:$0xff] }
0x1a3f   :  { %v8342_v7 = vpop.f32.mrf.mxu0  ;;  %17895 = vmatmul.mubr.msk.f32.vlgmr.msra.gmra.mxu1 %vm8434_vm5, %v22123_v47  ;;  %17909 = vmatmul.mubr.msk.f32.vlgmr.msra.gmra.mxu0 %vm8434_vm5, %v22123_v47  ;;  %v14561_v10 = vld [vmem:[%s23846_s12 + $0x60] sm:$0xff] }
0x1a40   :  { %v22134_v15 = vmax.f32 %v8419_v49, 0.0  ;;  %v8365_v2 = vadd.f32 %v8342_v7, %v8112_v26  ;;  %v8422_v16 = vadd.f32 %v8405_v0, %v8366_v39  ;;  %v8572_v1 = vld [vmem:[%s23846_s12 + $0x20] sm:$0xff]  ;;  %v14562_v0 = vld [vmem:[%s23846_s12 + $0x68] sm:$0xff]  ;;  %v14563_v49 = vld [vmem:[%s23846_s12 + $0x70] sm:$0xff] }
0x1a41   :  { %v17891_v40 = vpop.f32.mrf.mxu0  ;;  %v8573_v26 = vld [vmem:[%s23846_s12 + $0x28] sm:$0xff]  ;;  %v8574_v39 = vld [vmem:[%s23846_s12 + $0x30] sm:$0xff]  ;;  %v8575_v7 = vld [vmem:[%s23846_s12 + $0x38] sm:$0xff] }
0x1a42   :  { %v8421_v19 = vadd.f32 %v8400_v52, %v8365_v2  ;;  %v8368_v20 = vadd.f32 %v17891_v40, %v8115_v61  ;;  %17897 = vmatprep.mubr.msk.f32.mxu1 %vm8434_vm5, %v22134_v15  ;;  %17911 = vmatprep.mubr.msk.f32.mxu0 %vm8434_vm5, %v22134_v15  ;;  %v22148_v43 = vmax.f32 %v8422_v16, 0.0  ;;  %v14564_v52 = vld [vmem:[%s23846_s12 + $0x78] sm:$0xff] }
0x1a43   :  { %v8352_v37 = vpop.f32.mrf.mxu0  ;;  %17898 = vmatmul.mubr.msk.f32.gmra.mxu1 %vm8434_vm5, %v22136_v35  ;;  %17912 = vmatmul.mubr.msk.f32.gmra.mxu0 %vm8434_vm5, %v22136_v35 }
0x1a44   :  { %v22146_v23 = vmax.f32 %v8421_v19, 0.0  ;;  %v8367_v8 = vadd.f32 %v8352_v37, %v8114_v41  ;;  %v8424_v34 = vadd.f32 %v8415_v5, %v8368_v20 }
0x1a46   :  { %v8423_v11 = vadd.f32 %v8410_v46, %v8367_v8  ;;  %17900 = vmatprep.mubr.msk.f32.mxu1 %vm8434_vm5, %v22146_v23  ;;  %17914 = vmatprep.mubr.msk.f32.mxu0 %vm8434_vm5, %v22146_v23  ;;  %v22160_v3 = vmax.f32 %v8424_v34, 0.0 }
0x1a47   :  { %17901 = vmatmul.mubr.msk.f32.gmra.mxu1 %vm8434_vm5, %v22148_v43  ;;  %17915 = vmatmul.mubr.msk.f32.gmra.mxu0 %vm8434_vm5, %v22148_v43 }
0x1a48   :  { %v22158_v28 = vmax.f32 %v8423_v11, 0.0 }
0x1a4a   :  { %17903 = vmatprep.mubr.msk.f32.mxu1 %vm8434_vm5, %v22158_v28  ;;  %17917 = vmatprep.mubr.msk.f32.mxu0 %vm8434_vm5, %v22158_v28 }
0x1a4b   :  { %17904 = vmatmul.mubr.msk.f32.gmra.mxu1 %vm8434_vm5, %v22160_v3  ;;  %17918 = vmatmul.mubr.msk.f32.gmra.mxu0 %vm8434_vm5, %v22160_v3 }
0x1a4c   :  { %17936 = vmatprep.mubr.msk.f32.mxu1 %vm7604_vm3, %v14557_v18  ;;  %17964 = vmatprep.mubr.msk.f32.mxu0 %vm7604_vm3, %v8568_v63  ;;  %v14592_v63 = vld [vmem:[%s23846_s12 + $0x88] sm:$0xff] }
0x1aff   :  { %v17896_v58 = vpop.f32.mrf.mxu1  ;;  %v17910_v9 = vpop.f32.mrf.mxu0 }
0x1b01   :  { %v8529_v14 = vpop.f32.mrf.mxu1  ;;  %v8647_v62 = vpop.f32.mrf.mxu0 }
0x1b03   :  { %v17899_v51 = vpop.f32.mrf.mxu1  ;;  %v17913_v59 = vpop.f32.mrf.mxu0 }
0x1b05   :  { %v8539_v54 = vpop.f32.mrf.mxu1  ;;  %v8657_v33 = vpop.f32.mrf.mxu0 }
0x1b07   :  { %v17902_v24 = vpop.f32.mrf.mxu1  ;;  %v17916_v13 = vpop.f32.mrf.mxu0 }
0x1b09   :  { %v8549_v45 = vpop.f32.mrf.mxu1  ;;  %v8667_v38 = vpop.f32.mrf.mxu0 }
0x1b0b   :  { %v17905_v53 = vpop.f32.mrf.mxu1  ;;  %v17919_v32 = vpop.f32.mrf.mxu0 }
0x1b0c   :  { %17920 = vmatprep.subr.mxu1 %v17919_v32  ;;  %17948 = vmatprep.subr.mxu0 %v17905_v53 }
0x1b0d   :  { %v8559_v27 = vpop.f32.mrf.mxu1  ;;  %v8677_v60 = vpop.f32.mrf.mxu0  ;;  %17921 = vmatpush3.msra.mxu1 %v17919_v32  ;;  %17949 = vmatpush3.msra.mxu0 %v17905_v53  ;;  %v14621_v53 = vld [vmem:[%s23846_s12 + $0xe0] sm:$0xff]  ;;  %v14622_v32 = vld [vmem:[%s23846_s12 + $0xe8] sm:$0xff] }
0x1b0e   :  { %17922 = vmatprep.subr.mxu1 %v8677_v60  ;;  %17950 = vmatprep.subr.mxu0 %v8559_v27 }
0x1b0f   :  { %17923 = vmatpush3.msra.mxu1 %v8677_v60  ;;  %17951 = vmatpush3.msra.mxu0 %v8559_v27  ;;  %v14623_v27 = vld [vmem:[%s23846_s12 + $0xf0] sm:$0xff]  ;;  %v14624_v60 = vld [vmem:[%s23846_s12 + $0xf8] sm:$0xff] }
0x1b10   :  { %17924 = vmatprep.subr.mxu1 %v17916_v13  ;;  %17952 = vmatprep.subr.mxu0 %v17902_v24 }
0x1b11   :  { %17925 = vmatpush3.msra.mxu1 %v17916_v13  ;;  %17953 = vmatpush3.msra.mxu0 %v17902_v24  ;;  %v14617_v24 = vld [vmem:[%s23846_s12 + $0xc0] sm:$0xff]  ;;  %v14618_v13 = vld [vmem:[%s23846_s12 + $0xc8] sm:$0xff] }
0x1b12   :  { %17926 = vmatprep.subr.mxu1 %v8667_v38  ;;  %17954 = vmatprep.subr.mxu0 %v8549_v45 }
0x1b13   :  { %17927 = vmatpush3.msra.mxu1 %v8667_v38  ;;  %17955 = vmatpush3.msra.mxu0 %v8549_v45  ;;  %v14619_v45 = vld [vmem:[%s23846_s12 + $0xd0] sm:$0xff]  ;;  %v14620_v38 = vld [vmem:[%s23846_s12 + $0xd8] sm:$0xff] }
0x1b14   :  { %17928 = vmatprep.subr.mxu1 %v17913_v59  ;;  %17956 = vmatprep.subr.mxu0 %v17899_v51 }
0x1b15   :  { %17929 = vmatpush3.msra.mxu1 %v17913_v59  ;;  %17957 = vmatpush3.msra.mxu0 %v17899_v51  ;;  %v14595_v51 = vld [vmem:[%s23846_s12 + $0xa0] sm:$0xff]  ;;  %v14596_v59 = vld [vmem:[%s23846_s12 + $0xa8] sm:$0xff] }
0x1b16   :  { %17930 = vmatprep.subr.mxu1 %v8657_v33  ;;  %17958 = vmatprep.subr.mxu0 %v8539_v54 }
0x1b17   :  { %17931 = vmatpush3.msra.mxu1 %v8657_v33  ;;  %17959 = vmatpush3.msra.mxu0 %v8539_v54  ;;  %v14597_v54 = vld [vmem:[%s23846_s12 + $0xb0] sm:$0xff]  ;;  %v14598_v33 = vld [vmem:[%s23846_s12 + $0xb8] sm:$0xff] }
0x1b18   :  { %17932 = vmatprep.subr.mxu1 %v17910_v9  ;;  %17960 = vmatprep.subr.mxu0 %v17896_v58 }
0x1b19   :  { %17933 = vmatpush3.msra.mxu1 %v17910_v9  ;;  %17961 = vmatpush3.msra.mxu0 %v17896_v58  ;;  %v14593_v58 = vld [vmem:[%s23846_s12 + $0x90] sm:$0xff] }
0x1b1a   :  { %17934 = vmatprep.subr.mxu1 %v8647_v62  ;;  %17962 = vmatprep.subr.mxu0 %v8529_v14 }
0x1b1b   :  { %17935 = vmatpush3.msra.mxu1 %v8647_v62  ;;  %17963 = vmatpush3.msra.mxu0 %v8529_v14  ;;  %v14594_v62 = vld [vmem:[%s23846_s12 + $0x98] sm:$0xff] }
0x1b1c   :  { %17937 = vmatmul.mubr.msk.f32.vlgmr.msra.gmra.mxu1 %vm7604_vm3, %v14558_v29  ;;  %17965 = vmatmul.mubr.msk.f32.vlgmr.msra.gmra.mxu0 %vm7604_vm3, %v8569_v50 }
0x1b1d   :  { %17939 = vmatprep.mubr.msk.f32.mxu1 %vm7604_vm3, %v14559_v25  ;;  %17976 = vmatprep.subr.msk.mxu1 %vm8459_vm4, %v14581_v48 }
0x1b1e   :  { %17967 = vmatprep.mubr.msk.f32.mxu0 %vm7604_vm3, %v8570_v36  ;;  %17977 = vmatpush3.msk.msra.mxu1 %vm8459_vm4, %v14581_v48 }
0x1b1f   :  { %18018 = vmatprep.subr.msk.mxu1 %vm8459_vm4, %v14607_v57 }
0x1b20   :  { %17940 = vmatmul.mubr.msk.f32.gmra.mxu1 %vm7604_vm3, %v14560_v56  ;;  %17968 = vmatmul.mubr.msk.f32.gmra.mxu0 %vm7604_vm3, %v8571_v6 }
0x1b21   :  { %17942 = vmatprep.mubr.msk.f32.mxu1 %vm7604_vm3, %v14561_v10  ;;  %17970 = vmatprep.mubr.msk.f32.mxu0 %vm7604_vm3, %v8572_v1 }
0x1b24   :  { %17943 = vmatmul.mubr.msk.f32.gmra.mxu1 %vm7604_vm3, %v14562_v0  ;;  %17971 = vmatmul.mubr.msk.f32.gmra.mxu0 %vm7604_vm3, %v8573_v26 }
0x1b25   :  { %17945 = vmatprep.mubr.msk.f32.mxu1 %vm7604_vm3, %v14563_v49  ;;  %17973 = vmatprep.mubr.msk.f32.mxu0 %vm7604_vm3, %v8574_v39 }
0x1b28   :  { %17946 = vmatmul.mubr.msk.f32.gmra.mxu1 %vm7604_vm3, %v14564_v52  ;;  %17974 = vmatmul.mubr.msk.f32.gmra.mxu0 %vm7604_vm3, %v8575_v7 }
0x1b29   :  { %17978 = vmatprep.mubr.msk.f32.mxu1 %vm8434_vm5, %v22120_v55 }
0x1b2c   :  { %17979 = vmatmul.mubr.msk.f32.vlgmr.msra.gmra.mxu1 %vm8434_vm5, %v22123_v47 }
0x1b2d   :  { %17981 = vmatprep.mubr.msk.f32.mxu1 %vm8434_vm5, %v22134_v15  ;;  %18019 = vmatpush3.msk.msra.mxu1 %vm8459_vm4, %v14607_v57 }
0x1b30   :  { %17982 = vmatmul.mubr.msk.f32.gmra.mxu1 %vm8434_vm5, %v22136_v35 }
0x1b31   :  { %17984 = vmatprep.mubr.msk.f32.mxu1 %vm8434_vm5, %v22146_v23 }
0x1b34   :  { %17985 = vmatmul.mubr.msk.f32.gmra.mxu1 %vm8434_vm5, %v22148_v43 }
0x1b35   :  { %17987 = vmatprep.mubr.msk.f32.mxu1 %vm8434_vm5, %v22158_v28 }
0x1b38   :  { %17988 = vmatmul.mubr.msk.f32.gmra.mxu1 %vm8434_vm5, %v22160_v3 }
0x1b39   :  { %18020 = vmatprep.mubr.msk.f32.mxu1 %vm8434_vm5, %v22120_v55  ;;  %v14591_v55 = vld [vmem:[%s23846_s12 + $0x80] sm:$0xff] }
0x1b3a   :  { %18006 = vmatprep.mubr.msk.f32.mxu0 %vm7604_vm3, %v14591_v55 }
0x1b3c   :  { %18021 = vmatmul.mubr.msk.f32.vlgmr.msra.gmra.mxu1 %vm8434_vm5, %v22123_v47 }
0x1b3d   :  { %18023 = vmatprep.mubr.msk.f32.mxu1 %vm8434_vm5, %v22134_v15 }
0x1b40   :  { %18024 = vmatmul.mubr.msk.f32.gmra.mxu1 %vm8434_vm5, %v22136_v35 }
0x1b41   :  { %18026 = vmatprep.mubr.msk.f32.mxu1 %vm8434_vm5, %v22146_v23 }
0x1b44   :  { %18027 = vmatmul.mubr.msk.f32.gmra.mxu1 %vm8434_vm5, %v22148_v43 }
0x1b45   :  { %18029 = vmatprep.mubr.msk.f32.mxu1 %vm8434_vm5, %v22158_v28 }
0x1b48   :  { %18030 = vmatmul.mubr.msk.f32.gmra.mxu1 %vm8434_vm5, %v22160_v3 }
0x1bdc   :  { %v22280_v47 = vpop.f32.mrf.mxu1  ;;  %v17966_v29 = vpop.f32.mrf.mxu0 }
0x1bdd   :  { %v8920_v7 = vadd.f32 %v17966_v29, %v22280_v47  ;;  %v9573_v29 = vld [vmem:[%s23842_s14 + $0x20] sm:$0xff] }
0x1bde   :  { %v22282_v22 = vpop.f32.mrf.mxu1  ;;  %v8914_v50 = vpop.f32.mrf.mxu0 }
0x1be0   :  { %v22284_v61 = vpop.f32.mrf.mxu1  ;;  %v17969_v25 = vpop.f32.mrf.mxu0 }
0x1be2   :  { %v22286_v15 = vpop.f32.mrf.mxu1  ;;  %v8924_v48 = vpop.f32.mrf.mxu0 }
0x1be4   :  { %v22288_v2 = vpop.f32.mrf.mxu1  ;;  %v17972_v36 = vpop.f32.mrf.mxu0 }
0x1be6   :  { %v22290_v35 = vpop.f32.mrf.mxu1  ;;  %v8934_v57 = vpop.f32.mrf.mxu0 }
0x1be8   :  { %v22292_v16 = vpop.f32.mrf.mxu1  ;;  %v17975_v56 = vpop.f32.mrf.mxu0 }
0x1bea   :  { %v22294_v40 = vpop.f32.mrf.mxu1  ;;  %v8944_v6 = vpop.f32.mrf.mxu0 }
0x1bec   :  { %v17980_v41 = vpop.f32.mrf.mxu1 }
0x1bee   :  { %v9024_v19 = vpop.f32.mrf.mxu1 }
0x1bf0   :  { %v17983_v20 = vpop.f32.mrf.mxu1 }
0x1bf2   :  { %v9034_v37 = vpop.f32.mrf.mxu1 }
0x1bf4   :  { %v17986_v5 = vpop.f32.mrf.mxu1 }
0x1bf6   :  { %v9044_v23 = vpop.f32.mrf.mxu1 }
0x1bf8   :  { %v17989_v8 = vpop.f32.mrf.mxu1 }
0x1bf9   :  { %17990 = vmatprep.subr.mxu0 %v17989_v8 }
0x1bfa   :  { %v9054_v46 = vpop.f32.mrf.mxu1  ;;  %17991 = vmatpush3.msra.mxu0 %v17989_v8 }
0x1bfb   :  { %17992 = vmatprep.subr.mxu0 %v9054_v46 }
0x1bfc   :  { %17993 = vmatpush3.msra.mxu0 %v9054_v46  ;;  %v18022_v43 = vpop.f32.mrf.mxu1  ;;  %v8925_v46 = vadd.f32 %v8924_v48, %v22286_v15  ;;  %v8935_v15 = vadd.f32 %v8934_v57, %v22290_v35  ;;  %v9575_v48 = vld [vmem:[%s23842_s14 + $0x30] sm:$0xff]  ;;  %v9630_v57 = vld [vmem:[%s23843_s15 + $0x28] sm:$0xff] }
0x1bfd   :  { %17994 = vmatprep.subr.mxu0 %v17986_v5 }
0x1bfe   :  { %17995 = vmatpush3.msra.mxu0 %v17986_v5  ;;  %v9280_v34 = vpop.f32.mrf.mxu1 }
0x1bff   :  { %17996 = vmatprep.subr.mxu0 %v9044_v23 }
0x1c00   :  { %17997 = vmatpush3.msra.mxu0 %v9044_v23  ;;  %v18025_v11 = vpop.f32.mrf.mxu1 }
0x1c01   :  { %17998 = vmatprep.subr.mxu0 %v17983_v20 }
0x1c02   :  { %17999 = vmatpush3.msra.mxu0 %v17983_v20  ;;  %v9290_v28 = vpop.f32.mrf.mxu1 }
0x1c03   :  { %18000 = vmatprep.subr.mxu0 %v9034_v37 }
0x1c04   :  { %18001 = vmatpush3.msra.mxu0 %v9034_v37  ;;  %v18028_v3 = vpop.f32.mrf.mxu1  ;;  %v8930_v37 = vadd.f32 %v17969_v25, %v22284_v61  ;;  %v9628_v25 = vld [vmem:[%s23843_s15 + $0x18] sm:$0xff] }
0x1c05   :  { %18002 = vmatprep.subr.mxu0 %v17980_v41 }
0x1c06   :  { %18003 = vmatpush3.msra.mxu0 %v17980_v41  ;;  %v9300_v18 = vpop.f32.mrf.mxu1  ;;  %v8915_v41 = vadd.f32 %v8914_v50, %v22282_v22  ;;  %v8940_v22 = vadd.f32 %v17972_v36, %v22288_v2  ;;  %v9629_v50 = vld [vmem:[%s23843_s15 + $0x20] sm:$0xff]  ;;  %v9574_v36 = vld [vmem:[%s23842_s14 + $0x28] sm:$0xff] }
0x1c07   :  { %18004 = vmatprep.subr.mxu0 %v9024_v19 }
0x1c08   :  { %18005 = vmatpush3.msra.mxu0 %v9024_v19  ;;  %v18031_v9 = vpop.f32.mrf.mxu1 }
0x1c09   :  { %18007 = vmatmul.mubr.msk.f32.vlgmr.msra.gmra.mxu0 %vm7604_vm3, %v14592_v63  ;;  %18032 = vmatprep.subr.mxu0 %v18031_v9 }
0x1c0a   :  { %v9310_v14 = vpop.f32.mrf.mxu1  ;;  %18033 = vmatpush3.msra.mxu0 %v18031_v9  ;;  %18009 = vmatprep.mubr.msk.f32.mxu0 %vm7604_vm3, %v14593_v58  ;;  %v8950_v9 = vadd.f32 %v17975_v56, %v22292_v16  ;;  %v9576_v56 = vld [vmem:[%s23842_s14 + $0x38] sm:$0xff] }
0x1c0b   :  { %18034 = vmatprep.subr.mxu0 %v9310_v14 }
0x1c0c   :  { %18035 = vmatpush3.msra.mxu0 %v9310_v14 }
0x1c0d   :  { %18010 = vmatmul.mubr.msk.f32.gmra.mxu0 %vm7604_vm3, %v14594_v62  ;;  %18036 = vmatprep.subr.mxu0 %v18028_v3 }
0x1c0e   :  { %18037 = vmatpush3.msra.mxu0 %v18028_v3  ;;  %18012 = vmatprep.mubr.msk.f32.mxu0 %vm7604_vm3, %v14595_v51 }
0x1c0f   :  { %18038 = vmatprep.subr.mxu0 %v9300_v18 }
0x1c10   :  { %18039 = vmatpush3.msra.mxu0 %v9300_v18 }
0x1c11   :  { %18013 = vmatmul.mubr.msk.f32.gmra.mxu0 %vm7604_vm3, %v14596_v59  ;;  %18040 = vmatprep.subr.mxu0 %v18025_v11 }
0x1c12   :  { %18041 = vmatpush3.msra.mxu0 %v18025_v11  ;;  %18015 = vmatprep.mubr.msk.f32.mxu0 %vm7604_vm3, %v14597_v54 }
0x1c13   :  { %18042 = vmatprep.subr.mxu0 %v9290_v28 }
0x1c14   :  { %18043 = vmatpush3.msra.mxu0 %v9290_v28 }
0x1c15   :  { %18016 = vmatmul.mubr.msk.f32.gmra.mxu0 %vm7604_vm3, %v14598_v33  ;;  %18044 = vmatprep.subr.mxu0 %v18022_v43  ;;  %v8945_v33 = vadd.f32 %v8944_v6, %v22294_v40  ;;  %v22411_v6 = vpop.permute.xlu1 %9584 }
0x1c16   :  { %18045 = vmatpush3.msra.mxu0 %v18022_v43  ;;  %18048 = vmatprep.mubr.msk.f32.mxu0 %vm7604_vm3, %v14617_v24 }
0x1c17   :  { %18046 = vmatprep.subr.mxu0 %v9280_v34 }
0x1c18   :  { %18047 = vmatpush3.msra.mxu0 %v9280_v34 }
0x1c19   :  { %18049 = vmatmul.mubr.msk.f32.vlgmr.msra.gmra.mxu0 %vm7604_vm3, %v14618_v13 }
0x1c1a   :  { %18051 = vmatprep.mubr.msk.f32.mxu0 %vm7604_vm3, %v14619_v45 }
0x1c1d   :  { %18052 = vmatmul.mubr.msk.f32.gmra.mxu0 %vm7604_vm3, %v14620_v38 }
0x1c1e   :  { %18054 = vmatprep.mubr.msk.f32.mxu0 %vm7604_vm3, %v14621_v53 }
0x1c21   :  { %18055 = vmatmul.mubr.msk.f32.gmra.mxu0 %vm7604_vm3, %v14622_v32 }
0x1c22   :  { %18057 = vmatprep.mubr.msk.f32.mxu0 %vm7604_vm3, %v14623_v27 }
0x1c25   :  { %18058 = vmatmul.mubr.msk.f32.gmra.mxu0 %vm7604_vm3, %v14624_v60 }
0x1cc9   :  { %v18008_v10 = vpop.f32.mrf.mxu0 }
0x1cca   :  { %v9202_v19 = vadd.f32 %v18008_v10, %v8920_v7  ;;  %v22413_v10 = vpop.permute.xlu0 %9579 }
0x1ccb   :  { %v9162_v1 = vpop.f32.mrf.mxu0 }
0x1ccc   :  { %v9201_v5 = vadd.f32 %v9162_v1, %v8915_v41  ;;  %v22415_v1 = vpop.permute.xlu1 %9635 }
0x1ccd   :  { %v18011_v0 = vpop.f32.mrf.mxu0 }
0x1cce   :  { %v9204_v43 = vadd.f32 %v18011_v0, %v8930_v37  ;;  %v22417_v0 = vpop.permute.xlu0 %9640 }
0x1ccf   :  { %v9172_v26 = vpop.f32.mrf.mxu0 }
0x1cd0   :  { %v9203_v28 = vadd.f32 %v9172_v26, %v8925_v46  ;;  %v22419_v26 = vpop.permute.xlu1 %9589 }
0x1cd1   :  { %v18014_v49 = vpop.f32.mrf.mxu0 }
0x1cd2   :  { %v9206_v63 = vadd.f32 %v18014_v49, %v8940_v22  ;;  %v22421_v49 = vpop.permute.xlu0 %9594 }
0x1cd3   :  { %v9182_v39 = vpop.f32.mrf.mxu0 }
0x1cd4   :  { %v9205_v62 = vadd.f32 %v9182_v39, %v8935_v15  ;;  %v22423_v39 = vpop.permute.xlu1 %9645 }
0x1cd5   :  { %v18017_v52 = vpop.f32.mrf.mxu0 }
0x1cd6   :  { %v9208_v24 = vadd.f32 %v18017_v52, %v8950_v9 }
0x1cd7   :  { %v9192_v55 = vpop.f32.mrf.mxu0 }
0x1cd8   :  { %v9207_v45 = vadd.f32 %v9192_v55, %v8945_v33 }
0x1cd9   :  { %v18050_v20 = vpop.f32.mrf.mxu0 }
0x1cda   :  { %v22359_v23 = vadd.f32 %v18050_v20, %v9202_v19 }
0x1cdb   :  { %v9418_v8 = vpop.f32.mrf.mxu0 }
0x1cdc   :  { %v22362_v34 = vadd.f32 %v9418_v8, %v9201_v5  ;;  %v9468_v11 = vsel %vm7117_vm2, %v22359_v23, 0.0 }
0x1cdd   :  { %9469 = vadd.xlane.f32.xlu0 %v9468_v11  ;;  %v18053_v47 = vpop.f32.mrf.mxu0 }
0x1cde   :  { %v22367_v3 = vadd.f32 %v18053_v47, %v9204_v43  ;;  %v9465_v61 = vsel %vm7117_vm2, %v22362_v34, 0.0 }
0x1cdf   :  { %9466 = vadd.xlane.f32.xlu1 %v9465_v61  ;;  %v9428_v18 = vpop.f32.mrf.mxu0 }
0x1ce0   :  { %v9459_v58 = vadd.f32 %v9428_v18, %v9203_v28  ;;  %v9474_v2 = vsel %vm7117_vm2, %v22367_v3, 0.0 }
0x1ce1   :  { %v18056_v14 = vpop.f32.mrf.mxu0 }
0x1ce2   :  { %v22373_v51 = vadd.f32 %v18056_v14, %v9206_v63  ;;  %v9471_v59 = vsel %vm7117_vm2, %v9459_v58, 0.0 }
0x1ce3   :  { %9475 = vadd.xlane.f32.xlu1 %v9474_v2  ;;  %9472 = vadd.xlane.f32.xlu0 %v9471_v59  ;;  %v9438_v54 = vpop.f32.mrf.mxu0 }
0x1ce4   :  { %v9461_v35 = vadd.f32 %v9438_v54, %v9205_v62  ;;  %v9480_v16 = vsel %vm7117_vm2, %v22373_v51, 0.0 }
0x1ce5   :  { %v18059_v13 = vpop.f32.mrf.mxu0 }
0x1ce6   :  { %v22379_v38 = vadd.f32 %v18059_v13, %v9208_v24  ;;  %v9477_v53 = vsel %vm7117_vm2, %v9461_v35, 0.0 }
0x1ce7   :  { %9481 = vadd.xlane.f32.xlu1 %v9480_v16  ;;  %9478 = vadd.xlane.f32.xlu0 %v9477_v53  ;;  %v9448_v32 = vpop.f32.mrf.mxu0 }
0x1ce8   :  { %v22384_v27 = vadd.f32 %v9448_v32, %v9207_v45  ;;  %v9486_v60 = vsel %vm7117_vm2, %v22379_v38, 0.0 }
0x1cea   :  { %v9483_v40 = vsel %vm7117_vm2, %v22384_v27, 0.0 }
0x1ceb   :  { %9487 = vadd.xlane.f32.xlu1 %v9486_v60  ;;  %9484 = vadd.xlane.f32.xlu0 %v9483_v40  ;;  %v9632_v40 = vld [vmem:[%s23843_s15 + $0x38] sm:$0xff] }
0x1cfc   :  { %9599 = vperm.xlu1 %19086, %v9573_v29   ;;  %v14649_v29 = vld [vmem:[%s23847_s17 + $0x8] sm:$0xff] }
0x1cfd   :  { %18086 = vmatprep.subr.mxu0 %v14649_v29 }
0x1cfe   :  { %18087 = vmatpush3.msra.mxu0 %v14649_v29 }
0x1d00   :  { %9655 = vperm.xlu1 %19086, %v9629_v50   ;;  %v9697_v50 = vld [vmem:[%s23847_s17] sm:$0xff] }
0x1d01   :  { %9650 = vperm.xlu0 %19085, %v9628_v25   ;;  %18060 = vmatprep.subr.mxu1 %v9697_v50 }
0x1d02   :  { %18061 = vmatpush3.msra.mxu1 %v9697_v50 }
0x1d04   :  { %9609 = vperm.xlu1 %19086, %v9575_v48  }
0x1d05   :  { %9604 = vperm.xlu0 %19085, %v9574_v36  }
0x1d09   :  { %9660 = vperm.xlu0 %19085, %v9630_v57  }
0x1d0d   :  { %9614 = vperm.xlu0 %19085, %v9576_v56  }
0x1d66   :  { %v9470_v52 = vpop.xlane.xlu0 %9469 }
0x1d67   :  { %v9490_v7 = vmul.f32 0.125, %v9470_v52 }
0x1d68   :  { %v9467_v55 = vpop.xlane.xlu1 %9466 }
0x1d69   :  { %v22426_v41 = vsub.f32 %v22359_v23, %v9490_v7  ;;  %v9489_v19 = vmul.f32 0.125, %v9467_v55 }
0x1d6b   :  { %v22429_v20 = vsub.f32 %v22362_v34, %v9489_v19  ;;  %v9506_v37 = vmul.f32 %v22426_v41, %v22426_v41 }
0x1d6c   :  { %v9476_v5 = vpop.xlane.xlu1 %9475  ;;  %v9473_v8 = vpop.xlane.xlu0 %9472 }
0x1d6d   :  { %v9492_v46 = vmul.f32 0.125, %v9476_v5  ;;  %v9491_v43 = vmul.f32 0.125, %v9473_v8  ;;  %v9516_v11 = vsel %vm7117_vm2, %v9506_v37, 0.0  ;;  %v9505_v47 = vmul.f32 %v22429_v20, %v22429_v20 }
0x1d6e   :  { %9517 = vadd.xlane.f32.xlu1 %v9516_v11 }
0x1d6f   :  { %v22437_v23 = vsub.f32 %v22367_v3, %v9492_v46  ;;  %v22439_v22 = vsub.f32 %v9459_v58, %v9491_v43  ;;  %v9513_v34 = vsel %vm7117_vm2, %v9505_v47, 0.0 }
0x1d70   :  { %v9482_v28 = vpop.xlane.xlu1 %9481  ;;  %9514 = vadd.xlane.f32.xlu0 %v9513_v34  ;;  %v9479_v61 = vpop.xlane.xlu0 %9478 }
0x1d71   :  { %v9494_v18 = vmul.f32 0.125, %v9482_v28  ;;  %v9493_v15 = vmul.f32 0.125, %v9479_v61  ;;  %v9508_v63 = vmul.f32 %v22437_v23, %v22437_v23  ;;  %v9507_v9 = vmul.f32 %v22439_v22, %v22439_v22 }
0x1d73   :  { %v22447_v14 = vsub.f32 %v22373_v51, %v9494_v18  ;;  %v22449_v3 = vsub.f32 %v9461_v35, %v9493_v15  ;;  %v9522_v58 = vsel %vm7117_vm2, %v9508_v63, 0.0  ;;  %v9519_v62 = vsel %vm7117_vm2, %v9507_v9, 0.0 }
0x1d74   :  { %v9488_v2 = vpop.xlane.xlu1 %9487  ;;  %9523 = vadd.xlane.f32.xlu1 %v9522_v58  ;;  %9520 = vadd.xlane.f32.xlu0 %v9519_v62  ;;  %v9485_v59 = vpop.xlane.xlu0 %9484 }
0x1d75   :  { %v9496_v54 = vmul.f32 0.125, %v9488_v2  ;;  %v9495_v33 = vmul.f32 0.125, %v9485_v59  ;;  %v9510_v24 = vmul.f32 %v22447_v14, %v22447_v14  ;;  %v9509_v13 = vmul.f32 %v22449_v3, %v22449_v3 }
0x1d77   :  { %v22458_v51 = vsub.f32 %v22379_v38, %v9496_v54  ;;  %v22461_v35 = vsub.f32 %v22384_v27, %v9495_v33  ;;  %v9528_v45 = vsel %vm7117_vm2, %v9510_v24, 0.0  ;;  %v9525_v16 = vsel %vm7117_vm2, %v9509_v13, 0.0  ;;  %v9631_v27 = vld [vmem:[%s23843_s15 + $0x30] sm:$0xff] }
0x1d78   :  { %9529 = vadd.xlane.f32.xlu1 %v9528_v45  ;;  %9526 = vadd.xlane.f32.xlu0 %v9525_v16  ;;  %v22483_v48 = vpop.permute.xlu1 %9599 }
0x1d79   :  { %v9512_v53 = vmul.f32 %v22458_v51, %v22458_v51  ;;  %v9511_v32 = vmul.f32 %v22461_v35, %v22461_v35 }
0x1d7b   :  { %v9534_v60 = vsel %vm7117_vm2, %v9512_v53, 0.0  ;;  %v9531_v38 = vsel %vm7117_vm2, %v9511_v32, 0.0 }
0x1d7c   :  { %9535 = vadd.xlane.f32.xlu1 %v9534_v60  ;;  %9532 = vadd.xlane.f32.xlu0 %v9531_v38  ;;  %v9651_v25 = vpop.permute.xlu0 %9650  ;;  %v22487_v57 = vpop.permute.xlu1 %9655 }
0x1d80   :  { %v22485_v36 = vpop.permute.xlu0 %9604  ;;  %v22491_v52 = vpop.permute.xlu1 %9609 }
0x1d84   :  { %v22489_v56 = vpop.permute.xlu0 %9660 }
0x1d88   :  { %v22493_v7 = vpop.permute.xlu0 %9614 }
0x1d8d   :  { %9665 = vperm.xlu1 %19086, %v9631_v27  }
0x1d92   :  { %9670 = vperm.xlu0 %19085, %v9632_v40  }
0x1df7   :  { %v9518_v55 = vpop.xlane.xlu1 %9517 }
0x1df8   :  { %v9538_v19 = vmul.f32 0.125, %v9518_v55 }
0x1df9   :  { %v9515_v37 = vpop.xlane.xlu0 %9514 }
0x1dfa   :  { %v9546_v5 = vadd.f32 1e-05, %v9538_v19  ;;  %v9537_v8 = vmul.f32 0.125, %v9515_v37 }
0x1dfc   :  { %19111 = vrsqrt.f32 %v9546_v5  ;;  %v9545_v46 = vadd.f32 1e-05, %v9537_v8 }
0x1dfd   :  { %v9524_v43 = vpop.xlane.xlu1 %9523  ;;  %v9521_v11 = vpop.xlane.xlu0 %9520 }
0x1dfe   :  { %19113 = vrsqrt.f32 %v9545_v46  ;;  %v9540_v47 = vmul.f32 0.125, %v9524_v43  ;;  %v9539_v34 = vmul.f32 0.125, %v9521_v11 }
0x1e00   :  { %v9548_v28 = vadd.f32 1e-05, %v9540_v47  ;;  %v9547_v61 = vadd.f32 1e-05, %v9539_v34 }
0x1e01   :  { %v9530_v18 = vpop.xlane.xlu1 %9529  ;;  %v9527_v15 = vpop.xlane.xlu0 %9526 }
0x1e02   :  { %19115 = vrsqrt.f32 %v9548_v28  ;;  %v9542_v63 = vmul.f32 0.125, %v9530_v18  ;;  %v9541_v9 = vmul.f32 0.125, %v9527_v15  ;;  %v22586_v18 = vmax.f32 %v21842_v44, 0.0 }
0x1e03   :  { %19117 = vrsqrt.f32 %v9547_v61  ;;  %v22575_v61 = vmax.f32 %v21849_v21, 0.0  ;;  %v22600_v21 = vmax.f32 %v21867_v42, 0.0  ;;  %v22603_v44 = vmax.f32 %v21893_v12, 0.0  ;;  %v14666_v42 = vld [vmem:[%s23848_s16 + $0x20] sm:$0xff] }
0x1e04   :  { %v9550_v58 = vadd.f32 1e-05, %v9542_v63  ;;  %v9549_v62 = vadd.f32 1e-05, %v9541_v9  ;;  %v9891_v12 = vld [vmem:[%s23848_s16] sm:$0xff] }
0x1e05   :  { %v9536_v2 = vpop.xlane.xlu1 %9535  ;;  %v9533_v59 = vpop.xlane.xlu0 %9532 }
0x1e06   :  { %19119 = vrsqrt.f32 %v9550_v58  ;;  %v9544_v54 = vmul.f32 0.125, %v9536_v2  ;;  %v9543_v33 = vmul.f32 0.125, %v9533_v59 }
0x1e07   :  { %19121 = vrsqrt.f32 %v9549_v62 }
0x1e08   :  { %v9552_v24 = vadd.f32 1e-05, %v9544_v54  ;;  %v9551_v13 = vadd.f32 1e-05, %v9543_v33 }
0x1e09   :  { %v19112_v45 = vpop.eup %19111 }
0x1e0a   :  { %v9562_v16 = vmul.f32 %v19112_v45, %v22426_v41  ;;  %19123 = vrsqrt.f32 %v9552_v24 }
0x1e0b   :  { %v19114_v53 = vpop.eup %19113  ;;  %19125 = vrsqrt.f32 %v9551_v13 }
0x1e0c   :  { %v9618_v32 = vmul.f32 %v22411_v6, %v9562_v16  ;;  %v9561_v60 = vmul.f32 %v19114_v53, %v22429_v20 }
0x1e0e   :  { %v9617_v38 = vmul.f32 %v22413_v10, %v9561_v60  ;;  %v9674_v40 = vadd.f32 %v22417_v0, %v9618_v32 }
0x1e0f   :  { %v19116_v27 = vpop.eup %19115 }
0x1e10   :  { %v19118_v29 = vpop.eup %19117  ;;  %v9673_v50 = vadd.f32 %v22415_v1, %v9617_v38  ;;  %v9564_v55 = vmul.f32 %v19116_v27, %v22437_v23  ;;  %v22506_v6 = vmax.f32 %v9674_v40, 0.0 }
0x1e11   :  { %v9563_v19 = vmul.f32 %v19118_v29, %v22439_v22 }
0x1e12   :  { %v22503_v41 = vmax.f32 %v9673_v50, 0.0  ;;  %v9620_v37 = vmul.f32 %v22421_v49, %v9564_v55 }
0x1e13   :  { %v19120_v5 = vpop.eup %19119  ;;  %v9619_v20 = vmul.f32 %v22419_v26, %v9563_v19 }
0x1e14   :  { %v19122_v10 = vpop.eup %19121  ;;  %v9676_v8 = vadd.f32 %v9651_v25, %v9620_v37  ;;  %v9566_v0 = vmul.f32 %v19120_v5, %v22447_v14  ;;  %18062 = vmatprep.mubr.msk.f32.mxu1 %vm7117_vm2, %v22503_v41  ;;  %18088 = vmatprep.mubr.msk.f32.mxu0 %vm7117_vm2, %v22503_v41 }
0x1e15   :  { %v9675_v1 = vadd.f32 %v22423_v39, %v9619_v20  ;;  %v9565_v23 = vmul.f32 %v19122_v10, %v22449_v3  ;;  %18063 = vmatmul.mubr.msk.f32.vlgmr.msra.gmra.mxu1 %vm7117_vm2, %v22506_v6  ;;  %18089 = vmatmul.mubr.msk.f32.vlgmr.msra.gmra.mxu0 %vm7117_vm2, %v22506_v6 }
0x1e16   :  { %v22520_v26 = vmax.f32 %v9676_v8, 0.0  ;;  %v9622_v49 = vmul.f32 %v22485_v36, %v9566_v0 }
0x1e17   :  { %v19124_v22 = vpop.eup %19123  ;;  %v22523_v14 = vmax.f32 %v9675_v1, 0.0  ;;  %v9621_v25 = vmul.f32 %v22483_v48, %v9565_v23  ;;  %v9671_v48 = vpop.permute.xlu0 %9670 }
0x1e18   :  { %v19126_v46 = vpop.eup %19125  ;;  %v9678_v39 = vadd.f32 %v22489_v56, %v9622_v49  ;;  %v9568_v3 = vmul.f32 %v19124_v22, %v22458_v51  ;;  %v14667_v49 = vld [vmem:[%s23848_s16 + $0x28] sm:$0xff] }
0x1e19   :  { %v9677_v43 = vadd.f32 %v22487_v57, %v9621_v25  ;;  %v9567_v11 = vmul.f32 %v19126_v46, %v22461_v35  ;;  %18065 = vmatprep.mubr.msk.f32.mxu1 %vm7117_vm2, %v22523_v14  ;;  %18091 = vmatprep.mubr.msk.f32.mxu0 %vm7117_vm2, %v22523_v14  ;;  %v9666_v57 = vpop.permute.xlu1 %9665  ;;  %v9892_v22 = vld [vmem:[%s23848_s16 + $0x8] sm:$0xff]  ;;  %v14668_v25 = vld [vmem:[%s23848_s16 + $0x30] sm:$0xff] }
0x1e1a   :  { %v22534_v36 = vmax.f32 %v9678_v39, 0.0  ;;  %v9624_v47 = vmul.f32 %v22493_v7, %v9568_v3  ;;  %18066 = vmatmul.mubr.msk.f32.gmra.mxu1 %vm7117_vm2, %v22520_v26  ;;  %18092 = vmatmul.mubr.msk.f32.gmra.mxu0 %vm7117_vm2, %v22520_v26  ;;  %v9893_v46 = vld [vmem:[%s23848_s16 + $0x10] sm:$0xff]  ;;  %v14691_v3 = vld [vmem:[%s23847_s17 + $0x18] sm:$0xff] }
0x1e1b   :  { %v22541_v51 = vmax.f32 %v9677_v43, 0.0  ;;  %v9623_v35 = vmul.f32 %v22491_v52, %v9567_v11  ;;  %v22557_v52 = vmax.f32 %v21831_v17, 0.0  ;;  %v22572_v17 = vmax.f32 %v21826_v4, 0.0  ;;  %v14670_v39 = vld [vmem:[%s23847_s17 + $0x10] sm:$0xff]  ;;  %v14669_v43 = vld [vmem:[%s23848_s16 + $0x38] sm:$0xff] }
0x1e1c   :  { %v9680_v56 = vadd.f32 %v9671_v48, %v9624_v47  ;;  %v22589_v4 = vmax.f32 %v21874_v31, 0.0  ;;  %v22614_v31 = vmax.f32 %v21884_v30, 0.0  ;;  %v9894_v11 = vld [vmem:[%s23848_s16 + $0x18] sm:$0xff]  ;;  %v14687_v47 = vld [vmem:[%s23848_s16 + $0x40] sm:$0xff] }
0x1e1d   :  { %v9679_v34 = vadd.f32 %v9666_v57, %v9623_v35  ;;  %18068 = vmatprep.mubr.msk.f32.mxu1 %vm7117_vm2, %v22541_v51  ;;  %18094 = vmatprep.mubr.msk.f32.mxu0 %vm7117_vm2, %v22541_v51  ;;  %v14708_v35 = vld [vmem:[%s23848_s16 + $0x60] sm:$0xff] }
0x1e1e   :  { %v22548_v7 = vmax.f32 %v9680_v56, 0.0  ;;  %18069 = vmatmul.mubr.msk.f32.gmra.mxu1 %vm7117_vm2, %v22534_v36  ;;  %18095 = vmatmul.mubr.msk.f32.gmra.mxu0 %vm7117_vm2, %v22534_v36 }
0x1e1f   :  { %v22554_v28 = vmax.f32 %v9679_v34, 0.0 }
0x1e21   :  { %18071 = vmatprep.mubr.msk.f32.mxu1 %vm7117_vm2, %v22554_v28  ;;  %18097 = vmatprep.mubr.msk.f32.mxu0 %vm7117_vm2, %v22554_v28 }
0x1e22   :  { %18072 = vmatmul.mubr.msk.f32.gmra.mxu1 %vm7117_vm2, %v22548_v7  ;;  %18098 = vmatmul.mubr.msk.f32.gmra.mxu0 %vm7117_vm2, %v22548_v7 }
0x1e23   :  { %18074 = vmatprep.mubr.msk.f32.mxu1 %vm7117_vm2, %v22557_v52  ;;  %18100 = vmatprep.mubr.msk.f32.mxu0 %vm7117_vm2, %v22557_v52 }
0x1e26   :  { %18075 = vmatmul.mubr.msk.f32.gmra.mxu1 %vm7117_vm2, %v22572_v17  ;;  %18101 = vmatmul.mubr.msk.f32.gmra.mxu0 %vm7117_vm2, %v22572_v17 }
0x1e27   :  { %18077 = vmatprep.mubr.msk.f32.mxu1 %vm7117_vm2, %v22575_v61  ;;  %18103 = vmatprep.mubr.msk.f32.mxu0 %vm7117_vm2, %v22575_v61 }
0x1e2a   :  { %18078 = vmatmul.mubr.msk.f32.gmra.mxu1 %vm7117_vm2, %v22586_v18  ;;  %18104 = vmatmul.mubr.msk.f32.gmra.mxu0 %vm7117_vm2, %v22586_v18 }
0x1e2b   :  { %18080 = vmatprep.mubr.msk.f32.mxu1 %vm7117_vm2, %v22589_v4  ;;  %18106 = vmatprep.mubr.msk.f32.mxu0 %vm7117_vm2, %v22589_v4 }
0x1e2e   :  { %18081 = vmatmul.mubr.msk.f32.gmra.mxu1 %vm7117_vm2, %v22600_v21  ;;  %18107 = vmatmul.mubr.msk.f32.gmra.mxu0 %vm7117_vm2, %v22600_v21 }
0x1e2f   :  { %18083 = vmatprep.mubr.msk.f32.mxu1 %vm7117_vm2, %v22603_v44  ;;  %18109 = vmatprep.mubr.msk.f32.mxu0 %vm7117_vm2, %v22603_v44 }
0x1e32   :  { %18084 = vmatmul.mubr.msk.f32.gmra.mxu1 %vm7117_vm2, %v22614_v31  ;;  %18110 = vmatmul.mubr.msk.f32.gmra.mxu0 %vm7117_vm2, %v22614_v31 }
0x1e33   :  { %18144 = vmatprep.mubr.f32.mxu1 %v14666_v42  ;;  %18182 = vmatprep.mubr.f32.mxu0 %v9891_v12 }
0x1ed5   :  { %v22626_v15 = vpop.f32.mrf.mxu1  ;;  %v22628_v30 = vpop.f32.mrf.mxu0 }
0x1ed7   :  { %v22630_v63 = vpop.f32.mrf.mxu1  ;;  %v22632_v9 = vpop.f32.mrf.mxu0 }
0x1eda   :  { %v22634_v58 = vpop.f32.mrf.mxu1  ;;  %v22636_v62 = vpop.f32.mrf.mxu0 }
0x1edc   :  { %v22638_v2 = vpop.f32.mrf.mxu1  ;;  %v22640_v59 = vpop.f32.mrf.mxu0 }
0x1ede   :  { %v22642_v54 = vpop.f32.mrf.mxu1  ;;  %v22644_v33 = vpop.f32.mrf.mxu0 }
0x1ee0   :  { %v22646_v24 = vpop.f32.mrf.mxu1  ;;  %v22648_v13 = vpop.f32.mrf.mxu0 }
0x1ee2   :  { %v18073_v45 = vpop.f32.mrf.mxu1  ;;  %v18099_v16 = vpop.f32.mrf.mxu0 }
0x1ee4   :  { %v9842_v53 = vpop.f32.mrf.mxu1  ;;  %v9993_v32 = vpop.f32.mrf.mxu0 }
0x1ee6   :  { %v18076_v60 = vpop.f32.mrf.mxu1  ;;  %v18102_v38 = vpop.f32.mrf.mxu0 }
0x1ee8   :  { %v9852_v27 = vpop.f32.mrf.mxu1  ;;  %v10003_v40 = vpop.f32.mrf.mxu0 }
0x1eea   :  { %v18079_v29 = vpop.f32.mrf.mxu1  ;;  %v18105_v50 = vpop.f32.mrf.mxu0 }
0x1eec   :  { %v9862_v55 = vpop.f32.mrf.mxu1  ;;  %v10013_v19 = vpop.f32.mrf.mxu0 }
0x1eee   :  { %v18082_v37 = vpop.f32.mrf.mxu1  ;;  %v18108_v5 = vpop.f32.mrf.mxu0 }
0x1ef0   :  { %v9872_v20 = vpop.f32.mrf.mxu1  ;;  %v10023_v10 = vpop.f32.mrf.mxu0 }
0x1ef2   :  { %v18085_v8 = vpop.f32.mrf.mxu1  ;;  %v18111_v0 = vpop.f32.mrf.mxu0 }
0x1ef3   :  { %18112 = vmatprep.subr.mxu1 %v18111_v0  ;;  %18150 = vmatprep.subr.mxu0 %v18085_v8 }
0x1ef4   :  { %v9882_v1 = vpop.f32.mrf.mxu1  ;;  %v10033_v23 = vpop.f32.mrf.mxu0  ;;  %18113 = vmatpush3.msra.mxu1 %v18111_v0  ;;  %18151 = vmatpush3.msra.mxu0 %v18085_v8 }
0x1ef5   :  { %18114 = vmatprep.subr.mxu1 %v10033_v23  ;;  %18152 = vmatprep.subr.mxu0 %v9882_v1 }
0x1ef6   :  { %18115 = vmatpush3.msra.mxu1 %v10033_v23  ;;  %18153 = vmatpush3.msra.mxu0 %v9882_v1 }
0x1ef7   :  { %18116 = vmatprep.subr.mxu1 %v18108_v5  ;;  %18154 = vmatprep.subr.mxu0 %v18082_v37 }
0x1ef8   :  { %18117 = vmatpush3.msra.mxu1 %v18108_v5  ;;  %18155 = vmatpush3.msra.mxu0 %v18082_v37 }
0x1ef9   :  { %18118 = vmatprep.subr.mxu1 %v10023_v10  ;;  %18156 = vmatprep.subr.mxu0 %v9872_v20 }
0x1efa   :  { %18119 = vmatpush3.msra.mxu1 %v10023_v10  ;;  %18157 = vmatpush3.msra.mxu0 %v9872_v20 }
0x1efb   :  { %18120 = vmatprep.subr.mxu1 %v18105_v50  ;;  %18158 = vmatprep.subr.mxu0 %v18079_v29 }
0x1efc   :  { %18121 = vmatpush3.msra.mxu1 %v18105_v50  ;;  %18159 = vmatpush3.msra.mxu0 %v18079_v29 }
0x1efd   :  { %18122 = vmatprep.subr.mxu1 %v10013_v19  ;;  %18160 = vmatprep.subr.mxu0 %v9862_v55 }
0x1efe   :  { %18123 = vmatpush3.msra.mxu1 %v10013_v19  ;;  %18161 = vmatpush3.msra.mxu0 %v9862_v55 }
0x1eff   :  { %18124 = vmatprep.subr.mxu1 %v18102_v38  ;;  %18162 = vmatprep.subr.mxu0 %v18076_v60 }
0x1f00   :  { %18125 = vmatpush3.msra.mxu1 %v18102_v38  ;;  %18163 = vmatpush3.msra.mxu0 %v18076_v60 }
0x1f01   :  { %18126 = vmatprep.subr.mxu1 %v10003_v40  ;;  %18164 = vmatprep.subr.mxu0 %v9852_v27 }
0x1f02   :  { %18127 = vmatpush3.msra.mxu1 %v10003_v40  ;;  %18165 = vmatpush3.msra.mxu0 %v9852_v27 }
0x1f03   :  { %18128 = vmatprep.subr.mxu1 %v18099_v16  ;;  %18166 = vmatprep.subr.mxu0 %v18073_v45 }
0x1f04   :  { %18129 = vmatpush3.msra.mxu1 %v18099_v16  ;;  %18167 = vmatpush3.msra.mxu0 %v18073_v45 }
0x1f05   :  { %18130 = vmatprep.subr.mxu1 %v9993_v32  ;;  %18168 = vmatprep.subr.mxu0 %v9842_v53 }
0x1f06   :  { %18131 = vmatpush3.msra.mxu1 %v9993_v32  ;;  %18169 = vmatpush3.msra.mxu0 %v9842_v53 }
0x1f07   :  { %18132 = vmatprep.subr.mxu1 %v22644_v33  ;;  %18170 = vmatprep.subr.mxu0 %v22642_v54 }
0x1f08   :  { %18133 = vmatpush3.msra.mxu1 %v22644_v33  ;;  %18171 = vmatpush3.msra.mxu0 %v22642_v54 }
0x1f09   :  { %18134 = vmatprep.subr.mxu1 %v22648_v13  ;;  %18172 = vmatprep.subr.mxu0 %v22646_v24 }
0x1f0a   :  { %18135 = vmatpush3.msra.mxu1 %v22648_v13  ;;  %18173 = vmatpush3.msra.mxu0 %v22646_v24 }
0x1f0b   :  { %18136 = vmatprep.subr.mxu1 %v22636_v62  ;;  %18174 = vmatprep.subr.mxu0 %v22634_v58 }
0x1f0c   :  { %18137 = vmatpush3.msra.mxu1 %v22636_v62  ;;  %18175 = vmatpush3.msra.mxu0 %v22634_v58 }
0x1f0d   :  { %18138 = vmatprep.subr.mxu1 %v22640_v59  ;;  %18176 = vmatprep.subr.mxu0 %v22638_v2 }
0x1f0e   :  { %18139 = vmatpush3.msra.mxu1 %v22640_v59  ;;  %18177 = vmatpush3.msra.mxu0 %v22638_v2 }
0x1f0f   :  { %18140 = vmatprep.subr.mxu1 %v22628_v30  ;;  %18178 = vmatprep.subr.mxu0 %v22626_v15 }
0x1f10   :  { %18141 = vmatpush3.msra.mxu1 %v22628_v30  ;;  %18179 = vmatpush3.msra.mxu0 %v22626_v15 }
0x1f11   :  { %18142 = vmatprep.subr.mxu1 %v22632_v9  ;;  %18180 = vmatprep.subr.mxu0 %v22630_v63 }
0x1f12   :  { %18143 = vmatpush3.msra.mxu1 %v22632_v9  ;;  %18181 = vmatpush3.msra.mxu0 %v22630_v63 }
0x1f13   :  { %18145 = vmatmul.mubr.f32.vlgmr.msra.gmra.mxu1 %v14667_v49  ;;  %18183 = vmatmul.mubr.f32.vlgmr.msra.gmra.mxu0 %v9892_v22 }
0x1f14   :  { %18147 = vmatprep.mubr.f32.mxu1 %v14668_v25  ;;  %18185 = vmatprep.mubr.f32.mxu0 %v9893_v46 }
0x1f15   :  { %18188 = vmatprep.subr.mxu1 %v14670_v39  ;;  %18252 = vmatprep.subr.mxu0 %v14691_v3 }
0x1f16   :  { %18189 = vmatpush3.msra.mxu1 %v14670_v39  ;;  %18253 = vmatpush3.msra.mxu0 %v14691_v3  ;;  %v14688_v39 = vld [vmem:[%s23848_s16 + $0x48] sm:$0xff] }
0x1f17   :  { %18148 = vmatmul.mubr.f32.gmra.mxu1 %v14669_v43  ;;  %18186 = vmatmul.mubr.f32.gmra.mxu0 %v9894_v11  ;;  %v14709_v3 = vld [vmem:[%s23848_s16 + $0x68] sm:$0xff]  ;;  %v14689_v43 = vld [vmem:[%s23848_s16 + $0x50] sm:$0xff] }
0x1f18   :  { %18190 = vmatprep.mubr.msk.f32.mxu1 %vm7117_vm2, %v22503_v41  ;;  %18254 = vmatprep.mubr.msk.f32.mxu0 %vm7117_vm2, %v22503_v41  ;;  %v14710_v11 = vld [vmem:[%s23848_s16 + $0x70] sm:$0xff] }
0x1f1b   :  { %18191 = vmatmul.mubr.msk.f32.vlgmr.msra.gmra.mxu1 %vm7117_vm2, %v22506_v6  ;;  %18255 = vmatmul.mubr.msk.f32.vlgmr.msra.gmra.mxu0 %vm7117_vm2, %v22506_v6 }
0x1f1c   :  { %18193 = vmatprep.mubr.msk.f32.mxu1 %vm7117_vm2, %v22523_v14  ;;  %18257 = vmatprep.mubr.msk.f32.mxu0 %vm7117_vm2, %v22523_v14 }
0x1f1f   :  { %18194 = vmatmul.mubr.msk.f32.gmra.mxu1 %vm7117_vm2, %v22520_v26  ;;  %18258 = vmatmul.mubr.msk.f32.gmra.mxu0 %vm7117_vm2, %v22520_v26 }
0x1f20   :  { %18196 = vmatprep.mubr.msk.f32.mxu1 %vm7117_vm2, %v22541_v51  ;;  %18260 = vmatprep.mubr.msk.f32.mxu0 %vm7117_vm2, %v22541_v51 }
0x1f23   :  { %18197 = vmatmul.mubr.msk.f32.gmra.mxu1 %vm7117_vm2, %v22534_v36  ;;  %18261 = vmatmul.mubr.msk.f32.gmra.mxu0 %vm7117_vm2, %v22534_v36 }
0x1f24   :  { %18199 = vmatprep.mubr.msk.f32.mxu1 %vm7117_vm2, %v22554_v28  ;;  %18263 = vmatprep.mubr.msk.f32.mxu0 %vm7117_vm2, %v22554_v28 }
0x1f27   :  { %18200 = vmatmul.mubr.msk.f32.gmra.mxu1 %vm7117_vm2, %v22548_v7  ;;  %18264 = vmatmul.mubr.msk.f32.gmra.mxu0 %vm7117_vm2, %v22548_v7 }
0x1f28   :  { %18202 = vmatprep.mubr.msk.f32.mxu1 %vm7117_vm2, %v22557_v52  ;;  %18266 = vmatprep.mubr.msk.f32.mxu0 %vm7117_vm2, %v22557_v52 }
0x1f2b   :  { %18203 = vmatmul.mubr.msk.f32.gmra.mxu1 %vm7117_vm2, %v22572_v17  ;;  %18267 = vmatmul.mubr.msk.f32.gmra.mxu0 %vm7117_vm2, %v22572_v17 }
0x1f2c   :  { %18205 = vmatprep.mubr.msk.f32.mxu1 %vm7117_vm2, %v22575_v61  ;;  %18269 = vmatprep.mubr.msk.f32.mxu0 %vm7117_vm2, %v22575_v61 }
0x1f2f   :  { %18206 = vmatmul.mubr.msk.f32.gmra.mxu1 %vm7117_vm2, %v22586_v18  ;;  %18270 = vmatmul.mubr.msk.f32.gmra.mxu0 %vm7117_vm2, %v22586_v18 }
0x1f30   :  { %18208 = vmatprep.mubr.msk.f32.mxu1 %vm7117_vm2, %v22589_v4  ;;  %18272 = vmatprep.mubr.msk.f32.mxu0 %vm7117_vm2, %v22589_v4 }
0x1f33   :  { %18209 = vmatmul.mubr.msk.f32.gmra.mxu1 %vm7117_vm2, %v22600_v21  ;;  %18273 = vmatmul.mubr.msk.f32.gmra.mxu0 %vm7117_vm2, %v22600_v21 }
0x1f34   :  { %18211 = vmatprep.mubr.msk.f32.mxu1 %vm7117_vm2, %v22603_v44  ;;  %18275 = vmatprep.mubr.msk.f32.mxu0 %vm7117_vm2, %v22603_v44 }
0x1f37   :  { %18212 = vmatmul.mubr.msk.f32.gmra.mxu1 %vm7117_vm2, %v22614_v31  ;;  %18276 = vmatmul.mubr.msk.f32.gmra.mxu0 %vm7117_vm2, %v22614_v31 }
0x1f38   :  { %18246 = vmatprep.mubr.f32.mxu1 %v14687_v47  ;;  %18310 = vmatprep.mubr.f32.mxu0 %v14708_v35  ;;  %v14712_v47 = vld [vmem:[%s23847_s17 + $0x20] sm:$0xff]  ;;  %v14733_v35 = vld [vmem:[%s23847_s17 + $0x28] sm:$0xff] }
0x1fd3   :  { %v18146_v48 = vpop.f32.mrf.mxu1  ;;  %v18184_v57 = vpop.f32.mrf.mxu0 }
0x1fd4   :  { %v22768_v56 = vadd.f32 %v18184_v57, %v18146_v48  ;;  %v14690_v48 = vld [vmem:[%s23848_s16 + $0x58] sm:$0xff] }
0x1fd5   :  { %v22770_v34 = vpop.f32.mrf.mxu1  ;;  %v22772_v42 = vpop.f32.mrf.mxu0  ;;  %v14711_v57 = vld [vmem:[%s23848_s16 + $0x78] sm:$0xff] }
0x1fd7   :  { %v18149_v12 = vpop.f32.mrf.mxu1  ;;  %v18187_v15 = vpop.f32.mrf.mxu0 }
0x1fd8   :  { %v22774_v30 = vadd.f32 %v18187_v15, %v18149_v12  ;;  %v14729_v12 = vld [vmem:[%s23848_s16 + $0x80] sm:$0xff] }
0x1fd9   :  { %v22776_v63 = vpop.f32.mrf.mxu1  ;;  %v22778_v9 = vpop.f32.mrf.mxu0  ;;  %v14750_v15 = vld [vmem:[%s23848_s16 + $0xa0] sm:$0xff] }
0x1fdb   :  { %v22780_v58 = vpop.f32.mrf.mxu1  ;;  %v22782_v62 = vpop.f32.mrf.mxu0 }
0x1fdd   :  { %v22784_v2 = vpop.f32.mrf.mxu1  ;;  %v22786_v59 = vpop.f32.mrf.mxu0 }
0x1fdf   :  { %v22788_v54 = vpop.f32.mrf.mxu1  ;;  %v22790_v33 = vpop.f32.mrf.mxu0 }
0x1fe1   :  { %v22792_v24 = vpop.f32.mrf.mxu1  ;;  %v22794_v13 = vpop.f32.mrf.mxu0 }
0x1fe3   :  { %v22796_v45 = vpop.f32.mrf.mxu1  ;;  %v22798_v16 = vpop.f32.mrf.mxu0 }
0x1fe5   :  { %v22800_v53 = vpop.f32.mrf.mxu1  ;;  %v22802_v32 = vpop.f32.mrf.mxu0 }
0x1fe7   :  { %v18201_v60 = vpop.f32.mrf.mxu1  ;;  %v18265_v38 = vpop.f32.mrf.mxu0 }
0x1fe9   :  { %v10315_v27 = vpop.f32.mrf.mxu1  ;;  %v10556_v40 = vpop.f32.mrf.mxu0 }
0x1feb   :  { %v18204_v29 = vpop.f32.mrf.mxu1  ;;  %v18268_v50 = vpop.f32.mrf.mxu0 }
0x1fed   :  { %v10325_v55 = vpop.f32.mrf.mxu1  ;;  %v10566_v19 = vpop.f32.mrf.mxu0 }
0x1fef   :  { %v18207_v37 = vpop.f32.mrf.mxu1  ;;  %v18271_v5 = vpop.f32.mrf.mxu0 }
0x1ff1   :  { %v10335_v20 = vpop.f32.mrf.mxu1  ;;  %v10576_v10 = vpop.f32.mrf.mxu0 }
0x1ff3   :  { %v18210_v8 = vpop.f32.mrf.mxu1  ;;  %v18274_v0 = vpop.f32.mrf.mxu0 }
0x1ff5   :  { %v10345_v1 = vpop.f32.mrf.mxu1  ;;  %v10586_v23 = vpop.f32.mrf.mxu0 }
0x1ff7   :  { %v18213_v49 = vpop.f32.mrf.mxu1  ;;  %v18277_v22 = vpop.f32.mrf.mxu0 }
0x1ff8   :  { %18214 = vmatprep.subr.mxu1 %v18213_v49  ;;  %18278 = vmatprep.subr.mxu0 %v18277_v22 }
0x1ff9   :  { %v10355_v25 = vpop.f32.mrf.mxu1  ;;  %18215 = vmatpush3.msra.mxu1 %v18213_v49  ;;  %v10596_v46 = vpop.f32.mrf.mxu0  ;;  %18279 = vmatpush3.msra.mxu0 %v18277_v22 }
0x1ffa   :  { %18216 = vmatprep.subr.mxu1 %v10355_v25  ;;  %18280 = vmatprep.subr.mxu0 %v10596_v46 }
0x1ffb   :  { %18217 = vmatpush3.msra.mxu1 %v10355_v25  ;;  %18281 = vmatpush3.msra.mxu0 %v10596_v46 }
0x1ffc   :  { %18218 = vmatprep.subr.mxu1 %v18210_v8  ;;  %18282 = vmatprep.subr.mxu0 %v18274_v0 }
0x1ffd   :  { %18219 = vmatpush3.msra.mxu1 %v18210_v8  ;;  %18283 = vmatpush3.msra.mxu0 %v18274_v0 }
0x1ffe   :  { %18220 = vmatprep.subr.mxu1 %v10345_v1  ;;  %18284 = vmatprep.subr.mxu0 %v10586_v23 }
0x1fff   :  { %18221 = vmatpush3.msra.mxu1 %v10345_v1  ;;  %18285 = vmatpush3.msra.mxu0 %v10586_v23 }
0x2000   :  { %18222 = vmatprep.subr.mxu1 %v18207_v37  ;;  %18286 = vmatprep.subr.mxu0 %v18271_v5 }
0x2001   :  { %18223 = vmatpush3.msra.mxu1 %v18207_v37  ;;  %18287 = vmatpush3.msra.mxu0 %v18271_v5 }
0x2002   :  { %18224 = vmatprep.subr.mxu1 %v10335_v20  ;;  %18288 = vmatprep.subr.mxu0 %v10576_v10 }
0x2003   :  { %18225 = vmatpush3.msra.mxu1 %v10335_v20  ;;  %18289 = vmatpush3.msra.mxu0 %v10576_v10 }
0x2004   :  { %18226 = vmatprep.subr.mxu1 %v18204_v29  ;;  %18290 = vmatprep.subr.mxu0 %v18268_v50 }
0x2005   :  { %18227 = vmatpush3.msra.mxu1 %v18204_v29  ;;  %18291 = vmatpush3.msra.mxu0 %v18268_v50 }
0x2006   :  { %18228 = vmatprep.subr.mxu1 %v10325_v55  ;;  %18292 = vmatprep.subr.mxu0 %v10566_v19 }
0x2007   :  { %18229 = vmatpush3.msra.mxu1 %v10325_v55  ;;  %18293 = vmatpush3.msra.mxu0 %v10566_v19 }
0x2008   :  { %18230 = vmatprep.subr.mxu1 %v18201_v60  ;;  %18294 = vmatprep.subr.mxu0 %v18265_v38 }
0x2009   :  { %18231 = vmatpush3.msra.mxu1 %v18201_v60  ;;  %18295 = vmatpush3.msra.mxu0 %v18265_v38 }
0x200a   :  { %18232 = vmatprep.subr.mxu1 %v10315_v27  ;;  %18296 = vmatprep.subr.mxu0 %v10556_v40 }
0x200b   :  { %18233 = vmatpush3.msra.mxu1 %v10315_v27  ;;  %18297 = vmatpush3.msra.mxu0 %v10556_v40 }
0x200c   :  { %18234 = vmatprep.subr.mxu1 %v22796_v45  ;;  %18298 = vmatprep.subr.mxu0 %v22798_v16 }
0x200d   :  { %18235 = vmatpush3.msra.mxu1 %v22796_v45  ;;  %18299 = vmatpush3.msra.mxu0 %v22798_v16 }
0x200e   :  { %18236 = vmatprep.subr.mxu1 %v22800_v53  ;;  %18300 = vmatprep.subr.mxu0 %v22802_v32 }
0x200f   :  { %18237 = vmatpush3.msra.mxu1 %v22800_v53  ;;  %18301 = vmatpush3.msra.mxu0 %v22802_v32 }
0x2010   :  { %18238 = vmatprep.subr.mxu1 %v22788_v54  ;;  %18302 = vmatprep.subr.mxu0 %v22790_v33 }
0x2011   :  { %18239 = vmatpush3.msra.mxu1 %v22788_v54  ;;  %18303 = vmatpush3.msra.mxu0 %v22790_v33 }
0x2012   :  { %18240 = vmatprep.subr.mxu1 %v22792_v24  ;;  %18304 = vmatprep.subr.mxu0 %v22794_v13 }
0x2013   :  { %18241 = vmatpush3.msra.mxu1 %v22792_v24  ;;  %18305 = vmatpush3.msra.mxu0 %v22794_v13 }
0x2014   :  { %18242 = vmatprep.subr.mxu1 %v22780_v58  ;;  %18306 = vmatprep.subr.mxu0 %v22782_v62 }
0x2015   :  { %18243 = vmatpush3.msra.mxu1 %v22780_v58  ;;  %18307 = vmatpush3.msra.mxu0 %v22782_v62 }
0x2016   :  { %18244 = vmatprep.subr.mxu1 %v22784_v2  ;;  %18308 = vmatprep.subr.mxu0 %v22786_v59 }
0x2017   :  { %18245 = vmatpush3.msra.mxu1 %v22784_v2  ;;  %18309 = vmatpush3.msra.mxu0 %v22786_v59 }
0x2018   :  { %18247 = vmatmul.mubr.f32.vlgmr.msra.gmra.mxu1 %v14688_v39  ;;  %18311 = vmatmul.mubr.f32.vlgmr.msra.gmra.mxu0 %v14709_v3 }
0x2019   :  { %18249 = vmatprep.mubr.f32.mxu1 %v14689_v43  ;;  %18313 = vmatprep.mubr.f32.mxu0 %v14710_v11 }
0x201a   :  { %18316 = vmatprep.subr.mxu1 %v14712_v47  ;;  %18380 = vmatprep.subr.mxu0 %v14733_v35 }
0x201b   :  { %18317 = vmatpush3.msra.mxu1 %v14712_v47  ;;  %18381 = vmatpush3.msra.mxu0 %v14733_v35 }
0x201c   :  { %18250 = vmatmul.mubr.f32.gmra.mxu1 %v14690_v48  ;;  %18314 = vmatmul.mubr.f32.gmra.mxu0 %v14711_v57 }
0x201d   :  { %18318 = vmatprep.mubr.msk.f32.mxu1 %vm7117_vm2, %v22503_v41  ;;  %18382 = vmatprep.mubr.msk.f32.mxu0 %vm7117_vm2, %v22503_v41 }
0x2020   :  { %18319 = vmatmul.mubr.msk.f32.vlgmr.msra.gmra.mxu1 %vm7117_vm2, %v22506_v6  ;;  %18383 = vmatmul.mubr.msk.f32.vlgmr.msra.gmra.mxu0 %vm7117_vm2, %v22506_v6 }
0x2021   :  { %18321 = vmatprep.mubr.msk.f32.mxu1 %vm7117_vm2, %v22523_v14  ;;  %18385 = vmatprep.mubr.msk.f32.mxu0 %vm7117_vm2, %v22523_v14 }
0x2024   :  { %18322 = vmatmul.mubr.msk.f32.gmra.mxu1 %vm7117_vm2, %v22520_v26  ;;  %18386 = vmatmul.mubr.msk.f32.gmra.mxu0 %vm7117_vm2, %v22520_v26 }
0x2025   :  { %18324 = vmatprep.mubr.msk.f32.mxu1 %vm7117_vm2, %v22541_v51  ;;  %18388 = vmatprep.mubr.msk.f32.mxu0 %vm7117_vm2, %v22541_v51 }
0x2028   :  { %18325 = vmatmul.mubr.msk.f32.gmra.mxu1 %vm7117_vm2, %v22534_v36  ;;  %18389 = vmatmul.mubr.msk.f32.gmra.mxu0 %vm7117_vm2, %v22534_v36 }
0x2029   :  { %18327 = vmatprep.mubr.msk.f32.mxu1 %vm7117_vm2, %v22554_v28  ;;  %18391 = vmatprep.mubr.msk.f32.mxu0 %vm7117_vm2, %v22554_v28 }
0x202c   :  { %18328 = vmatmul.mubr.msk.f32.gmra.mxu1 %vm7117_vm2, %v22548_v7  ;;  %18392 = vmatmul.mubr.msk.f32.gmra.mxu0 %vm7117_vm2, %v22548_v7 }
0x202d   :  { %18330 = vmatprep.mubr.msk.f32.mxu1 %vm7117_vm2, %v22557_v52  ;;  %18394 = vmatprep.mubr.msk.f32.mxu0 %vm7117_vm2, %v22557_v52 }
0x2030   :  { %18331 = vmatmul.mubr.msk.f32.gmra.mxu1 %vm7117_vm2, %v22572_v17  ;;  %18395 = vmatmul.mubr.msk.f32.gmra.mxu0 %vm7117_vm2, %v22572_v17 }
0x2031   :  { %18333 = vmatprep.mubr.msk.f32.mxu1 %vm7117_vm2, %v22575_v61  ;;  %18397 = vmatprep.mubr.msk.f32.mxu0 %vm7117_vm2, %v22575_v61 }
0x2034   :  { %18334 = vmatmul.mubr.msk.f32.gmra.mxu1 %vm7117_vm2, %v22586_v18  ;;  %18398 = vmatmul.mubr.msk.f32.gmra.mxu0 %vm7117_vm2, %v22586_v18 }
0x2035   :  { %18336 = vmatprep.mubr.msk.f32.mxu1 %vm7117_vm2, %v22589_v4  ;;  %18400 = vmatprep.mubr.msk.f32.mxu0 %vm7117_vm2, %v22589_v4 }
0x2038   :  { %18337 = vmatmul.mubr.msk.f32.gmra.mxu1 %vm7117_vm2, %v22600_v21  ;;  %18401 = vmatmul.mubr.msk.f32.gmra.mxu0 %vm7117_vm2, %v22600_v21 }
0x2039   :  { %18339 = vmatprep.mubr.msk.f32.mxu1 %vm7117_vm2, %v22603_v44  ;;  %18403 = vmatprep.mubr.msk.f32.mxu0 %vm7117_vm2, %v22603_v44 }
0x203c   :  { %18340 = vmatmul.mubr.msk.f32.gmra.mxu1 %vm7117_vm2, %v22614_v31  ;;  %18404 = vmatmul.mubr.msk.f32.gmra.mxu0 %vm7117_vm2, %v22614_v31 }
0x203d   :  { %18374 = vmatprep.mubr.f32.mxu1 %v14729_v12  ;;  %18438 = vmatprep.mubr.f32.mxu0 %v14750_v15 }
0x20d8   :  { %v18248_v58 = vpop.f32.mrf.mxu1  ;;  %v18312_v62 = vpop.f32.mrf.mxu0 }
0x20d9   :  { %v10455_v2 = vadd.f32 %v18248_v58, %v22768_v56  ;;  %v14730_v58 = vld [vmem:[%s23848_s16 + $0x88] sm:$0xff] }
0x20da   :  { %v22923_v59 = vpop.f32.mrf.mxu1  ;;  %v22925_v54 = vpop.f32.mrf.mxu0 }
0x20db   :  { %v22927_v33 = vadd.f32 %v18312_v62, %v10455_v2  ;;  %v14751_v62 = vld [vmem:[%s23848_s16 + $0xa8] sm:$0xff]  ;;  %v14731_v2 = vld [vmem:[%s23848_s16 + $0x90] sm:$0xff] }
0x20dc   :  { %v18251_v24 = vpop.f32.mrf.mxu1  ;;  %v18315_v13 = vpop.f32.mrf.mxu0 }
0x20dd   :  { %v10457_v45 = vadd.f32 %v18251_v24, %v22774_v30  ;;  %v14752_v24 = vld [vmem:[%s23848_s16 + $0xb0] sm:$0xff] }
0x20de   :  { %v22930_v16 = vpop.f32.mrf.mxu1  ;;  %v22932_v53 = vpop.f32.mrf.mxu0 }
0x20df   :  { %v22934_v32 = vadd.f32 %v18315_v13, %v10457_v45  ;;  %v14754_v13 = vld [vmem:[%s23847_s17 + $0x30] sm:$0xff]  ;;  %v14775_v45 = vld [vmem:[%s23847_s17 + $0x38] sm:$0xff] }
0x20e0   :  { %v22936_v60 = vpop.f32.mrf.mxu1  ;;  %v22938_v38 = vpop.f32.mrf.mxu0 }
0x20e2   :  { %v22940_v56 = vpop.f32.mrf.mxu1  ;;  %v22942_v27 = vpop.f32.mrf.mxu0 }
0x20e4   :  { %v22944_v40 = vpop.f32.mrf.mxu1  ;;  %v22946_v29 = vpop.f32.mrf.mxu0 }
0x20e6   :  { %v22948_v50 = vpop.f32.mrf.mxu1  ;;  %v22950_v30 = vpop.f32.mrf.mxu0 }
0x20e8   :  { %v22952_v55 = vpop.f32.mrf.mxu1  ;;  %v22954_v19 = vpop.f32.mrf.mxu0 }
0x20ea   :  { %v22956_v37 = vpop.f32.mrf.mxu1  ;;  %v22958_v5 = vpop.f32.mrf.mxu0 }
0x20ec   :  { %v18329_v20 = vpop.f32.mrf.mxu1  ;;  %v18393_v10 = vpop.f32.mrf.mxu0 }
0x20ee   :  { %v10797_v8 = vpop.f32.mrf.mxu1  ;;  %v11038_v0 = vpop.f32.mrf.mxu0 }
0x20f0   :  { %v18332_v1 = vpop.f32.mrf.mxu1  ;;  %v18396_v23 = vpop.f32.mrf.mxu0 }
0x20f2   :  { %v10807_v49 = vpop.f32.mrf.mxu1  ;;  %v11048_v22 = vpop.f32.mrf.mxu0 }
0x20f4   :  { %v18335_v25 = vpop.f32.mrf.mxu1  ;;  %v18399_v46 = vpop.f32.mrf.mxu0 }
0x20f6   :  { %v10817_v39 = vpop.f32.mrf.mxu1  ;;  %v11058_v3 = vpop.f32.mrf.mxu0 }
0x20f8   :  { %v18338_v43 = vpop.f32.mrf.mxu1  ;;  %v18402_v11 = vpop.f32.mrf.mxu0 }
0x20fa   :  { %v10827_v47 = vpop.f32.mrf.mxu1  ;;  %v11068_v35 = vpop.f32.mrf.mxu0 }
0x20fc   :  { %v18341_v48 = vpop.f32.mrf.mxu1  ;;  %v18405_v57 = vpop.f32.mrf.mxu0 }
0x20fd   :  { %18342 = vmatprep.subr.mxu1 %v18341_v48  ;;  %18406 = vmatprep.subr.mxu0 %v18405_v57 }
0x20fe   :  { %v10837_v12 = vpop.f32.mrf.mxu1  ;;  %18343 = vmatpush3.msra.mxu1 %v18341_v48  ;;  %v11078_v15 = vpop.f32.mrf.mxu0  ;;  %18407 = vmatpush3.msra.mxu0 %v18405_v57 }
0x20ff   :  { %18344 = vmatprep.subr.mxu1 %v10837_v12  ;;  %18408 = vmatprep.subr.mxu0 %v11078_v15 }
0x2100   :  { %18345 = vmatpush3.msra.mxu1 %v10837_v12  ;;  %18409 = vmatpush3.msra.mxu0 %v11078_v15 }
0x2101   :  { %18346 = vmatprep.subr.mxu1 %v18338_v43  ;;  %18410 = vmatprep.subr.mxu0 %v18402_v11 }
0x2102   :  { %18347 = vmatpush3.msra.mxu1 %v18338_v43  ;;  %18411 = vmatpush3.msra.mxu0 %v18402_v11 }
0x2103   :  { %18348 = vmatprep.subr.mxu1 %v10827_v47  ;;  %18412 = vmatprep.subr.mxu0 %v11068_v35 }
0x2104   :  { %18349 = vmatpush3.msra.mxu1 %v10827_v47  ;;  %18413 = vmatpush3.msra.mxu0 %v11068_v35 }
0x2105   :  { %18350 = vmatprep.subr.mxu1 %v18335_v25  ;;  %18414 = vmatprep.subr.mxu0 %v18399_v46 }
0x2106   :  { %18351 = vmatpush3.msra.mxu1 %v18335_v25  ;;  %18415 = vmatpush3.msra.mxu0 %v18399_v46 }
0x2107   :  { %18352 = vmatprep.subr.mxu1 %v10817_v39  ;;  %18416 = vmatprep.subr.mxu0 %v11058_v3 }
0x2108   :  { %18353 = vmatpush3.msra.mxu1 %v10817_v39  ;;  %18417 = vmatpush3.msra.mxu0 %v11058_v3 }
0x2109   :  { %18354 = vmatprep.subr.mxu1 %v18332_v1  ;;  %18418 = vmatprep.subr.mxu0 %v18396_v23 }
0x210a   :  { %18355 = vmatpush3.msra.mxu1 %v18332_v1  ;;  %18419 = vmatpush3.msra.mxu0 %v18396_v23 }
0x210b   :  { %18356 = vmatprep.subr.mxu1 %v10807_v49  ;;  %18420 = vmatprep.subr.mxu0 %v11048_v22 }
0x210c   :  { %18357 = vmatpush3.msra.mxu1 %v10807_v49  ;;  %18421 = vmatpush3.msra.mxu0 %v11048_v22 }
0x210d   :  { %18358 = vmatprep.subr.mxu1 %v18329_v20  ;;  %18422 = vmatprep.subr.mxu0 %v18393_v10 }
0x210e   :  { %18359 = vmatpush3.msra.mxu1 %v18329_v20  ;;  %18423 = vmatpush3.msra.mxu0 %v18393_v10 }
0x210f   :  { %18360 = vmatprep.subr.mxu1 %v10797_v8  ;;  %18424 = vmatprep.subr.mxu0 %v11038_v0 }
0x2110   :  { %18361 = vmatpush3.msra.mxu1 %v10797_v8  ;;  %18425 = vmatpush3.msra.mxu0 %v11038_v0 }
0x2111   :  { %18362 = vmatprep.subr.mxu1 %v22952_v55  ;;  %18426 = vmatprep.subr.mxu0 %v22954_v19 }
0x2112   :  { %18363 = vmatpush3.msra.mxu1 %v22952_v55  ;;  %18427 = vmatpush3.msra.mxu0 %v22954_v19 }
0x2113   :  { %18364 = vmatprep.subr.mxu1 %v22956_v37  ;;  %18428 = vmatprep.subr.mxu0 %v22958_v5 }
0x2114   :  { %18365 = vmatpush3.msra.mxu1 %v22956_v37  ;;  %18429 = vmatpush3.msra.mxu0 %v22958_v5 }
0x2115   :  { %18366 = vmatprep.subr.mxu1 %v22944_v40  ;;  %18430 = vmatprep.subr.mxu0 %v22946_v29 }
0x2116   :  { %18367 = vmatpush3.msra.mxu1 %v22944_v40  ;;  %18431 = vmatpush3.msra.mxu0 %v22946_v29  ;;  %v10199_v40 = vadd.f32 %v22772_v42, %v22770_v34 }
0x2117   :  { %18368 = vmatprep.subr.mxu1 %v22948_v50  ;;  %18432 = vmatprep.subr.mxu0 %v22950_v30 }
0x2118   :  { %18369 = vmatpush3.msra.mxu1 %v22948_v50  ;;  %18433 = vmatpush3.msra.mxu0 %v22950_v30  ;;  %v10454_v29 = vadd.f32 %v22923_v59, %v10199_v40  ;;  %v10209_v50 = vadd.f32 %v22778_v9, %v22776_v63 }
0x2119   :  { %18370 = vmatprep.subr.mxu1 %v22936_v60  ;;  %18434 = vmatprep.subr.mxu0 %v22938_v38 }
0x211a   :  { %18371 = vmatpush3.msra.mxu1 %v22936_v60  ;;  %18435 = vmatpush3.msra.mxu0 %v22938_v38  ;;  %v14732_v60 = vld [vmem:[%s23848_s16 + $0x98] sm:$0xff]  ;;  %v10695_v19 = vadd.f32 %v22925_v54, %v10454_v29  ;;  %v10456_v37 = vadd.f32 %v22930_v16, %v10209_v50 }
0x211b   :  { %18372 = vmatprep.subr.mxu1 %v22940_v56  ;;  %18436 = vmatprep.subr.mxu0 %v22942_v27  ;;  %v14753_v38 = vld [vmem:[%s23848_s16 + $0xb8] sm:$0xff] }
0x211c   :  { %18373 = vmatpush3.msra.mxu1 %v22940_v56  ;;  %18437 = vmatpush3.msra.mxu0 %v22942_v27  ;;  %v14771_v56 = vld [vmem:[%s23848_s16 + $0xc0] sm:$0xff]  ;;  %v10697_v42 = vadd.f32 %v22932_v53, %v10456_v37  ;;  %v14772_v37 = vld [vmem:[%s23848_s16 + $0xc8] sm:$0xff] }
0x211d   :  { %18375 = vmatmul.mubr.f32.vlgmr.msra.gmra.mxu1 %v14730_v58  ;;  %18439 = vmatmul.mubr.f32.vlgmr.msra.gmra.mxu0 %v14751_v62  ;;  %v14792_v27 = vld [vmem:[%s23848_s16 + $0xe0] sm:$0xff] }
0x211e   :  { %18377 = vmatprep.mubr.f32.mxu1 %v14731_v2  ;;  %18441 = vmatprep.mubr.f32.mxu0 %v14752_v24 }
0x211f   :  { %18444 = vmatprep.subr.mxu1 %v14754_v13  ;;  %18508 = vmatprep.subr.mxu0 %v14775_v45 }
0x2120   :  { %18445 = vmatpush3.msra.mxu1 %v14754_v13  ;;  %18509 = vmatpush3.msra.mxu0 %v14775_v45 }
0x2121   :  { %18378 = vmatmul.mubr.f32.gmra.mxu1 %v14732_v60  ;;  %18442 = vmatmul.mubr.f32.gmra.mxu0 %v14753_v38 }
0x2122   :  { %18446 = vmatprep.mubr.msk.f32.mxu1 %vm7117_vm2, %v22503_v41  ;;  %18510 = vmatprep.mubr.msk.f32.mxu0 %vm7117_vm2, %v22503_v41 }
0x2125   :  { %18447 = vmatmul.mubr.msk.f32.vlgmr.msra.gmra.mxu1 %vm7117_vm2, %v22506_v6  ;;  %18511 = vmatmul.mubr.msk.f32.vlgmr.msra.gmra.mxu0 %vm7117_vm2, %v22506_v6 }
0x2126   :  { %18449 = vmatprep.mubr.msk.f32.mxu1 %vm7117_vm2, %v22523_v14  ;;  %18513 = vmatprep.mubr.msk.f32.mxu0 %vm7117_vm2, %v22523_v14 }
0x2129   :  { %18450 = vmatmul.mubr.msk.f32.gmra.mxu1 %vm7117_vm2, %v22520_v26  ;;  %18514 = vmatmul.mubr.msk.f32.gmra.mxu0 %vm7117_vm2, %v22520_v26 }
0x212a   :  { %18452 = vmatprep.mubr.msk.f32.mxu1 %vm7117_vm2, %v22541_v51  ;;  %18516 = vmatprep.mubr.msk.f32.mxu0 %vm7117_vm2, %v22541_v51 }
0x212d   :  { %18453 = vmatmul.mubr.msk.f32.gmra.mxu1 %vm7117_vm2, %v22534_v36  ;;  %18517 = vmatmul.mubr.msk.f32.gmra.mxu0 %vm7117_vm2, %v22534_v36 }
0x212e   :  { %18455 = vmatprep.mubr.msk.f32.mxu1 %vm7117_vm2, %v22554_v28  ;;  %18519 = vmatprep.mubr.msk.f32.mxu0 %vm7117_vm2, %v22554_v28 }
0x2131   :  { %18456 = vmatmul.mubr.msk.f32.gmra.mxu1 %vm7117_vm2, %v22548_v7  ;;  %18520 = vmatmul.mubr.msk.f32.gmra.mxu0 %vm7117_vm2, %v22548_v7 }
0x2132   :  { %18458 = vmatprep.mubr.msk.f32.mxu1 %vm7117_vm2, %v22557_v52  ;;  %18522 = vmatprep.mubr.msk.f32.mxu0 %vm7117_vm2, %v22557_v52 }
0x2135   :  { %18459 = vmatmul.mubr.msk.f32.gmra.mxu1 %vm7117_vm2, %v22572_v17  ;;  %18523 = vmatmul.mubr.msk.f32.gmra.mxu0 %vm7117_vm2, %v22572_v17 }
0x2136   :  { %18461 = vmatprep.mubr.msk.f32.mxu1 %vm7117_vm2, %v22575_v61  ;;  %18525 = vmatprep.mubr.msk.f32.mxu0 %vm7117_vm2, %v22575_v61 }
0x2139   :  { %18462 = vmatmul.mubr.msk.f32.gmra.mxu1 %vm7117_vm2, %v22586_v18  ;;  %18526 = vmatmul.mubr.msk.f32.gmra.mxu0 %vm7117_vm2, %v22586_v18 }
0x213a   :  { %18464 = vmatprep.mubr.msk.f32.mxu1 %vm7117_vm2, %v22589_v4  ;;  %18528 = vmatprep.mubr.msk.f32.mxu0 %vm7117_vm2, %v22589_v4 }
0x213d   :  { %18465 = vmatmul.mubr.msk.f32.gmra.mxu1 %vm7117_vm2, %v22600_v21  ;;  %18529 = vmatmul.mubr.msk.f32.gmra.mxu0 %vm7117_vm2, %v22600_v21 }
0x213e   :  { %18467 = vmatprep.mubr.msk.f32.mxu1 %vm7117_vm2, %v22603_v44  ;;  %18531 = vmatprep.mubr.msk.f32.mxu0 %vm7117_vm2, %v22603_v44 }
0x2141   :  { %18468 = vmatmul.mubr.msk.f32.gmra.mxu1 %vm7117_vm2, %v22614_v31  ;;  %18532 = vmatmul.mubr.msk.f32.gmra.mxu0 %vm7117_vm2, %v22614_v31 }
0x2142   :  { %18502 = vmatprep.mubr.f32.mxu1 %v14771_v56  ;;  %18566 = vmatprep.mubr.f32.mxu0 %v14792_v27 }
0x21dd   :  { %v18376_v30 = vpop.f32.mrf.mxu1  ;;  %v18440_v55 = vpop.f32.mrf.mxu0 }
0x21de   :  { %v10937_v5 = vadd.f32 %v18376_v30, %v22927_v33 }
0x21df   :  { %v10917_v20 = vpop.f32.mrf.mxu1  ;;  %v11158_v10 = vpop.f32.mrf.mxu0 }
0x21e0   :  { %v23086_v8 = vadd.f32 %v18440_v55, %v10937_v5  ;;  %v10936_v0 = vadd.f32 %v10917_v20, %v10695_v19  ;;  %v14793_v5 = vld [vmem:[%s23848_s16 + $0xe8] sm:$0xff]  ;;  %v14773_v20 = vld [vmem:[%s23848_s16 + $0xd0] sm:$0xff] }
0x21e1   :  { %v18379_v1 = vpop.f32.mrf.mxu1  ;;  %v18443_v34 = vpop.f32.mrf.mxu0 }
0x21e2   :  { %v23089_v59 = vadd.f32 %v11158_v10, %v10936_v0  ;;  %v10939_v63 = vadd.f32 %v18379_v1, %v22934_v32  ;;  %v14794_v10 = vld [vmem:[%s23848_s16 + $0xf0] sm:$0xff]  ;;  %v14796_v0 = vld [vmem:[%s23847_s17 + $0x40] sm:$0xff]  ;;  %v14817_v1 = vld [vmem:[%s23847_s17 + $0x48] sm:$0xff] }
0x21e3   :  { %v10927_v9 = vpop.f32.mrf.mxu1  ;;  %v11168_v23 = vpop.f32.mrf.mxu0 }
0x21e4   :  { %v23092_v54 = vadd.f32 %v18443_v34, %v10939_v63  ;;  %v10938_v16 = vadd.f32 %v10927_v9, %v10697_v42  ;;  %v14774_v34 = vld [vmem:[%s23848_s16 + $0xd8] sm:$0xff]  ;;  %v14813_v63 = vld [vmem:[%s23848_s16 + $0x100] sm:$0xff] }
0x21e5   :  { %v23094_v49 = vpop.f32.mrf.mxu1  ;;  %v23096_v33 = vpop.f32.mrf.mxu0  ;;  %v14795_v42 = vld [vmem:[%s23848_s16 + $0xf8] sm:$0xff]  ;;  %v14834_v9 = vld [vmem:[%s23848_s16 + $0x120] sm:$0xff] }
0x21e6   :  { %v23098_v22 = vadd.f32 %v11168_v23, %v10938_v16 }
0x21e7   :  { %v23100_v25 = vpop.f32.mrf.mxu1  ;;  %v23102_v46 = vpop.f32.mrf.mxu0 }
0x21e9   :  { %v23104_v53 = vpop.f32.mrf.mxu1  ;;  %v23106_v39 = vpop.f32.mrf.mxu0 }
0x21eb   :  { %v23108_v32 = vpop.f32.mrf.mxu1  ;;  %v23110_v3 = vpop.f32.mrf.mxu0 }
0x21ed   :  { %v23112_v43 = vpop.f32.mrf.mxu1  ;;  %v23114_v11 = vpop.f32.mrf.mxu0 }
0x21ef   :  { %v23116_v47 = vpop.f32.mrf.mxu1  ;;  %v23118_v35 = vpop.f32.mrf.mxu0 }
0x21f1   :  { %v18457_v48 = vpop.f32.mrf.mxu1  ;;  %v18521_v57 = vpop.f32.mrf.mxu0 }
0x21f3   :  { %v11279_v12 = vpop.f32.mrf.mxu1  ;;  %v11520_v15 = vpop.f32.mrf.mxu0 }
0x21f5   :  { %v18460_v58 = vpop.f32.mrf.mxu1  ;;  %v18524_v62 = vpop.f32.mrf.mxu0 }
0x21f7   :  { %v11289_v2 = vpop.f32.mrf.mxu1  ;;  %v11530_v24 = vpop.f32.mrf.mxu0 }
0x21f9   :  { %v18463_v13 = vpop.f32.mrf.mxu1  ;;  %v18527_v45 = vpop.f32.mrf.mxu0 }
0x21fb   :  { %v11299_v60 = vpop.f32.mrf.mxu1  ;;  %v11540_v38 = vpop.f32.mrf.mxu0 }
0x21fd   :  { %v18466_v56 = vpop.f32.mrf.mxu1  ;;  %v18530_v27 = vpop.f32.mrf.mxu0 }
0x21ff   :  { %v11309_v40 = vpop.f32.mrf.mxu1  ;;  %v11550_v29 = vpop.f32.mrf.mxu0 }
0x2201   :  { %v18469_v50 = vpop.f32.mrf.mxu1  ;;  %v18533_v30 = vpop.f32.mrf.mxu0 }
0x2202   :  { %18470 = vmatprep.subr.mxu1 %v18469_v50  ;;  %18534 = vmatprep.subr.mxu0 %v18533_v30 }
0x2203   :  { %v11319_v55 = vpop.f32.mrf.mxu1  ;;  %18471 = vmatpush3.msra.mxu1 %v18469_v50  ;;  %v11560_v19 = vpop.f32.mrf.mxu0  ;;  %18535 = vmatpush3.msra.mxu0 %v18533_v30 }
0x2204   :  { %18472 = vmatprep.subr.mxu1 %v11319_v55  ;;  %18536 = vmatprep.subr.mxu0 %v11560_v19 }
0x2205   :  { %18473 = vmatpush3.msra.mxu1 %v11319_v55  ;;  %18537 = vmatpush3.msra.mxu0 %v11560_v19 }
0x2206   :  { %18474 = vmatprep.subr.mxu1 %v18466_v56  ;;  %18538 = vmatprep.subr.mxu0 %v18530_v27 }
0x2207   :  { %18475 = vmatpush3.msra.mxu1 %v18466_v56  ;;  %18539 = vmatpush3.msra.mxu0 %v18530_v27 }
0x2208   :  { %18476 = vmatprep.subr.mxu1 %v11309_v40  ;;  %18540 = vmatprep.subr.mxu0 %v11550_v29 }
0x2209   :  { %18477 = vmatpush3.msra.mxu1 %v11309_v40  ;;  %18541 = vmatpush3.msra.mxu0 %v11550_v29 }
0x220a   :  { %18478 = vmatprep.subr.mxu1 %v18463_v13  ;;  %18542 = vmatprep.subr.mxu0 %v18527_v45 }
0x220b   :  { %18479 = vmatpush3.msra.mxu1 %v18463_v13  ;;  %18543 = vmatpush3.msra.mxu0 %v18527_v45 }
0x220c   :  { %18480 = vmatprep.subr.mxu1 %v11299_v60  ;;  %18544 = vmatprep.subr.mxu0 %v11540_v38 }
0x220d   :  { %18481 = vmatpush3.msra.mxu1 %v11299_v60  ;;  %18545 = vmatpush3.msra.mxu0 %v11540_v38 }
0x220e   :  { %18482 = vmatprep.subr.mxu1 %v18460_v58  ;;  %18546 = vmatprep.subr.mxu0 %v18524_v62 }
0x220f   :  { %18483 = vmatpush3.msra.mxu1 %v18460_v58  ;;  %18547 = vmatpush3.msra.mxu0 %v18524_v62 }
0x2210   :  { %18484 = vmatprep.subr.mxu1 %v11289_v2  ;;  %18548 = vmatprep.subr.mxu0 %v11530_v24 }
0x2211   :  { %18485 = vmatpush3.msra.mxu1 %v11289_v2  ;;  %18549 = vmatpush3.msra.mxu0 %v11530_v24 }
0x2212   :  { %18486 = vmatprep.subr.mxu1 %v18457_v48  ;;  %18550 = vmatprep.subr.mxu0 %v18521_v57 }
0x2213   :  { %18487 = vmatpush3.msra.mxu1 %v18457_v48  ;;  %18551 = vmatpush3.msra.mxu0 %v18521_v57 }
0x2214   :  { %18488 = vmatprep.subr.mxu1 %v11279_v12  ;;  %18552 = vmatprep.subr.mxu0 %v11520_v15 }
0x2215   :  { %18489 = vmatpush3.msra.mxu1 %v11279_v12  ;;  %18553 = vmatpush3.msra.mxu0 %v11520_v15 }
0x2216   :  { %18490 = vmatprep.subr.mxu1 %v23112_v43  ;;  %18554 = vmatprep.subr.mxu0 %v23114_v11 }
0x2217   :  { %18491 = vmatpush3.msra.mxu1 %v23112_v43  ;;  %18555 = vmatpush3.msra.mxu0 %v23114_v11 }
0x2218   :  { %18492 = vmatprep.subr.mxu1 %v23116_v47  ;;  %18556 = vmatprep.subr.mxu0 %v23118_v35 }
0x2219   :  { %18493 = vmatpush3.msra.mxu1 %v23116_v47  ;;  %18557 = vmatpush3.msra.mxu0 %v23118_v35 }
0x221a   :  { %18494 = vmatprep.subr.mxu1 %v23104_v53  ;;  %18558 = vmatprep.subr.mxu0 %v23106_v39 }
0x221b   :  { %18495 = vmatpush3.msra.mxu1 %v23104_v53  ;;  %18559 = vmatpush3.msra.mxu0 %v23106_v39 }
0x221c   :  { %18496 = vmatprep.subr.mxu1 %v23108_v32  ;;  %18560 = vmatprep.subr.mxu0 %v23110_v3 }
0x221d   :  { %18497 = vmatpush3.msra.mxu1 %v23108_v32  ;;  %18561 = vmatpush3.msra.mxu0 %v23110_v3 }
0x221e   :  { %18498 = vmatprep.subr.mxu1 %v23094_v49  ;;  %18562 = vmatprep.subr.mxu0 %v23096_v33 }
0x221f   :  { %18499 = vmatpush3.msra.mxu1 %v23094_v49  ;;  %18563 = vmatpush3.msra.mxu0 %v23096_v33 }
0x2220   :  { %18500 = vmatprep.subr.mxu1 %v23100_v25  ;;  %18564 = vmatprep.subr.mxu0 %v23102_v46 }
0x2221   :  { %18501 = vmatpush3.msra.mxu1 %v23100_v25  ;;  %18565 = vmatpush3.msra.mxu0 %v23102_v46 }
0x2222   :  { %18503 = vmatmul.mubr.f32.vlgmr.msra.gmra.mxu1 %v14772_v37  ;;  %18567 = vmatmul.mubr.f32.vlgmr.msra.gmra.mxu0 %v14793_v5 }
0x2223   :  { %18505 = vmatprep.mubr.f32.mxu1 %v14773_v20  ;;  %18569 = vmatprep.mubr.f32.mxu0 %v14794_v10 }
0x2224   :  { %18572 = vmatprep.subr.mxu1 %v14796_v0  ;;  %18636 = vmatprep.subr.mxu0 %v14817_v1 }
0x2225   :  { %18573 = vmatpush3.msra.mxu1 %v14796_v0  ;;  %18637 = vmatpush3.msra.mxu0 %v14817_v1 }
0x2226   :  { %18506 = vmatmul.mubr.f32.gmra.mxu1 %v14774_v34  ;;  %18570 = vmatmul.mubr.f32.gmra.mxu0 %v14795_v42 }
0x2227   :  { %18574 = vmatprep.mubr.msk.f32.mxu1 %vm7117_vm2, %v22503_v41  ;;  %18638 = vmatprep.mubr.msk.f32.mxu0 %vm7117_vm2, %v22503_v41 }
0x222a   :  { %18575 = vmatmul.mubr.msk.f32.vlgmr.msra.gmra.mxu1 %vm7117_vm2, %v22506_v6  ;;  %18639 = vmatmul.mubr.msk.f32.vlgmr.msra.gmra.mxu0 %vm7117_vm2, %v22506_v6 }
0x222b   :  { %18577 = vmatprep.mubr.msk.f32.mxu1 %vm7117_vm2, %v22523_v14  ;;  %18641 = vmatprep.mubr.msk.f32.mxu0 %vm7117_vm2, %v22523_v14 }
0x222e   :  { %18578 = vmatmul.mubr.msk.f32.gmra.mxu1 %vm7117_vm2, %v22520_v26  ;;  %18642 = vmatmul.mubr.msk.f32.gmra.mxu0 %vm7117_vm2, %v22520_v26 }
0x222f   :  { %18580 = vmatprep.mubr.msk.f32.mxu1 %vm7117_vm2, %v22541_v51  ;;  %18644 = vmatprep.mubr.msk.f32.mxu0 %vm7117_vm2, %v22541_v51 }
0x2232   :  { %18581 = vmatmul.mubr.msk.f32.gmra.mxu1 %vm7117_vm2, %v22534_v36  ;;  %18645 = vmatmul.mubr.msk.f32.gmra.mxu0 %vm7117_vm2, %v22534_v36 }
0x2233   :  { %18583 = vmatprep.mubr.msk.f32.mxu1 %vm7117_vm2, %v22554_v28  ;;  %18647 = vmatprep.mubr.msk.f32.mxu0 %vm7117_vm2, %v22554_v28 }
0x2236   :  { %18584 = vmatmul.mubr.msk.f32.gmra.mxu1 %vm7117_vm2, %v22548_v7  ;;  %18648 = vmatmul.mubr.msk.f32.gmra.mxu0 %vm7117_vm2, %v22548_v7 }
0x2237   :  { %18586 = vmatprep.mubr.msk.f32.mxu1 %vm7117_vm2, %v22557_v52  ;;  %18650 = vmatprep.mubr.msk.f32.mxu0 %vm7117_vm2, %v22557_v52 }
0x223a   :  { %18587 = vmatmul.mubr.msk.f32.gmra.mxu1 %vm7117_vm2, %v22572_v17  ;;  %18651 = vmatmul.mubr.msk.f32.gmra.mxu0 %vm7117_vm2, %v22572_v17 }
0x223b   :  { %18589 = vmatprep.mubr.msk.f32.mxu1 %vm7117_vm2, %v22575_v61  ;;  %18653 = vmatprep.mubr.msk.f32.mxu0 %vm7117_vm2, %v22575_v61 }
0x223e   :  { %18590 = vmatmul.mubr.msk.f32.gmra.mxu1 %vm7117_vm2, %v22586_v18  ;;  %18654 = vmatmul.mubr.msk.f32.gmra.mxu0 %vm7117_vm2, %v22586_v18 }
0x223f   :  { %18592 = vmatprep.mubr.msk.f32.mxu1 %vm7117_vm2, %v22589_v4  ;;  %18656 = vmatprep.mubr.msk.f32.mxu0 %vm7117_vm2, %v22589_v4 }
0x2242   :  { %18593 = vmatmul.mubr.msk.f32.gmra.mxu1 %vm7117_vm2, %v22600_v21  ;;  %18657 = vmatmul.mubr.msk.f32.gmra.mxu0 %vm7117_vm2, %v22600_v21 }
0x2243   :  { %18595 = vmatprep.mubr.msk.f32.mxu1 %vm7117_vm2, %v22603_v44  ;;  %18659 = vmatprep.mubr.msk.f32.mxu0 %vm7117_vm2, %v22603_v44 }
0x2246   :  { %18596 = vmatmul.mubr.msk.f32.gmra.mxu1 %vm7117_vm2, %v22614_v31  ;;  %18660 = vmatmul.mubr.msk.f32.gmra.mxu0 %vm7117_vm2, %v22614_v31 }
0x2247   :  { %18630 = vmatprep.mubr.f32.mxu1 %v14813_v63  ;;  %18694 = vmatprep.mubr.f32.mxu0 %v14834_v9 }
0x22e2   :  { %v18504_v23 = vpop.f32.mrf.mxu1  ;;  %v18568_v16 = vpop.f32.mrf.mxu0 }
0x22e3   :  { %v11419_v49 = vadd.f32 %v18504_v23, %v23086_v8  ;;  %v14814_v23 = vld [vmem:[%s23848_s16 + $0x108] sm:$0xff] }
0x22e4   :  { %v11399_v33 = vpop.f32.mrf.mxu1  ;;  %v11640_v25 = vpop.f32.mrf.mxu0 }
0x22e5   :  { %v23239_v46 = vadd.f32 %v18568_v16, %v11419_v49  ;;  %v11418_v53 = vadd.f32 %v11399_v33, %v23089_v59  ;;  %v14835_v16 = vld [vmem:[%s23848_s16 + $0x128] sm:$0xff]  ;;  %v14815_v49 = vld [vmem:[%s23848_s16 + $0x110] sm:$0xff] }
0x22e6   :  { %v18507_v39 = vpop.f32.mrf.mxu1  ;;  %v18571_v32 = vpop.f32.mrf.mxu0  ;;  %v14836_v33 = vld [vmem:[%s23848_s16 + $0x130] sm:$0xff] }
0x22e7   :  { %v23242_v3 = vadd.f32 %v11640_v25, %v11418_v53  ;;  %v11421_v43 = vadd.f32 %v18507_v39, %v23092_v54  ;;  %v14838_v25 = vld [vmem:[%s23847_s17 + $0x50] sm:$0xff]  ;;  %v14859_v53 = vld [vmem:[%s23847_s17 + $0x58] sm:$0xff] }
0x22e8   :  { %v11409_v11 = vpop.f32.mrf.mxu1  ;;  %v11650_v47 = vpop.f32.mrf.mxu0  ;;  %v14816_v39 = vld [vmem:[%s23848_s16 + $0x118] sm:$0xff] }
0x22e9   :  { %v23245_v35 = vadd.f32 %v18571_v32, %v11421_v43  ;;  %v11420_v48 = vadd.f32 %v11409_v11, %v23098_v22  ;;  %v14837_v32 = vld [vmem:[%s23848_s16 + $0x138] sm:$0xff]  ;;  %v14855_v43 = vld [vmem:[%s23848_s16 + $0x140] sm:$0xff] }
0x22ea   :  { %v23248_v57 = vpop.f32.mrf.mxu1  ;;  %v23250_v8 = vpop.f32.mrf.mxu0  ;;  %v14876_v11 = vld [vmem:[%s23848_s16 + $0x160] sm:$0xff] }
0x22eb   :  { %v23252_v12 = vadd.f32 %v11650_v47, %v11420_v48 }
0x22ec   :  { %v23254_v15 = vpop.f32.mrf.mxu1  ;;  %v23256_v59 = vpop.f32.mrf.mxu0 }
0x22ee   :  { %v23258_v58 = vpop.f32.mrf.mxu1  ;;  %v23260_v62 = vpop.f32.mrf.mxu0 }
0x22f0   :  { %v23262_v54 = vpop.f32.mrf.mxu1  ;;  %v23264_v2 = vpop.f32.mrf.mxu0 }
0x22f2   :  { %v23266_v24 = vpop.f32.mrf.mxu1  ;;  %v23268_v22 = vpop.f32.mrf.mxu0 }
0x22f4   :  { %v23270_v13 = vpop.f32.mrf.mxu1  ;;  %v23272_v45 = vpop.f32.mrf.mxu0 }
0x22f6   :  { %v18585_v60 = vpop.f32.mrf.mxu1  ;;  %v18649_v38 = vpop.f32.mrf.mxu0 }
0x22f8   :  { %v11761_v56 = vpop.f32.mrf.mxu1  ;;  %v12002_v27 = vpop.f32.mrf.mxu0 }
0x22fa   :  { %v18588_v40 = vpop.f32.mrf.mxu1  ;;  %v18652_v29 = vpop.f32.mrf.mxu0 }
0x22fc   :  { %v11771_v50 = vpop.f32.mrf.mxu1  ;;  %v12012_v30 = vpop.f32.mrf.mxu0 }
0x22fe   :  { %v18591_v55 = vpop.f32.mrf.mxu1  ;;  %v18655_v19 = vpop.f32.mrf.mxu0 }
0x2300   :  { %v11781_v37 = vpop.f32.mrf.mxu1  ;;  %v12022_v5 = vpop.f32.mrf.mxu0 }
0x2302   :  { %v18594_v20 = vpop.f32.mrf.mxu1  ;;  %v18658_v10 = vpop.f32.mrf.mxu0 }
0x2304   :  { %v11791_v0 = vpop.f32.mrf.mxu1  ;;  %v12032_v1 = vpop.f32.mrf.mxu0 }
0x2306   :  { %v18597_v34 = vpop.f32.mrf.mxu1  ;;  %v18661_v42 = vpop.f32.mrf.mxu0 }
0x2307   :  { %18598 = vmatprep.subr.mxu1 %v18597_v34  ;;  %18662 = vmatprep.subr.mxu0 %v18661_v42 }
0x2308   :  { %v11801_v63 = vpop.f32.mrf.mxu1  ;;  %18599 = vmatpush3.msra.mxu1 %v18597_v34  ;;  %v12042_v9 = vpop.f32.mrf.mxu0  ;;  %18663 = vmatpush3.msra.mxu0 %v18661_v42 }
0x2309   :  { %18600 = vmatprep.subr.mxu1 %v11801_v63  ;;  %18664 = vmatprep.subr.mxu0 %v12042_v9 }
0x230a   :  { %18601 = vmatpush3.msra.mxu1 %v11801_v63  ;;  %18665 = vmatpush3.msra.mxu0 %v12042_v9 }
0x230b   :  { %18602 = vmatprep.subr.mxu1 %v18594_v20  ;;  %18666 = vmatprep.subr.mxu0 %v18658_v10 }
0x230c   :  { %18603 = vmatpush3.msra.mxu1 %v18594_v20  ;;  %18667 = vmatpush3.msra.mxu0 %v18658_v10 }
0x230d   :  { %18604 = vmatprep.subr.mxu1 %v11791_v0  ;;  %18668 = vmatprep.subr.mxu0 %v12032_v1 }
0x230e   :  { %18605 = vmatpush3.msra.mxu1 %v11791_v0  ;;  %18669 = vmatpush3.msra.mxu0 %v12032_v1 }
0x230f   :  { %18606 = vmatprep.subr.mxu1 %v18591_v55  ;;  %18670 = vmatprep.subr.mxu0 %v18655_v19 }
0x2310   :  { %18607 = vmatpush3.msra.mxu1 %v18591_v55  ;;  %18671 = vmatpush3.msra.mxu0 %v18655_v19 }
0x2311   :  { %18608 = vmatprep.subr.mxu1 %v11781_v37  ;;  %18672 = vmatprep.subr.mxu0 %v12022_v5 }
0x2312   :  { %18609 = vmatpush3.msra.mxu1 %v11781_v37  ;;  %18673 = vmatpush3.msra.mxu0 %v12022_v5 }
0x2313   :  { %18610 = vmatprep.subr.mxu1 %v18588_v40  ;;  %18674 = vmatprep.subr.mxu0 %v18652_v29 }
0x2314   :  { %18611 = vmatpush3.msra.mxu1 %v18588_v40  ;;  %18675 = vmatpush3.msra.mxu0 %v18652_v29 }
0x2315   :  { %18612 = vmatprep.subr.mxu1 %v11771_v50  ;;  %18676 = vmatprep.subr.mxu0 %v12012_v30 }
0x2316   :  { %18613 = vmatpush3.msra.mxu1 %v11771_v50  ;;  %18677 = vmatpush3.msra.mxu0 %v12012_v30 }
0x2317   :  { %18614 = vmatprep.subr.mxu1 %v18585_v60  ;;  %18678 = vmatprep.subr.mxu0 %v18649_v38 }
0x2318   :  { %18615 = vmatpush3.msra.mxu1 %v18585_v60  ;;  %18679 = vmatpush3.msra.mxu0 %v18649_v38 }
0x2319   :  { %18616 = vmatprep.subr.mxu1 %v11761_v56  ;;  %18680 = vmatprep.subr.mxu0 %v12002_v27 }
0x231a   :  { %18617 = vmatpush3.msra.mxu1 %v11761_v56  ;;  %18681 = vmatpush3.msra.mxu0 %v12002_v27 }
0x231b   :  { %18618 = vmatprep.subr.mxu1 %v23266_v24  ;;  %18682 = vmatprep.subr.mxu0 %v23268_v22 }
0x231c   :  { %18619 = vmatpush3.msra.mxu1 %v23266_v24  ;;  %18683 = vmatpush3.msra.mxu0 %v23268_v22 }
0x231d   :  { %18620 = vmatprep.subr.mxu1 %v23270_v13  ;;  %18684 = vmatprep.subr.mxu0 %v23272_v45 }
0x231e   :  { %18621 = vmatpush3.msra.mxu1 %v23270_v13  ;;  %18685 = vmatpush3.msra.mxu0 %v23272_v45 }
0x231f   :  { %18622 = vmatprep.subr.mxu1 %v23258_v58  ;;  %18686 = vmatprep.subr.mxu0 %v23260_v62 }
0x2320   :  { %18623 = vmatpush3.msra.mxu1 %v23258_v58  ;;  %18687 = vmatpush3.msra.mxu0 %v23260_v62 }
0x2321   :  { %18624 = vmatprep.subr.mxu1 %v23262_v54  ;;  %18688 = vmatprep.subr.mxu0 %v23264_v2 }
0x2322   :  { %18625 = vmatpush3.msra.mxu1 %v23262_v54  ;;  %18689 = vmatpush3.msra.mxu0 %v23264_v2 }
0x2323   :  { %18626 = vmatprep.subr.mxu1 %v23248_v57  ;;  %18690 = vmatprep.subr.mxu0 %v23250_v8 }
0x2324   :  { %18627 = vmatpush3.msra.mxu1 %v23248_v57  ;;  %18691 = vmatpush3.msra.mxu0 %v23250_v8 }
0x2325   :  { %18628 = vmatprep.subr.mxu1 %v23254_v15  ;;  %18692 = vmatprep.subr.mxu0 %v23256_v59 }
0x2326   :  { %18629 = vmatpush3.msra.mxu1 %v23254_v15  ;;  %18693 = vmatpush3.msra.mxu0 %v23256_v59 }
0x2327   :  { %18631 = vmatmul.mubr.f32.vlgmr.msra.gmra.mxu1 %v14814_v23  ;;  %18695 = vmatmul.mubr.f32.vlgmr.msra.gmra.mxu0 %v14835_v16 }
0x2328   :  { %18633 = vmatprep.mubr.f32.mxu1 %v14815_v49  ;;  %18697 = vmatprep.mubr.f32.mxu0 %v14836_v33 }
0x2329   :  { %18700 = vmatprep.subr.mxu1 %v14838_v25  ;;  %18764 = vmatprep.subr.mxu0 %v14859_v53 }
0x232a   :  { %18701 = vmatpush3.msra.mxu1 %v14838_v25  ;;  %18765 = vmatpush3.msra.mxu0 %v14859_v53 }
0x232b   :  { %18634 = vmatmul.mubr.f32.gmra.mxu1 %v14816_v39  ;;  %18698 = vmatmul.mubr.f32.gmra.mxu0 %v14837_v32 }
0x232c   :  { %18702 = vmatprep.mubr.msk.f32.mxu1 %vm7117_vm2, %v22503_v41  ;;  %18766 = vmatprep.mubr.msk.f32.mxu0 %vm7117_vm2, %v22503_v41 }
0x232f   :  { %18703 = vmatmul.mubr.msk.f32.vlgmr.msra.gmra.mxu1 %vm7117_vm2, %v22506_v6  ;;  %18767 = vmatmul.mubr.msk.f32.vlgmr.msra.gmra.mxu0 %vm7117_vm2, %v22506_v6 }
0x2330   :  { %18705 = vmatprep.mubr.msk.f32.mxu1 %vm7117_vm2, %v22523_v14  ;;  %18769 = vmatprep.mubr.msk.f32.mxu0 %vm7117_vm2, %v22523_v14 }
0x2333   :  { %18706 = vmatmul.mubr.msk.f32.gmra.mxu1 %vm7117_vm2, %v22520_v26  ;;  %18770 = vmatmul.mubr.msk.f32.gmra.mxu0 %vm7117_vm2, %v22520_v26 }
0x2334   :  { %18708 = vmatprep.mubr.msk.f32.mxu1 %vm7117_vm2, %v22541_v51  ;;  %18772 = vmatprep.mubr.msk.f32.mxu0 %vm7117_vm2, %v22541_v51 }
0x2337   :  { %18709 = vmatmul.mubr.msk.f32.gmra.mxu1 %vm7117_vm2, %v22534_v36  ;;  %18773 = vmatmul.mubr.msk.f32.gmra.mxu0 %vm7117_vm2, %v22534_v36 }
0x2338   :  { %18711 = vmatprep.mubr.msk.f32.mxu1 %vm7117_vm2, %v22554_v28  ;;  %18775 = vmatprep.mubr.msk.f32.mxu0 %vm7117_vm2, %v22554_v28 }
0x233b   :  { %18712 = vmatmul.mubr.msk.f32.gmra.mxu1 %vm7117_vm2, %v22548_v7  ;;  %18776 = vmatmul.mubr.msk.f32.gmra.mxu0 %vm7117_vm2, %v22548_v7 }
0x233c   :  { %18714 = vmatprep.mubr.msk.f32.mxu1 %vm7117_vm2, %v22557_v52  ;;  %18778 = vmatprep.mubr.msk.f32.mxu0 %vm7117_vm2, %v22557_v52 }
0x233f   :  { %18715 = vmatmul.mubr.msk.f32.gmra.mxu1 %vm7117_vm2, %v22572_v17  ;;  %18779 = vmatmul.mubr.msk.f32.gmra.mxu0 %vm7117_vm2, %v22572_v17 }
0x2340   :  { %18717 = vmatprep.mubr.msk.f32.mxu1 %vm7117_vm2, %v22575_v61  ;;  %18781 = vmatprep.mubr.msk.f32.mxu0 %vm7117_vm2, %v22575_v61 }
0x2343   :  { %18718 = vmatmul.mubr.msk.f32.gmra.mxu1 %vm7117_vm2, %v22586_v18  ;;  %18782 = vmatmul.mubr.msk.f32.gmra.mxu0 %vm7117_vm2, %v22586_v18 }
0x2344   :  { %18720 = vmatprep.mubr.msk.f32.mxu1 %vm7117_vm2, %v22589_v4  ;;  %18784 = vmatprep.mubr.msk.f32.mxu0 %vm7117_vm2, %v22589_v4 }
0x2347   :  { %18721 = vmatmul.mubr.msk.f32.gmra.mxu1 %vm7117_vm2, %v22600_v21  ;;  %18785 = vmatmul.mubr.msk.f32.gmra.mxu0 %vm7117_vm2, %v22600_v21 }
0x2348   :  { %18723 = vmatprep.mubr.msk.f32.mxu1 %vm7117_vm2, %v22603_v44  ;;  %18787 = vmatprep.mubr.msk.f32.mxu0 %vm7117_vm2, %v22603_v44 }
0x234b   :  { %18724 = vmatmul.mubr.msk.f32.gmra.mxu1 %vm7117_vm2, %v22614_v31  ;;  %18788 = vmatmul.mubr.msk.f32.gmra.mxu0 %vm7117_vm2, %v22614_v31 }
0x234c   :  { %18758 = vmatprep.mubr.f32.mxu1 %v14855_v43  ;;  %18822 = vmatprep.mubr.f32.mxu0 %v14876_v11 }
0x23e7   :  { %v18632_v47 = vpop.f32.mrf.mxu1  ;;  %v18696_v48 = vpop.f32.mrf.mxu0 }
0x23e8   :  { %v11901_v57 = vadd.f32 %v18632_v47, %v23239_v46  ;;  %v14856_v47 = vld [vmem:[%s23848_s16 + $0x148] sm:$0xff] }
0x23e9   :  { %v11881_v8 = vpop.f32.mrf.mxu1  ;;  %v12122_v15 = vpop.f32.mrf.mxu0 }
0x23ea   :  { %v23393_v59 = vadd.f32 %v18696_v48, %v11901_v57  ;;  %v11900_v58 = vadd.f32 %v11881_v8, %v23242_v3  ;;  %v14877_v48 = vld [vmem:[%s23848_s16 + $0x168] sm:$0xff]  ;;  %v14857_v57 = vld [vmem:[%s23848_s16 + $0x150] sm:$0xff] }
0x23eb   :  { %v18635_v62 = vpop.f32.mrf.mxu1  ;;  %v18699_v54 = vpop.f32.mrf.mxu0  ;;  %v14878_v8 = vld [vmem:[%s23848_s16 + $0x170] sm:$0xff] }
0x23ec   :  { %v23396_v2 = vadd.f32 %v12122_v15, %v11900_v58  ;;  %v11903_v24 = vadd.f32 %v18635_v62, %v23245_v35  ;;  %v14880_v15 = vld [vmem:[%s23847_s17 + $0x60] sm:$0xff]  ;;  %v14901_v58 = vld [vmem:[%s23847_s17 + $0x68] sm:$0xff]  ;;  %v14858_v62 = vld [vmem:[%s23848_s16 + $0x158] sm:$0xff] }
0x23ed   :  { %v11891_v22 = vpop.f32.mrf.mxu1  ;;  %v12132_v13 = vpop.f32.mrf.mxu0 }
0x23ee   :  { %v23399_v45 = vadd.f32 %v18699_v54, %v11903_v24  ;;  %v11902_v60 = vadd.f32 %v11891_v22, %v23252_v12  ;;  %v14879_v54 = vld [vmem:[%s23848_s16 + $0x178] sm:$0xff]  ;;  %v14897_v24 = vld [vmem:[%s23848_s16 + $0x180] sm:$0xff] }
0x23ef   :  { %v23402_v38 = vpop.f32.mrf.mxu1  ;;  %v23404_v46 = vpop.f32.mrf.mxu0  ;;  %v14918_v22 = vld [vmem:[%s23848_s16 + $0x1a0] sm:$0xff] }
0x23f0   :  { %v23406_v56 = vadd.f32 %v12132_v13, %v11902_v60 }
0x23f1   :  { %v23408_v27 = vpop.f32.mrf.mxu1  ;;  %v23410_v3 = vpop.f32.mrf.mxu0 }
0x23f3   :  { %v23412_v40 = vpop.f32.mrf.mxu1  ;;  %v23414_v29 = vpop.f32.mrf.mxu0 }
0x23f5   :  { %v23416_v35 = vpop.f32.mrf.mxu1  ;;  %v23418_v50 = vpop.f32.mrf.mxu0 }
0x23f7   :  { %v23420_v30 = vpop.f32.mrf.mxu1  ;;  %v23422_v12 = vpop.f32.mrf.mxu0 }
0x23f9   :  { %v23424_v55 = vpop.f32.mrf.mxu1  ;;  %v23426_v19 = vpop.f32.mrf.mxu0 }
0x23fb   :  { %v18713_v37 = vpop.f32.mrf.mxu1  ;;  %v18777_v5 = vpop.f32.mrf.mxu0 }
0x23fd   :  { %v12243_v20 = vpop.f32.mrf.mxu1  ;;  %v12484_v10 = vpop.f32.mrf.mxu0 }
0x23ff   :  { %v18716_v0 = vpop.f32.mrf.mxu1  ;;  %v18780_v1 = vpop.f32.mrf.mxu0 }
0x2401   :  { %v12253_v34 = vpop.f32.mrf.mxu1  ;;  %v12494_v42 = vpop.f32.mrf.mxu0 }
0x2403   :  { %v18719_v63 = vpop.f32.mrf.mxu1  ;;  %v18783_v9 = vpop.f32.mrf.mxu0 }
0x2405   :  { %v12263_v23 = vpop.f32.mrf.mxu1  ;;  %v12504_v16 = vpop.f32.mrf.mxu0 }
0x2407   :  { %v18722_v49 = vpop.f32.mrf.mxu1  ;;  %v18786_v33 = vpop.f32.mrf.mxu0 }
0x2409   :  { %v12273_v25 = vpop.f32.mrf.mxu1  ;;  %v12514_v53 = vpop.f32.mrf.mxu0 }
0x240b   :  { %v18725_v39 = vpop.f32.mrf.mxu1  ;;  %v18789_v32 = vpop.f32.mrf.mxu0 }
0x240c   :  { %18726 = vmatprep.subr.mxu1 %v18725_v39  ;;  %18790 = vmatprep.subr.mxu0 %v18789_v32 }
0x240d   :  { %v12283_v43 = vpop.f32.mrf.mxu1  ;;  %18727 = vmatpush3.msra.mxu1 %v18725_v39  ;;  %v12524_v11 = vpop.f32.mrf.mxu0  ;;  %18791 = vmatpush3.msra.mxu0 %v18789_v32 }
0x240e   :  { %18728 = vmatprep.subr.mxu1 %v12283_v43  ;;  %18792 = vmatprep.subr.mxu0 %v12524_v11 }
0x240f   :  { %18729 = vmatpush3.msra.mxu1 %v12283_v43  ;;  %18793 = vmatpush3.msra.mxu0 %v12524_v11 }
0x2410   :  { %18730 = vmatprep.subr.mxu1 %v18722_v49  ;;  %18794 = vmatprep.subr.mxu0 %v18786_v33 }
0x2411   :  { %18731 = vmatpush3.msra.mxu1 %v18722_v49  ;;  %18795 = vmatpush3.msra.mxu0 %v18786_v33 }
0x2412   :  { %18732 = vmatprep.subr.mxu1 %v12273_v25  ;;  %18796 = vmatprep.subr.mxu0 %v12514_v53 }
0x2413   :  { %18733 = vmatpush3.msra.mxu1 %v12273_v25  ;;  %18797 = vmatpush3.msra.mxu0 %v12514_v53 }
0x2414   :  { %18734 = vmatprep.subr.mxu1 %v18719_v63  ;;  %18798 = vmatprep.subr.mxu0 %v18783_v9 }
0x2415   :  { %18735 = vmatpush3.msra.mxu1 %v18719_v63  ;;  %18799 = vmatpush3.msra.mxu0 %v18783_v9 }
0x2416   :  { %18736 = vmatprep.subr.mxu1 %v12263_v23  ;;  %18800 = vmatprep.subr.mxu0 %v12504_v16 }
0x2417   :  { %18737 = vmatpush3.msra.mxu1 %v12263_v23  ;;  %18801 = vmatpush3.msra.mxu0 %v12504_v16 }
0x2418   :  { %18738 = vmatprep.subr.mxu1 %v18716_v0  ;;  %18802 = vmatprep.subr.mxu0 %v18780_v1 }
0x2419   :  { %18739 = vmatpush3.msra.mxu1 %v18716_v0  ;;  %18803 = vmatpush3.msra.mxu0 %v18780_v1 }
0x241a   :  { %18740 = vmatprep.subr.mxu1 %v12253_v34  ;;  %18804 = vmatprep.subr.mxu0 %v12494_v42 }
0x241b   :  { %18741 = vmatpush3.msra.mxu1 %v12253_v34  ;;  %18805 = vmatpush3.msra.mxu0 %v12494_v42 }
0x241c   :  { %18742 = vmatprep.subr.mxu1 %v18713_v37  ;;  %18806 = vmatprep.subr.mxu0 %v18777_v5 }
0x241d   :  { %18743 = vmatpush3.msra.mxu1 %v18713_v37  ;;  %18807 = vmatpush3.msra.mxu0 %v18777_v5 }
0x241e   :  { %18744 = vmatprep.subr.mxu1 %v12243_v20  ;;  %18808 = vmatprep.subr.mxu0 %v12484_v10 }
0x241f   :  { %18745 = vmatpush3.msra.mxu1 %v12243_v20  ;;  %18809 = vmatpush3.msra.mxu0 %v12484_v10 }
0x2420   :  { %18746 = vmatprep.subr.mxu1 %v23420_v30  ;;  %18810 = vmatprep.subr.mxu0 %v23422_v12 }
0x2421   :  { %18747 = vmatpush3.msra.mxu1 %v23420_v30  ;;  %18811 = vmatpush3.msra.mxu0 %v23422_v12 }
0x2422   :  { %18748 = vmatprep.subr.mxu1 %v23424_v55  ;;  %18812 = vmatprep.subr.mxu0 %v23426_v19 }
0x2423   :  { %18749 = vmatpush3.msra.mxu1 %v23424_v55  ;;  %18813 = vmatpush3.msra.mxu0 %v23426_v19 }
0x2424   :  { %18750 = vmatprep.subr.mxu1 %v23412_v40  ;;  %18814 = vmatprep.subr.mxu0 %v23414_v29 }
0x2425   :  { %18751 = vmatpush3.msra.mxu1 %v23412_v40  ;;  %18815 = vmatpush3.msra.mxu0 %v23414_v29 }
0x2426   :  { %18752 = vmatprep.subr.mxu1 %v23416_v35  ;;  %18816 = vmatprep.subr.mxu0 %v23418_v50 }
0x2427   :  { %18753 = vmatpush3.msra.mxu1 %v23416_v35  ;;  %18817 = vmatpush3.msra.mxu0 %v23418_v50 }
0x2428   :  { %18754 = vmatprep.subr.mxu1 %v23402_v38  ;;  %18818 = vmatprep.subr.mxu0 %v23404_v46 }
0x2429   :  { %18755 = vmatpush3.msra.mxu1 %v23402_v38  ;;  %18819 = vmatpush3.msra.mxu0 %v23404_v46 }
0x242a   :  { %18756 = vmatprep.subr.mxu1 %v23408_v27  ;;  %18820 = vmatprep.subr.mxu0 %v23410_v3 }
0x242b   :  { %18757 = vmatpush3.msra.mxu1 %v23408_v27  ;;  %18821 = vmatpush3.msra.mxu0 %v23410_v3 }
0x242c   :  { %18759 = vmatmul.mubr.f32.vlgmr.msra.gmra.mxu1 %v14856_v47  ;;  %18823 = vmatmul.mubr.f32.vlgmr.msra.gmra.mxu0 %v14877_v48 }
0x242d   :  { %18761 = vmatprep.mubr.f32.mxu1 %v14857_v57  ;;  %18825 = vmatprep.mubr.f32.mxu0 %v14878_v8 }
0x242e   :  { %18828 = vmatprep.subr.mxu1 %v14880_v15  ;;  %18892 = vmatprep.subr.mxu0 %v14901_v58 }
0x242f   :  { %18829 = vmatpush3.msra.mxu1 %v14880_v15  ;;  %18893 = vmatpush3.msra.mxu0 %v14901_v58 }
0x2430   :  { %18762 = vmatmul.mubr.f32.gmra.mxu1 %v14858_v62  ;;  %18826 = vmatmul.mubr.f32.gmra.mxu0 %v14879_v54 }
0x2431   :  { %18830 = vmatprep.mubr.msk.f32.mxu1 %vm7117_vm2, %v22503_v41  ;;  %18894 = vmatprep.mubr.msk.f32.mxu0 %vm7117_vm2, %v22503_v41 }
0x2434   :  { %18831 = vmatmul.mubr.msk.f32.vlgmr.msra.gmra.mxu1 %vm7117_vm2, %v22506_v6  ;;  %18895 = vmatmul.mubr.msk.f32.vlgmr.msra.gmra.mxu0 %vm7117_vm2, %v22506_v6 }
0x2435   :  { %18833 = vmatprep.mubr.msk.f32.mxu1 %vm7117_vm2, %v22523_v14  ;;  %18897 = vmatprep.mubr.msk.f32.mxu0 %vm7117_vm2, %v22523_v14 }
0x2438   :  { %18834 = vmatmul.mubr.msk.f32.gmra.mxu1 %vm7117_vm2, %v22520_v26  ;;  %18898 = vmatmul.mubr.msk.f32.gmra.mxu0 %vm7117_vm2, %v22520_v26 }
0x2439   :  { %18836 = vmatprep.mubr.msk.f32.mxu1 %vm7117_vm2, %v22541_v51  ;;  %18900 = vmatprep.mubr.msk.f32.mxu0 %vm7117_vm2, %v22541_v51 }
0x243c   :  { %18837 = vmatmul.mubr.msk.f32.gmra.mxu1 %vm7117_vm2, %v22534_v36  ;;  %18901 = vmatmul.mubr.msk.f32.gmra.mxu0 %vm7117_vm2, %v22534_v36 }
0x243d   :  { %18839 = vmatprep.mubr.msk.f32.mxu1 %vm7117_vm2, %v22554_v28  ;;  %18903 = vmatprep.mubr.msk.f32.mxu0 %vm7117_vm2, %v22554_v28 }
0x2440   :  { %18840 = vmatmul.mubr.msk.f32.gmra.mxu1 %vm7117_vm2, %v22548_v7  ;;  %18904 = vmatmul.mubr.msk.f32.gmra.mxu0 %vm7117_vm2, %v22548_v7 }
0x2441   :  { %18842 = vmatprep.mubr.msk.f32.mxu1 %vm7117_vm2, %v22557_v52  ;;  %18906 = vmatprep.mubr.msk.f32.mxu0 %vm7117_vm2, %v22557_v52 }
0x2444   :  { %18843 = vmatmul.mubr.msk.f32.gmra.mxu1 %vm7117_vm2, %v22572_v17  ;;  %18907 = vmatmul.mubr.msk.f32.gmra.mxu0 %vm7117_vm2, %v22572_v17 }
0x2445   :  { %18845 = vmatprep.mubr.msk.f32.mxu1 %vm7117_vm2, %v22575_v61  ;;  %18909 = vmatprep.mubr.msk.f32.mxu0 %vm7117_vm2, %v22575_v61 }
0x2448   :  { %18846 = vmatmul.mubr.msk.f32.gmra.mxu1 %vm7117_vm2, %v22586_v18  ;;  %18910 = vmatmul.mubr.msk.f32.gmra.mxu0 %vm7117_vm2, %v22586_v18 }
0x2449   :  { %18848 = vmatprep.mubr.msk.f32.mxu1 %vm7117_vm2, %v22589_v4  ;;  %18912 = vmatprep.mubr.msk.f32.mxu0 %vm7117_vm2, %v22589_v4 }
0x244c   :  { %18849 = vmatmul.mubr.msk.f32.gmra.mxu1 %vm7117_vm2, %v22600_v21  ;;  %18913 = vmatmul.mubr.msk.f32.gmra.mxu0 %vm7117_vm2, %v22600_v21 }
0x244d   :  { %18851 = vmatprep.mubr.msk.f32.mxu1 %vm7117_vm2, %v22603_v44  ;;  %18915 = vmatprep.mubr.msk.f32.mxu0 %vm7117_vm2, %v22603_v44 }
0x2450   :  { %18852 = vmatmul.mubr.msk.f32.gmra.mxu1 %vm7117_vm2, %v22614_v31  ;;  %18916 = vmatmul.mubr.msk.f32.gmra.mxu0 %vm7117_vm2, %v22614_v31 }
0x2451   :  { %18886 = vmatprep.mubr.f32.mxu1 %v14897_v24  ;;  %18950 = vmatprep.mubr.f32.mxu0 %v14918_v22 }
0x24ec   :  { %v18760_v13 = vpop.f32.mrf.mxu1  ;;  %v18824_v60 = vpop.f32.mrf.mxu0 }
0x24ed   :  { %v12383_v38 = vadd.f32 %v18760_v13, %v23393_v59  ;;  %v14898_v13 = vld [vmem:[%s23848_s16 + $0x188] sm:$0xff] }
0x24ee   :  { %v12363_v46 = vpop.f32.mrf.mxu1  ;;  %v12604_v27 = vpop.f32.mrf.mxu0 }
0x24ef   :  { %v23547_v3 = vadd.f32 %v18824_v60, %v12383_v38  ;;  %v12382_v40 = vadd.f32 %v12363_v46, %v23396_v2  ;;  %v14919_v60 = vld [vmem:[%s23848_s16 + $0x1a8] sm:$0xff]  ;;  %v14899_v38 = vld [vmem:[%s23848_s16 + $0x190] sm:$0xff] }
0x24f0   :  { %v18763_v29 = vpop.f32.mrf.mxu1  ;;  %v18827_v35 = vpop.f32.mrf.mxu0  ;;  %v14920_v46 = vld [vmem:[%s23848_s16 + $0x1b0] sm:$0xff] }
0x24f1   :  { %v23550_v50 = vadd.f32 %v12604_v27, %v12382_v40  ;;  %v12385_v30 = vadd.f32 %v18763_v29, %v23399_v45  ;;  %v14922_v27 = vld [vmem:[%s23847_s17 + $0x70] sm:$0xff]  ;;  %v14943_v40 = vld [vmem:[%s23847_s17 + $0x78] sm:$0xff] }
0x24f2   :  { %v12373_v12 = vpop.f32.mrf.mxu1  ;;  %v12614_v55 = vpop.f32.mrf.mxu0  ;;  %v14900_v29 = vld [vmem:[%s23848_s16 + $0x198] sm:$0xff] }
0x24f3   :  { %v23553_v19 = vadd.f32 %v18827_v35, %v12385_v30  ;;  %v12384_v37 = vadd.f32 %v12373_v12, %v23406_v56  ;;  %v14921_v35 = vld [vmem:[%s23848_s16 + $0x1b8] sm:$0xff] }
0x24f4   :  { %v23556_v5 = vpop.f32.mrf.mxu1  ;;  %v23558_v59 = vpop.f32.mrf.mxu0 }
0x24f5   :  { %v23560_v20 = vadd.f32 %v12614_v55, %v12384_v37 }
0x24f6   :  { %v23562_v10 = vpop.f32.mrf.mxu1  ;;  %v23564_v2 = vpop.f32.mrf.mxu0 }
0x24f8   :  { %v23566_v0 = vpop.f32.mrf.mxu1  ;;  %v23568_v1 = vpop.f32.mrf.mxu0 }
0x24fa   :  { %v23570_v45 = vpop.f32.mrf.mxu1  ;;  %v23572_v34 = vpop.f32.mrf.mxu0 }
0x24fc   :  { %v23574_v42 = vpop.f32.mrf.mxu1  ;;  %v23576_v56 = vpop.f32.mrf.mxu0 }
0x24fe   :  { %v23578_v63 = vpop.f32.mrf.mxu1  ;;  %v23580_v9 = vpop.f32.mrf.mxu0 }
0x2500   :  { %v18841_v23 = vpop.f32.mrf.mxu1  ;;  %v18905_v16 = vpop.f32.mrf.mxu0 }
0x2502   :  { %v12725_v49 = vpop.f32.mrf.mxu1  ;;  %v12966_v33 = vpop.f32.mrf.mxu0 }
0x2504   :  { %v18844_v25 = vpop.f32.mrf.mxu1  ;;  %v18908_v53 = vpop.f32.mrf.mxu0 }
0x2506   :  { %v12735_v39 = vpop.f32.mrf.mxu1  ;;  %v12976_v32 = vpop.f32.mrf.mxu0 }
0x2508   :  { %v18847_v43 = vpop.f32.mrf.mxu1  ;;  %v18911_v11 = vpop.f32.mrf.mxu0 }
0x250a   :  { %v12745_v47 = vpop.f32.mrf.mxu1  ;;  %v12986_v48 = vpop.f32.mrf.mxu0 }
0x250c   :  { %v18850_v57 = vpop.f32.mrf.mxu1  ;;  %v18914_v8 = vpop.f32.mrf.mxu0 }
0x250e   :  { %v12755_v15 = vpop.f32.mrf.mxu1  ;;  %v12996_v58 = vpop.f32.mrf.mxu0 }
0x2510   :  { %v18853_v62 = vpop.f32.mrf.mxu1  ;;  %v18917_v54 = vpop.f32.mrf.mxu0 }
0x2511   :  { %18854 = vmatprep.subr.mxu1 %v18853_v62  ;;  %18918 = vmatprep.subr.mxu0 %v18917_v54 }
0x2512   :  { %v12765_v24 = vpop.f32.mrf.mxu1  ;;  %18855 = vmatpush3.msra.mxu1 %v18853_v62  ;;  %v13006_v22 = vpop.f32.mrf.mxu0  ;;  %18919 = vmatpush3.msra.mxu0 %v18917_v54  ;;  %v14941_v62 = vld [vmem:[%s23848_s16 + $0x1d0] sm:$0xff] }
0x2513   :  { %18856 = vmatprep.subr.mxu1 %v12765_v24  ;;  %18920 = vmatprep.subr.mxu0 %v13006_v22  ;;  %v14962_v54 = vld [vmem:[%s23848_s16 + $0x1f0] sm:$0xff] }
0x2514   :  { %18857 = vmatpush3.msra.mxu1 %v12765_v24  ;;  %18921 = vmatpush3.msra.mxu0 %v13006_v22  ;;  %v14942_v24 = vld [vmem:[%s23848_s16 + $0x1d8] sm:$0xff] }
0x2515   :  { %18858 = vmatprep.subr.mxu1 %v18850_v57  ;;  %18922 = vmatprep.subr.mxu0 %v18914_v8  ;;  %v14963_v22 = vld [vmem:[%s23848_s16 + $0x1f8] sm:$0xff] }
0x2516   :  { %18859 = vmatpush3.msra.mxu1 %v18850_v57  ;;  %18923 = vmatpush3.msra.mxu0 %v18914_v8 }
0x2517   :  { %18860 = vmatprep.subr.mxu1 %v12755_v15  ;;  %18924 = vmatprep.subr.mxu0 %v12996_v58 }
0x2518   :  { %18861 = vmatpush3.msra.mxu1 %v12755_v15  ;;  %18925 = vmatpush3.msra.mxu0 %v12996_v58  ;;  %v14940_v15 = vld [vmem:[%s23848_s16 + $0x1c8] sm:$0xff] }
0x2519   :  { %18862 = vmatprep.subr.mxu1 %v18847_v43  ;;  %18926 = vmatprep.subr.mxu0 %v18911_v11  ;;  %v14961_v58 = vld [vmem:[%s23848_s16 + $0x1e8] sm:$0xff] }
0x251a   :  { %18863 = vmatpush3.msra.mxu1 %v18847_v43  ;;  %18927 = vmatpush3.msra.mxu0 %v18911_v11 }
0x251b   :  { %18864 = vmatprep.subr.mxu1 %v12745_v47  ;;  %18928 = vmatprep.subr.mxu0 %v12986_v48 }
0x251c   :  { %18865 = vmatpush3.msra.mxu1 %v12745_v47  ;;  %18929 = vmatpush3.msra.mxu0 %v12986_v48 }
0x251d   :  { %18866 = vmatprep.subr.mxu1 %v18844_v25  ;;  %18930 = vmatprep.subr.mxu0 %v18908_v53 }
0x251e   :  { %18867 = vmatpush3.msra.mxu1 %v18844_v25  ;;  %18931 = vmatpush3.msra.mxu0 %v18908_v53 }
0x251f   :  { %18868 = vmatprep.subr.mxu1 %v12735_v39  ;;  %18932 = vmatprep.subr.mxu0 %v12976_v32 }
0x2520   :  { %18869 = vmatpush3.msra.mxu1 %v12735_v39  ;;  %18933 = vmatpush3.msra.mxu0 %v12976_v32 }
0x2521   :  { %18870 = vmatprep.subr.mxu1 %v18841_v23  ;;  %18934 = vmatprep.subr.mxu0 %v18905_v16 }
0x2522   :  { %18871 = vmatpush3.msra.mxu1 %v18841_v23  ;;  %18935 = vmatpush3.msra.mxu0 %v18905_v16 }
0x2523   :  { %18872 = vmatprep.subr.mxu1 %v12725_v49  ;;  %18936 = vmatprep.subr.mxu0 %v12966_v33 }
0x2524   :  { %18873 = vmatpush3.msra.mxu1 %v12725_v49  ;;  %18937 = vmatpush3.msra.mxu0 %v12966_v33 }
0x2525   :  { %18874 = vmatprep.subr.mxu1 %v23574_v42  ;;  %18938 = vmatprep.subr.mxu0 %v23576_v56 }
0x2526   :  { %18875 = vmatpush3.msra.mxu1 %v23574_v42  ;;  %18939 = vmatpush3.msra.mxu0 %v23576_v56 }
0x2527   :  { %18876 = vmatprep.subr.mxu1 %v23578_v63  ;;  %18940 = vmatprep.subr.mxu0 %v23580_v9 }
0x2528   :  { %18877 = vmatpush3.msra.mxu1 %v23578_v63  ;;  %18941 = vmatpush3.msra.mxu0 %v23580_v9 }
0x2529   :  { %18878 = vmatprep.subr.mxu1 %v23566_v0  ;;  %18942 = vmatprep.subr.mxu0 %v23568_v1 }
0x252a   :  { %18879 = vmatpush3.msra.mxu1 %v23566_v0  ;;  %18943 = vmatpush3.msra.mxu0 %v23568_v1 }
0x252b   :  { %18880 = vmatprep.subr.mxu1 %v23570_v45  ;;  %18944 = vmatprep.subr.mxu0 %v23572_v34 }
0x252c   :  { %18881 = vmatpush3.msra.mxu1 %v23570_v45  ;;  %18945 = vmatpush3.msra.mxu0 %v23572_v34 }
0x252d   :  { %18882 = vmatprep.subr.mxu1 %v23556_v5  ;;  %18946 = vmatprep.subr.mxu0 %v23558_v59 }
0x252e   :  { %18883 = vmatpush3.msra.mxu1 %v23556_v5  ;;  %18947 = vmatpush3.msra.mxu0 %v23558_v59 }
0x252f   :  { %18884 = vmatprep.subr.mxu1 %v23562_v10  ;;  %18948 = vmatprep.subr.mxu0 %v23564_v2 }
0x2530   :  { %18885 = vmatpush3.msra.mxu1 %v23562_v10  ;;  %18949 = vmatpush3.msra.mxu0 %v23564_v2 }
0x2531   :  { %18887 = vmatmul.mubr.f32.vlgmr.msra.gmra.mxu1 %v14898_v13  ;;  %18951 = vmatmul.mubr.f32.vlgmr.msra.gmra.mxu0 %v14919_v60 }
0x2532   :  { %18889 = vmatprep.mubr.f32.mxu1 %v14899_v38  ;;  %18953 = vmatprep.mubr.f32.mxu0 %v14920_v46 }
0x2533   :  { %18956 = vmatprep.subr.mxu1 %v14922_v27  ;;  %19020 = vmatprep.subr.mxu0 %v14943_v40 }
0x2534   :  { %18957 = vmatpush3.msra.mxu1 %v14922_v27  ;;  %19021 = vmatpush3.msra.mxu0 %v14943_v40 }
0x2535   :  { %18890 = vmatmul.mubr.f32.gmra.mxu1 %v14900_v29  ;;  %18954 = vmatmul.mubr.f32.gmra.mxu0 %v14921_v35 }
0x2536   :  { %18958 = vmatprep.mubr.msk.f32.mxu1 %vm7117_vm2, %v22503_v41  ;;  %19022 = vmatprep.mubr.msk.f32.mxu0 %vm7117_vm2, %v22503_v41  ;;  %v14939_v41 = vld [vmem:[%s23848_s16 + $0x1c0] sm:$0xff] }
0x2539   :  { %18959 = vmatmul.mubr.msk.f32.vlgmr.msra.gmra.mxu1 %vm7117_vm2, %v22506_v6  ;;  %19023 = vmatmul.mubr.msk.f32.vlgmr.msra.gmra.mxu0 %vm7117_vm2, %v22506_v6  ;;  %v14960_v6 = vld [vmem:[%s23848_s16 + $0x1e0] sm:$0xff] }
0x253a   :  { %18961 = vmatprep.mubr.msk.f32.mxu1 %vm7117_vm2, %v22523_v14  ;;  %19025 = vmatprep.mubr.msk.f32.mxu0 %vm7117_vm2, %v22523_v14 }
0x253d   :  { %18962 = vmatmul.mubr.msk.f32.gmra.mxu1 %vm7117_vm2, %v22520_v26  ;;  %19026 = vmatmul.mubr.msk.f32.gmra.mxu0 %vm7117_vm2, %v22520_v26 }
0x253e   :  { %18964 = vmatprep.mubr.msk.f32.mxu1 %vm7117_vm2, %v22541_v51  ;;  %19028 = vmatprep.mubr.msk.f32.mxu0 %vm7117_vm2, %v22541_v51 }
0x2541   :  { %18965 = vmatmul.mubr.msk.f32.gmra.mxu1 %vm7117_vm2, %v22534_v36  ;;  %19029 = vmatmul.mubr.msk.f32.gmra.mxu0 %vm7117_vm2, %v22534_v36 }
0x2542   :  { %18967 = vmatprep.mubr.msk.f32.mxu1 %vm7117_vm2, %v22554_v28  ;;  %19031 = vmatprep.mubr.msk.f32.mxu0 %vm7117_vm2, %v22554_v28 }
0x2545   :  { %18968 = vmatmul.mubr.msk.f32.gmra.mxu1 %vm7117_vm2, %v22548_v7  ;;  %19032 = vmatmul.mubr.msk.f32.gmra.mxu0 %vm7117_vm2, %v22548_v7 }
0x2546   :  { %18970 = vmatprep.mubr.msk.f32.mxu1 %vm7117_vm2, %v22557_v52  ;;  %19034 = vmatprep.mubr.msk.f32.mxu0 %vm7117_vm2, %v22557_v52 }
0x2549   :  { %18971 = vmatmul.mubr.msk.f32.gmra.mxu1 %vm7117_vm2, %v22572_v17  ;;  %19035 = vmatmul.mubr.msk.f32.gmra.mxu0 %vm7117_vm2, %v22572_v17 }
0x254a   :  { %18973 = vmatprep.mubr.msk.f32.mxu1 %vm7117_vm2, %v22575_v61  ;;  %19037 = vmatprep.mubr.msk.f32.mxu0 %vm7117_vm2, %v22575_v61 }
0x254d   :  { %18974 = vmatmul.mubr.msk.f32.gmra.mxu1 %vm7117_vm2, %v22586_v18  ;;  %19038 = vmatmul.mubr.msk.f32.gmra.mxu0 %vm7117_vm2, %v22586_v18 }
0x254e   :  { %18976 = vmatprep.mubr.msk.f32.mxu1 %vm7117_vm2, %v22589_v4  ;;  %19040 = vmatprep.mubr.msk.f32.mxu0 %vm7117_vm2, %v22589_v4 }
0x2551   :  { %18977 = vmatmul.mubr.msk.f32.gmra.mxu1 %vm7117_vm2, %v22600_v21  ;;  %19041 = vmatmul.mubr.msk.f32.gmra.mxu0 %vm7117_vm2, %v22600_v21 }
0x2552   :  { %18979 = vmatprep.mubr.msk.f32.mxu1 %vm7117_vm2, %v22603_v44  ;;  %19043 = vmatprep.mubr.msk.f32.mxu0 %vm7117_vm2, %v22603_v44 }
0x2555   :  { %18980 = vmatmul.mubr.msk.f32.gmra.mxu1 %vm7117_vm2, %v22614_v31  ;;  %19044 = vmatmul.mubr.msk.f32.gmra.mxu0 %vm7117_vm2, %v22614_v31 }
0x2556   :  { %19014 = vmatprep.mubr.f32.mxu1 %v14939_v41  ;;  %19078 = vmatprep.mubr.f32.mxu0 %v14960_v6 }
0x25f1   :  { %v18888_v26 = vpop.f32.mrf.mxu1  ;;  %v18952_v14 = vpop.f32.mrf.mxu0 }
0x25f2   :  { %v12865_v36 = vadd.f32 %v18888_v26, %v23547_v3 }
0x25f3   :  { %v12845_v51 = vpop.f32.mrf.mxu1  ;;  %v13086_v7 = vpop.f32.mrf.mxu0 }
0x25f4   :  { %v23701_v28 = vadd.f32 %v18952_v14, %v12865_v36  ;;  %v12864_v52 = vadd.f32 %v12845_v51, %v23550_v50 }
0x25f5   :  { %v18891_v17 = vpop.f32.mrf.mxu1  ;;  %v18955_v61 = vpop.f32.mrf.mxu0 }
0x25f6   :  { %v23704_v18 = vadd.f32 %v13086_v7, %v12864_v52  ;;  %v12867_v4 = vadd.f32 %v18891_v17, %v23553_v19 }
0x25f7   :  { %v12855_v21 = vpop.f32.mrf.mxu1  ;;  %v13096_v44 = vpop.f32.mrf.mxu0 }
0x25f8   :  { %v23707_v31 = vadd.f32 %v18955_v61, %v12867_v4  ;;  %v12866_v30 = vadd.f32 %v12855_v21, %v23560_v20  ;;  %v13644_v4 = vld [vmem:[%s23849_s18 + $0x8] sm:$0xff]  ;;  %v13645_v21 = vld [vmem:[%s23849_s18 + $0x10] sm:$0xff] }
0x25f9   :  { %v23710_v12 = vpop.f32.mrf.mxu1  ;;  %v23712_v3 = vpop.f32.mrf.mxu0 }
0x25fa   :  { %v23714_v55 = vadd.f32 %v13096_v44, %v12866_v30  ;;  %v13643_v44 = vld [vmem:[%s23849_s18] sm:$0xff]  ;;  %v13646_v30 = vld [vmem:[%s23849_s18 + $0x18] sm:$0xff] }
0x25fb   :  { %v23716_v37 = vpop.f32.mrf.mxu1  ;;  %v23718_v50 = vpop.f32.mrf.mxu0 }
0x25fd   :  { %v23720_v5 = vpop.f32.mrf.mxu1  ;;  %v23722_v59 = vpop.f32.mrf.mxu0 }
0x25ff   :  { %v23724_v19 = vpop.f32.mrf.mxu1  ;;  %v23726_v10 = vpop.f32.mrf.mxu0 }
0x2601   :  { %v23728_v2 = vpop.f32.mrf.mxu1  ;;  %v23730_v20 = vpop.f32.mrf.mxu0 }
0x2603   :  { %v23732_v0 = vpop.f32.mrf.mxu1  ;;  %v23734_v1 = vpop.f32.mrf.mxu0 }
0x2605   :  { %v18969_v45 = vpop.f32.mrf.mxu1  ;;  %v19033_v34 = vpop.f32.mrf.mxu0 }
0x2607   :  { %v13207_v42 = vpop.f32.mrf.mxu1  ;;  %v13448_v56 = vpop.f32.mrf.mxu0 }
0x2609   :  { %v18972_v63 = vpop.f32.mrf.mxu1  ;;  %v19036_v9 = vpop.f32.mrf.mxu0 }
0x260b   :  { %v13217_v23 = vpop.f32.mrf.mxu1  ;;  %v13458_v16 = vpop.f32.mrf.mxu0 }
0x260d   :  { %v18975_v49 = vpop.f32.mrf.mxu1  ;;  %v19039_v33 = vpop.f32.mrf.mxu0 }
0x260f   :  { %v13227_v25 = vpop.f32.mrf.mxu1  ;;  %v13468_v53 = vpop.f32.mrf.mxu0 }
0x2611   :  { %v18978_v39 = vpop.f32.mrf.mxu1  ;;  %v19042_v32 = vpop.f32.mrf.mxu0 }
0x2613   :  { %v13237_v43 = vpop.f32.mrf.mxu1  ;;  %v13478_v11 = vpop.f32.mrf.mxu0 }
0x2615   :  { %v18981_v47 = vpop.f32.mrf.mxu1  ;;  %v19045_v48 = vpop.f32.mrf.mxu0 }
0x2616   :  { %18982 = vmatprep.subr.mxu1 %v18981_v47  ;;  %19046 = vmatprep.subr.mxu0 %v19045_v48 }
0x2617   :  { %v13247_v57 = vpop.f32.mrf.mxu1  ;;  %18983 = vmatpush3.msra.mxu1 %v18981_v47  ;;  %v13488_v8 = vpop.f32.mrf.mxu0  ;;  %19047 = vmatpush3.msra.mxu0 %v19045_v48 }
0x2618   :  { %18984 = vmatprep.subr.mxu1 %v13247_v57  ;;  %19048 = vmatprep.subr.mxu0 %v13488_v8 }
0x2619   :  { %18985 = vmatpush3.msra.mxu1 %v13247_v57  ;;  %19049 = vmatpush3.msra.mxu0 %v13488_v8 }
0x261a   :  { %18986 = vmatprep.subr.mxu1 %v18978_v39  ;;  %19050 = vmatprep.subr.mxu0 %v19042_v32 }
0x261b   :  { %18987 = vmatpush3.msra.mxu1 %v18978_v39  ;;  %19051 = vmatpush3.msra.mxu0 %v19042_v32 }
0x261c   :  { %18988 = vmatprep.subr.mxu1 %v13237_v43  ;;  %19052 = vmatprep.subr.mxu0 %v13478_v11 }
0x261d   :  { %18989 = vmatpush3.msra.mxu1 %v13237_v43  ;;  %19053 = vmatpush3.msra.mxu0 %v13478_v11 }
0x261e   :  { %18990 = vmatprep.subr.mxu1 %v18975_v49  ;;  %19054 = vmatprep.subr.mxu0 %v19039_v33 }
0x261f   :  { %18991 = vmatpush3.msra.mxu1 %v18975_v49  ;;  %19055 = vmatpush3.msra.mxu0 %v19039_v33  ;;  %v13673_v49 = vld [vmem:[%s23850_s19 + $0x10] sm:$0xff]  ;;  %v13674_v33 = vld [vmem:[%s23850_s19 + $0x18] sm:$0xff] }
0x2620   :  { %18992 = vmatprep.subr.mxu1 %v13227_v25  ;;  %19056 = vmatprep.subr.mxu0 %v13468_v53 }
0x2621   :  { %18993 = vmatpush3.msra.mxu1 %v13227_v25  ;;  %19057 = vmatpush3.msra.mxu0 %v13468_v53 }
0x2622   :  { %18994 = vmatprep.subr.mxu1 %v18972_v63  ;;  %19058 = vmatprep.subr.mxu0 %v19036_v9 }
0x2623   :  { %18995 = vmatpush3.msra.mxu1 %v18972_v63  ;;  %19059 = vmatpush3.msra.mxu0 %v19036_v9 }
0x2624   :  { %18996 = vmatprep.subr.mxu1 %v13217_v23  ;;  %19060 = vmatprep.subr.mxu0 %v13458_v16 }
0x2625   :  { %18997 = vmatpush3.msra.mxu1 %v13217_v23  ;;  %19061 = vmatpush3.msra.mxu0 %v13458_v16 }
0x2626   :  { %18998 = vmatprep.subr.mxu1 %v18969_v45  ;;  %19062 = vmatprep.subr.mxu0 %v19033_v34 }
0x2627   :  { %18999 = vmatpush3.msra.mxu1 %v18969_v45  ;;  %19063 = vmatpush3.msra.mxu0 %v19033_v34 }
0x2628   :  { %19000 = vmatprep.subr.mxu1 %v13207_v42  ;;  %19064 = vmatprep.subr.mxu0 %v13448_v56 }
0x2629   :  { %19001 = vmatpush3.msra.mxu1 %v13207_v42  ;;  %19065 = vmatpush3.msra.mxu0 %v13448_v56 }
0x262a   :  { %19002 = vmatprep.subr.mxu1 %v23728_v2  ;;  %19066 = vmatprep.subr.mxu0 %v23730_v20 }
0x262b   :  { %19003 = vmatpush3.msra.mxu1 %v23728_v2  ;;  %19067 = vmatpush3.msra.mxu0 %v23730_v20 }
0x262c   :  { %19004 = vmatprep.subr.mxu1 %v23732_v0  ;;  %19068 = vmatprep.subr.mxu0 %v23734_v1 }
0x262d   :  { %19005 = vmatpush3.msra.mxu1 %v23732_v0  ;;  %19069 = vmatpush3.msra.mxu0 %v23734_v1 }
0x262e   :  { %19006 = vmatprep.subr.mxu1 %v23720_v5  ;;  %19070 = vmatprep.subr.mxu0 %v23722_v59 }
0x262f   :  { %19007 = vmatpush3.msra.mxu1 %v23720_v5  ;;  %19071 = vmatpush3.msra.mxu0 %v23722_v59 }
0x2630   :  { %19008 = vmatprep.subr.mxu1 %v23724_v19  ;;  %19072 = vmatprep.subr.mxu0 %v23726_v10 }
0x2631   :  { %19009 = vmatpush3.msra.mxu1 %v23724_v19  ;;  %19073 = vmatpush3.msra.mxu0 %v23726_v10 }
0x2632   :  { %19010 = vmatprep.subr.mxu1 %v23710_v12  ;;  %19074 = vmatprep.subr.mxu0 %v23712_v3 }
0x2633   :  { %19011 = vmatpush3.msra.mxu1 %v23710_v12  ;;  %19075 = vmatpush3.msra.mxu0 %v23712_v3  ;;  %v13672_v12 = vld [vmem:[%s23850_s19 + $0x8] sm:$0xff] }
0x2634   :  { %19012 = vmatprep.subr.mxu1 %v23716_v37  ;;  %19076 = vmatprep.subr.mxu0 %v23718_v50 }
0x2635   :  { %19013 = vmatpush3.msra.mxu1 %v23716_v37  ;;  %19077 = vmatpush3.msra.mxu0 %v23718_v50 }
0x2636   :  { %19015 = vmatmul.mubr.f32.vlgmr.msra.gmra.mxu1 %v14940_v15  ;;  %19079 = vmatmul.mubr.f32.vlgmr.msra.gmra.mxu0 %v14961_v58 }
0x2637   :  { %19017 = vmatprep.mubr.f32.mxu1 %v14941_v62  ;;  %19081 = vmatprep.mubr.f32.mxu0 %v14962_v54 }
0x263a   :  { %19018 = vmatmul.mubr.f32.gmra.mxu1 %v14942_v24  ;;  %19082 = vmatmul.mubr.f32.gmra.mxu0 %v14963_v22 }
0x26f6   :  { %v19016_v13 = vpop.f32.mrf.mxu1  ;;  %v19080_v60 = vpop.f32.mrf.mxu0 }
0x26f7   :  { %v13347_v38 = vadd.f32 %v19016_v13, %v23701_v28 }
0x26f8   :  { %v13327_v46 = vpop.f32.mrf.mxu1  ;;  %v13568_v27 = vpop.f32.mrf.mxu0 }
0x26f9   :  { %v13346_v40 = vadd.f32 %v13327_v46, %v23704_v18  ;;  %v13588_v29 = vadd.f32 %v19080_v60, %v13347_v38 }
0x26fa   :  { %v19019_v35 = vpop.f32.mrf.mxu1  ;;  %v19083_v41 = vpop.f32.mrf.mxu0 }
0x26fb   :  { %v13349_v6 = vadd.f32 %v19019_v35, %v23707_v31  ;;  %v13587_v26 = vadd.f32 %v13568_v27, %v13346_v40  ;;  %v13594_v14 = vsel %vm3230_vm1, %v13588_v29, 0.0  ;;  %v13671_v31 = vld [vmem:[%s23850_s19] sm:$0xff] }
0x26fc   :  { %13595 = vadd.xlane.f32.xlu0 %v13594_v14  ;;  %v13337_v36 = vpop.f32.mrf.mxu1  ;;  %v13578_v28 = vpop.f32.mrf.mxu0 }
0x26fd   :  { %v13590_v51 = vadd.f32 %v19083_v41, %v13349_v6  ;;  %v13348_v7 = vadd.f32 %v13337_v36, %v23714_v55  ;;  %v13591_v52 = vsel %vm3230_vm1, %v13587_v26, 0.0 }
0x26fe   :  { %13592 = vadd.xlane.f32.xlu1 %v13591_v52 }
0x26ff   :  { %v13589_v17 = vadd.f32 %v13578_v28, %v13348_v7  ;;  %v13600_v61 = vsel %vm3230_vm1, %v13590_v51, 0.0 }
0x2701   :  { %v13597_v18 = vsel %vm3230_vm1, %v13589_v17, 0.0 }
0x2702   :  { %13601 = vadd.xlane.f32.xlu1 %v13600_v61  ;;  %13598 = vadd.xlane.f32.xlu0 %v13597_v18 }
0x2713   :  { %13654 = vperm.xlu1 %19086, %v13644_v4  }
0x2717   :  { %13659 = vperm.xlu1 %19086, %v13645_v21  }
0x2718   :  { %13649 = vperm.xlu0 %19085, %v13643_v44  }
0x271b   :  { %13677 = vperm.xlu1 %19086, %v13671_v31  }
0x271c   :  { %13664 = vperm.xlu0 %19085, %v13646_v30  }
0x2720   :  { %13682 = vperm.xlu0 %19085, %v13672_v12  }
0x2785   :  { %v13596_v3 = vpop.xlane.xlu0 %13595 }
0x2786   :  { %v13604_v55 = vmul.f32 0.03125, %v13596_v3 }
0x2787   :  { %v13593_v37 = vpop.xlane.xlu1 %13592 }
0x2788   :  { %v13608_v50 = vsub.f32 %v13588_v29, %v13604_v55  ;;  %v13603_v5 = vmul.f32 0.03125, %v13593_v37 }
0x278a   :  { %v13607_v59 = vsub.f32 %v13587_v26, %v13603_v5  ;;  %v13612_v19 = vmul.f32 %v13608_v50, %v13608_v50 }
0x278b   :  { %v13602_v10 = vpop.xlane.xlu1 %13601  ;;  %v13599_v2 = vpop.xlane.xlu0 %13598 }
0x278c   :  { %v13606_v20 = vmul.f32 0.03125, %v13602_v10  ;;  %v13605_v0 = vmul.f32 0.03125, %v13599_v2  ;;  %v13618_v1 = vsel %vm3230_vm1, %v13612_v19, 0.0  ;;  %v13611_v45 = vmul.f32 %v13607_v59, %v13607_v59 }
0x278d   :  { %13619 = vadd.xlane.f32.xlu1 %v13618_v1 }
0x278e   :  { %v13610_v34 = vsub.f32 %v13590_v51, %v13606_v20  ;;  %v13609_v42 = vsub.f32 %v13589_v17, %v13605_v0  ;;  %v13615_v56 = vsel %vm3230_vm1, %v13611_v45, 0.0 }
0x278f   :  { %13616 = vadd.xlane.f32.xlu0 %v13615_v56  ;;  %v13655_v25 = vpop.permute.xlu1 %13654 }
0x2790   :  { %v13614_v63 = vmul.f32 %v13610_v34, %v13610_v34  ;;  %v13613_v9 = vmul.f32 %v13609_v42, %v13609_v42 }
0x2792   :  { %v13624_v23 = vsel %vm3230_vm1, %v13614_v63, 0.0  ;;  %v13621_v16 = vsel %vm3230_vm1, %v13613_v9, 0.0 }
0x2793   :  { %13625 = vadd.xlane.f32.xlu1 %v13624_v23  ;;  %13622 = vadd.xlane.f32.xlu0 %v13621_v16  ;;  %v13650_v53 = vpop.permute.xlu0 %13649  ;;  %v13660_v39 = vpop.permute.xlu1 %13659 }
0x2797   :  { %v13665_v32 = vpop.permute.xlu0 %13664  ;;  %v13678_v43 = vpop.permute.xlu1 %13677 }
0x279b   :  { %v13683_v11 = vpop.permute.xlu0 %13682 }
0x27a4   :  { %13687 = vperm.xlu1 %19086, %v13673_v49  }
0x27a9   :  { %13692 = vperm.xlu0 %19085, %v13674_v33  }
0x2816   :  { %v13620_v47 = vpop.xlane.xlu1 %13619 }
0x2817   :  { %v13628_v48 = vmul.f32 0.03125, %v13620_v47 }
0x2818   :  { %v13617_v57 = vpop.xlane.xlu0 %13616 }
0x2819   :  { %v13632_v8 = vadd.f32 1e-05, %v13628_v48  ;;  %v13627_v15 = vmul.f32 0.03125, %v13617_v57 }
0x281b   :  { %19127 = vrsqrt.f32 %v13632_v8  ;;  %v13631_v58 = vadd.f32 1e-05, %v13627_v15 }
0x281c   :  { %v13626_v62 = vpop.xlane.xlu1 %13625  ;;  %v13623_v54 = vpop.xlane.xlu0 %13622 }
0x281d   :  { %19129 = vrsqrt.f32 %v13631_v58  ;;  %v13630_v24 = vmul.f32 0.03125, %v13626_v62  ;;  %v13629_v22 = vmul.f32 0.03125, %v13623_v54 }
0x281f   :  { %v13634_v13 = vadd.f32 1e-05, %v13630_v24  ;;  %v13633_v60 = vadd.f32 1e-05, %v13629_v22 }
0x2820   :  { %v13688_v17 = vpop.permute.xlu1 %13687 }
0x2821   :  { %19131 = vrsqrt.f32 %v13634_v13 }
0x2822   :  { %19133 = vrsqrt.f32 %v13633_v60 }
0x2824   :  { %v13693_v28 = vpop.permute.xlu0 %13692 }
0x2828   :  { %v19128_v38 = vpop.eup %19127 }
0x2829   :  { %v13640_v46 = vmul.f32 %v19128_v38, %v13608_v50 }
0x282a   :  { %v19130_v27 = vpop.eup %19129 }
0x282b   :  { %v13668_v40 = vmul.f32 %v13655_v25, %v13640_v46  ;;  %v13639_v29 = vmul.f32 %v19130_v27, %v13607_v59 }
0x282d   :  { %v13696_v35 = vadd.f32 %v13683_v11, %v13668_v40  ;;  %v13667_v41 = vmul.f32 %v13650_v53, %v13639_v29 }
0x282e   :  { %v19132_v6 = vpop.eup %19131 }
0x282f   :  { %v19134_v26 = vpop.eup %19133  ;;  %13700 = vst.msk [vmem:[%s23838_s20 + $0x8] sm:$0xff] %vm3230_vm1, %v13696_v35  ;;  %v13695_v14 = vadd.f32 %v13678_v43, %v13667_v41  ;;  %v13642_v36 = vmul.f32 %v19132_v6, %v13610_v34 }
0x2830   :  { %v13641_v51 = vmul.f32 %v19134_v26, %v13609_v42 }
0x2831   :  { %13699 = vst.msk [vmem:[%s23838_s20] sm:$0xff] %vm3230_vm1, %v13695_v14  ;;  %v13670_v7 = vmul.f32 %v13665_v32, %v13642_v36 }
0x2832   :  { %v13669_v52 = vmul.f32 %v13660_v39, %v13641_v51 }
0x2833   :  { %v13698_v61 = vadd.f32 %v13693_v28, %v13670_v7 }
0x2834   :  { %v13697_v18 = vadd.f32 %v13688_v17, %v13669_v52 }
0x2835   :  { %13702 = vst.msk [vmem:[%s23838_s20 + $0x18] sm:$0xff] %vm3230_vm1, %v13698_v61 }
0x2836   :  { %13701 = vst.msk [vmem:[%s23838_s20 + $0x10] sm:$0xff] %vm3230_vm1, %v13697_v18 }

// kernel: unet_forward.10
= control target key start
LH: loop header
LB: loop body
LE: loop exit
PB: predicated region body
PF: predicated region fallthrough
CT: control target
= control target key end

     0   :  { %vm200_vm0 = vcmask 261120   ;;  %v514_v44 = vmov 0   ;;  %s648_s1 = inlined_call_operand.vmem [shape: bf16[288,128], index: 1, kind: input, shape index: {}]   ;;  %s649_s0 = inlined_call_operand.vmem [shape: bf16[32,288], index: 0, kind: input, shape index: {}]   ;;  %s650_s2 = inlined_call_operand.vmem [shape: f32[32,1], index: 2, kind: input, shape index: {}]   ;;  %s651_s3 = inlined_call_operand.vmem [shape: f32[32,1], index: 3, kind: input, shape index: {}]   ;;  %s652_s4 = inlined_call_operand.vmem [shape: f32[32,128], index: 4, kind: output, shape index: {}]  }
   0x1   :  { %v486_v0 = vld [vmem:[%s648_s1 + $0x78] sm:$0xff]   ;;  %v488_v2 = vld [vmem:[%s648_s1 + $0x70] sm:$0xff]   ;;  %v490_v4 = vld [vmem:[%s648_s1 + $0x68] sm:$0xff]   ;;  %484 = vset.pattern.permute.xlu0 %v514_v44  ;;  %485 = vset.pattern.permute.xlu1 %v514_v44 }
   0x2   :  { %v487_v1 = vld [vmem:[%s648_s1 + $0x38] sm:$0xff]   ;;  %443 = vmatprep.subr.bf16.mxu0 %v486_v0  ;;  %v489_v3 = vld [vmem:[%s648_s1 + $0x30] sm:$0xff]   ;;  %v491_v5 = vld [vmem:[%s648_s1 + $0x28] sm:$0xff]  }
   0x3   :  { %444 = vmatpush3.bf16.msra.mxu0 %v487_v1  ;;  %v492_v6 = vld [vmem:[%s648_s1 + $0x60] sm:$0xff]   ;;  %v494_v8 = vld [vmem:[%s648_s1 + $0x58] sm:$0xff]   ;;  %v499_v9 = vld [vmem:[%s648_s1 + $0x88] sm:$0xff]  }
   0x4   :  { %445 = vmatprep.subr.bf16.mxu0 %v488_v2  ;;  %v493_v7 = vld [vmem:[%s648_s1 + $0x20] sm:$0xff]   ;;  %v495_v10 = vld [vmem:[%s648_s1 + $0x18] sm:$0xff]   ;;  %v496_v11 = vld [vmem:[%s648_s1 + $0x50] sm:$0xff]   ;;  %475 = vmatprep.subr.bf16.mxu1 %v499_v9 }
   0x5   :  { %476 = vmatpush3.bf16.msra.mxu1 %v499_v9  ;;  %v502_v12 = vld [vmem:[%s648_s1 + $0x80] sm:$0xff]   ;;  %v497_v13 = vld [vmem:[%s648_s1 + $0x10] sm:$0xff]   ;;  %v498_v14 = vld [vmem:[%s648_s1 + $0x48] sm:$0xff]  }
   0x6   :  { %477 = vmatprep.subr.bf16.mxu1 %v502_v12  ;;  %v506_v15 = vld [vmem:[%s649_s0 + $0x4] ss:$12 sps:$4 sm:$0xff]   ;;  %v507_v16 = vld [vmem:[%s649_s0 + $0x8] ss:$12 sps:$4 sm:$0xff]   ;;  %v508_v17 = vld [vmem:[%s649_s0 + $0x20] ss:$12 sps:$4 sm:$0xff]  }
   0x7   :  { %446 = vmatpush3.bf16.msra.mxu0 %v489_v3  ;;  %239 = vmatprep.mubr.bf16.mxu0 %v506_v15  ;;  %v500_v18 = vld [vmem:[%s648_s1 + $0x8] sm:$0xff]   ;;  %v501_v19 = vld [vmem:[%s648_s1 + $0x40] sm:$0xff]   ;;  %v356_v53 = vld [vmem:[%s650_s2 + $0x18] sm:$0xff] }
   0x8   :  { %447 = vmatprep.subr.bf16.mxu0 %v490_v4  ;;  %479 = vmatprep.mubr.msk.bf16.mxu1 %vm200_vm0, %v507_v16  ;;  %v503_v20 = vld [vmem:[%s648_s1] sm:$0xff]   ;;  %v509_v22 = vld [vmem:[%s649_s0 + $0x1c] ss:$12 sps:$4 sm:$0xff]   ;;  %v355_v3 = vld [vmem:[%s650_s2 + $0x10] sm:$0xff] }
   0x9   :  { %478 = vmatpush3.bf16.msra.mxu1 %v502_v12  ;;  %v504_v21 = vld [vmem:[%s649_s0] ss:$12 sps:$4 sm:$0xff]   ;;  %v511_v23 = vld [vmem:[%s649_s0 + $0x18] ss:$12 sps:$4 sm:$0xff]   ;;  %v383_v15 = vld [vmem:[%s651_s3 + $0x10] sm:$0xff] }
   0xa   :  { %v382_v54 = vld [vmem:[%s651_s3 + $0x8] sm:$0xff]  ;;  %v384_v55 = vld [vmem:[%s651_s3 + $0x18] sm:$0xff]  ;;  %v353_v1 = vld [vmem:[%s650_s2] sm:$0xff] }
   0xb   :  { %448 = vmatpush3.bf16.msra.mxu0 %v491_v5  ;;  %v354_v2 = vld [vmem:[%s650_s2 + $0x8] sm:$0xff]  ;;  %v381_v4 = vld [vmem:[%s651_s3] sm:$0xff] }
   0xc   :  { %449 = vmatprep.subr.bf16.mxu0 %v492_v6  ;;  %480 = vmatmul.mubr.msk.bf16.vlgmr.msra.gmra.mxu1 %vm200_vm0, %v508_v17 }
   0xf   :  { %450 = vmatpush3.bf16.msra.mxu0 %v493_v7 }
  0x10   :  { %451 = vmatprep.subr.bf16.mxu0 %v494_v8 }
  0x13   :  { %452 = vmatpush3.bf16.msra.mxu0 %v495_v10 }
  0x14   :  { %453 = vmatprep.subr.bf16.mxu0 %v496_v11 }
  0x17   :  { %454 = vmatpush3.bf16.msra.mxu0 %v497_v13 }
  0x18   :  { %455 = vmatprep.subr.bf16.mxu0 %v498_v14 }
  0x1b   :  { %456 = vmatpush3.bf16.msra.mxu0 %v500_v18 }
  0x1c   :  { %457 = vmatprep.subr.bf16.mxu0 %v501_v19 }
  0x1f   :  { %458 = vmatpush3.bf16.msra.mxu0 %v503_v20 }
  0x22   :  { %240 = vmatmul.mubr.bf16.vlgmr.msra.gmra.mxu0 %v504_v21 }
  0x23   :  { %247 = vmatprep.mubr.bf16.mxu0 %v509_v22 }
  0x2a   :  { %248 = vmatmul.mubr.bf16.gmra.mxu0 %v511_v23 }
  0xcc   :  { %v481_v24 = vpop.f32.mrf.mxu1 }
  0xce   :  { %v290_v26 = vpop.f32.mrf.mxu1 }
  0xd0   :  { %v482_v30 = vpop.f32.mrf.mxu1 }
  0xd2   :  { %v293_v34 = vpop.f32.mrf.mxu1 }
  0xe2   :  { %v459_v25 = vpop.f32.mrf.mxu0 }
  0xe4   :  { %v460_v27 = vpop.f32.mrf.mxu0 }
  0xe5   :  { %v461_v28 = vadd.f32 %v460_v27, %v459_v25 }
  0xe6   :  { %v462_v29 = vpop.f32.mrf.mxu0 }
  0xe7   :  { %v291_v31 = vadd.f32 %v461_v28, %v290_v26 }
  0xe8   :  { %v463_v32 = vpop.f32.mrf.mxu0 }
  0xe9   :  { %v464_v33 = vadd.f32 %v463_v32, %v462_v29  ;;  %305 = vadd.xlane.f32.xlu0 %v291_v31 }
  0xea   :  { %v465_v35 = vpop.f32.mrf.mxu0 }
  0xeb   :  { %v294_v36 = vadd.f32 %v464_v33, %v293_v34 }
  0xec   :  { %v466_v37 = vpop.f32.mrf.mxu0 }
  0xed   :  { %v467_v38 = vadd.f32 %v466_v37, %v465_v35  ;;  %307 = vadd.xlane.f32.xlu0 %v294_v36 }
  0xee   :  { %v468_v39 = vpop.f32.mrf.mxu0 }
  0xef   :  { %v299_v40 = vadd.f32 %v481_v24, %v467_v38 }
  0xf0   :  { %v469_v41 = vpop.f32.mrf.mxu0 }
  0xf1   :  { %v470_v42 = vadd.f32 %v469_v41, %v468_v39  ;;  %309 = vadd.xlane.f32.xlu1 %v299_v40 }
  0xf3   :  { %v302_v43 = vadd.f32 %v482_v30, %v470_v42 }
  0xf5   :  { %311 = vadd.xlane.f32.xlu1 %v302_v43 }
 0x172   :  { %v306_v45 = vpop.xlane.xlu0 %305 }
 0x176   :  { %v308_v46 = vpop.xlane.xlu0 %307 }
 0x177   :  { %v313_v48 = vadd.f32 %v308_v46, %v306_v45 }
 0x17a   :  { %v310_v47 = vpop.xlane.xlu1 %309 }
 0x17b   :  { %v314_v49 = vadd.f32 %v313_v48, %v310_v47 }
 0x17e   :  { %v312_v50 = vpop.xlane.xlu1 %311 }
 0x17f   :  { %v315_v51 = vadd.f32 %v314_v49, %v312_v50 }
 0x181   :  { %v316_v52 = vmul.f32 0.001953125, %v315_v51 }
 0x183   :  { %319 = vperm.xlu0 %484, %v316_v52  }
 0x187   :  { %374 = vperm.xlu0 %484, %v356_v53  }
 0x18b   :  { %392 = vperm.xlu0 %484, %v382_v54  }
 0x18f   :  { %402 = vperm.xlu0 %484, %v384_v55  }
 0x1fe   :  { %v320_v56 = vpop.permute.xlu0 %319 }
 0x1ff   :  { %v322_v57 = vsub.f32 %v291_v31, %v320_v56  ;;  %v323_v59 = vsub.f32 %v294_v36, %v320_v56  ;;  %v324_v61 = vsub.f32 %v299_v40, %v320_v56  ;;  %v325_v63 = vsub.f32 %v302_v43, %v320_v56 }
 0x201   :  { %v326_v58 = vmul.f32 %v322_v57, %v322_v57  ;;  %v327_v60 = vmul.f32 %v323_v59, %v323_v59  ;;  %v328_v62 = vmul.f32 %v324_v61, %v324_v61  ;;  %v329_v0 = vmul.f32 %v325_v63, %v325_v63 }
 0x202   :  { %v375_v19 = vpop.permute.xlu0 %374 }
 0x203   :  { %330 = vadd.xlane.f32.xlu1 %v326_v58 }
 0x206   :  { %v393_v21 = vpop.permute.xlu0 %392 }
 0x207   :  { %332 = vadd.xlane.f32.xlu1 %v327_v60 }
 0x20a   :  { %v403_v31 = vpop.permute.xlu0 %402 }
 0x20b   :  { %334 = vadd.xlane.f32.xlu1 %v328_v62 }
 0x20f   :  { %336 = vadd.xlane.f32.xlu1 %v329_v0 }
 0x220   :  { %359 = vperm.xlu1 %485, %v353_v1  }
 0x224   :  { %364 = vperm.xlu1 %485, %v354_v2  }
 0x228   :  { %369 = vperm.xlu1 %485, %v355_v3  }
 0x22c   :  { %387 = vperm.xlu1 %485, %v381_v4  }
 0x28c   :  { %v331_v5 = vpop.xlane.xlu1 %330 }
 0x290   :  { %v333_v6 = vpop.xlane.xlu1 %332 }
 0x291   :  { %v338_v8 = vadd.f32 %v333_v6, %v331_v5 }
 0x294   :  { %v335_v7 = vpop.xlane.xlu1 %334 }
 0x295   :  { %v339_v9 = vadd.f32 %v338_v8, %v335_v7 }
 0x298   :  { %v337_v10 = vpop.xlane.xlu1 %336 }
 0x299   :  { %v340_v11 = vadd.f32 %v339_v9, %v337_v10 }
 0x29b   :  { %v341_v12 = vmul.f32 0.001953125, %v340_v11 }
 0x29c   :  { %v360_v16 = vpop.permute.xlu1 %359 }
 0x29d   :  { %v342_v13 = vadd.f32 1e-05, %v341_v12 }
 0x29f   :  { %512 = vrsqrt.f32 %v342_v13 }
 0x2a0   :  { %v365_v17 = vpop.permute.xlu1 %364 }
 0x2a4   :  { %v370_v18 = vpop.permute.xlu1 %369 }
 0x2a8   :  { %v388_v20 = vpop.permute.xlu1 %387 }
 0x2ac   :  { %v513_v14 = vpop.eup %512 }
 0x2ad   :  { %346 = vperm.xlu1 %485, %v513_v14  }
 0x2b1   :  { %397 = vperm.xlu1 %485, %v383_v15  }
 0x328   :  { %v347_v22 = vpop.permute.xlu1 %346 }
 0x329   :  { %v349_v23 = vmul.f32 %v347_v22, %v322_v57  ;;  %v350_v24 = vmul.f32 %v347_v22, %v323_v59  ;;  %v352_v25 = vmul.f32 %v347_v22, %v325_v63  ;;  %v351_v26 = vmul.f32 %v347_v22, %v324_v61 }
 0x32b   :  { %v377_v27 = vmul.f32 %v360_v16, %v349_v23  ;;  %v378_v28 = vmul.f32 %v365_v17, %v350_v24  ;;  %v380_v29 = vmul.f32 %v375_v19, %v352_v25  ;;  %v379_v30 = vmul.f32 %v370_v18, %v351_v26 }
 0x32c   :  { %v398_v32 = vpop.permute.xlu1 %397 }
 0x32d   :  { %v405_v33 = vadd.f32 %v388_v20, %v377_v27  ;;  %v406_v34 = vadd.f32 %v393_v21, %v378_v28  ;;  %v408_v35 = vadd.f32 %v403_v31, %v380_v29  ;;  %v407_v36 = vadd.f32 %v398_v32, %v379_v30 }
 0x32f   :  { %409 = vst [vmem:[%s652_s4] sm:$0xff] %v405_v33  ;;  %410 = vst [vmem:[%s652_s4 + $0x8] sm:$0xff] %v406_v34 }
 0x330   :  { %411 = vst [vmem:[%s652_s4 + $0x10] sm:$0xff] %v407_v36  ;;  %412 = vst [vmem:[%s652_s4 + $0x18] sm:$0xff] %v408_v35 }

// kernel: unet_forward.11
= control target key start
LH: loop header
LB: loop body
LE: loop exit
PB: predicated region body
PF: predicated region fallthrough
CT: control target
= control target key end

     0   :  { %v479_v1 = vmov 0   ;;  %vm254_vm0 = vcmask 130048   ;;  %s644_s1 = inlined_call_operand.vmem [shape: bf16[144,512], index: 1, kind: input, shape index: {}]   ;;  %s645_s0 = inlined_call_operand.vmem [shape: bf16[12,144], index: 0, kind: input, shape index: {}]   ;;  %s646_s2 = inlined_call_operand.vmem [shape: f32[12,1], index: 2, kind: input, shape index: {}]   ;;  %s647_s3 = inlined_call_operand.vmem [shape: f32[12,512], index: 3, kind: output, shape index: {}]  }
   0x1   :  { %v406_v0 = vld [vmem:[%s644_s1 + $0xe4] ss:$16 sps:$4 sm:$0xff]   ;;  %405 = vset.pattern.permute.xlu0 %v479_v1  ;;  %v408_v2 = vld [vmem:[%s644_s1 + $0xec] ss:$16 sps:$4 sm:$0xff]   ;;  %v410_v3 = vld [vmem:[%s644_s1 + $0xe0] ss:$16 sps:$4 sm:$0xff]  }
   0x2   :  { %258 = vmatprep.subr.bf16.mxu0 %v406_v0  ;;  %v411_v4 = vld [vmem:[%s644_s1 + $0xe8] ss:$16 sps:$4 sm:$0xff]   ;;  %301 = vmatprep.subr.bf16.mxu1 %v408_v2  ;;  %v412_v5 = vld [vmem:[%s644_s1 + $0xc4] ss:$16 sps:$4 sm:$0xff]   ;;  %v414_v6 = vld [vmem:[%s644_s1 + $0xcc] ss:$16 sps:$4 sm:$0xff]  }
   0x3   :  { %259 = vmatpush1.bf16.msra.mxu0 %v410_v3  ;;  %302 = vmatpush1.bf16.msra.mxu1 %v411_v4  ;;  %v416_v7 = vld [vmem:[%s644_s1 + $0xc0] ss:$16 sps:$4 sm:$0xff]   ;;  %v417_v8 = vld [vmem:[%s644_s1 + $0xc8] ss:$16 sps:$4 sm:$0xff]   ;;  %v418_v9 = vld [vmem:[%s644_s1 + $0xa4] ss:$16 sps:$4 sm:$0xff]  }
   0x4   :  { %260 = vmatprep.subr.bf16.mxu0 %v412_v5  ;;  %303 = vmatprep.subr.bf16.mxu1 %v414_v6  ;;  %v420_v10 = vld [vmem:[%s644_s1 + $0xac] ss:$16 sps:$4 sm:$0xff]   ;;  %v422_v11 = vld [vmem:[%s644_s1 + $0xa0] ss:$16 sps:$4 sm:$0xff]   ;;  %v423_v12 = vld [vmem:[%s644_s1 + $0xa8] ss:$16 sps:$4 sm:$0xff]  }
   0x5   :  { %v424_v13 = vld [vmem:[%s644_s1 + $0x84] ss:$16 sps:$4 sm:$0xff]   ;;  %v426_v14 = vld [vmem:[%s644_s1 + $0x8c] ss:$16 sps:$4 sm:$0xff]   ;;  %v428_v15 = vld [vmem:[%s644_s1 + $0x80] ss:$16 sps:$4 sm:$0xff]  }
   0x6   :  { %v429_v16 = vld [vmem:[%s644_s1 + $0x88] ss:$16 sps:$4 sm:$0xff]   ;;  %v430_v17 = vld [vmem:[%s644_s1 + $0x64] ss:$16 sps:$4 sm:$0xff]   ;;  %v432_v18 = vld [vmem:[%s644_s1 + $0x6c] ss:$16 sps:$4 sm:$0xff]  }
   0x7   :  { %261 = vmatpush1.bf16.msra.mxu0 %v416_v7  ;;  %304 = vmatpush1.bf16.msra.mxu1 %v417_v8  ;;  %v434_v19 = vld [vmem:[%s644_s1 + $0x60] ss:$16 sps:$4 sm:$0xff]   ;;  %v435_v20 = vld [vmem:[%s644_s1 + $0x68] ss:$16 sps:$4 sm:$0xff]   ;;  %v436_v21 = vld [vmem:[%s644_s1 + $0x44] ss:$16 sps:$4 sm:$0xff]  }
   0x8   :  { %262 = vmatprep.subr.bf16.mxu0 %v418_v9  ;;  %305 = vmatprep.subr.bf16.mxu1 %v420_v10  ;;  %v438_v22 = vld [vmem:[%s644_s1 + $0x4c] ss:$16 sps:$4 sm:$0xff]   ;;  %v440_v23 = vld [vmem:[%s644_s1 + $0x40] ss:$16 sps:$4 sm:$0xff]   ;;  %v441_v24 = vld [vmem:[%s644_s1 + $0x48] ss:$16 sps:$4 sm:$0xff]  }
   0x9   :  { %v442_v25 = vld [vmem:[%s644_s1 + $0x24] ss:$16 sps:$4 sm:$0xff]   ;;  %v444_v26 = vld [vmem:[%s644_s1 + $0x2c] ss:$16 sps:$4 sm:$0xff]   ;;  %v446_v27 = vld [vmem:[%s644_s1 + $0x20] ss:$16 sps:$4 sm:$0xff]  }
   0xa   :  { %v447_v28 = vld [vmem:[%s644_s1 + $0x28] ss:$16 sps:$4 sm:$0xff]   ;;  %v448_v29 = vld [vmem:[%s644_s1 + $0x4] ss:$16 sps:$4 sm:$0xff]   ;;  %v450_v30 = vld [vmem:[%s644_s1 + $0xc] ss:$16 sps:$4 sm:$0xff]  }
   0xb   :  { %263 = vmatpush1.bf16.msra.mxu0 %v422_v11  ;;  %306 = vmatpush1.bf16.msra.mxu1 %v423_v12  ;;  %v462_v31 = vld [vmem:[%s645_s0 + $0x4] ss:$8 sps:$4 sm:$0x3f]   ;;  %v54_v33 = vld [vmem:[%s646_s2 + $0x8] sm:$0xf] }
   0xc   :  { %264 = vmatprep.subr.bf16.mxu0 %v424_v13  ;;  %307 = vmatprep.subr.bf16.mxu1 %v426_v14  ;;  %v53_v32 = vld [vmem:[%s646_s2] sm:$0xff]  ;;  %v453_v35 = vld [vmem:[%s644_s1 + $0x8] ss:$16 sps:$4 sm:$0xff]   ;;  %v456_v37 = vld [vmem:[%s644_s1 + $0x10c] ss:$16 sps:$4 sm:$0xff]  }
   0xd   :  { %57 = vperm.xlu0 %405, %v53_v32   ;;  %402 = vmatprep.mubr.msk.bf16.mxu0 %vm254_vm0, %v462_v31  ;;  %v452_v34 = vld [vmem:[%s644_s1] ss:$16 sps:$4 sm:$0xff]   ;;  %v454_v36 = vld [vmem:[%s644_s1 + $0x104] ss:$16 sps:$4 sm:$0xff]   ;;  %v459_v39 = vld [vmem:[%s644_s1 + $0x108] ss:$16 sps:$4 sm:$0xff]  }
   0xe   :  { %403 = vmatprep.mubr.msk.bf16.mxu1 %vm254_vm0, %v462_v31  ;;  %v458_v38 = vld [vmem:[%s644_s1 + $0x100] ss:$16 sps:$4 sm:$0xff]  }
   0xf   :  { %265 = vmatpush1.bf16.msra.mxu0 %v428_v15  ;;  %308 = vmatpush1.bf16.msra.mxu1 %v429_v16  ;;  %v460_v40 = vld [vmem:[%s645_s0] ss:$8 sps:$4 sm:$0x3f]  }
  0x10   :  { %266 = vmatprep.subr.bf16.mxu0 %v430_v17  ;;  %309 = vmatprep.subr.bf16.mxu1 %v432_v18 }
  0x11   :  { %62 = vperm.xlu0 %405, %v54_v33  }
  0x13   :  { %267 = vmatpush1.bf16.msra.mxu0 %v434_v19  ;;  %310 = vmatpush1.bf16.msra.mxu1 %v435_v20 }
  0x14   :  { %268 = vmatprep.subr.bf16.mxu0 %v436_v21  ;;  %311 = vmatprep.subr.bf16.mxu1 %v438_v22 }
  0x17   :  { %269 = vmatpush1.bf16.msra.mxu0 %v440_v23  ;;  %312 = vmatpush1.bf16.msra.mxu1 %v441_v24 }
  0x18   :  { %270 = vmatprep.subr.bf16.mxu0 %v442_v25  ;;  %313 = vmatprep.subr.bf16.mxu1 %v444_v26 }
  0x1b   :  { %271 = vmatpush1.bf16.msra.mxu0 %v446_v27  ;;  %314 = vmatpush1.bf16.msra.mxu1 %v447_v28 }
  0x1c   :  { %272 = vmatprep.subr.bf16.mxu0 %v448_v29  ;;  %315 = vmatprep.subr.bf16.mxu1 %v450_v30 }
  0x1f   :  { %273 = vmatpush1.bf16.msra.mxu0 %v452_v34  ;;  %316 = vmatpush1.bf16.msra.mxu1 %v453_v35 }
  0x20   :  { %288 = vmatprep.subr.bf16.mxu0 %v454_v36  ;;  %331 = vmatprep.subr.bf16.mxu1 %v456_v37 }
  0x23   :  { %289 = vmatpush2.bf16.msra.mxu0 %v458_v38  ;;  %332 = vmatpush2.bf16.msra.mxu1 %v459_v39 }
  0x26   :  { %291 = vmatmul.mubr.bf16.vlgmr.msra.gmra.mxu0 %v460_v40  ;;  %334 = vmatmul.mubr.bf16.vlgmr.msra.gmra.mxu1 %v460_v40 }
  0x88   :  { %v58_v41 = vpop.permute.xlu0 %57 }
  0x8c   :  { %v63_v48 = vpop.permute.xlu0 %62 }
  0xe6   :  { %v292_v42 = vpop.f32.mrf.mxu0  ;;  %v335_v43 = vpop.f32.mrf.mxu1 }
  0xe7   :  { %v293_v44 = vadd.f32 %v292_v42, %v58_v41  ;;  %v336_v45 = vadd.f32 %v335_v43, %v58_v41 }
  0xe8   :  { %v294_v46 = vpop.f32.mrf.mxu0  ;;  %v337_v47 = vpop.f32.mrf.mxu1 }
  0xe9   :  { %463 = vtanh.f32 %v293_v44  ;;  %v295_v49 = vadd.f32 %v294_v46, %v58_v41  ;;  %v338_v50 = vadd.f32 %v337_v47, %v58_v41 }
  0xea   :  { %465 = vtanh.f32 %v336_v45  ;;  %v296_v51 = vpop.f32.mrf.mxu0  ;;  %v339_v52 = vpop.f32.mrf.mxu1 }
  0xeb   :  { %467 = vtanh.f32 %v295_v49  ;;  %v297_v53 = vadd.f32 %v296_v51, %v63_v48  ;;  %v340_v54 = vadd.f32 %v339_v52, %v63_v48 }
  0xec   :  { %469 = vtanh.f32 %v338_v50  ;;  %v298_v55 = vpop.f32.mrf.mxu0  ;;  %v341_v56 = vpop.f32.mrf.mxu1 }
  0xed   :  { %471 = vtanh.f32 %v297_v53  ;;  %v299_v57 = vadd.f32 %v298_v55, %v63_v48  ;;  %v342_v58 = vadd.f32 %v341_v56, %v63_v48 }
  0xee   :  { %473 = vtanh.f32 %v340_v54 }
  0xef   :  { %475 = vtanh.f32 %v299_v57 }
  0xf0   :  { %477 = vtanh.f32 %v342_v58 }
  0xf6   :  { %v464_v59 = vpop.eup %463 }
  0xf7   :  { %v466_v60 = vpop.eup %465  ;;  %352 = vst [vmem:[%s647_s3] sm:$0xff] %v464_v59 }
  0xf8   :  { %v468_v61 = vpop.eup %467  ;;  %354 = vst [vmem:[%s647_s3 + $0x10] sm:$0xff] %v466_v60 }
  0xf9   :  { %v470_v62 = vpop.eup %469  ;;  %353 = vst [vmem:[%s647_s3 + $0x8] sm:$0xff] %v468_v61 }
  0xfa   :  { %v472_v63 = vpop.eup %471  ;;  %355 = vst [vmem:[%s647_s3 + $0x18] sm:$0xff] %v470_v62 }
  0xfb   :  { %v474_v0 = vpop.eup %473  ;;  %356 = vst [vmem:[%s647_s3 + $0x20] sm:$0xf] %v472_v63 }
  0xfc   :  { %v476_v1 = vpop.eup %475  ;;  %358 = vst [vmem:[%s647_s3 + $0x30] sm:$0xf] %v474_v0 }
  0xfd   :  { %v478_v2 = vpop.eup %477  ;;  %357 = vst [vmem:[%s647_s3 + $0x28] sm:$0xf] %v476_v1 }
  0xfe   :  { %359 = vst [vmem:[%s647_s3 + $0x38] sm:$0xf] %v478_v2 }

</bundles_post_ra>
